<compile_context>
chip_gen: v6e
topology: v6e:2x2x1
jax: 0.10.0
libtpu: 0.0.40
codegen_flags: <defaults>
</compile_context>

<pallas_src>
import functools
import math

import jax
import jax.numpy as jnp
from jax.experimental import pallas as pl
from jax.experimental.pallas import tpu as pltpu


# ------------------------------------------------------------------
# Model constants (fixed by the PyTorch module)
# ------------------------------------------------------------------
D_MODEL, N_HEADS, D_FF, N_LAYERS = 32, 4, 64, 3
FC_DIMS = 60 + 40 + 14 + 1 + 1   # 116
WEATHER_WEEKS = 52               # implied by Linear(6*20, 60)
SOIL_DEPTHS = 6                  # implied by Linear(24, 12)
N_WFEAT = 6                      # weather features
N_SFEAT = 11                     # soil features


# ------------------------------------------------------------------
# In-kernel helpers
# ------------------------------------------------------------------
def _layer_norm(x, g, b, eps):
    mu = jnp.mean(x, axis=-1, keepdims=True)
    xc = x - mu
    var = jnp.mean(xc * xc, axis=-1, keepdims=True)
    return xc * jax.lax.rsqrt(var + eps) * g + b


# ------------------------------------------------------------------
# The single fused kernel: CNN chains + heads + transformer + fc1
# ------------------------------------------------------------------
def _fused_kernel(
    # per-batch-element inputs
    w_in_ref, s_in_ref, ec_ref, mask_ref,
    # weather CNN chain (folded conv/pool matmuls), bf16 W / f32 b
    wcw0, wcb0, wcw1, wcb1, wcw2, wcb2, wcw3, wcb3, wcw4, wcb4,
    # soil CNN chain
    scw0, scb0, scw1, scb1, scw2, scb2, scw3, scb3,
    # fc heads + input/coord projection
    wwfc_ref, bwfc_ref, wsfc_ref, bsfc_ref,
    winw_ref, wins_ref, winec_ref, bin_ref,
    # transformer (stacked over layers on the leading axis)
    wqkv_ref, bqkv_ref, wo_ref, bo_ref,
    ln1g_ref, ln1b_ref, wff1_ref, bff1_ref, wff2_ref, bff2_ref,
    ln2g_ref, ln2b_ref,
    # final head
    wfc_ref, bfc_ref,
    # output
    o_ref,
    *, n_years, n_wfeat, n_sfeat, n_layers, n_heads, d_model, eps):
    f32, bf16 = jnp.float32, jnp.bfloat16
    dh = d_model // n_heads

    def mm(a, w_bf16):
        """MXU matmul: f32 activation cast to bf16, bf16 weight, f32 accumulation."""
        return jnp.dot(a.astype(bf16), w_bf16, preferred_element_type=f32)

    # ---------------- weather CNN chain: (6*Y, 52) -> (6*Y, 20) ----------------
    hw = w_in_ref[0]
    for w_r, b_r, relu in ((wcw0, wcb0, True), (wcw1, wcb1, True),
                           (wcw2, wcb2, True), (wcw3, wcb3, True),
                           (wcw4, wcb4, False)):
        hw = mm(hw, w_r[...]) + b_r[...]
        if relu:
            hw = jnp.maximum(hw, 0.0)

    # ---------------- soil CNN chain: (11*Y, 6) -> (11*Y, 12) ------------------
    hs = s_in_ref[0]
    for w_r, b_r, relu in ((scw0, scb0, True), (scw1, scb1, True),
                           (scw2, scb2, False), (scw3, scb3, True)):
        hs = mm(hs, w_r[...]) + b_r[...]
        if relu:
            hs = jnp.maximum(hs, 0.0)

    # -------- weather_fc / soil_fc: regroup feature-major rows per year --------
    # hw rows are (feature, year); slice feature f -> contiguous (Y, 20) block and
    # multiply by the matching 20-row block of the Linear(120, 60) weight.
    w60 = bwfc_ref[...]
    for f in range(n_wfeat):
        w60 = w60 + mm(hw[f * n_years:(f + 1) * n_years, :], wwfc_ref[f])
    w60 = jnp.maximum(w60, 0.0)                      # weather_fc ReLU

    s40 = bsfc_ref[...]
    for f in range(n_sfeat):
        s40 = s40 + mm(hs[f * n_years:(f + 1) * n_years, :], wsfc_ref[f])

    # ---------------- input projection (+ coord embedding, bias folded) --------
    ec = ec_ref[0]                                   # (Y, 18) = practices/year/y_past/coord
    h = (mm(w60, winw_ref[...]) + mm(s40, wins_ref[...])
         + mm(ec, winec_ref[...]) + bin_ref[...])    # (Y, d_model)

    # ---------------- key-padding attention bias (per batch element) -----------
    m = mask_ref[0]                                  # (1, Y) f32, 1.0 = valid
    bias = jnp.where(m > 0.5, jnp.zeros_like(m), jnp.full_like(m, -1e9))

    scale = 1.0 / math.sqrt(dh)
    for l in range(n_layers):
        # fused QKV projection: one (Y,32)@(32,96) matmul, per-head lane slices
        qkv = mm(h, wqkv_ref[l]) + bqkv_ref[l]       # (Y, 96) f32
        attn = bo_ref[l]                             # (1, d_model), broadcasts
        for hd in range(n_heads):
            q = qkv[:, hd * dh:(hd + 1) * dh]
            k = qkv[:, d_model + hd * dh:d_model + (hd + 1) * dh]
            v = qkv[:, 2 * d_model + hd * dh:2 * d_model + (hd + 1) * dh]
            sc = jax.lax.dot_general(
                q.astype(bf16), k.astype(bf16),
                (((1,), (1,)), ((), ())),
                preferred_element_type=f32) * scale + bias      # (Y, Y)
            mx = jnp.max(sc, axis=-1, keepdims=True)
            pr = jnp.exp(sc - mx)
            pr = pr * pl.reciprocal(jnp.sum(pr, axis=-1, keepdims=True), approx=True)
            ctx = jnp.dot(pr.astype(bf16), v.astype(bf16),
                          preferred_element_type=f32)           # (Y, dh)
            attn = attn + jnp.dot(ctx.astype(bf16), wo_ref[l, hd],
                                  preferred_element_type=f32)   # (Y, d_model)
        h = _layer_norm(h + attn, ln1g_ref[l], ln1b_ref[l], eps)

        ff = jnp.maximum(mm(h, wff1_ref[l]) + bff1_ref[l], 0.0)
        ff = mm(ff, wff2_ref[l]) + bff2_ref[l]
        h = _layer_norm(h + ff, ln2g_ref[l], ln2b_ref[l], eps)

    # ---------------- fc1 -------------------------------------------------------
    # NOTE: last dim of 1 => masked store; negligible at Y=8 (lane-dense variant
    # only worth it at production batch sizes).
    o_ref[0] = mm(h, wfc_ref[...]) + bfc_ref[...]


# ------------------------------------------------------------------
# Init-time folding: Conv1d / AvgPool1d / Flatten as dense matrices acting on
# position-major, channel-minor flattened per-sample features.
# ------------------------------------------------------------------
def conv_matrix(w, l_in, padding):
    """(L_in*C_in, L_out*C_out) matrix equivalent to stride-1 Conv1d."""
    c_out, c_in, ksz = w.shape
    l_out = l_in + 2 * padding - ksz + 1
    li = jnp.arange(l_in)[:, None]
    lo = jnp.arange(l_out)[None, :]
    k = li - lo + padding
    valid = ((k >= 0) & (k < ksz)).astype(w.dtype)
    kc = jnp.clip(k, 0, ksz - 1)
    wk = jnp.transpose(w, (2, 1, 0))[kc]               # (L_in, L_out, C_in, C_out)
    wk = wk * valid[:, :, None, None]
    return jnp.transpose(wk, (0, 2, 1, 3)).reshape(l_in * c_in, l_out * c_out)


def pool_matrix(l_in, c):
    """AvgPool1d(kernel=2, stride=2) as a (L_in*C, L_out*C) matrix."""
    l_out = (l_in - 2) // 2 + 1
    li = jnp.arange(l_in)[:, None]
    lp = jnp.arange(l_out)[None, :]
    sel = ((li == 2 * lp) | (li == 2 * lp + 1)).astype(jnp.float32) * 0.5
    eye = jnp.eye(c, dtype=jnp.float32)
    return (sel[:, None, :, None] * eye[None, :, None, :]).reshape(l_in * c, l_out * c)


# ------------------------------------------------------------------
# Parameters (PyTorch-like uniform(+-1/sqrt(fan_in)))
# ------------------------------------------------------------------
def _uniform(key, shape, bound):
    return jax.random.uniform(key, shape, jnp.float32, -bound, bound)


def _conv_params(key, c_in, c_out, ksz):
    kw, kb = jax.random.split(key)
    bound = 1.0 / math.sqrt(c_in * ksz)
    return _uniform(kw, (c_out, c_in, ksz), bound), _uniform(kb, (c_out,), bound)


def _dense_params(key, fan_in, fan_out):
    kw, kb = jax.random.split(key)
    bound = 1.0 / math.sqrt(fan_in)
    return _uniform(kw, (fan_in, fan_out), bound), _uniform(kb, (fan_out,), bound)


def init_params(key):
    keys = iter(jax.random.split(key, 64))
    nxt = lambda: next(keys)
    p = {}
    # soil_cnn
    p["s_conv1"] = _conv_params(nxt(), 1, 4, 3)
    p["s_conv2"] = _conv_params(nxt(), 4, 8, 3)
    p["s_conv3"] = _conv_params(nxt(), 8, 12, 2)
    p["s_lin"] = _dense_params(nxt(), 24, 12)
    # weather_cnn
    p["w_conv1"] = _conv_params(nxt(), 1, 8, 9)
    p["w_conv2"] = _conv_params(nxt(), 8, 12, 3)
    p["w_conv3"] = _conv_params(nxt(), 12, 16, 3)
    p["w_conv4"] = _conv_params(nxt(), 16, 20, 3)
    # fully connected heads
    p["weather_fc"] = _dense_params(nxt(), 6 * 20, 60)
    p["soil_fc"] = _dense_params(nxt(), 11 * 12, 40)
    # trend transformer (assumed structure, see TODO at top)
    p["t_in"] = _dense_params(nxt(), FC_DIMS, D_MODEL)
    p["t_coord"] = _dense_params(nxt(), 2, D_MODEL)
    layers = []
    for _ in range(N_LAYERS):
        layers.append({
            "wq": _dense_params(nxt(), D_MODEL, D_MODEL),
            "wk": _dense_params(nxt(), D_MODEL, D_MODEL),
            "wv": _dense_params(nxt(), D_MODEL, D_MODEL),
            "wo": _dense_params(nxt(), D_MODEL, D_MODEL),
            "ln1": (jnp.ones((D_MODEL,), jnp.float32), jnp.zeros((D_MODEL,), jnp.float32)),
            "ff1": _dense_params(nxt(), D_MODEL, D_FF),
            "ff2": _dense_params(nxt(), D_FF, D_MODEL),
            "ln2": (jnp.ones((D_MODEL,), jnp.float32), jnp.zeros((D_MODEL,), jnp.float32)),
        })
    p["t_layers"] = layers
    p["fc1"] = _dense_params(nxt(), D_MODEL, 1)
    return p


def build_kernel_params(p):
    """Fold conv/pool/flatten into bf16 matmul chains and stack transformer weights."""
    f32, bf16 = jnp.float32, jnp.bfloat16
    kp = {}

    # ---- weather CNN chain (lengths: 52 ->44 ->22 ->20 ->10 ->8 ->4 ->2 ->1) ----
    w1, b1 = p["w_conv1"]; w2, b2 = p["w_conv2"]
    w3, b3 = p["w_conv3"]; w4, b4 = p["w_conv4"]
    wsteps = [
        (conv_matrix(w1, 52, 0), jnp.tile(b1, 44)),
        (pool_matrix(44, 8) @ conv_matrix(w2, 22, 0), jnp.tile(b2, 20)),
        (pool_matrix(20, 12) @ conv_matrix(w3, 10, 0), jnp.tile(b3, 8)),
        (pool_matrix(8, 16) @ conv_matrix(w4, 4, 0), jnp.tile(b4, 2)),
        # final AvgPool + Flatten; trailing ReLU of the Sequential is a no-op
        (pool_matrix(2, 20), jnp.zeros((20,), f32)),
    ]
    for i, (w, bb) in enumerate(wsteps):
        kp[f"wch_w{i}"] = w.astype(bf16)
        kp[f"wch_b{i}"] = bb.reshape(1, -1).astype(f32)

    # ---- soil CNN chain (lengths: 6 ->6 ->3 ->3 ->1 ->2) + Linear(24,12) ----
    s1, c1 = p["s_conv1"]; s2, c2 = p["s_conv2"]; s3, c3 = p["s_conv3"]
    wlin, blin = p["s_lin"]
    # reorder Linear input rows from torch flatten (channel-major) to our
    # position-major feature layout: row (l*12 + c) <- (c*2 + l)
    perm = (jnp.arange(12)[None, :] * 2 + jnp.arange(2)[:, None]).reshape(-1)
    ssteps = [
        (conv_matrix(s1, 6, 1), jnp.tile(c1, 6)),
        (pool_matrix(6, 4) @ conv_matrix(s2, 3, 1), jnp.tile(c2, 3)),
        (pool_matrix(3, 8) @ conv_matrix(s3, 1, 1), jnp.tile(c3, 2)),
        (wlin[perm, :], blin),
    ]
    for i, (w, bb) in enumerate(ssteps):
        kp[f"sch_w{i}"] = w.astype(bf16)
        kp[f"sch_b{i}"] = bb.reshape(1, -1).astype(f32)

    # ---- fc heads, restacked per input feature for in-kernel regrouping ----
    wwfc, bwfc = p["weather_fc"]
    kp["wwfc"] = wwfc.reshape(N_WFEAT, 20, 60).astype(bf16)
    kp["bwfc"] = bwfc.reshape(1, -1).astype(f32)
    wsfc, bsfc = p["soil_fc"]
    kp["wsfc"] = wsfc.reshape(N_SFEAT, 12, 40).astype(bf16)
    kp["bsfc"] = bsfc.reshape(1, -1).astype(f32)

    # ---- input projection split by source; coord projection folded in ----
    win, b_in = p["t_in"]
    wcoord, bcoord = p["t_coord"]
    kp["win_w"] = win[:60].astype(bf16)
    kp["win_s"] = win[60:100].astype(bf16)
    kp["win_ec"] = jnp.concatenate([win[100:], wcoord], axis=0).astype(bf16)  # (18, 32)
    kp["b_in"] = (b_in + bcoord).reshape(1, -1).astype(f32)

    # ---- transformer layers: fused QKV, per-head out-proj blocks ----
    dh = D_MODEL // N_HEADS
    wqkv, bqkv, wo, bo = [], [], [], []
    ln1g, ln1b, wff1, bff1, wff2, bff2, ln2g, ln2b = ([] for _ in range(8))
    for lyr in p["t_layers"]:
        wqkv.append(jnp.concatenate([lyr["wq"][0], lyr["wk"][0], lyr["wv"][0]], axis=1))
        bqkv.append(jnp.concatenate([lyr["wq"][1], lyr["wk"][1], lyr["wv"][1]]).reshape(1, -1))
        wo.append(lyr["wo"][0].reshape(N_HEADS, dh, D_MODEL))
        bo.append(lyr["wo"][1].reshape(1, D_MODEL))
        ln1g.append(lyr["ln1"][0].reshape(1, -1)); ln1b.append(lyr["ln1"][1].reshape(1, -1))
        wff1.append(lyr["ff1"][0]); bff1.append(lyr["ff1"][1].reshape(1, -1))
        wff2.append(lyr["ff2"][0]); bff2.append(lyr["ff2"][1].reshape(1, -1))
        ln2g.append(lyr["ln2"][0].reshape(1, -1)); ln2b.append(lyr["ln2"][1].reshape(1, -1))
    kp["wqkv"] = jnp.stack(wqkv).astype(bf16)                # (L, 32, 96)
    kp["bqkv"] = jnp.stack(bqkv).astype(f32)                 # (L, 1, 96)
    kp["wo"] = jnp.stack(wo).astype(bf16)                    # (L, H, dh, 32)
    kp["bo"] = jnp.stack(bo).astype(f32)                     # (L, 1, 32)
    kp["ln1g"], kp["ln1b"] = jnp.stack(ln1g), jnp.stack(ln1b)
    kp["wff1"] = jnp.stack(wff1).astype(bf16)
    kp["bff1"] = jnp.stack(bff1).astype(f32)
    kp["wff2"] = jnp.stack(wff2).astype(bf16)
    kp["bff2"] = jnp.stack(bff2).astype(f32)
    kp["ln2g"], kp["ln2b"] = jnp.stack(ln2g), jnp.stack(ln2b)
    wfc1, bfc1 = p["fc1"]
    kp["wfc1"] = wfc1.astype(bf16)                           # (32, 1)
    kp["bfc1"] = bfc1.reshape(1, 1).astype(f32)
    return kp


_WEIGHT_ORDER = [
    "wch_w0", "wch_b0", "wch_w1", "wch_b1", "wch_w2", "wch_b2",
    "wch_w3", "wch_b3", "wch_w4", "wch_b4",
    "sch_w0", "sch_b0", "sch_w1", "sch_b1", "sch_w2", "sch_b2",
    "sch_w3", "sch_b3",
    "wwfc", "bwfc", "wsfc", "bsfc",
    "win_w", "win_s", "win_ec", "b_in",
    "wqkv", "bqkv", "wo", "bo",
    "ln1g", "ln1b", "wff1", "bff1", "wff2", "bff2", "ln2g", "ln2b",
    "wfc1", "bfc1",
]


def _batch_spec(arr):
    inner = arr.shape[1:]
    nd = len(inner)
    return pl.BlockSpec((1,) + inner, lambda i: (i,) + (0,) * nd)


def _full_spec(arr):
    nd = arr.ndim
    return pl.BlockSpec(arr.shape, lambda i: (0,) * nd)


# ------------------------------------------------------------------
# Model forward (ONE pallas_call launch, grid over batch elements)
# ------------------------------------------------------------------
def cnn_yield_predictor(kp, weather, soil, practices, year, coord, y_past, mask):
    f32 = jnp.float32
    b, y, n_wf, n_weeks = weather.shape
    n_sf, n_depth = soil.shape[2], soil.shape[3]

    # Feature-major layout per batch element: rows ordered (feature, year) so the
    # per-feature slices inside the kernel are contiguous 8-row blocks.
    w_in = jnp.transpose(weather, (0, 2, 1, 3)).reshape(b, n_wf * y, n_weeks).astype(f32)
    s_in = jnp.transpose(soil, (0, 2, 1, 3)).reshape(b, n_sf * y, n_depth).astype(f32)

    coord_last = coord.reshape(b, -1, 2)[:, -1, :]                       # (B, 2)
    ec = jnp.concatenate(
        [practices, year.reshape(b, y, 1), y_past[:, :, None],
         jnp.broadcast_to(coord_last[:, None, :], (b, y, 2))],
        axis=2).astype(f32)                                              # (B, Y, 18)
    mask_f = mask.astype(f32).reshape(b, 1, y)                           # 1.0 = valid

    weight_args = [kp[name] for name in _WEIGHT_ORDER]
    in_specs = ([_batch_spec(w_in), _batch_spec(s_in),
                 _batch_spec(ec), _batch_spec(mask_f)]
                + [_full_spec(a) for a in weight_args])

    kernel = functools.partial(
        _fused_kernel, n_years=y, n_wfeat=n_wf, n_sfeat=n_sf,
        n_layers=N_LAYERS, n_heads=N_HEADS, d_model=D_MODEL, eps=1e-5)

    out = pl.pallas_call(
        kernel,
        out_shape=jax.ShapeDtypeStruct((b, y, 1), f32),
        grid=(b,),
        in_specs=in_specs,
        out_specs=pl.BlockSpec((1, y, 1), lambda i: (i, 0, 0)),
        compiler_params=pltpu.CompilerParams(
            dimension_semantics=("parallel",),
            vmem_limit_bytes=32 * 1024 * 1024),
    )(w_in, s_in, ec, mask_f, *weight_args)
    return out                                                           # (B, Y, 1)


# ------------------------------------------------------------------
if __name__ == "__main__":
    key = jax.random.PRNGKey(0)
    kp_, kw_, ks_, kpr, kc_, kyp = jax.random.split(key, 6)

    B, Y = 2, 8                                            # batch, n_years
    kparams = build_kernel_params(init_params(kp_))

    weather = jax.random.normal(kw_, (B, Y, N_WFEAT, WEATHER_WEEKS), jnp.float32)
    soil = jax.random.normal(ks_, (B, Y, N_SFEAT, SOIL_DEPTHS), jnp.float32)
    practices = jax.random.normal(kpr, (B, Y, 14), jnp.float32)
    year = jnp.tile(jnp.arange(Y, dtype=jnp.float32)[None, :], (B, 1))
    coord = jax.random.normal(kc_, (B, Y, 2), jnp.float32)
    y_past = jax.random.normal(kyp, (B, Y), jnp.float32)
    mask = jnp.ones((B, Y), dtype=bool)

    fwd = jax.jit(functools.partial(cnn_yield_predictor, kparams))
    out = jax.block_until_ready(fwd(weather, soil, practices, year, coord, y_past, mask))
    assert out.shape == (B, Y, 1) and out.dtype == jnp.float32
    assert bool(jnp.isfinite(out).all())
    print("KERNEL_OK")
</pallas_src>

<mosaic_0001>
module attributes {stable_mosaic.version = 11 : i64} {
  func.func @_fused_kernel(%arg0: i32, %arg1: memref<1x48x52xf32, #tpu.memory_space<vmem>>, %arg2: memref<1x88x6xf32, #tpu.memory_space<vmem>>, %arg3: memref<1x8x18xf32, #tpu.memory_space<vmem>>, %arg4: memref<1x1x8xf32, #tpu.memory_space<vmem>>, %arg5: memref<52x352xbf16, #tpu.memory_space<vmem>>, %arg6: memref<1x352xf32, #tpu.memory_space<vmem>>, %arg7: memref<352x240xbf16, #tpu.memory_space<vmem>>, %arg8: memref<1x240xf32, #tpu.memory_space<vmem>>, %arg9: memref<240x128xbf16, #tpu.memory_space<vmem>>, %arg10: memref<1x128xf32, #tpu.memory_space<vmem>>, %arg11: memref<128x40xbf16, #tpu.memory_space<vmem>>, %arg12: memref<1x40xf32, #tpu.memory_space<vmem>>, %arg13: memref<40x20xbf16, #tpu.memory_space<vmem>>, %arg14: memref<1x20xf32, #tpu.memory_space<vmem>>, %arg15: memref<6x24xbf16, #tpu.memory_space<vmem>>, %arg16: memref<1x24xf32, #tpu.memory_space<vmem>>, %arg17: memref<24x24xbf16, #tpu.memory_space<vmem>>, %arg18: memref<1x24xf32, #tpu.memory_space<vmem>>, %arg19: memref<24x24xbf16, #tpu.memory_space<vmem>>, %arg20: memref<1x24xf32, #tpu.memory_space<vmem>>, %arg21: memref<24x12xbf16, #tpu.memory_space<vmem>>, %arg22: memref<1x12xf32, #tpu.memory_space<vmem>>, %arg23: memref<6x20x60xbf16, #tpu.memory_space<vmem>>, %arg24: memref<1x60xf32, #tpu.memory_space<vmem>>, %arg25: memref<11x12x40xbf16, #tpu.memory_space<vmem>>, %arg26: memref<1x40xf32, #tpu.memory_space<vmem>>, %arg27: memref<60x32xbf16, #tpu.memory_space<vmem>>, %arg28: memref<40x32xbf16, #tpu.memory_space<vmem>>, %arg29: memref<18x32xbf16, #tpu.memory_space<vmem>>, %arg30: memref<1x32xf32, #tpu.memory_space<vmem>>, %arg31: memref<3x32x96xbf16, #tpu.memory_space<vmem>>, %arg32: memref<3x1x96xf32, #tpu.memory_space<vmem>>, %arg33: memref<3x4x8x32xbf16, #tpu.memory_space<vmem>>, %arg34: memref<3x1x32xf32, #tpu.memory_space<vmem>>, %arg35: memref<3x1x32xf32, #tpu.memory_space<vmem>>, %arg36: memref<3x1x32xf32, #tpu.memory_space<vmem>>, %arg37: memref<3x32x64xbf16, #tpu.memory_space<vmem>>, %arg38: memref<3x1x64xf32, #tpu.memory_space<vmem>>, %arg39: memref<3x64x32xbf16, #tpu.memory_space<vmem>>, %arg40: memref<3x1x32xf32, #tpu.memory_space<vmem>>, %arg41: memref<3x1x32xf32, #tpu.memory_space<vmem>>, %arg42: memref<3x1x32xf32, #tpu.memory_space<vmem>>, %arg43: memref<32x1xbf16, #tpu.memory_space<vmem>>, %arg44: memref<1x1xf32, #tpu.memory_space<vmem>>, %arg45: memref<1x8x1xf32, #tpu.memory_space<vmem>>) attributes {dimension_semantics = [#tpu.dimension_semantics<parallel>], iteration_bounds = array<i64: 2>, scalar_prefetch = 0 : i64, scratch_operands = 0 : i64, tpu.core_type = #tpu.core_type<tc>, window_params = [{transform_indices = @transform_0, window_bounds = array<i64: 1, 48, 52>}, {transform_indices = @transform_1, window_bounds = array<i64: 1, 88, 6>}, {transform_indices = @transform_2, window_bounds = array<i64: 1, 8, 18>}, {transform_indices = @transform_3, window_bounds = array<i64: 1, 1, 8>}, {pipeline_mode = #tpu.pipeline_mode<synchronous>, transform_indices = @transform_4, window_bounds = array<i64: 52, 352>}, {pipeline_mode = #tpu.pipeline_mode<synchronous>, transform_indices = @transform_5, window_bounds = array<i64: 1, 352>}, {pipeline_mode = #tpu.pipeline_mode<synchronous>, transform_indices = @transform_6, window_bounds = array<i64: 352, 240>}, {pipeline_mode = #tpu.pipeline_mode<synchronous>, transform_indices = @transform_7, window_bounds = array<i64: 1, 240>}, {pipeline_mode = #tpu.pipeline_mode<synchronous>, transform_indices = @transform_8, window_bounds = array<i64: 240, 128>}, {pipeline_mode = #tpu.pipeline_mode<synchronous>, transform_indices = @transform_9, window_bounds = array<i64: 1, 128>}, {pipeline_mode = #tpu.pipeline_mode<synchronous>, transform_indices = @transform_10, window_bounds = array<i64: 128, 40>}, {pipeline_mode = #tpu.pipeline_mode<synchronous>, transform_indices = @transform_11, window_bounds = array<i64: 1, 40>}, {pipeline_mode = #tpu.pipeline_mode<synchronous>, transform_indices = @transform_12, window_bounds = array<i64: 40, 20>}, {pipeline_mode = #tpu.pipeline_mode<synchronous>, transform_indices = @transform_13, window_bounds = array<i64: 1, 20>}, {pipeline_mode = #tpu.pipeline_mode<synchronous>, transform_indices = @transform_14, window_bounds = array<i64: 6, 24>}, {pipeline_mode = #tpu.pipeline_mode<synchronous>, transform_indices = @transform_15, window_bounds = array<i64: 1, 24>}, {pipeline_mode = #tpu.pipeline_mode<synchronous>, transform_indices = @transform_16, window_bounds = array<i64: 24, 24>}, {pipeline_mode = #tpu.pipeline_mode<synchronous>, transform_indices = @transform_17, window_bounds = array<i64: 1, 24>}, {pipeline_mode = #tpu.pipeline_mode<synchronous>, transform_indices = @transform_18, window_bounds = array<i64: 24, 24>}, {pipeline_mode = #tpu.pipeline_mode<synchronous>, transform_indices = @transform_19, window_bounds = array<i64: 1, 24>}, {pipeline_mode = #tpu.pipeline_mode<synchronous>, transform_indices = @transform_20, window_bounds = array<i64: 24, 12>}, {pipeline_mode = #tpu.pipeline_mode<synchronous>, transform_indices = @transform_21, window_bounds = array<i64: 1, 12>}, {pipeline_mode = #tpu.pipeline_mode<synchronous>, transform_indices = @transform_22, window_bounds = array<i64: 6, 20, 60>}, {pipeline_mode = #tpu.pipeline_mode<synchronous>, transform_indices = @transform_23, window_bounds = array<i64: 1, 60>}, {pipeline_mode = #tpu.pipeline_mode<synchronous>, transform_indices = @transform_24, window_bounds = array<i64: 11, 12, 40>}, {pipeline_mode = #tpu.pipeline_mode<synchronous>, transform_indices = @transform_25, window_bounds = array<i64: 1, 40>}, {pipeline_mode = #tpu.pipeline_mode<synchronous>, transform_indices = @transform_26, window_bounds = array<i64: 60, 32>}, {pipeline_mode = #tpu.pipeline_mode<synchronous>, transform_indices = @transform_27, window_bounds = array<i64: 40, 32>}, {pipeline_mode = #tpu.pipeline_mode<synchronous>, transform_indices = @transform_28, window_bounds = array<i64: 18, 32>}, {pipeline_mode = #tpu.pipeline_mode<synchronous>, transform_indices = @transform_29, window_bounds = array<i64: 1, 32>}, {pipeline_mode = #tpu.pipeline_mode<synchronous>, transform_indices = @transform_30, window_bounds = array<i64: 3, 32, 96>}, {pipeline_mode = #tpu.pipeline_mode<synchronous>, transform_indices = @transform_31, window_bounds = array<i64: 3, 1, 96>}, {pipeline_mode = #tpu.pipeline_mode<synchronous>, transform_indices = @transform_32, window_bounds = array<i64: 3, 4, 8, 32>}, {pipeline_mode = #tpu.pipeline_mode<synchronous>, transform_indices = @transform_33, window_bounds = array<i64: 3, 1, 32>}, {pipeline_mode = #tpu.pipeline_mode<synchronous>, transform_indices = @transform_34, window_bounds = array<i64: 3, 1, 32>}, {pipeline_mode = #tpu.pipeline_mode<synchronous>, transform_indices = @transform_35, window_bounds = array<i64: 3, 1, 32>}, {pipeline_mode = #tpu.pipeline_mode<synchronous>, transform_indices = @transform_36, window_bounds = array<i64: 3, 32, 64>}, {pipeline_mode = #tpu.pipeline_mode<synchronous>, transform_indices = @transform_37, window_bounds = array<i64: 3, 1, 64>}, {pipeline_mode = #tpu.pipeline_mode<synchronous>, transform_indices = @transform_38, window_bounds = array<i64: 3, 64, 32>}, {pipeline_mode = #tpu.pipeline_mode<synchronous>, transform_indices = @transform_39, window_bounds = array<i64: 3, 1, 32>}, {pipeline_mode = #tpu.pipeline_mode<synchronous>, transform_indices = @transform_40, window_bounds = array<i64: 3, 1, 32>}, {pipeline_mode = #tpu.pipeline_mode<synchronous>, transform_indices = @transform_41, window_bounds = array<i64: 3, 1, 32>}, {pipeline_mode = #tpu.pipeline_mode<synchronous>, transform_indices = @transform_42, window_bounds = array<i64: 32, 1>}, {pipeline_mode = #tpu.pipeline_mode<synchronous>, transform_indices = @transform_43, window_bounds = array<i64: 1, 1>}, {transform_indices = @transform_44, window_bounds = array<i64: 1, 8, 1>}]} {
    %c0 = arith.constant 0 : index
    %c0_0 = arith.constant 0 : index
    %c0_1 = arith.constant 0 : index
    %0 = vector.load %arg1[%c0, %c0_0, %c0_1] : memref<1x48x52xf32, #tpu.memory_space<vmem>>, vector<1x48x52xf32>
    %1 = vector.shape_cast %0 : vector<1x48x52xf32> to vector<48x52xf32>
    %c0_2 = arith.constant 0 : index
    %c0_3 = arith.constant 0 : index
    %2 = vector.load %arg5[%c0_2, %c0_3] : memref<52x352xbf16, #tpu.memory_space<vmem>>, vector<52x352xbf16>
    %3 = arith.truncf %1 : vector<48x52xf32> to vector<48x52xbf16>
    %cst = arith.constant dense<0.000000e+00> : vector<48x352xf32>
    %4 = tpu.matmul %3, %2, %cst {dimension_numbers = #tpu.dot_dimension_numbers<[1], [0], [0], [1], [0, 0, 1, 1], [], []>} : vector<48x52xbf16>, vector<52x352xbf16>, vector<48x352xf32> -> vector<48x352xf32>
    %c0_4 = arith.constant 0 : index
    %c0_5 = arith.constant 0 : index
    %5 = vector.load %arg6[%c0_4, %c0_5] : memref<1x352xf32, #tpu.memory_space<vmem>>, vector<1x352xf32>
    %6 = vector.broadcast %5 : vector<1x352xf32> to vector<48x352xf32>
    %7 = arith.addf %4, %6 : vector<48x352xf32>
    %cst_6 = arith.constant 0.000000e+00 : f32
    %8 = vector.broadcast %cst_6 : f32 to vector<48x352xf32>
    %9 = arith.maximumf %7, %8 : vector<48x352xf32>
    %c0_7 = arith.constant 0 : index
    %c0_8 = arith.constant 0 : index
    %10 = vector.load %arg7[%c0_7, %c0_8] : memref<352x240xbf16, #tpu.memory_space<vmem>>, vector<352x240xbf16>
    %11 = arith.truncf %9 : vector<48x352xf32> to vector<48x352xbf16>
    %cst_9 = arith.constant dense<0.000000e+00> : vector<48x240xf32>
    %12 = tpu.matmul %11, %10, %cst_9 {dimension_numbers = #tpu.dot_dimension_numbers<[1], [0], [0], [1], [0, 0, 1, 1], [], []>} : vector<48x352xbf16>, vector<352x240xbf16>, vector<48x240xf32> -> vector<48x240xf32>
    %c0_10 = arith.constant 0 : index
    %c0_11 = arith.constant 0 : index
    %13 = vector.load %arg8[%c0_10, %c0_11] : memref<1x240xf32, #tpu.memory_space<vmem>>, vector<1x240xf32>
    %14 = vector.broadcast %13 : vector<1x240xf32> to vector<48x240xf32>
    %15 = arith.addf %12, %14 : vector<48x240xf32>
    %cst_12 = arith.constant 0.000000e+00 : f32
    %16 = vector.broadcast %cst_12 : f32 to vector<48x240xf32>
    %17 = arith.maximumf %15, %16 : vector<48x240xf32>
    %c0_13 = arith.constant 0 : index
    %c0_14 = arith.constant 0 : index
    %18 = vector.load %arg9[%c0_13, %c0_14] : memref<240x128xbf16, #tpu.memory_space<vmem>>, vector<240x128xbf16>
    %19 = arith.truncf %17 : vector<48x240xf32> to vector<48x240xbf16>
    %cst_15 = arith.constant dense<0.000000e+00> : vector<48x128xf32>
    %20 = tpu.matmul %19, %18, %cst_15 {dimension_numbers = #tpu.dot_dimension_numbers<[1], [0], [0], [1], [0, 0, 1, 1], [], []>} : vector<48x240xbf16>, vector<240x128xbf16>, vector<48x128xf32> -> vector<48x128xf32>
    %c0_16 = arith.constant 0 : index
    %c0_17 = arith.constant 0 : index
    %21 = vector.load %arg10[%c0_16, %c0_17] : memref<1x128xf32, #tpu.memory_space<vmem>>, vector<1x128xf32>
    %22 = vector.broadcast %21 : vector<1x128xf32> to vector<48x128xf32>
    %23 = arith.addf %20, %22 : vector<48x128xf32>
    %cst_18 = arith.constant 0.000000e+00 : f32
    %24 = vector.broadcast %cst_18 : f32 to vector<48x128xf32>
    %25 = arith.maximumf %23, %24 : vector<48x128xf32>
    %c0_19 = arith.constant 0 : index
    %c0_20 = arith.constant 0 : index
    %26 = vector.load %arg11[%c0_19, %c0_20] : memref<128x40xbf16, #tpu.memory_space<vmem>>, vector<128x40xbf16>
    %27 = arith.truncf %25 : vector<48x128xf32> to vector<48x128xbf16>
    %cst_21 = arith.constant dense<0.000000e+00> : vector<48x40xf32>
    %28 = tpu.matmul %27, %26, %cst_21 {dimension_numbers = #tpu.dot_dimension_numbers<[1], [0], [0], [1], [0, 0, 1, 1], [], []>} : vector<48x128xbf16>, vector<128x40xbf16>, vector<48x40xf32> -> vector<48x40xf32>
    %c0_22 = arith.constant 0 : index
    %c0_23 = arith.constant 0 : index
    %29 = vector.load %arg12[%c0_22, %c0_23] : memref<1x40xf32, #tpu.memory_space<vmem>>, vector<1x40xf32>
    %30 = vector.broadcast %29 : vector<1x40xf32> to vector<48x40xf32>
    %31 = arith.addf %28, %30 : vector<48x40xf32>
    %cst_24 = arith.constant 0.000000e+00 : f32
    %32 = vector.broadcast %cst_24 : f32 to vector<48x40xf32>
    %33 = arith.maximumf %31, %32 : vector<48x40xf32>
    %c0_25 = arith.constant 0 : index
    %c0_26 = arith.constant 0 : index
    %34 = vector.load %arg13[%c0_25, %c0_26] : memref<40x20xbf16, #tpu.memory_space<vmem>>, vector<40x20xbf16>
    %35 = arith.truncf %33 : vector<48x40xf32> to vector<48x40xbf16>
    %cst_27 = arith.constant dense<0.000000e+00> : vector<48x20xf32>
    %36 = tpu.matmul %35, %34, %cst_27 {dimension_numbers = #tpu.dot_dimension_numbers<[1], [0], [0], [1], [0, 0, 1, 1], [], []>} : vector<48x40xbf16>, vector<40x20xbf16>, vector<48x20xf32> -> vector<48x20xf32>
    %c0_28 = arith.constant 0 : index
    %c0_29 = arith.constant 0 : index
    %37 = vector.load %arg14[%c0_28, %c0_29] : memref<1x20xf32, #tpu.memory_space<vmem>>, vector<1x20xf32>
    %38 = vector.broadcast %37 : vector<1x20xf32> to vector<48x20xf32>
    %39 = arith.addf %36, %38 : vector<48x20xf32>
    %c0_30 = arith.constant 0 : index
    %c0_31 = arith.constant 0 : index
    %c0_32 = arith.constant 0 : index
    %40 = vector.load %arg2[%c0_30, %c0_31, %c0_32] : memref<1x88x6xf32, #tpu.memory_space<vmem>>, vector<1x88x6xf32>
    %41 = vector.shape_cast %40 : vector<1x88x6xf32> to vector<88x6xf32>
    %c0_33 = arith.constant 0 : index
    %c0_34 = arith.constant 0 : index
    %42 = vector.load %arg15[%c0_33, %c0_34] : memref<6x24xbf16, #tpu.memory_space<vmem>>, vector<6x24xbf16>
    %43 = arith.truncf %41 : vector<88x6xf32> to vector<88x6xbf16>
    %cst_35 = arith.constant dense<0.000000e+00> : vector<88x24xf32>
    %44 = tpu.matmul %43, %42, %cst_35 {dimension_numbers = #tpu.dot_dimension_numbers<[1], [0], [0], [1], [0, 0, 1, 1], [], []>} : vector<88x6xbf16>, vector<6x24xbf16>, vector<88x24xf32> -> vector<88x24xf32>
    %c0_36 = arith.constant 0 : index
    %c0_37 = arith.constant 0 : index
    %45 = vector.load %arg16[%c0_36, %c0_37] : memref<1x24xf32, #tpu.memory_space<vmem>>, vector<1x24xf32>
    %46 = vector.broadcast %45 : vector<1x24xf32> to vector<88x24xf32>
    %47 = arith.addf %44, %46 : vector<88x24xf32>
    %cst_38 = arith.constant 0.000000e+00 : f32
    %48 = vector.broadcast %cst_38 : f32 to vector<88x24xf32>
    %49 = arith.maximumf %47, %48 : vector<88x24xf32>
    %c0_39 = arith.constant 0 : index
    %c0_40 = arith.constant 0 : index
    %50 = vector.load %arg17[%c0_39, %c0_40] : memref<24x24xbf16, #tpu.memory_space<vmem>>, vector<24x24xbf16>
    %51 = arith.truncf %49 : vector<88x24xf32> to vector<88x24xbf16>
    %cst_41 = arith.constant dense<0.000000e+00> : vector<88x24xf32>
    %52 = tpu.matmul %51, %50, %cst_41 {dimension_numbers = #tpu.dot_dimension_numbers<[1], [0], [0], [1], [0, 0, 1, 1], [], []>} : vector<88x24xbf16>, vector<24x24xbf16>, vector<88x24xf32> -> vector<88x24xf32>
    %c0_42 = arith.constant 0 : index
    %c0_43 = arith.constant 0 : index
    %53 = vector.load %arg18[%c0_42, %c0_43] : memref<1x24xf32, #tpu.memory_space<vmem>>, vector<1x24xf32>
    %54 = vector.broadcast %53 : vector<1x24xf32> to vector<88x24xf32>
    %55 = arith.addf %52, %54 : vector<88x24xf32>
    %cst_44 = arith.constant 0.000000e+00 : f32
    %56 = vector.broadcast %cst_44 : f32 to vector<88x24xf32>
    %57 = arith.maximumf %55, %56 : vector<88x24xf32>
    %c0_45 = arith.constant 0 : index
    %c0_46 = arith.constant 0 : index
    %58 = vector.load %arg19[%c0_45, %c0_46] : memref<24x24xbf16, #tpu.memory_space<vmem>>, vector<24x24xbf16>
    %59 = arith.truncf %57 : vector<88x24xf32> to vector<88x24xbf16>
    %cst_47 = arith.constant dense<0.000000e+00> : vector<88x24xf32>
    %60 = tpu.matmul %59, %58, %cst_47 {dimension_numbers = #tpu.dot_dimension_numbers<[1], [0], [0], [1], [0, 0, 1, 1], [], []>} : vector<88x24xbf16>, vector<24x24xbf16>, vector<88x24xf32> -> vector<88x24xf32>
    %c0_48 = arith.constant 0 : index
    %c0_49 = arith.constant 0 : index
    %61 = vector.load %arg20[%c0_48, %c0_49] : memref<1x24xf32, #tpu.memory_space<vmem>>, vector<1x24xf32>
    %62 = vector.broadcast %61 : vector<1x24xf32> to vector<88x24xf32>
    %63 = arith.addf %60, %62 : vector<88x24xf32>
    %c0_50 = arith.constant 0 : index
    %c0_51 = arith.constant 0 : index
    %64 = vector.load %arg21[%c0_50, %c0_51] : memref<24x12xbf16, #tpu.memory_space<vmem>>, vector<24x12xbf16>
    %65 = arith.truncf %63 : vector<88x24xf32> to vector<88x24xbf16>
    %cst_52 = arith.constant dense<0.000000e+00> : vector<88x12xf32>
    %66 = tpu.matmul %65, %64, %cst_52 {dimension_numbers = #tpu.dot_dimension_numbers<[1], [0], [0], [1], [0, 0, 1, 1], [], []>} : vector<88x24xbf16>, vector<24x12xbf16>, vector<88x12xf32> -> vector<88x12xf32>
    %c0_53 = arith.constant 0 : index
    %c0_54 = arith.constant 0 : index
    %67 = vector.load %arg22[%c0_53, %c0_54] : memref<1x12xf32, #tpu.memory_space<vmem>>, vector<1x12xf32>
    %68 = vector.broadcast %67 : vector<1x12xf32> to vector<88x12xf32>
    %69 = arith.addf %66, %68 : vector<88x12xf32>
    %cst_55 = arith.constant 0.000000e+00 : f32
    %70 = vector.broadcast %cst_55 : f32 to vector<88x12xf32>
    %71 = arith.maximumf %69, %70 : vector<88x12xf32>
    %c0_56 = arith.constant 0 : index
    %c0_57 = arith.constant 0 : index
    %72 = vector.load %arg24[%c0_56, %c0_57] : memref<1x60xf32, #tpu.memory_space<vmem>>, vector<1x60xf32>
    %73 = vector.extract_strided_slice %39 {offsets = [0, 0], sizes = [8, 20], strides = [1, 1]} : vector<48x20xf32> to vector<8x20xf32>
    %c0_58 = arith.constant 0 : index
    %c0_59 = arith.constant 0 : index
    %c0_60 = arith.constant 0 : index
    %74 = vector.load %arg23[%c0_58, %c0_59, %c0_60] : memref<6x20x60xbf16, #tpu.memory_space<vmem>>, vector<1x20x60xbf16>
    %75 = vector.shape_cast %74 : vector<1x20x60xbf16> to vector<20x60xbf16>
    %76 = arith.truncf %73 : vector<8x20xf32> to vector<8x20xbf16>
    %cst_61 = arith.constant dense<0.000000e+00> : vector<8x60xf32>
    %77 = tpu.matmul %76, %75, %cst_61 {dimension_numbers = #tpu.dot_dimension_numbers<[1], [0], [0], [1], [0, 0, 1, 1], [], []>} : vector<8x20xbf16>, vector<20x60xbf16>, vector<8x60xf32> -> vector<8x60xf32>
    %78 = vector.broadcast %72 : vector<1x60xf32> to vector<8x60xf32>
    %79 = arith.addf %78, %77 : vector<8x60xf32>
    %80 = vector.extract_strided_slice %39 {offsets = [8, 0], sizes = [8, 20], strides = [1, 1]} : vector<48x20xf32> to vector<8x20xf32>
    %c1 = arith.constant 1 : index
    %c0_62 = arith.constant 0 : index
    %c0_63 = arith.constant 0 : index
    %81 = vector.load %arg23[%c1, %c0_62, %c0_63] : memref<6x20x60xbf16, #tpu.memory_space<vmem>>, vector<1x20x60xbf16>
    %82 = vector.shape_cast %81 : vector<1x20x60xbf16> to vector<20x60xbf16>
    %83 = arith.truncf %80 : vector<8x20xf32> to vector<8x20xbf16>
    %cst_64 = arith.constant dense<0.000000e+00> : vector<8x60xf32>
    %84 = tpu.matmul %83, %82, %cst_64 {dimension_numbers = #tpu.dot_dimension_numbers<[1], [0], [0], [1], [0, 0, 1, 1], [], []>} : vector<8x20xbf16>, vector<20x60xbf16>, vector<8x60xf32> -> vector<8x60xf32>
    %85 = arith.addf %79, %84 : vector<8x60xf32>
    %86 = vector.extract_strided_slice %39 {offsets = [16, 0], sizes = [8, 20], strides = [1, 1]} : vector<48x20xf32> to vector<8x20xf32>
    %c2 = arith.constant 2 : index
    %c0_65 = arith.constant 0 : index
    %c0_66 = arith.constant 0 : index
    %87 = vector.load %arg23[%c2, %c0_65, %c0_66] : memref<6x20x60xbf16, #tpu.memory_space<vmem>>, vector<1x20x60xbf16>
    %88 = vector.shape_cast %87 : vector<1x20x60xbf16> to vector<20x60xbf16>
    %89 = arith.truncf %86 : vector<8x20xf32> to vector<8x20xbf16>
    %cst_67 = arith.constant dense<0.000000e+00> : vector<8x60xf32>
    %90 = tpu.matmul %89, %88, %cst_67 {dimension_numbers = #tpu.dot_dimension_numbers<[1], [0], [0], [1], [0, 0, 1, 1], [], []>} : vector<8x20xbf16>, vector<20x60xbf16>, vector<8x60xf32> -> vector<8x60xf32>
    %91 = arith.addf %85, %90 : vector<8x60xf32>
    %92 = vector.extract_strided_slice %39 {offsets = [24, 0], sizes = [8, 20], strides = [1, 1]} : vector<48x20xf32> to vector<8x20xf32>
    %c3 = arith.constant 3 : index
    %c0_68 = arith.constant 0 : index
    %c0_69 = arith.constant 0 : index
    %93 = vector.load %arg23[%c3, %c0_68, %c0_69] : memref<6x20x60xbf16, #tpu.memory_space<vmem>>, vector<1x20x60xbf16>
    %94 = vector.shape_cast %93 : vector<1x20x60xbf16> to vector<20x60xbf16>
    %95 = arith.truncf %92 : vector<8x20xf32> to vector<8x20xbf16>
    %cst_70 = arith.constant dense<0.000000e+00> : vector<8x60xf32>
    %96 = tpu.matmul %95, %94, %cst_70 {dimension_numbers = #tpu.dot_dimension_numbers<[1], [0], [0], [1], [0, 0, 1, 1], [], []>} : vector<8x20xbf16>, vector<20x60xbf16>, vector<8x60xf32> -> vector<8x60xf32>
    %97 = arith.addf %91, %96 : vector<8x60xf32>
    %98 = vector.extract_strided_slice %39 {offsets = [32, 0], sizes = [8, 20], strides = [1, 1]} : vector<48x20xf32> to vector<8x20xf32>
    %c4 = arith.constant 4 : index
    %c0_71 = arith.constant 0 : index
    %c0_72 = arith.constant 0 : index
    %99 = vector.load %arg23[%c4, %c0_71, %c0_72] : memref<6x20x60xbf16, #tpu.memory_space<vmem>>, vector<1x20x60xbf16>
    %100 = vector.shape_cast %99 : vector<1x20x60xbf16> to vector<20x60xbf16>
    %101 = arith.truncf %98 : vector<8x20xf32> to vector<8x20xbf16>
    %cst_73 = arith.constant dense<0.000000e+00> : vector<8x60xf32>
    %102 = tpu.matmul %101, %100, %cst_73 {dimension_numbers = #tpu.dot_dimension_numbers<[1], [0], [0], [1], [0, 0, 1, 1], [], []>} : vector<8x20xbf16>, vector<20x60xbf16>, vector<8x60xf32> -> vector<8x60xf32>
    %103 = arith.addf %97, %102 : vector<8x60xf32>
    %104 = vector.extract_strided_slice %39 {offsets = [40, 0], sizes = [8, 20], strides = [1, 1]} : vector<48x20xf32> to vector<8x20xf32>
    %c5 = arith.constant 5 : index
    %c0_74 = arith.constant 0 : index
    %c0_75 = arith.constant 0 : index
    %105 = vector.load %arg23[%c5, %c0_74, %c0_75] : memref<6x20x60xbf16, #tpu.memory_space<vmem>>, vector<1x20x60xbf16>
    %106 = vector.shape_cast %105 : vector<1x20x60xbf16> to vector<20x60xbf16>
    %107 = arith.truncf %104 : vector<8x20xf32> to vector<8x20xbf16>
    %cst_76 = arith.constant dense<0.000000e+00> : vector<8x60xf32>
    %108 = tpu.matmul %107, %106, %cst_76 {dimension_numbers = #tpu.dot_dimension_numbers<[1], [0], [0], [1], [0, 0, 1, 1], [], []>} : vector<8x20xbf16>, vector<20x60xbf16>, vector<8x60xf32> -> vector<8x60xf32>
    %109 = arith.addf %103, %108 : vector<8x60xf32>
    %cst_77 = arith.constant 0.000000e+00 : f32
    %110 = vector.broadcast %cst_77 : f32 to vector<8x60xf32>
    %111 = arith.maximumf %109, %110 : vector<8x60xf32>
    %c0_78 = arith.constant 0 : index
    %c0_79 = arith.constant 0 : index
    %112 = vector.load %arg26[%c0_78, %c0_79] : memref<1x40xf32, #tpu.memory_space<vmem>>, vector<1x40xf32>
    %113 = vector.extract_strided_slice %71 {offsets = [0, 0], sizes = [8, 12], strides = [1, 1]} : vector<88x12xf32> to vector<8x12xf32>
    %c0_80 = arith.constant 0 : index
    %c0_81 = arith.constant 0 : index
    %c0_82 = arith.constant 0 : index
    %114 = vector.load %arg25[%c0_80, %c0_81, %c0_82] : memref<11x12x40xbf16, #tpu.memory_space<vmem>>, vector<1x12x40xbf16>
    %115 = vector.shape_cast %114 : vector<1x12x40xbf16> to vector<12x40xbf16>
    %116 = arith.truncf %113 : vector<8x12xf32> to vector<8x12xbf16>
    %cst_83 = arith.constant dense<0.000000e+00> : vector<8x40xf32>
    %117 = tpu.matmul %116, %115, %cst_83 {dimension_numbers = #tpu.dot_dimension_numbers<[1], [0], [0], [1], [0, 0, 1, 1], [], []>} : vector<8x12xbf16>, vector<12x40xbf16>, vector<8x40xf32> -> vector<8x40xf32>
    %118 = vector.broadcast %112 : vector<1x40xf32> to vector<8x40xf32>
    %119 = arith.addf %118, %117 : vector<8x40xf32>
    %120 = vector.extract_strided_slice %71 {offsets = [8, 0], sizes = [8, 12], strides = [1, 1]} : vector<88x12xf32> to vector<8x12xf32>
    %c1_84 = arith.constant 1 : index
    %c0_85 = arith.constant 0 : index
    %c0_86 = arith.constant 0 : index
    %121 = vector.load %arg25[%c1_84, %c0_85, %c0_86] : memref<11x12x40xbf16, #tpu.memory_space<vmem>>, vector<1x12x40xbf16>
    %122 = vector.shape_cast %121 : vector<1x12x40xbf16> to vector<12x40xbf16>
    %123 = arith.truncf %120 : vector<8x12xf32> to vector<8x12xbf16>
    %cst_87 = arith.constant dense<0.000000e+00> : vector<8x40xf32>
    %124 = tpu.matmul %123, %122, %cst_87 {dimension_numbers = #tpu.dot_dimension_numbers<[1], [0], [0], [1], [0, 0, 1, 1], [], []>} : vector<8x12xbf16>, vector<12x40xbf16>, vector<8x40xf32> -> vector<8x40xf32>
    %125 = arith.addf %119, %124 : vector<8x40xf32>
    %126 = vector.extract_strided_slice %71 {offsets = [16, 0], sizes = [8, 12], strides = [1, 1]} : vector<88x12xf32> to vector<8x12xf32>
    %c2_88 = arith.constant 2 : index
    %c0_89 = arith.constant 0 : index
    %c0_90 = arith.constant 0 : index
    %127 = vector.load %arg25[%c2_88, %c0_89, %c0_90] : memref<11x12x40xbf16, #tpu.memory_space<vmem>>, vector<1x12x40xbf16>
    %128 = vector.shape_cast %127 : vector<1x12x40xbf16> to vector<12x40xbf16>
    %129 = arith.truncf %126 : vector<8x12xf32> to vector<8x12xbf16>
    %cst_91 = arith.constant dense<0.000000e+00> : vector<8x40xf32>
    %130 = tpu.matmul %129, %128, %cst_91 {dimension_numbers = #tpu.dot_dimension_numbers<[1], [0], [0], [1], [0, 0, 1, 1], [], []>} : vector<8x12xbf16>, vector<12x40xbf16>, vector<8x40xf32> -> vector<8x40xf32>
    %131 = arith.addf %125, %130 : vector<8x40xf32>
    %132 = vector.extract_strided_slice %71 {offsets = [24, 0], sizes = [8, 12], strides = [1, 1]} : vector<88x12xf32> to vector<8x12xf32>
    %c3_92 = arith.constant 3 : index
    %c0_93 = arith.constant 0 : index
    %c0_94 = arith.constant 0 : index
    %133 = vector.load %arg25[%c3_92, %c0_93, %c0_94] : memref<11x12x40xbf16, #tpu.memory_space<vmem>>, vector<1x12x40xbf16>
    %134 = vector.shape_cast %133 : vector<1x12x40xbf16> to vector<12x40xbf16>
    %135 = arith.truncf %132 : vector<8x12xf32> to vector<8x12xbf16>
    %cst_95 = arith.constant dense<0.000000e+00> : vector<8x40xf32>
    %136 = tpu.matmul %135, %134, %cst_95 {dimension_numbers = #tpu.dot_dimension_numbers<[1], [0], [0], [1], [0, 0, 1, 1], [], []>} : vector<8x12xbf16>, vector<12x40xbf16>, vector<8x40xf32> -> vector<8x40xf32>
    %137 = arith.addf %131, %136 : vector<8x40xf32>
    %138 = vector.extract_strided_slice %71 {offsets = [32, 0], sizes = [8, 12], strides = [1, 1]} : vector<88x12xf32> to vector<8x12xf32>
    %c4_96 = arith.constant 4 : index
    %c0_97 = arith.constant 0 : index
    %c0_98 = arith.constant 0 : index
    %139 = vector.load %arg25[%c4_96, %c0_97, %c0_98] : memref<11x12x40xbf16, #tpu.memory_space<vmem>>, vector<1x12x40xbf16>
    %140 = vector.shape_cast %139 : vector<1x12x40xbf16> to vector<12x40xbf16>
    %141 = arith.truncf %138 : vector<8x12xf32> to vector<8x12xbf16>
    %cst_99 = arith.constant dense<0.000000e+00> : vector<8x40xf32>
    %142 = tpu.matmul %141, %140, %cst_99 {dimension_numbers = #tpu.dot_dimension_numbers<[1], [0], [0], [1], [0, 0, 1, 1], [], []>} : vector<8x12xbf16>, vector<12x40xbf16>, vector<8x40xf32> -> vector<8x40xf32>
    %143 = arith.addf %137, %142 : vector<8x40xf32>
    %144 = vector.extract_strided_slice %71 {offsets = [40, 0], sizes = [8, 12], strides = [1, 1]} : vector<88x12xf32> to vector<8x12xf32>
    %c5_100 = arith.constant 5 : index
    %c0_101 = arith.constant 0 : index
    %c0_102 = arith.constant 0 : index
    %145 = vector.load %arg25[%c5_100, %c0_101, %c0_102] : memref<11x12x40xbf16, #tpu.memory_space<vmem>>, vector<1x12x40xbf16>
    %146 = vector.shape_cast %145 : vector<1x12x40xbf16> to vector<12x40xbf16>
    %147 = arith.truncf %144 : vector<8x12xf32> to vector<8x12xbf16>
    %cst_103 = arith.constant dense<0.000000e+00> : vector<8x40xf32>
    %148 = tpu.matmul %147, %146, %cst_103 {dimension_numbers = #tpu.dot_dimension_numbers<[1], [0], [0], [1], [0, 0, 1, 1], [], []>} : vector<8x12xbf16>, vector<12x40xbf16>, vector<8x40xf32> -> vector<8x40xf32>
    %149 = arith.addf %143, %148 : vector<8x40xf32>
    %150 = vector.extract_strided_slice %71 {offsets = [48, 0], sizes = [8, 12], strides = [1, 1]} : vector<88x12xf32> to vector<8x12xf32>
    %c6 = arith.constant 6 : index
    %c0_104 = arith.constant 0 : index
    %c0_105 = arith.constant 0 : index
    %151 = vector.load %arg25[%c6, %c0_104, %c0_105] : memref<11x12x40xbf16, #tpu.memory_space<vmem>>, vector<1x12x40xbf16>
    %152 = vector.shape_cast %151 : vector<1x12x40xbf16> to vector<12x40xbf16>
    %153 = arith.truncf %150 : vector<8x12xf32> to vector<8x12xbf16>
    %cst_106 = arith.constant dense<0.000000e+00> : vector<8x40xf32>
    %154 = tpu.matmul %153, %152, %cst_106 {dimension_numbers = #tpu.dot_dimension_numbers<[1], [0], [0], [1], [0, 0, 1, 1], [], []>} : vector<8x12xbf16>, vector<12x40xbf16>, vector<8x40xf32> -> vector<8x40xf32>
    %155 = arith.addf %149, %154 : vector<8x40xf32>
    %156 = vector.extract_strided_slice %71 {offsets = [56, 0], sizes = [8, 12], strides = [1, 1]} : vector<88x12xf32> to vector<8x12xf32>
    %c7 = arith.constant 7 : index
    %c0_107 = arith.constant 0 : index
    %c0_108 = arith.constant 0 : index
    %157 = vector.load %arg25[%c7, %c0_107, %c0_108] : memref<11x12x40xbf16, #tpu.memory_space<vmem>>, vector<1x12x40xbf16>
    %158 = vector.shape_cast %157 : vector<1x12x40xbf16> to vector<12x40xbf16>
    %159 = arith.truncf %156 : vector<8x12xf32> to vector<8x12xbf16>
    %cst_109 = arith.constant dense<0.000000e+00> : vector<8x40xf32>
    %160 = tpu.matmul %159, %158, %cst_109 {dimension_numbers = #tpu.dot_dimension_numbers<[1], [0], [0], [1], [0, 0, 1, 1], [], []>} : vector<8x12xbf16>, vector<12x40xbf16>, vector<8x40xf32> -> vector<8x40xf32>
    %161 = arith.addf %155, %160 : vector<8x40xf32>
    %162 = vector.extract_strided_slice %71 {offsets = [64, 0], sizes = [8, 12], strides = [1, 1]} : vector<88x12xf32> to vector<8x12xf32>
    %c8 = arith.constant 8 : index
    %c0_110 = arith.constant 0 : index
    %c0_111 = arith.constant 0 : index
    %163 = vector.load %arg25[%c8, %c0_110, %c0_111] : memref<11x12x40xbf16, #tpu.memory_space<vmem>>, vector<1x12x40xbf16>
    %164 = vector.shape_cast %163 : vector<1x12x40xbf16> to vector<12x40xbf16>
    %165 = arith.truncf %162 : vector<8x12xf32> to vector<8x12xbf16>
    %cst_112 = arith.constant dense<0.000000e+00> : vector<8x40xf32>
    %166 = tpu.matmul %165, %164, %cst_112 {dimension_numbers = #tpu.dot_dimension_numbers<[1], [0], [0], [1], [0, 0, 1, 1], [], []>} : vector<8x12xbf16>, vector<12x40xbf16>, vector<8x40xf32> -> vector<8x40xf32>
    %167 = arith.addf %161, %166 : vector<8x40xf32>
    %168 = vector.extract_strided_slice %71 {offsets = [72, 0], sizes = [8, 12], strides = [1, 1]} : vector<88x12xf32> to vector<8x12xf32>
    %c9 = arith.constant 9 : index
    %c0_113 = arith.constant 0 : index
    %c0_114 = arith.constant 0 : index
    %169 = vector.load %arg25[%c9, %c0_113, %c0_114] : memref<11x12x40xbf16, #tpu.memory_space<vmem>>, vector<1x12x40xbf16>
    %170 = vector.shape_cast %169 : vector<1x12x40xbf16> to vector<12x40xbf16>
    %171 = arith.truncf %168 : vector<8x12xf32> to vector<8x12xbf16>
    %cst_115 = arith.constant dense<0.000000e+00> : vector<8x40xf32>
    %172 = tpu.matmul %171, %170, %cst_115 {dimension_numbers = #tpu.dot_dimension_numbers<[1], [0], [0], [1], [0, 0, 1, 1], [], []>} : vector<8x12xbf16>, vector<12x40xbf16>, vector<8x40xf32> -> vector<8x40xf32>
    %173 = arith.addf %167, %172 : vector<8x40xf32>
    %174 = vector.extract_strided_slice %71 {offsets = [80, 0], sizes = [8, 12], strides = [1, 1]} : vector<88x12xf32> to vector<8x12xf32>
    %c10 = arith.constant 10 : index
    %c0_116 = arith.constant 0 : index
    %c0_117 = arith.constant 0 : index
    %175 = vector.load %arg25[%c10, %c0_116, %c0_117] : memref<11x12x40xbf16, #tpu.memory_space<vmem>>, vector<1x12x40xbf16>
    %176 = vector.shape_cast %175 : vector<1x12x40xbf16> to vector<12x40xbf16>
    %177 = arith.truncf %174 : vector<8x12xf32> to vector<8x12xbf16>
    %cst_118 = arith.constant dense<0.000000e+00> : vector<8x40xf32>
    %178 = tpu.matmul %177, %176, %cst_118 {dimension_numbers = #tpu.dot_dimension_numbers<[1], [0], [0], [1], [0, 0, 1, 1], [], []>} : vector<8x12xbf16>, vector<12x40xbf16>, vector<8x40xf32> -> vector<8x40xf32>
    %179 = arith.addf %173, %178 : vector<8x40xf32>
    %c0_119 = arith.constant 0 : index
    %c0_120 = arith.constant 0 : index
    %c0_121 = arith.constant 0 : index
    %180 = vector.load %arg3[%c0_119, %c0_120, %c0_121] : memref<1x8x18xf32, #tpu.memory_space<vmem>>, vector<1x8x18xf32>
    %181 = vector.shape_cast %180 : vector<1x8x18xf32> to vector<8x18xf32>
    %c0_122 = arith.constant 0 : index
    %c0_123 = arith.constant 0 : index
    %182 = vector.load %arg27[%c0_122, %c0_123] : memref<60x32xbf16, #tpu.memory_space<vmem>>, vector<60x32xbf16>
    %183 = arith.truncf %111 : vector<8x60xf32> to vector<8x60xbf16>
    %cst_124 = arith.constant dense<0.000000e+00> : vector<8x32xf32>
    %184 = tpu.matmul %183, %182, %cst_124 {dimension_numbers = #tpu.dot_dimension_numbers<[1], [0], [0], [1], [0, 0, 1, 1], [], []>} : vector<8x60xbf16>, vector<60x32xbf16>, vector<8x32xf32> -> vector<8x32xf32>
    %c0_125 = arith.constant 0 : index
    %c0_126 = arith.constant 0 : index
    %185 = vector.load %arg28[%c0_125, %c0_126] : memref<40x32xbf16, #tpu.memory_space<vmem>>, vector<40x32xbf16>
    %186 = arith.truncf %179 : vector<8x40xf32> to vector<8x40xbf16>
    %cst_127 = arith.constant dense<0.000000e+00> : vector<8x32xf32>
    %187 = tpu.matmul %186, %185, %cst_127 {dimension_numbers = #tpu.dot_dimension_numbers<[1], [0], [0], [1], [0, 0, 1, 1], [], []>} : vector<8x40xbf16>, vector<40x32xbf16>, vector<8x32xf32> -> vector<8x32xf32>
    %188 = arith.addf %184, %187 : vector<8x32xf32>
    %c0_128 = arith.constant 0 : index
    %c0_129 = arith.constant 0 : index
    %189 = vector.load %arg29[%c0_128, %c0_129] : memref<18x32xbf16, #tpu.memory_space<vmem>>, vector<18x32xbf16>
    %190 = arith.truncf %181 : vector<8x18xf32> to vector<8x18xbf16>
    %cst_130 = arith.constant dense<0.000000e+00> : vector<8x32xf32>
    %191 = tpu.matmul %190, %189, %cst_130 {dimension_numbers = #tpu.dot_dimension_numbers<[1], [0], [0], [1], [0, 0, 1, 1], [], []>} : vector<8x18xbf16>, vector<18x32xbf16>, vector<8x32xf32> -> vector<8x32xf32>
    %192 = arith.addf %188, %191 : vector<8x32xf32>
    %c0_131 = arith.constant 0 : index
    %c0_132 = arith.constant 0 : index
    %193 = vector.load %arg30[%c0_131, %c0_132] : memref<1x32xf32, #tpu.memory_space<vmem>>, vector<1x32xf32>
    %194 = vector.broadcast %193 : vector<1x32xf32> to vector<8x32xf32>
    %195 = arith.addf %192, %194 : vector<8x32xf32>
    %c0_133 = arith.constant 0 : index
    %c0_134 = arith.constant 0 : index
    %c0_135 = arith.constant 0 : index
    %196 = vector.load %arg4[%c0_133, %c0_134, %c0_135] : memref<1x1x8xf32, #tpu.memory_space<vmem>>, vector<1x1x8xf32>
    %197 = vector.shape_cast %196 : vector<1x1x8xf32> to vector<1x8xf32>
    %cst_136 = arith.constant 5.000000e-01 : f32
    %198 = vector.broadcast %cst_136 : f32 to vector<1x8xf32>
    %199 = arith.cmpf ogt, %197, %198 : vector<1x8xf32>
    %cst_137 = arith.constant 0.000000e+00 : f32
    %200 = vector.broadcast %cst_137 : f32 to vector<1x8xf32>
    %cst_138 = arith.constant -1.000000e+09 : f32
    %201 = vector.broadcast %cst_138 : f32 to vector<1x8xf32>
    %202 = arith.select %199, %200, %201 : vector<1x8xi1>, vector<1x8xf32>
    %c0_139 = arith.constant 0 : index
    %c0_140 = arith.constant 0 : index
    %c0_141 = arith.constant 0 : index
    %203 = vector.load %arg31[%c0_139, %c0_140, %c0_141] : memref<3x32x96xbf16, #tpu.memory_space<vmem>>, vector<1x32x96xbf16>
    %204 = vector.shape_cast %203 : vector<1x32x96xbf16> to vector<32x96xbf16>
    %205 = arith.truncf %195 : vector<8x32xf32> to vector<8x32xbf16>
    %cst_142 = arith.constant dense<0.000000e+00> : vector<8x96xf32>
    %206 = tpu.matmul %205, %204, %cst_142 {dimension_numbers = #tpu.dot_dimension_numbers<[1], [0], [0], [1], [0, 0, 1, 1], [], []>} : vector<8x32xbf16>, vector<32x96xbf16>, vector<8x96xf32> -> vector<8x96xf32>
    %c0_143 = arith.constant 0 : index
    %c0_144 = arith.constant 0 : index
    %c0_145 = arith.constant 0 : index
    %207 = vector.load %arg32[%c0_143, %c0_144, %c0_145] : memref<3x1x96xf32, #tpu.memory_space<vmem>>, vector<1x1x96xf32>
    %208 = vector.shape_cast %207 : vector<1x1x96xf32> to vector<1x96xf32>
    %209 = vector.broadcast %208 : vector<1x96xf32> to vector<8x96xf32>
    %210 = arith.addf %206, %209 : vector<8x96xf32>
    %c0_146 = arith.constant 0 : index
    %c0_147 = arith.constant 0 : index
    %c0_148 = arith.constant 0 : index
    %211 = vector.load %arg34[%c0_146, %c0_147, %c0_148] : memref<3x1x32xf32, #tpu.memory_space<vmem>>, vector<1x1x32xf32>
    %212 = vector.shape_cast %211 : vector<1x1x32xf32> to vector<1x32xf32>
    %213 = vector.extract_strided_slice %210 {offsets = [0, 0], sizes = [8, 8], strides = [1, 1]} : vector<8x96xf32> to vector<8x8xf32>
    %214 = vector.extract_strided_slice %210 {offsets = [0, 32], sizes = [8, 8], strides = [1, 1]} : vector<8x96xf32> to vector<8x8xf32>
    %215 = vector.extract_strided_slice %210 {offsets = [0, 64], sizes = [8, 8], strides = [1, 1]} : vector<8x96xf32> to vector<8x8xf32>
    %216 = arith.truncf %213 : vector<8x8xf32> to vector<8x8xbf16>
    %217 = arith.truncf %214 : vector<8x8xf32> to vector<8x8xbf16>
    %cst_149 = arith.constant dense<0.000000e+00> : vector<8x8xf32>
    %218 = tpu.matmul %216, %217, %cst_149 {dimension_numbers = #tpu.dot_dimension_numbers<[1], [1], [0], [0], [0, 0, 1, 0], [], []>} : vector<8x8xbf16>, vector<8x8xbf16>, vector<8x8xf32> -> vector<8x8xf32>
    %cst_150 = arith.constant 0.353553385 : f32
    %219 = vector.broadcast %cst_150 : f32 to vector<8x8xf32>
    %220 = arith.mulf %218, %219 : vector<8x8xf32>
    %221 = vector.broadcast %202 : vector<1x8xf32> to vector<8x8xf32>
    %222 = arith.addf %220, %221 : vector<8x8xf32>
    %cst_151 = arith.constant dense<0xFF800000> : vector<8xf32>
    %223 = vector.multi_reduction <maximumf>, %222, %cst_151 [1] : vector<8x8xf32> to vector<8xf32>
    %224 = vector.shape_cast %223 : vector<8xf32> to vector<8x1xf32>
    %225 = vector.broadcast %224 : vector<8x1xf32> to vector<8x8xf32>
    %226 = arith.subf %222, %225 : vector<8x8xf32>
    %227 = math.exp %226 : vector<8x8xf32>
    %cst_152 = arith.constant dense<0.000000e+00> : vector<8xf32>
    %228 = vector.multi_reduction <add>, %227, %cst_152 [1] : vector<8x8xf32> to vector<8xf32>
    %229 = vector.shape_cast %228 : vector<8xf32> to vector<8x1xf32>
    %230 = tpu.reciprocal %229 {approx = true} : vector<8x1xf32> -> vector<8x1xf32>
    %231 = vector.broadcast %230 : vector<8x1xf32> to vector<8x8xf32>
    %232 = arith.mulf %227, %231 : vector<8x8xf32>
    %233 = arith.truncf %232 : vector<8x8xf32> to vector<8x8xbf16>
    %234 = arith.truncf %215 : vector<8x8xf32> to vector<8x8xbf16>
    %cst_153 = arith.constant dense<0.000000e+00> : vector<8x8xf32>
    %235 = tpu.matmul %233, %234, %cst_153 {dimension_numbers = #tpu.dot_dimension_numbers<[1], [0], [0], [1], [0, 0, 1, 1], [], []>} : vector<8x8xbf16>, vector<8x8xbf16>, vector<8x8xf32> -> vector<8x8xf32>
    %236 = arith.truncf %235 : vector<8x8xf32> to vector<8x8xbf16>
    %c0_154 = arith.constant 0 : index
    %c0_155 = arith.constant 0 : index
    %c0_156 = arith.constant 0 : index
    %c0_157 = arith.constant 0 : index
    %237 = vector.load %arg33[%c0_154, %c0_155, %c0_156, %c0_157] : memref<3x4x8x32xbf16, #tpu.memory_space<vmem>>, vector<1x1x8x32xbf16>
    %238 = vector.shape_cast %237 : vector<1x1x8x32xbf16> to vector<8x32xbf16>
    %cst_158 = arith.constant dense<0.000000e+00> : vector<8x32xf32>
    %239 = tpu.matmul %236, %238, %cst_158 {dimension_numbers = #tpu.dot_dimension_numbers<[1], [0], [0], [1], [0, 0, 1, 1], [], []>} : vector<8x8xbf16>, vector<8x32xbf16>, vector<8x32xf32> -> vector<8x32xf32>
    %240 = vector.broadcast %212 : vector<1x32xf32> to vector<8x32xf32>
    %241 = arith.addf %240, %239 : vector<8x32xf32>
    %242 = vector.extract_strided_slice %210 {offsets = [0, 8], sizes = [8, 8], strides = [1, 1]} : vector<8x96xf32> to vector<8x8xf32>
    %243 = vector.extract_strided_slice %210 {offsets = [0, 40], sizes = [8, 8], strides = [1, 1]} : vector<8x96xf32> to vector<8x8xf32>
    %244 = vector.extract_strided_slice %210 {offsets = [0, 72], sizes = [8, 8], strides = [1, 1]} : vector<8x96xf32> to vector<8x8xf32>
    %245 = arith.truncf %242 : vector<8x8xf32> to vector<8x8xbf16>
    %246 = arith.truncf %243 : vector<8x8xf32> to vector<8x8xbf16>
    %cst_159 = arith.constant dense<0.000000e+00> : vector<8x8xf32>
    %247 = tpu.matmul %245, %246, %cst_159 {dimension_numbers = #tpu.dot_dimension_numbers<[1], [1], [0], [0], [0, 0, 1, 0], [], []>} : vector<8x8xbf16>, vector<8x8xbf16>, vector<8x8xf32> -> vector<8x8xf32>
    %cst_160 = arith.constant 0.353553385 : f32
    %248 = vector.broadcast %cst_160 : f32 to vector<8x8xf32>
    %249 = arith.mulf %247, %248 : vector<8x8xf32>
    %250 = vector.broadcast %202 : vector<1x8xf32> to vector<8x8xf32>
    %251 = arith.addf %249, %250 : vector<8x8xf32>
    %cst_161 = arith.constant dense<0xFF800000> : vector<8xf32>
    %252 = vector.multi_reduction <maximumf>, %251, %cst_161 [1] : vector<8x8xf32> to vector<8xf32>
    %253 = vector.shape_cast %252 : vector<8xf32> to vector<8x1xf32>
    %254 = vector.broadcast %253 : vector<8x1xf32> to vector<8x8xf32>
    %255 = arith.subf %251, %254 : vector<8x8xf32>
    %256 = math.exp %255 : vector<8x8xf32>
    %cst_162 = arith.constant dense<0.000000e+00> : vector<8xf32>
    %257 = vector.multi_reduction <add>, %256, %cst_162 [1] : vector<8x8xf32> to vector<8xf32>
    %258 = vector.shape_cast %257 : vector<8xf32> to vector<8x1xf32>
    %259 = tpu.reciprocal %258 {approx = true} : vector<8x1xf32> -> vector<8x1xf32>
    %260 = vector.broadcast %259 : vector<8x1xf32> to vector<8x8xf32>
    %261 = arith.mulf %256, %260 : vector<8x8xf32>
    %262 = arith.truncf %261 : vector<8x8xf32> to vector<8x8xbf16>
    %263 = arith.truncf %244 : vector<8x8xf32> to vector<8x8xbf16>
    %cst_163 = arith.constant dense<0.000000e+00> : vector<8x8xf32>
    %264 = tpu.matmul %262, %263, %cst_163 {dimension_numbers = #tpu.dot_dimension_numbers<[1], [0], [0], [1], [0, 0, 1, 1], [], []>} : vector<8x8xbf16>, vector<8x8xbf16>, vector<8x8xf32> -> vector<8x8xf32>
    %265 = arith.truncf %264 : vector<8x8xf32> to vector<8x8xbf16>
    %c0_164 = arith.constant 0 : index
    %c1_165 = arith.constant 1 : index
    %c0_166 = arith.constant 0 : index
    %c0_167 = arith.constant 0 : index
    %266 = vector.load %arg33[%c0_164, %c1_165, %c0_166, %c0_167] : memref<3x4x8x32xbf16, #tpu.memory_space<vmem>>, vector<1x1x8x32xbf16>
    %267 = vector.shape_cast %266 : vector<1x1x8x32xbf16> to vector<8x32xbf16>
    %cst_168 = arith.constant dense<0.000000e+00> : vector<8x32xf32>
    %268 = tpu.matmul %265, %267, %cst_168 {dimension_numbers = #tpu.dot_dimension_numbers<[1], [0], [0], [1], [0, 0, 1, 1], [], []>} : vector<8x8xbf16>, vector<8x32xbf16>, vector<8x32xf32> -> vector<8x32xf32>
    %269 = arith.addf %241, %268 : vector<8x32xf32>
    %270 = vector.extract_strided_slice %210 {offsets = [0, 16], sizes = [8, 8], strides = [1, 1]} : vector<8x96xf32> to vector<8x8xf32>
    %271 = vector.extract_strided_slice %210 {offsets = [0, 48], sizes = [8, 8], strides = [1, 1]} : vector<8x96xf32> to vector<8x8xf32>
    %272 = vector.extract_strided_slice %210 {offsets = [0, 80], sizes = [8, 8], strides = [1, 1]} : vector<8x96xf32> to vector<8x8xf32>
    %273 = arith.truncf %270 : vector<8x8xf32> to vector<8x8xbf16>
    %274 = arith.truncf %271 : vector<8x8xf32> to vector<8x8xbf16>
    %cst_169 = arith.constant dense<0.000000e+00> : vector<8x8xf32>
    %275 = tpu.matmul %273, %274, %cst_169 {dimension_numbers = #tpu.dot_dimension_numbers<[1], [1], [0], [0], [0, 0, 1, 0], [], []>} : vector<8x8xbf16>, vector<8x8xbf16>, vector<8x8xf32> -> vector<8x8xf32>
    %cst_170 = arith.constant 0.353553385 : f32
    %276 = vector.broadcast %cst_170 : f32 to vector<8x8xf32>
    %277 = arith.mulf %275, %276 : vector<8x8xf32>
    %278 = vector.broadcast %202 : vector<1x8xf32> to vector<8x8xf32>
    %279 = arith.addf %277, %278 : vector<8x8xf32>
    %cst_171 = arith.constant dense<0xFF800000> : vector<8xf32>
    %280 = vector.multi_reduction <maximumf>, %279, %cst_171 [1] : vector<8x8xf32> to vector<8xf32>
    %281 = vector.shape_cast %280 : vector<8xf32> to vector<8x1xf32>
    %282 = vector.broadcast %281 : vector<8x1xf32> to vector<8x8xf32>
    %283 = arith.subf %279, %282 : vector<8x8xf32>
    %284 = math.exp %283 : vector<8x8xf32>
    %cst_172 = arith.constant dense<0.000000e+00> : vector<8xf32>
    %285 = vector.multi_reduction <add>, %284, %cst_172 [1] : vector<8x8xf32> to vector<8xf32>
    %286 = vector.shape_cast %285 : vector<8xf32> to vector<8x1xf32>
    %287 = tpu.reciprocal %286 {approx = true} : vector<8x1xf32> -> vector<8x1xf32>
    %288 = vector.broadcast %287 : vector<8x1xf32> to vector<8x8xf32>
    %289 = arith.mulf %284, %288 : vector<8x8xf32>
    %290 = arith.truncf %289 : vector<8x8xf32> to vector<8x8xbf16>
    %291 = arith.truncf %272 : vector<8x8xf32> to vector<8x8xbf16>
    %cst_173 = arith.constant dense<0.000000e+00> : vector<8x8xf32>
    %292 = tpu.matmul %290, %291, %cst_173 {dimension_numbers = #tpu.dot_dimension_numbers<[1], [0], [0], [1], [0, 0, 1, 1], [], []>} : vector<8x8xbf16>, vector<8x8xbf16>, vector<8x8xf32> -> vector<8x8xf32>
    %293 = arith.truncf %292 : vector<8x8xf32> to vector<8x8xbf16>
    %c0_174 = arith.constant 0 : index
    %c2_175 = arith.constant 2 : index
    %c0_176 = arith.constant 0 : index
    %c0_177 = arith.constant 0 : index
    %294 = vector.load %arg33[%c0_174, %c2_175, %c0_176, %c0_177] : memref<3x4x8x32xbf16, #tpu.memory_space<vmem>>, vector<1x1x8x32xbf16>
    %295 = vector.shape_cast %294 : vector<1x1x8x32xbf16> to vector<8x32xbf16>
    %cst_178 = arith.constant dense<0.000000e+00> : vector<8x32xf32>
    %296 = tpu.matmul %293, %295, %cst_178 {dimension_numbers = #tpu.dot_dimension_numbers<[1], [0], [0], [1], [0, 0, 1, 1], [], []>} : vector<8x8xbf16>, vector<8x32xbf16>, vector<8x32xf32> -> vector<8x32xf32>
    %297 = arith.addf %269, %296 : vector<8x32xf32>
    %298 = vector.extract_strided_slice %210 {offsets = [0, 24], sizes = [8, 8], strides = [1, 1]} : vector<8x96xf32> to vector<8x8xf32>
    %299 = vector.extract_strided_slice %210 {offsets = [0, 56], sizes = [8, 8], strides = [1, 1]} : vector<8x96xf32> to vector<8x8xf32>
    %300 = vector.extract_strided_slice %210 {offsets = [0, 88], sizes = [8, 8], strides = [1, 1]} : vector<8x96xf32> to vector<8x8xf32>
    %301 = arith.truncf %298 : vector<8x8xf32> to vector<8x8xbf16>
    %302 = arith.truncf %299 : vector<8x8xf32> to vector<8x8xbf16>
    %cst_179 = arith.constant dense<0.000000e+00> : vector<8x8xf32>
    %303 = tpu.matmul %301, %302, %cst_179 {dimension_numbers = #tpu.dot_dimension_numbers<[1], [1], [0], [0], [0, 0, 1, 0], [], []>} : vector<8x8xbf16>, vector<8x8xbf16>, vector<8x8xf32> -> vector<8x8xf32>
    %cst_180 = arith.constant 0.353553385 : f32
    %304 = vector.broadcast %cst_180 : f32 to vector<8x8xf32>
    %305 = arith.mulf %303, %304 : vector<8x8xf32>
    %306 = vector.broadcast %202 : vector<1x8xf32> to vector<8x8xf32>
    %307 = arith.addf %305, %306 : vector<8x8xf32>
    %cst_181 = arith.constant dense<0xFF800000> : vector<8xf32>
    %308 = vector.multi_reduction <maximumf>, %307, %cst_181 [1] : vector<8x8xf32> to vector<8xf32>
    %309 = vector.shape_cast %308 : vector<8xf32> to vector<8x1xf32>
    %310 = vector.broadcast %309 : vector<8x1xf32> to vector<8x8xf32>
    %311 = arith.subf %307, %310 : vector<8x8xf32>
    %312 = math.exp %311 : vector<8x8xf32>
    %cst_182 = arith.constant dense<0.000000e+00> : vector<8xf32>
    %313 = vector.multi_reduction <add>, %312, %cst_182 [1] : vector<8x8xf32> to vector<8xf32>
    %314 = vector.shape_cast %313 : vector<8xf32> to vector<8x1xf32>
    %315 = tpu.reciprocal %314 {approx = true} : vector<8x1xf32> -> vector<8x1xf32>
    %316 = vector.broadcast %315 : vector<8x1xf32> to vector<8x8xf32>
    %317 = arith.mulf %312, %316 : vector<8x8xf32>
    %318 = arith.truncf %317 : vector<8x8xf32> to vector<8x8xbf16>
    %319 = arith.truncf %300 : vector<8x8xf32> to vector<8x8xbf16>
    %cst_183 = arith.constant dense<0.000000e+00> : vector<8x8xf32>
    %320 = tpu.matmul %318, %319, %cst_183 {dimension_numbers = #tpu.dot_dimension_numbers<[1], [0], [0], [1], [0, 0, 1, 1], [], []>} : vector<8x8xbf16>, vector<8x8xbf16>, vector<8x8xf32> -> vector<8x8xf32>
    %321 = arith.truncf %320 : vector<8x8xf32> to vector<8x8xbf16>
    %c0_184 = arith.constant 0 : index
    %c3_185 = arith.constant 3 : index
    %c0_186 = arith.constant 0 : index
    %c0_187 = arith.constant 0 : index
    %322 = vector.load %arg33[%c0_184, %c3_185, %c0_186, %c0_187] : memref<3x4x8x32xbf16, #tpu.memory_space<vmem>>, vector<1x1x8x32xbf16>
    %323 = vector.shape_cast %322 : vector<1x1x8x32xbf16> to vector<8x32xbf16>
    %cst_188 = arith.constant dense<0.000000e+00> : vector<8x32xf32>
    %324 = tpu.matmul %321, %323, %cst_188 {dimension_numbers = #tpu.dot_dimension_numbers<[1], [0], [0], [1], [0, 0, 1, 1], [], []>} : vector<8x8xbf16>, vector<8x32xbf16>, vector<8x32xf32> -> vector<8x32xf32>
    %325 = arith.addf %297, %324 : vector<8x32xf32>
    %326 = arith.addf %195, %325 : vector<8x32xf32>
    %c0_189 = arith.constant 0 : index
    %c0_190 = arith.constant 0 : index
    %c0_191 = arith.constant 0 : index
    %327 = vector.load %arg35[%c0_189, %c0_190, %c0_191] : memref<3x1x32xf32, #tpu.memory_space<vmem>>, vector<1x1x32xf32>
    %328 = vector.shape_cast %327 : vector<1x1x32xf32> to vector<1x32xf32>
    %c0_192 = arith.constant 0 : index
    %c0_193 = arith.constant 0 : index
    %c0_194 = arith.constant 0 : index
    %329 = vector.load %arg36[%c0_192, %c0_193, %c0_194] : memref<3x1x32xf32, #tpu.memory_space<vmem>>, vector<1x1x32xf32>
    %330 = vector.shape_cast %329 : vector<1x1x32xf32> to vector<1x32xf32>
    %cst_195 = arith.constant dense<0.000000e+00> : vector<8xf32>
    %331 = vector.multi_reduction <add>, %326, %cst_195 [1] : vector<8x32xf32> to vector<8xf32>
    %332 = vector.shape_cast %331 : vector<8xf32> to vector<8x1xf32>
    %cst_196 = arith.constant 3.200000e+01 : f32
    %333 = vector.broadcast %cst_196 : f32 to vector<8x1xf32>
    %334 = arith.divf %332, %333 : vector<8x1xf32>
    %335 = vector.broadcast %334 : vector<8x1xf32> to vector<8x32xf32>
    %336 = arith.subf %326, %335 : vector<8x32xf32>
    %337 = arith.mulf %336, %336 : vector<8x32xf32>
    %cst_197 = arith.constant dense<0.000000e+00> : vector<8xf32>
    %338 = vector.multi_reduction <add>, %337, %cst_197 [1] : vector<8x32xf32> to vector<8xf32>
    %339 = vector.shape_cast %338 : vector<8xf32> to vector<8x1xf32>
    %cst_198 = arith.constant 3.200000e+01 : f32
    %340 = vector.broadcast %cst_198 : f32 to vector<8x1xf32>
    %341 = arith.divf %339, %340 : vector<8x1xf32>
    %cst_199 = arith.constant 9.99999974E-6 : f32
    %342 = vector.broadcast %cst_199 : f32 to vector<8x1xf32>
    %343 = arith.addf %341, %342 : vector<8x1xf32>
    %344 = math.rsqrt %343 : vector<8x1xf32>
    %345 = vector.broadcast %344 : vector<8x1xf32> to vector<8x32xf32>
    %346 = arith.mulf %336, %345 : vector<8x32xf32>
    %347 = vector.broadcast %328 : vector<1x32xf32> to vector<8x32xf32>
    %348 = arith.mulf %346, %347 : vector<8x32xf32>
    %349 = vector.broadcast %330 : vector<1x32xf32> to vector<8x32xf32>
    %350 = arith.addf %348, %349 : vector<8x32xf32>
    %c0_200 = arith.constant 0 : index
    %c0_201 = arith.constant 0 : index
    %c0_202 = arith.constant 0 : index
    %351 = vector.load %arg37[%c0_200, %c0_201, %c0_202] : memref<3x32x64xbf16, #tpu.memory_space<vmem>>, vector<1x32x64xbf16>
    %352 = vector.shape_cast %351 : vector<1x32x64xbf16> to vector<32x64xbf16>
    %353 = arith.truncf %350 : vector<8x32xf32> to vector<8x32xbf16>
    %cst_203 = arith.constant dense<0.000000e+00> : vector<8x64xf32>
    %354 = tpu.matmul %353, %352, %cst_203 {dimension_numbers = #tpu.dot_dimension_numbers<[1], [0], [0], [1], [0, 0, 1, 1], [], []>} : vector<8x32xbf16>, vector<32x64xbf16>, vector<8x64xf32> -> vector<8x64xf32>
    %c0_204 = arith.constant 0 : index
    %c0_205 = arith.constant 0 : index
    %c0_206 = arith.constant 0 : index
    %355 = vector.load %arg38[%c0_204, %c0_205, %c0_206] : memref<3x1x64xf32, #tpu.memory_space<vmem>>, vector<1x1x64xf32>
    %356 = vector.shape_cast %355 : vector<1x1x64xf32> to vector<1x64xf32>
    %357 = vector.broadcast %356 : vector<1x64xf32> to vector<8x64xf32>
    %358 = arith.addf %354, %357 : vector<8x64xf32>
    %cst_207 = arith.constant 0.000000e+00 : f32
    %359 = vector.broadcast %cst_207 : f32 to vector<8x64xf32>
    %360 = arith.maximumf %358, %359 : vector<8x64xf32>
    %c0_208 = arith.constant 0 : index
    %c0_209 = arith.constant 0 : index
    %c0_210 = arith.constant 0 : index
    %361 = vector.load %arg39[%c0_208, %c0_209, %c0_210] : memref<3x64x32xbf16, #tpu.memory_space<vmem>>, vector<1x64x32xbf16>
    %362 = vector.shape_cast %361 : vector<1x64x32xbf16> to vector<64x32xbf16>
    %363 = arith.truncf %360 : vector<8x64xf32> to vector<8x64xbf16>
    %cst_211 = arith.constant dense<0.000000e+00> : vector<8x32xf32>
    %364 = tpu.matmul %363, %362, %cst_211 {dimension_numbers = #tpu.dot_dimension_numbers<[1], [0], [0], [1], [0, 0, 1, 1], [], []>} : vector<8x64xbf16>, vector<64x32xbf16>, vector<8x32xf32> -> vector<8x32xf32>
    %c0_212 = arith.constant 0 : index
    %c0_213 = arith.constant 0 : index
    %c0_214 = arith.constant 0 : index
    %365 = vector.load %arg40[%c0_212, %c0_213, %c0_214] : memref<3x1x32xf32, #tpu.memory_space<vmem>>, vector<1x1x32xf32>
    %366 = vector.shape_cast %365 : vector<1x1x32xf32> to vector<1x32xf32>
    %367 = vector.broadcast %366 : vector<1x32xf32> to vector<8x32xf32>
    %368 = arith.addf %364, %367 : vector<8x32xf32>
    %369 = arith.addf %350, %368 : vector<8x32xf32>
    %c0_215 = arith.constant 0 : index
    %c0_216 = arith.constant 0 : index
    %c0_217 = arith.constant 0 : index
    %370 = vector.load %arg41[%c0_215, %c0_216, %c0_217] : memref<3x1x32xf32, #tpu.memory_space<vmem>>, vector<1x1x32xf32>
    %371 = vector.shape_cast %370 : vector<1x1x32xf32> to vector<1x32xf32>
    %c0_218 = arith.constant 0 : index
    %c0_219 = arith.constant 0 : index
    %c0_220 = arith.constant 0 : index
    %372 = vector.load %arg42[%c0_218, %c0_219, %c0_220] : memref<3x1x32xf32, #tpu.memory_space<vmem>>, vector<1x1x32xf32>
    %373 = vector.shape_cast %372 : vector<1x1x32xf32> to vector<1x32xf32>
    %cst_221 = arith.constant dense<0.000000e+00> : vector<8xf32>
    %374 = vector.multi_reduction <add>, %369, %cst_221 [1] : vector<8x32xf32> to vector<8xf32>
    %375 = vector.shape_cast %374 : vector<8xf32> to vector<8x1xf32>
    %cst_222 = arith.constant 3.200000e+01 : f32
    %376 = vector.broadcast %cst_222 : f32 to vector<8x1xf32>
    %377 = arith.divf %375, %376 : vector<8x1xf32>
    %378 = vector.broadcast %377 : vector<8x1xf32> to vector<8x32xf32>
    %379 = arith.subf %369, %378 : vector<8x32xf32>
    %380 = arith.mulf %379, %379 : vector<8x32xf32>
    %cst_223 = arith.constant dense<0.000000e+00> : vector<8xf32>
    %381 = vector.multi_reduction <add>, %380, %cst_223 [1] : vector<8x32xf32> to vector<8xf32>
    %382 = vector.shape_cast %381 : vector<8xf32> to vector<8x1xf32>
    %cst_224 = arith.constant 3.200000e+01 : f32
    %383 = vector.broadcast %cst_224 : f32 to vector<8x1xf32>
    %384 = arith.divf %382, %383 : vector<8x1xf32>
    %cst_225 = arith.constant 9.99999974E-6 : f32
    %385 = vector.broadcast %cst_225 : f32 to vector<8x1xf32>
    %386 = arith.addf %384, %385 : vector<8x1xf32>
    %387 = math.rsqrt %386 : vector<8x1xf32>
    %388 = vector.broadcast %387 : vector<8x1xf32> to vector<8x32xf32>
    %389 = arith.mulf %379, %388 : vector<8x32xf32>
    %390 = vector.broadcast %371 : vector<1x32xf32> to vector<8x32xf32>
    %391 = arith.mulf %389, %390 : vector<8x32xf32>
    %392 = vector.broadcast %373 : vector<1x32xf32> to vector<8x32xf32>
    %393 = arith.addf %391, %392 : vector<8x32xf32>
    %c1_226 = arith.constant 1 : index
    %c0_227 = arith.constant 0 : index
    %c0_228 = arith.constant 0 : index
    %394 = vector.load %arg31[%c1_226, %c0_227, %c0_228] : memref<3x32x96xbf16, #tpu.memory_space<vmem>>, vector<1x32x96xbf16>
    %395 = vector.shape_cast %394 : vector<1x32x96xbf16> to vector<32x96xbf16>
    %396 = arith.truncf %393 : vector<8x32xf32> to vector<8x32xbf16>
    %cst_229 = arith.constant dense<0.000000e+00> : vector<8x96xf32>
    %397 = tpu.matmul %396, %395, %cst_229 {dimension_numbers = #tpu.dot_dimension_numbers<[1], [0], [0], [1], [0, 0, 1, 1], [], []>} : vector<8x32xbf16>, vector<32x96xbf16>, vector<8x96xf32> -> vector<8x96xf32>
    %c1_230 = arith.constant 1 : index
    %c0_231 = arith.constant 0 : index
    %c0_232 = arith.constant 0 : index
    %398 = vector.load %arg32[%c1_230, %c0_231, %c0_232] : memref<3x1x96xf32, #tpu.memory_space<vmem>>, vector<1x1x96xf32>
    %399 = vector.shape_cast %398 : vector<1x1x96xf32> to vector<1x96xf32>
    %400 = vector.broadcast %399 : vector<1x96xf32> to vector<8x96xf32>
    %401 = arith.addf %397, %400 : vector<8x96xf32>
    %c1_233 = arith.constant 1 : index
    %c0_234 = arith.constant 0 : index
    %c0_235 = arith.constant 0 : index
    %402 = vector.load %arg34[%c1_233, %c0_234, %c0_235] : memref<3x1x32xf32, #tpu.memory_space<vmem>>, vector<1x1x32xf32>
    %403 = vector.shape_cast %402 : vector<1x1x32xf32> to vector<1x32xf32>
    %404 = vector.extract_strided_slice %401 {offsets = [0, 0], sizes = [8, 8], strides = [1, 1]} : vector<8x96xf32> to vector<8x8xf32>
    %405 = vector.extract_strided_slice %401 {offsets = [0, 32], sizes = [8, 8], strides = [1, 1]} : vector<8x96xf32> to vector<8x8xf32>
    %406 = vector.extract_strided_slice %401 {offsets = [0, 64], sizes = [8, 8], strides = [1, 1]} : vector<8x96xf32> to vector<8x8xf32>
    %407 = arith.truncf %404 : vector<8x8xf32> to vector<8x8xbf16>
    %408 = arith.truncf %405 : vector<8x8xf32> to vector<8x8xbf16>
    %cst_236 = arith.constant dense<0.000000e+00> : vector<8x8xf32>
    %409 = tpu.matmul %407, %408, %cst_236 {dimension_numbers = #tpu.dot_dimension_numbers<[1], [1], [0], [0], [0, 0, 1, 0], [], []>} : vector<8x8xbf16>, vector<8x8xbf16>, vector<8x8xf32> -> vector<8x8xf32>
    %cst_237 = arith.constant 0.353553385 : f32
    %410 = vector.broadcast %cst_237 : f32 to vector<8x8xf32>
    %411 = arith.mulf %409, %410 : vector<8x8xf32>
    %412 = vector.broadcast %202 : vector<1x8xf32> to vector<8x8xf32>
    %413 = arith.addf %411, %412 : vector<8x8xf32>
    %cst_238 = arith.constant dense<0xFF800000> : vector<8xf32>
    %414 = vector.multi_reduction <maximumf>, %413, %cst_238 [1] : vector<8x8xf32> to vector<8xf32>
    %415 = vector.shape_cast %414 : vector<8xf32> to vector<8x1xf32>
    %416 = vector.broadcast %415 : vector<8x1xf32> to vector<8x8xf32>
    %417 = arith.subf %413, %416 : vector<8x8xf32>
    %418 = math.exp %417 : vector<8x8xf32>
    %cst_239 = arith.constant dense<0.000000e+00> : vector<8xf32>
    %419 = vector.multi_reduction <add>, %418, %cst_239 [1] : vector<8x8xf32> to vector<8xf32>
    %420 = vector.shape_cast %419 : vector<8xf32> to vector<8x1xf32>
    %421 = tpu.reciprocal %420 {approx = true} : vector<8x1xf32> -> vector<8x1xf32>
    %422 = vector.broadcast %421 : vector<8x1xf32> to vector<8x8xf32>
    %423 = arith.mulf %418, %422 : vector<8x8xf32>
    %424 = arith.truncf %423 : vector<8x8xf32> to vector<8x8xbf16>
    %425 = arith.truncf %406 : vector<8x8xf32> to vector<8x8xbf16>
    %cst_240 = arith.constant dense<0.000000e+00> : vector<8x8xf32>
    %426 = tpu.matmul %424, %425, %cst_240 {dimension_numbers = #tpu.dot_dimension_numbers<[1], [0], [0], [1], [0, 0, 1, 1], [], []>} : vector<8x8xbf16>, vector<8x8xbf16>, vector<8x8xf32> -> vector<8x8xf32>
    %427 = arith.truncf %426 : vector<8x8xf32> to vector<8x8xbf16>
    %c1_241 = arith.constant 1 : index
    %c0_242 = arith.constant 0 : index
    %c0_243 = arith.constant 0 : index
    %c0_244 = arith.constant 0 : index
    %428 = vector.load %arg33[%c1_241, %c0_242, %c0_243, %c0_244] : memref<3x4x8x32xbf16, #tpu.memory_space<vmem>>, vector<1x1x8x32xbf16>
    %429 = vector.shape_cast %428 : vector<1x1x8x32xbf16> to vector<8x32xbf16>
    %cst_245 = arith.constant dense<0.000000e+00> : vector<8x32xf32>
    %430 = tpu.matmul %427, %429, %cst_245 {dimension_numbers = #tpu.dot_dimension_numbers<[1], [0], [0], [1], [0, 0, 1, 1], [], []>} : vector<8x8xbf16>, vector<8x32xbf16>, vector<8x32xf32> -> vector<8x32xf32>
    %431 = vector.broadcast %403 : vector<1x32xf32> to vector<8x32xf32>
    %432 = arith.addf %431, %430 : vector<8x32xf32>
    %433 = vector.extract_strided_slice %401 {offsets = [0, 8], sizes = [8, 8], strides = [1, 1]} : vector<8x96xf32> to vector<8x8xf32>
    %434 = vector.extract_strided_slice %401 {offsets = [0, 40], sizes = [8, 8], strides = [1, 1]} : vector<8x96xf32> to vector<8x8xf32>
    %435 = vector.extract_strided_slice %401 {offsets = [0, 72], sizes = [8, 8], strides = [1, 1]} : vector<8x96xf32> to vector<8x8xf32>
    %436 = arith.truncf %433 : vector<8x8xf32> to vector<8x8xbf16>
    %437 = arith.truncf %434 : vector<8x8xf32> to vector<8x8xbf16>
    %cst_246 = arith.constant dense<0.000000e+00> : vector<8x8xf32>
    %438 = tpu.matmul %436, %437, %cst_246 {dimension_numbers = #tpu.dot_dimension_numbers<[1], [1], [0], [0], [0, 0, 1, 0], [], []>} : vector<8x8xbf16>, vector<8x8xbf16>, vector<8x8xf32> -> vector<8x8xf32>
    %cst_247 = arith.constant 0.353553385 : f32
    %439 = vector.broadcast %cst_247 : f32 to vector<8x8xf32>
    %440 = arith.mulf %438, %439 : vector<8x8xf32>
    %441 = vector.broadcast %202 : vector<1x8xf32> to vector<8x8xf32>
    %442 = arith.addf %440, %441 : vector<8x8xf32>
    %cst_248 = arith.constant dense<0xFF800000> : vector<8xf32>
    %443 = vector.multi_reduction <maximumf>, %442, %cst_248 [1] : vector<8x8xf32> to vector<8xf32>
    %444 = vector.shape_cast %443 : vector<8xf32> to vector<8x1xf32>
    %445 = vector.broadcast %444 : vector<8x1xf32> to vector<8x8xf32>
    %446 = arith.subf %442, %445 : vector<8x8xf32>
    %447 = math.exp %446 : vector<8x8xf32>
    %cst_249 = arith.constant dense<0.000000e+00> : vector<8xf32>
    %448 = vector.multi_reduction <add>, %447, %cst_249 [1] : vector<8x8xf32> to vector<8xf32>
    %449 = vector.shape_cast %448 : vector<8xf32> to vector<8x1xf32>
    %450 = tpu.reciprocal %449 {approx = true} : vector<8x1xf32> -> vector<8x1xf32>
    %451 = vector.broadcast %450 : vector<8x1xf32> to vector<8x8xf32>
    %452 = arith.mulf %447, %451 : vector<8x8xf32>
    %453 = arith.truncf %452 : vector<8x8xf32> to vector<8x8xbf16>
    %454 = arith.truncf %435 : vector<8x8xf32> to vector<8x8xbf16>
    %cst_250 = arith.constant dense<0.000000e+00> : vector<8x8xf32>
    %455 = tpu.matmul %453, %454, %cst_250 {dimension_numbers = #tpu.dot_dimension_numbers<[1], [0], [0], [1], [0, 0, 1, 1], [], []>} : vector<8x8xbf16>, vector<8x8xbf16>, vector<8x8xf32> -> vector<8x8xf32>
    %456 = arith.truncf %455 : vector<8x8xf32> to vector<8x8xbf16>
    %c1_251 = arith.constant 1 : index
    %c1_252 = arith.constant 1 : index
    %c0_253 = arith.constant 0 : index
    %c0_254 = arith.constant 0 : index
    %457 = vector.load %arg33[%c1_251, %c1_252, %c0_253, %c0_254] : memref<3x4x8x32xbf16, #tpu.memory_space<vmem>>, vector<1x1x8x32xbf16>
    %458 = vector.shape_cast %457 : vector<1x1x8x32xbf16> to vector<8x32xbf16>
    %cst_255 = arith.constant dense<0.000000e+00> : vector<8x32xf32>
    %459 = tpu.matmul %456, %458, %cst_255 {dimension_numbers = #tpu.dot_dimension_numbers<[1], [0], [0], [1], [0, 0, 1, 1], [], []>} : vector<8x8xbf16>, vector<8x32xbf16>, vector<8x32xf32> -> vector<8x32xf32>
    %460 = arith.addf %432, %459 : vector<8x32xf32>
    %461 = vector.extract_strided_slice %401 {offsets = [0, 16], sizes = [8, 8], strides = [1, 1]} : vector<8x96xf32> to vector<8x8xf32>
    %462 = vector.extract_strided_slice %401 {offsets = [0, 48], sizes = [8, 8], strides = [1, 1]} : vector<8x96xf32> to vector<8x8xf32>
    %463 = vector.extract_strided_slice %401 {offsets = [0, 80], sizes = [8, 8], strides = [1, 1]} : vector<8x96xf32> to vector<8x8xf32>
    %464 = arith.truncf %461 : vector<8x8xf32> to vector<8x8xbf16>
    %465 = arith.truncf %462 : vector<8x8xf32> to vector<8x8xbf16>
    %cst_256 = arith.constant dense<0.000000e+00> : vector<8x8xf32>
    %466 = tpu.matmul %464, %465, %cst_256 {dimension_numbers = #tpu.dot_dimension_numbers<[1], [1], [0], [0], [0, 0, 1, 0], [], []>} : vector<8x8xbf16>, vector<8x8xbf16>, vector<8x8xf32> -> vector<8x8xf32>
    %cst_257 = arith.constant 0.353553385 : f32
    %467 = vector.broadcast %cst_257 : f32 to vector<8x8xf32>
    %468 = arith.mulf %466, %467 : vector<8x8xf32>
    %469 = vector.broadcast %202 : vector<1x8xf32> to vector<8x8xf32>
    %470 = arith.addf %468, %469 : vector<8x8xf32>
    %cst_258 = arith.constant dense<0xFF800000> : vector<8xf32>
    %471 = vector.multi_reduction <maximumf>, %470, %cst_258 [1] : vector<8x8xf32> to vector<8xf32>
    %472 = vector.shape_cast %471 : vector<8xf32> to vector<8x1xf32>
    %473 = vector.broadcast %472 : vector<8x1xf32> to vector<8x8xf32>
    %474 = arith.subf %470, %473 : vector<8x8xf32>
    %475 = math.exp %474 : vector<8x8xf32>
    %cst_259 = arith.constant dense<0.000000e+00> : vector<8xf32>
    %476 = vector.multi_reduction <add>, %475, %cst_259 [1] : vector<8x8xf32> to vector<8xf32>
    %477 = vector.shape_cast %476 : vector<8xf32> to vector<8x1xf32>
    %478 = tpu.reciprocal %477 {approx = true} : vector<8x1xf32> -> vector<8x1xf32>
    %479 = vector.broadcast %478 : vector<8x1xf32> to vector<8x8xf32>
    %480 = arith.mulf %475, %479 : vector<8x8xf32>
    %481 = arith.truncf %480 : vector<8x8xf32> to vector<8x8xbf16>
    %482 = arith.truncf %463 : vector<8x8xf32> to vector<8x8xbf16>
    %cst_260 = arith.constant dense<0.000000e+00> : vector<8x8xf32>
    %483 = tpu.matmul %481, %482, %cst_260 {dimension_numbers = #tpu.dot_dimension_numbers<[1], [0], [0], [1], [0, 0, 1, 1], [], []>} : vector<8x8xbf16>, vector<8x8xbf16>, vector<8x8xf32> -> vector<8x8xf32>
    %484 = arith.truncf %483 : vector<8x8xf32> to vector<8x8xbf16>
    %c1_261 = arith.constant 1 : index
    %c2_262 = arith.constant 2 : index
    %c0_263 = arith.constant 0 : index
    %c0_264 = arith.constant 0 : index
    %485 = vector.load %arg33[%c1_261, %c2_262, %c0_263, %c0_264] : memref<3x4x8x32xbf16, #tpu.memory_space<vmem>>, vector<1x1x8x32xbf16>
    %486 = vector.shape_cast %485 : vector<1x1x8x32xbf16> to vector<8x32xbf16>
    %cst_265 = arith.constant dense<0.000000e+00> : vector<8x32xf32>
    %487 = tpu.matmul %484, %486, %cst_265 {dimension_numbers = #tpu.dot_dimension_numbers<[1], [0], [0], [1], [0, 0, 1, 1], [], []>} : vector<8x8xbf16>, vector<8x32xbf16>, vector<8x32xf32> -> vector<8x32xf32>
    %488 = arith.addf %460, %487 : vector<8x32xf32>
    %489 = vector.extract_strided_slice %401 {offsets = [0, 24], sizes = [8, 8], strides = [1, 1]} : vector<8x96xf32> to vector<8x8xf32>
    %490 = vector.extract_strided_slice %401 {offsets = [0, 56], sizes = [8, 8], strides = [1, 1]} : vector<8x96xf32> to vector<8x8xf32>
    %491 = vector.extract_strided_slice %401 {offsets = [0, 88], sizes = [8, 8], strides = [1, 1]} : vector<8x96xf32> to vector<8x8xf32>
    %492 = arith.truncf %489 : vector<8x8xf32> to vector<8x8xbf16>
    %493 = arith.truncf %490 : vector<8x8xf32> to vector<8x8xbf16>
    %cst_266 = arith.constant dense<0.000000e+00> : vector<8x8xf32>
    %494 = tpu.matmul %492, %493, %cst_266 {dimension_numbers = #tpu.dot_dimension_numbers<[1], [1], [0], [0], [0, 0, 1, 0], [], []>} : vector<8x8xbf16>, vector<8x8xbf16>, vector<8x8xf32> -> vector<8x8xf32>
    %cst_267 = arith.constant 0.353553385 : f32
    %495 = vector.broadcast %cst_267 : f32 to vector<8x8xf32>
    %496 = arith.mulf %494, %495 : vector<8x8xf32>
    %497 = vector.broadcast %202 : vector<1x8xf32> to vector<8x8xf32>
    %498 = arith.addf %496, %497 : vector<8x8xf32>
    %cst_268 = arith.constant dense<0xFF800000> : vector<8xf32>
    %499 = vector.multi_reduction <maximumf>, %498, %cst_268 [1] : vector<8x8xf32> to vector<8xf32>
    %500 = vector.shape_cast %499 : vector<8xf32> to vector<8x1xf32>
    %501 = vector.broadcast %500 : vector<8x1xf32> to vector<8x8xf32>
    %502 = arith.subf %498, %501 : vector<8x8xf32>
    %503 = math.exp %502 : vector<8x8xf32>
    %cst_269 = arith.constant dense<0.000000e+00> : vector<8xf32>
    %504 = vector.multi_reduction <add>, %503, %cst_269 [1] : vector<8x8xf32> to vector<8xf32>
    %505 = vector.shape_cast %504 : vector<8xf32> to vector<8x1xf32>
    %506 = tpu.reciprocal %505 {approx = true} : vector<8x1xf32> -> vector<8x1xf32>
    %507 = vector.broadcast %506 : vector<8x1xf32> to vector<8x8xf32>
    %508 = arith.mulf %503, %507 : vector<8x8xf32>
    %509 = arith.truncf %508 : vector<8x8xf32> to vector<8x8xbf16>
    %510 = arith.truncf %491 : vector<8x8xf32> to vector<8x8xbf16>
    %cst_270 = arith.constant dense<0.000000e+00> : vector<8x8xf32>
    %511 = tpu.matmul %509, %510, %cst_270 {dimension_numbers = #tpu.dot_dimension_numbers<[1], [0], [0], [1], [0, 0, 1, 1], [], []>} : vector<8x8xbf16>, vector<8x8xbf16>, vector<8x8xf32> -> vector<8x8xf32>
    %512 = arith.truncf %511 : vector<8x8xf32> to vector<8x8xbf16>
    %c1_271 = arith.constant 1 : index
    %c3_272 = arith.constant 3 : index
    %c0_273 = arith.constant 0 : index
    %c0_274 = arith.constant 0 : index
    %513 = vector.load %arg33[%c1_271, %c3_272, %c0_273, %c0_274] : memref<3x4x8x32xbf16, #tpu.memory_space<vmem>>, vector<1x1x8x32xbf16>
    %514 = vector.shape_cast %513 : vector<1x1x8x32xbf16> to vector<8x32xbf16>
    %cst_275 = arith.constant dense<0.000000e+00> : vector<8x32xf32>
    %515 = tpu.matmul %512, %514, %cst_275 {dimension_numbers = #tpu.dot_dimension_numbers<[1], [0], [0], [1], [0, 0, 1, 1], [], []>} : vector<8x8xbf16>, vector<8x32xbf16>, vector<8x32xf32> -> vector<8x32xf32>
    %516 = arith.addf %488, %515 : vector<8x32xf32>
    %517 = arith.addf %393, %516 : vector<8x32xf32>
    %c1_276 = arith.constant 1 : index
    %c0_277 = arith.constant 0 : index
    %c0_278 = arith.constant 0 : index
    %518 = vector.load %arg35[%c1_276, %c0_277, %c0_278] : memref<3x1x32xf32, #tpu.memory_space<vmem>>, vector<1x1x32xf32>
    %519 = vector.shape_cast %518 : vector<1x1x32xf32> to vector<1x32xf32>
    %c1_279 = arith.constant 1 : index
    %c0_280 = arith.constant 0 : index
    %c0_281 = arith.constant 0 : index
    %520 = vector.load %arg36[%c1_279, %c0_280, %c0_281] : memref<3x1x32xf32, #tpu.memory_space<vmem>>, vector<1x1x32xf32>
    %521 = vector.shape_cast %520 : vector<1x1x32xf32> to vector<1x32xf32>
    %cst_282 = arith.constant dense<0.000000e+00> : vector<8xf32>
    %522 = vector.multi_reduction <add>, %517, %cst_282 [1] : vector<8x32xf32> to vector<8xf32>
    %523 = vector.shape_cast %522 : vector<8xf32> to vector<8x1xf32>
    %cst_283 = arith.constant 3.200000e+01 : f32
    %524 = vector.broadcast %cst_283 : f32 to vector<8x1xf32>
    %525 = arith.divf %523, %524 : vector<8x1xf32>
    %526 = vector.broadcast %525 : vector<8x1xf32> to vector<8x32xf32>
    %527 = arith.subf %517, %526 : vector<8x32xf32>
    %528 = arith.mulf %527, %527 : vector<8x32xf32>
    %cst_284 = arith.constant dense<0.000000e+00> : vector<8xf32>
    %529 = vector.multi_reduction <add>, %528, %cst_284 [1] : vector<8x32xf32> to vector<8xf32>
    %530 = vector.shape_cast %529 : vector<8xf32> to vector<8x1xf32>
    %cst_285 = arith.constant 3.200000e+01 : f32
    %531 = vector.broadcast %cst_285 : f32 to vector<8x1xf32>
    %532 = arith.divf %530, %531 : vector<8x1xf32>
    %cst_286 = arith.constant 9.99999974E-6 : f32
    %533 = vector.broadcast %cst_286 : f32 to vector<8x1xf32>
    %534 = arith.addf %532, %533 : vector<8x1xf32>
    %535 = math.rsqrt %534 : vector<8x1xf32>
    %536 = vector.broadcast %535 : vector<8x1xf32> to vector<8x32xf32>
    %537 = arith.mulf %527, %536 : vector<8x32xf32>
    %538 = vector.broadcast %519 : vector<1x32xf32> to vector<8x32xf32>
    %539 = arith.mulf %537, %538 : vector<8x32xf32>
    %540 = vector.broadcast %521 : vector<1x32xf32> to vector<8x32xf32>
    %541 = arith.addf %539, %540 : vector<8x32xf32>
    %c1_287 = arith.constant 1 : index
    %c0_288 = arith.constant 0 : index
    %c0_289 = arith.constant 0 : index
    %542 = vector.load %arg37[%c1_287, %c0_288, %c0_289] : memref<3x32x64xbf16, #tpu.memory_space<vmem>>, vector<1x32x64xbf16>
    %543 = vector.shape_cast %542 : vector<1x32x64xbf16> to vector<32x64xbf16>
    %544 = arith.truncf %541 : vector<8x32xf32> to vector<8x32xbf16>
    %cst_290 = arith.constant dense<0.000000e+00> : vector<8x64xf32>
    %545 = tpu.matmul %544, %543, %cst_290 {dimension_numbers = #tpu.dot_dimension_numbers<[1], [0], [0], [1], [0, 0, 1, 1], [], []>} : vector<8x32xbf16>, vector<32x64xbf16>, vector<8x64xf32> -> vector<8x64xf32>
    %c1_291 = arith.constant 1 : index
    %c0_292 = arith.constant 0 : index
    %c0_293 = arith.constant 0 : index
    %546 = vector.load %arg38[%c1_291, %c0_292, %c0_293] : memref<3x1x64xf32, #tpu.memory_space<vmem>>, vector<1x1x64xf32>
    %547 = vector.shape_cast %546 : vector<1x1x64xf32> to vector<1x64xf32>
    %548 = vector.broadcast %547 : vector<1x64xf32> to vector<8x64xf32>
    %549 = arith.addf %545, %548 : vector<8x64xf32>
    %cst_294 = arith.constant 0.000000e+00 : f32
    %550 = vector.broadcast %cst_294 : f32 to vector<8x64xf32>
    %551 = arith.maximumf %549, %550 : vector<8x64xf32>
    %c1_295 = arith.constant 1 : index
    %c0_296 = arith.constant 0 : index
    %c0_297 = arith.constant 0 : index
    %552 = vector.load %arg39[%c1_295, %c0_296, %c0_297] : memref<3x64x32xbf16, #tpu.memory_space<vmem>>, vector<1x64x32xbf16>
    %553 = vector.shape_cast %552 : vector<1x64x32xbf16> to vector<64x32xbf16>
    %554 = arith.truncf %551 : vector<8x64xf32> to vector<8x64xbf16>
    %cst_298 = arith.constant dense<0.000000e+00> : vector<8x32xf32>
    %555 = tpu.matmul %554, %553, %cst_298 {dimension_numbers = #tpu.dot_dimension_numbers<[1], [0], [0], [1], [0, 0, 1, 1], [], []>} : vector<8x64xbf16>, vector<64x32xbf16>, vector<8x32xf32> -> vector<8x32xf32>
    %c1_299 = arith.constant 1 : index
    %c0_300 = arith.constant 0 : index
    %c0_301 = arith.constant 0 : index
    %556 = vector.load %arg40[%c1_299, %c0_300, %c0_301] : memref<3x1x32xf32, #tpu.memory_space<vmem>>, vector<1x1x32xf32>
    %557 = vector.shape_cast %556 : vector<1x1x32xf32> to vector<1x32xf32>
    %558 = vector.broadcast %557 : vector<1x32xf32> to vector<8x32xf32>
    %559 = arith.addf %555, %558 : vector<8x32xf32>
    %560 = arith.addf %541, %559 : vector<8x32xf32>
    %c1_302 = arith.constant 1 : index
    %c0_303 = arith.constant 0 : index
    %c0_304 = arith.constant 0 : index
    %561 = vector.load %arg41[%c1_302, %c0_303, %c0_304] : memref<3x1x32xf32, #tpu.memory_space<vmem>>, vector<1x1x32xf32>
    %562 = vector.shape_cast %561 : vector<1x1x32xf32> to vector<1x32xf32>
    %c1_305 = arith.constant 1 : index
    %c0_306 = arith.constant 0 : index
    %c0_307 = arith.constant 0 : index
    %563 = vector.load %arg42[%c1_305, %c0_306, %c0_307] : memref<3x1x32xf32, #tpu.memory_space<vmem>>, vector<1x1x32xf32>
    %564 = vector.shape_cast %563 : vector<1x1x32xf32> to vector<1x32xf32>
    %cst_308 = arith.constant dense<0.000000e+00> : vector<8xf32>
    %565 = vector.multi_reduction <add>, %560, %cst_308 [1] : vector<8x32xf32> to vector<8xf32>
    %566 = vector.shape_cast %565 : vector<8xf32> to vector<8x1xf32>
    %cst_309 = arith.constant 3.200000e+01 : f32
    %567 = vector.broadcast %cst_309 : f32 to vector<8x1xf32>
    %568 = arith.divf %566, %567 : vector<8x1xf32>
    %569 = vector.broadcast %568 : vector<8x1xf32> to vector<8x32xf32>
    %570 = arith.subf %560, %569 : vector<8x32xf32>
    %571 = arith.mulf %570, %570 : vector<8x32xf32>
    %cst_310 = arith.constant dense<0.000000e+00> : vector<8xf32>
    %572 = vector.multi_reduction <add>, %571, %cst_310 [1] : vector<8x32xf32> to vector<8xf32>
    %573 = vector.shape_cast %572 : vector<8xf32> to vector<8x1xf32>
    %cst_311 = arith.constant 3.200000e+01 : f32
    %574 = vector.broadcast %cst_311 : f32 to vector<8x1xf32>
    %575 = arith.divf %573, %574 : vector<8x1xf32>
    %cst_312 = arith.constant 9.99999974E-6 : f32
    %576 = vector.broadcast %cst_312 : f32 to vector<8x1xf32>
    %577 = arith.addf %575, %576 : vector<8x1xf32>
    %578 = math.rsqrt %577 : vector<8x1xf32>
    %579 = vector.broadcast %578 : vector<8x1xf32> to vector<8x32xf32>
    %580 = arith.mulf %570, %579 : vector<8x32xf32>
    %581 = vector.broadcast %562 : vector<1x32xf32> to vector<8x32xf32>
    %582 = arith.mulf %580, %581 : vector<8x32xf32>
    %583 = vector.broadcast %564 : vector<1x32xf32> to vector<8x32xf32>
    %584 = arith.addf %582, %583 : vector<8x32xf32>
    %c2_313 = arith.constant 2 : index
    %c0_314 = arith.constant 0 : index
    %c0_315 = arith.constant 0 : index
    %585 = vector.load %arg31[%c2_313, %c0_314, %c0_315] : memref<3x32x96xbf16, #tpu.memory_space<vmem>>, vector<1x32x96xbf16>
    %586 = vector.shape_cast %585 : vector<1x32x96xbf16> to vector<32x96xbf16>
    %587 = arith.truncf %584 : vector<8x32xf32> to vector<8x32xbf16>
    %cst_316 = arith.constant dense<0.000000e+00> : vector<8x96xf32>
    %588 = tpu.matmul %587, %586, %cst_316 {dimension_numbers = #tpu.dot_dimension_numbers<[1], [0], [0], [1], [0, 0, 1, 1], [], []>} : vector<8x32xbf16>, vector<32x96xbf16>, vector<8x96xf32> -> vector<8x96xf32>
    %c2_317 = arith.constant 2 : index
    %c0_318 = arith.constant 0 : index
    %c0_319 = arith.constant 0 : index
    %589 = vector.load %arg32[%c2_317, %c0_318, %c0_319] : memref<3x1x96xf32, #tpu.memory_space<vmem>>, vector<1x1x96xf32>
    %590 = vector.shape_cast %589 : vector<1x1x96xf32> to vector<1x96xf32>
    %591 = vector.broadcast %590 : vector<1x96xf32> to vector<8x96xf32>
    %592 = arith.addf %588, %591 : vector<8x96xf32>
    %c2_320 = arith.constant 2 : index
    %c0_321 = arith.constant 0 : index
    %c0_322 = arith.constant 0 : index
    %593 = vector.load %arg34[%c2_320, %c0_321, %c0_322] : memref<3x1x32xf32, #tpu.memory_space<vmem>>, vector<1x1x32xf32>
    %594 = vector.shape_cast %593 : vector<1x1x32xf32> to vector<1x32xf32>
    %595 = vector.extract_strided_slice %592 {offsets = [0, 0], sizes = [8, 8], strides = [1, 1]} : vector<8x96xf32> to vector<8x8xf32>
    %596 = vector.extract_strided_slice %592 {offsets = [0, 32], sizes = [8, 8], strides = [1, 1]} : vector<8x96xf32> to vector<8x8xf32>
    %597 = vector.extract_strided_slice %592 {offsets = [0, 64], sizes = [8, 8], strides = [1, 1]} : vector<8x96xf32> to vector<8x8xf32>
    %598 = arith.truncf %595 : vector<8x8xf32> to vector<8x8xbf16>
    %599 = arith.truncf %596 : vector<8x8xf32> to vector<8x8xbf16>
    %cst_323 = arith.constant dense<0.000000e+00> : vector<8x8xf32>
    %600 = tpu.matmul %598, %599, %cst_323 {dimension_numbers = #tpu.dot_dimension_numbers<[1], [1], [0], [0], [0, 0, 1, 0], [], []>} : vector<8x8xbf16>, vector<8x8xbf16>, vector<8x8xf32> -> vector<8x8xf32>
    %cst_324 = arith.constant 0.353553385 : f32
    %601 = vector.broadcast %cst_324 : f32 to vector<8x8xf32>
    %602 = arith.mulf %600, %601 : vector<8x8xf32>
    %603 = vector.broadcast %202 : vector<1x8xf32> to vector<8x8xf32>
    %604 = arith.addf %602, %603 : vector<8x8xf32>
    %cst_325 = arith.constant dense<0xFF800000> : vector<8xf32>
    %605 = vector.multi_reduction <maximumf>, %604, %cst_325 [1] : vector<8x8xf32> to vector<8xf32>
    %606 = vector.shape_cast %605 : vector<8xf32> to vector<8x1xf32>
    %607 = vector.broadcast %606 : vector<8x1xf32> to vector<8x8xf32>
    %608 = arith.subf %604, %607 : vector<8x8xf32>
    %609 = math.exp %608 : vector<8x8xf32>
    %cst_326 = arith.constant dense<0.000000e+00> : vector<8xf32>
    %610 = vector.multi_reduction <add>, %609, %cst_326 [1] : vector<8x8xf32> to vector<8xf32>
    %611 = vector.shape_cast %610 : vector<8xf32> to vector<8x1xf32>
    %612 = tpu.reciprocal %611 {approx = true} : vector<8x1xf32> -> vector<8x1xf32>
    %613 = vector.broadcast %612 : vector<8x1xf32> to vector<8x8xf32>
    %614 = arith.mulf %609, %613 : vector<8x8xf32>
    %615 = arith.truncf %614 : vector<8x8xf32> to vector<8x8xbf16>
    %616 = arith.truncf %597 : vector<8x8xf32> to vector<8x8xbf16>
    %cst_327 = arith.constant dense<0.000000e+00> : vector<8x8xf32>
    %617 = tpu.matmul %615, %616, %cst_327 {dimension_numbers = #tpu.dot_dimension_numbers<[1], [0], [0], [1], [0, 0, 1, 1], [], []>} : vector<8x8xbf16>, vector<8x8xbf16>, vector<8x8xf32> -> vector<8x8xf32>
    %618 = arith.truncf %617 : vector<8x8xf32> to vector<8x8xbf16>
    %c2_328 = arith.constant 2 : index
    %c0_329 = arith.constant 0 : index
    %c0_330 = arith.constant 0 : index
    %c0_331 = arith.constant 0 : index
    %619 = vector.load %arg33[%c2_328, %c0_329, %c0_330, %c0_331] : memref<3x4x8x32xbf16, #tpu.memory_space<vmem>>, vector<1x1x8x32xbf16>
    %620 = vector.shape_cast %619 : vector<1x1x8x32xbf16> to vector<8x32xbf16>
    %cst_332 = arith.constant dense<0.000000e+00> : vector<8x32xf32>
    %621 = tpu.matmul %618, %620, %cst_332 {dimension_numbers = #tpu.dot_dimension_numbers<[1], [0], [0], [1], [0, 0, 1, 1], [], []>} : vector<8x8xbf16>, vector<8x32xbf16>, vector<8x32xf32> -> vector<8x32xf32>
    %622 = vector.broadcast %594 : vector<1x32xf32> to vector<8x32xf32>
    %623 = arith.addf %622, %621 : vector<8x32xf32>
    %624 = vector.extract_strided_slice %592 {offsets = [0, 8], sizes = [8, 8], strides = [1, 1]} : vector<8x96xf32> to vector<8x8xf32>
    %625 = vector.extract_strided_slice %592 {offsets = [0, 40], sizes = [8, 8], strides = [1, 1]} : vector<8x96xf32> to vector<8x8xf32>
    %626 = vector.extract_strided_slice %592 {offsets = [0, 72], sizes = [8, 8], strides = [1, 1]} : vector<8x96xf32> to vector<8x8xf32>
    %627 = arith.truncf %624 : vector<8x8xf32> to vector<8x8xbf16>
    %628 = arith.truncf %625 : vector<8x8xf32> to vector<8x8xbf16>
    %cst_333 = arith.constant dense<0.000000e+00> : vector<8x8xf32>
    %629 = tpu.matmul %627, %628, %cst_333 {dimension_numbers = #tpu.dot_dimension_numbers<[1], [1], [0], [0], [0, 0, 1, 0], [], []>} : vector<8x8xbf16>, vector<8x8xbf16>, vector<8x8xf32> -> vector<8x8xf32>
    %cst_334 = arith.constant 0.353553385 : f32
    %630 = vector.broadcast %cst_334 : f32 to vector<8x8xf32>
    %631 = arith.mulf %629, %630 : vector<8x8xf32>
    %632 = vector.broadcast %202 : vector<1x8xf32> to vector<8x8xf32>
    %633 = arith.addf %631, %632 : vector<8x8xf32>
    %cst_335 = arith.constant dense<0xFF800000> : vector<8xf32>
    %634 = vector.multi_reduction <maximumf>, %633, %cst_335 [1] : vector<8x8xf32> to vector<8xf32>
    %635 = vector.shape_cast %634 : vector<8xf32> to vector<8x1xf32>
    %636 = vector.broadcast %635 : vector<8x1xf32> to vector<8x8xf32>
    %637 = arith.subf %633, %636 : vector<8x8xf32>
    %638 = math.exp %637 : vector<8x8xf32>
    %cst_336 = arith.constant dense<0.000000e+00> : vector<8xf32>
    %639 = vector.multi_reduction <add>, %638, %cst_336 [1] : vector<8x8xf32> to vector<8xf32>
    %640 = vector.shape_cast %639 : vector<8xf32> to vector<8x1xf32>
    %641 = tpu.reciprocal %640 {approx = true} : vector<8x1xf32> -> vector<8x1xf32>
    %642 = vector.broadcast %641 : vector<8x1xf32> to vector<8x8xf32>
    %643 = arith.mulf %638, %642 : vector<8x8xf32>
    %644 = arith.truncf %643 : vector<8x8xf32> to vector<8x8xbf16>
    %645 = arith.truncf %626 : vector<8x8xf32> to vector<8x8xbf16>
    %cst_337 = arith.constant dense<0.000000e+00> : vector<8x8xf32>
    %646 = tpu.matmul %644, %645, %cst_337 {dimension_numbers = #tpu.dot_dimension_numbers<[1], [0], [0], [1], [0, 0, 1, 1], [], []>} : vector<8x8xbf16>, vector<8x8xbf16>, vector<8x8xf32> -> vector<8x8xf32>
    %647 = arith.truncf %646 : vector<8x8xf32> to vector<8x8xbf16>
    %c2_338 = arith.constant 2 : index
    %c1_339 = arith.constant 1 : index
    %c0_340 = arith.constant 0 : index
    %c0_341 = arith.constant 0 : index
    %648 = vector.load %arg33[%c2_338, %c1_339, %c0_340, %c0_341] : memref<3x4x8x32xbf16, #tpu.memory_space<vmem>>, vector<1x1x8x32xbf16>
    %649 = vector.shape_cast %648 : vector<1x1x8x32xbf16> to vector<8x32xbf16>
    %cst_342 = arith.constant dense<0.000000e+00> : vector<8x32xf32>
    %650 = tpu.matmul %647, %649, %cst_342 {dimension_numbers = #tpu.dot_dimension_numbers<[1], [0], [0], [1], [0, 0, 1, 1], [], []>} : vector<8x8xbf16>, vector<8x32xbf16>, vector<8x32xf32> -> vector<8x32xf32>
    %651 = arith.addf %623, %650 : vector<8x32xf32>
    %652 = vector.extract_strided_slice %592 {offsets = [0, 16], sizes = [8, 8], strides = [1, 1]} : vector<8x96xf32> to vector<8x8xf32>
    %653 = vector.extract_strided_slice %592 {offsets = [0, 48], sizes = [8, 8], strides = [1, 1]} : vector<8x96xf32> to vector<8x8xf32>
    %654 = vector.extract_strided_slice %592 {offsets = [0, 80], sizes = [8, 8], strides = [1, 1]} : vector<8x96xf32> to vector<8x8xf32>
    %655 = arith.truncf %652 : vector<8x8xf32> to vector<8x8xbf16>
    %656 = arith.truncf %653 : vector<8x8xf32> to vector<8x8xbf16>
    %cst_343 = arith.constant dense<0.000000e+00> : vector<8x8xf32>
    %657 = tpu.matmul %655, %656, %cst_343 {dimension_numbers = #tpu.dot_dimension_numbers<[1], [1], [0], [0], [0, 0, 1, 0], [], []>} : vector<8x8xbf16>, vector<8x8xbf16>, vector<8x8xf32> -> vector<8x8xf32>
    %cst_344 = arith.constant 0.353553385 : f32
    %658 = vector.broadcast %cst_344 : f32 to vector<8x8xf32>
    %659 = arith.mulf %657, %658 : vector<8x8xf32>
    %660 = vector.broadcast %202 : vector<1x8xf32> to vector<8x8xf32>
    %661 = arith.addf %659, %660 : vector<8x8xf32>
    %cst_345 = arith.constant dense<0xFF800000> : vector<8xf32>
    %662 = vector.multi_reduction <maximumf>, %661, %cst_345 [1] : vector<8x8xf32> to vector<8xf32>
    %663 = vector.shape_cast %662 : vector<8xf32> to vector<8x1xf32>
    %664 = vector.broadcast %663 : vector<8x1xf32> to vector<8x8xf32>
    %665 = arith.subf %661, %664 : vector<8x8xf32>
    %666 = math.exp %665 : vector<8x8xf32>
    %cst_346 = arith.constant dense<0.000000e+00> : vector<8xf32>
    %667 = vector.multi_reduction <add>, %666, %cst_346 [1] : vector<8x8xf32> to vector<8xf32>
    %668 = vector.shape_cast %667 : vector<8xf32> to vector<8x1xf32>
    %669 = tpu.reciprocal %668 {approx = true} : vector<8x1xf32> -> vector<8x1xf32>
    %670 = vector.broadcast %669 : vector<8x1xf32> to vector<8x8xf32>
    %671 = arith.mulf %666, %670 : vector<8x8xf32>
    %672 = arith.truncf %671 : vector<8x8xf32> to vector<8x8xbf16>
    %673 = arith.truncf %654 : vector<8x8xf32> to vector<8x8xbf16>
    %cst_347 = arith.constant dense<0.000000e+00> : vector<8x8xf32>
    %674 = tpu.matmul %672, %673, %cst_347 {dimension_numbers = #tpu.dot_dimension_numbers<[1], [0], [0], [1], [0, 0, 1, 1], [], []>} : vector<8x8xbf16>, vector<8x8xbf16>, vector<8x8xf32> -> vector<8x8xf32>
    %675 = arith.truncf %674 : vector<8x8xf32> to vector<8x8xbf16>
    %c2_348 = arith.constant 2 : index
    %c2_349 = arith.constant 2 : index
    %c0_350 = arith.constant 0 : index
    %c0_351 = arith.constant 0 : index
    %676 = vector.load %arg33[%c2_348, %c2_349, %c0_350, %c0_351] : memref<3x4x8x32xbf16, #tpu.memory_space<vmem>>, vector<1x1x8x32xbf16>
    %677 = vector.shape_cast %676 : vector<1x1x8x32xbf16> to vector<8x32xbf16>
    %cst_352 = arith.constant dense<0.000000e+00> : vector<8x32xf32>
    %678 = tpu.matmul %675, %677, %cst_352 {dimension_numbers = #tpu.dot_dimension_numbers<[1], [0], [0], [1], [0, 0, 1, 1], [], []>} : vector<8x8xbf16>, vector<8x32xbf16>, vector<8x32xf32> -> vector<8x32xf32>
    %679 = arith.addf %651, %678 : vector<8x32xf32>
    %680 = vector.extract_strided_slice %592 {offsets = [0, 24], sizes = [8, 8], strides = [1, 1]} : vector<8x96xf32> to vector<8x8xf32>
    %681 = vector.extract_strided_slice %592 {offsets = [0, 56], sizes = [8, 8], strides = [1, 1]} : vector<8x96xf32> to vector<8x8xf32>
    %682 = vector.extract_strided_slice %592 {offsets = [0, 88], sizes = [8, 8], strides = [1, 1]} : vector<8x96xf32> to vector<8x8xf32>
    %683 = arith.truncf %680 : vector<8x8xf32> to vector<8x8xbf16>
    %684 = arith.truncf %681 : vector<8x8xf32> to vector<8x8xbf16>
    %cst_353 = arith.constant dense<0.000000e+00> : vector<8x8xf32>
    %685 = tpu.matmul %683, %684, %cst_353 {dimension_numbers = #tpu.dot_dimension_numbers<[1], [1], [0], [0], [0, 0, 1, 0], [], []>} : vector<8x8xbf16>, vector<8x8xbf16>, vector<8x8xf32> -> vector<8x8xf32>
    %cst_354 = arith.constant 0.353553385 : f32
    %686 = vector.broadcast %cst_354 : f32 to vector<8x8xf32>
    %687 = arith.mulf %685, %686 : vector<8x8xf32>
    %688 = vector.broadcast %202 : vector<1x8xf32> to vector<8x8xf32>
    %689 = arith.addf %687, %688 : vector<8x8xf32>
    %cst_355 = arith.constant dense<0xFF800000> : vector<8xf32>
    %690 = vector.multi_reduction <maximumf>, %689, %cst_355 [1] : vector<8x8xf32> to vector<8xf32>
    %691 = vector.shape_cast %690 : vector<8xf32> to vector<8x1xf32>
    %692 = vector.broadcast %691 : vector<8x1xf32> to vector<8x8xf32>
    %693 = arith.subf %689, %692 : vector<8x8xf32>
    %694 = math.exp %693 : vector<8x8xf32>
    %cst_356 = arith.constant dense<0.000000e+00> : vector<8xf32>
    %695 = vector.multi_reduction <add>, %694, %cst_356 [1] : vector<8x8xf32> to vector<8xf32>
    %696 = vector.shape_cast %695 : vector<8xf32> to vector<8x1xf32>
    %697 = tpu.reciprocal %696 {approx = true} : vector<8x1xf32> -> vector<8x1xf32>
    %698 = vector.broadcast %697 : vector<8x1xf32> to vector<8x8xf32>
    %699 = arith.mulf %694, %698 : vector<8x8xf32>
    %700 = arith.truncf %699 : vector<8x8xf32> to vector<8x8xbf16>
    %701 = arith.truncf %682 : vector<8x8xf32> to vector<8x8xbf16>
    %cst_357 = arith.constant dense<0.000000e+00> : vector<8x8xf32>
    %702 = tpu.matmul %700, %701, %cst_357 {dimension_numbers = #tpu.dot_dimension_numbers<[1], [0], [0], [1], [0, 0, 1, 1], [], []>} : vector<8x8xbf16>, vector<8x8xbf16>, vector<8x8xf32> -> vector<8x8xf32>
    %703 = arith.truncf %702 : vector<8x8xf32> to vector<8x8xbf16>
    %c2_358 = arith.constant 2 : index
    %c3_359 = arith.constant 3 : index
    %c0_360 = arith.constant 0 : index
    %c0_361 = arith.constant 0 : index
    %704 = vector.load %arg33[%c2_358, %c3_359, %c0_360, %c0_361] : memref<3x4x8x32xbf16, #tpu.memory_space<vmem>>, vector<1x1x8x32xbf16>
    %705 = vector.shape_cast %704 : vector<1x1x8x32xbf16> to vector<8x32xbf16>
    %cst_362 = arith.constant dense<0.000000e+00> : vector<8x32xf32>
    %706 = tpu.matmul %703, %705, %cst_362 {dimension_numbers = #tpu.dot_dimension_numbers<[1], [0], [0], [1], [0, 0, 1, 1], [], []>} : vector<8x8xbf16>, vector<8x32xbf16>, vector<8x32xf32> -> vector<8x32xf32>
    %707 = arith.addf %679, %706 : vector<8x32xf32>
    %708 = arith.addf %584, %707 : vector<8x32xf32>
    %c2_363 = arith.constant 2 : index
    %c0_364 = arith.constant 0 : index
    %c0_365 = arith.constant 0 : index
    %709 = vector.load %arg35[%c2_363, %c0_364, %c0_365] : memref<3x1x32xf32, #tpu.memory_space<vmem>>, vector<1x1x32xf32>
    %710 = vector.shape_cast %709 : vector<1x1x32xf32> to vector<1x32xf32>
    %c2_366 = arith.constant 2 : index
    %c0_367 = arith.constant 0 : index
    %c0_368 = arith.constant 0 : index
    %711 = vector.load %arg36[%c2_366, %c0_367, %c0_368] : memref<3x1x32xf32, #tpu.memory_space<vmem>>, vector<1x1x32xf32>
    %712 = vector.shape_cast %711 : vector<1x1x32xf32> to vector<1x32xf32>
    %cst_369 = arith.constant dense<0.000000e+00> : vector<8xf32>
    %713 = vector.multi_reduction <add>, %708, %cst_369 [1] : vector<8x32xf32> to vector<8xf32>
    %714 = vector.shape_cast %713 : vector<8xf32> to vector<8x1xf32>
    %cst_370 = arith.constant 3.200000e+01 : f32
    %715 = vector.broadcast %cst_370 : f32 to vector<8x1xf32>
    %716 = arith.divf %714, %715 : vector<8x1xf32>
    %717 = vector.broadcast %716 : vector<8x1xf32> to vector<8x32xf32>
    %718 = arith.subf %708, %717 : vector<8x32xf32>
    %719 = arith.mulf %718, %718 : vector<8x32xf32>
    %cst_371 = arith.constant dense<0.000000e+00> : vector<8xf32>
    %720 = vector.multi_reduction <add>, %719, %cst_371 [1] : vector<8x32xf32> to vector<8xf32>
    %721 = vector.shape_cast %720 : vector<8xf32> to vector<8x1xf32>
    %cst_372 = arith.constant 3.200000e+01 : f32
    %722 = vector.broadcast %cst_372 : f32 to vector<8x1xf32>
    %723 = arith.divf %721, %722 : vector<8x1xf32>
    %cst_373 = arith.constant 9.99999974E-6 : f32
    %724 = vector.broadcast %cst_373 : f32 to vector<8x1xf32>
    %725 = arith.addf %723, %724 : vector<8x1xf32>
    %726 = math.rsqrt %725 : vector<8x1xf32>
    %727 = vector.broadcast %726 : vector<8x1xf32> to vector<8x32xf32>
    %728 = arith.mulf %718, %727 : vector<8x32xf32>
    %729 = vector.broadcast %710 : vector<1x32xf32> to vector<8x32xf32>
    %730 = arith.mulf %728, %729 : vector<8x32xf32>
    %731 = vector.broadcast %712 : vector<1x32xf32> to vector<8x32xf32>
    %732 = arith.addf %730, %731 : vector<8x32xf32>
    %c2_374 = arith.constant 2 : index
    %c0_375 = arith.constant 0 : index
    %c0_376 = arith.constant 0 : index
    %733 = vector.load %arg37[%c2_374, %c0_375, %c0_376] : memref<3x32x64xbf16, #tpu.memory_space<vmem>>, vector<1x32x64xbf16>
    %734 = vector.shape_cast %733 : vector<1x32x64xbf16> to vector<32x64xbf16>
    %735 = arith.truncf %732 : vector<8x32xf32> to vector<8x32xbf16>
    %cst_377 = arith.constant dense<0.000000e+00> : vector<8x64xf32>
    %736 = tpu.matmul %735, %734, %cst_377 {dimension_numbers = #tpu.dot_dimension_numbers<[1], [0], [0], [1], [0, 0, 1, 1], [], []>} : vector<8x32xbf16>, vector<32x64xbf16>, vector<8x64xf32> -> vector<8x64xf32>
    %c2_378 = arith.constant 2 : index
    %c0_379 = arith.constant 0 : index
    %c0_380 = arith.constant 0 : index
    %737 = vector.load %arg38[%c2_378, %c0_379, %c0_380] : memref<3x1x64xf32, #tpu.memory_space<vmem>>, vector<1x1x64xf32>
    %738 = vector.shape_cast %737 : vector<1x1x64xf32> to vector<1x64xf32>
    %739 = vector.broadcast %738 : vector<1x64xf32> to vector<8x64xf32>
    %740 = arith.addf %736, %739 : vector<8x64xf32>
    %cst_381 = arith.constant 0.000000e+00 : f32
    %741 = vector.broadcast %cst_381 : f32 to vector<8x64xf32>
    %742 = arith.maximumf %740, %741 : vector<8x64xf32>
    %c2_382 = arith.constant 2 : index
    %c0_383 = arith.constant 0 : index
    %c0_384 = arith.constant 0 : index
    %743 = vector.load %arg39[%c2_382, %c0_383, %c0_384] : memref<3x64x32xbf16, #tpu.memory_space<vmem>>, vector<1x64x32xbf16>
    %744 = vector.shape_cast %743 : vector<1x64x32xbf16> to vector<64x32xbf16>
    %745 = arith.truncf %742 : vector<8x64xf32> to vector<8x64xbf16>
    %cst_385 = arith.constant dense<0.000000e+00> : vector<8x32xf32>
    %746 = tpu.matmul %745, %744, %cst_385 {dimension_numbers = #tpu.dot_dimension_numbers<[1], [0], [0], [1], [0, 0, 1, 1], [], []>} : vector<8x64xbf16>, vector<64x32xbf16>, vector<8x32xf32> -> vector<8x32xf32>
    %c2_386 = arith.constant 2 : index
    %c0_387 = arith.constant 0 : index
    %c0_388 = arith.constant 0 : index
    %747 = vector.load %arg40[%c2_386, %c0_387, %c0_388] : memref<3x1x32xf32, #tpu.memory_space<vmem>>, vector<1x1x32xf32>
    %748 = vector.shape_cast %747 : vector<1x1x32xf32> to vector<1x32xf32>
    %749 = vector.broadcast %748 : vector<1x32xf32> to vector<8x32xf32>
    %750 = arith.addf %746, %749 : vector<8x32xf32>
    %751 = arith.addf %732, %750 : vector<8x32xf32>
    %c2_389 = arith.constant 2 : index
    %c0_390 = arith.constant 0 : index
    %c0_391 = arith.constant 0 : index
    %752 = vector.load %arg41[%c2_389, %c0_390, %c0_391] : memref<3x1x32xf32, #tpu.memory_space<vmem>>, vector<1x1x32xf32>
    %753 = vector.shape_cast %752 : vector<1x1x32xf32> to vector<1x32xf32>
    %c2_392 = arith.constant 2 : index
    %c0_393 = arith.constant 0 : index
    %c0_394 = arith.constant 0 : index
    %754 = vector.load %arg42[%c2_392, %c0_393, %c0_394] : memref<3x1x32xf32, #tpu.memory_space<vmem>>, vector<1x1x32xf32>
    %755 = vector.shape_cast %754 : vector<1x1x32xf32> to vector<1x32xf32>
    %cst_395 = arith.constant dense<0.000000e+00> : vector<8xf32>
    %756 = vector.multi_reduction <add>, %751, %cst_395 [1] : vector<8x32xf32> to vector<8xf32>
    %757 = vector.shape_cast %756 : vector<8xf32> to vector<8x1xf32>
    %cst_396 = arith.constant 3.200000e+01 : f32
    %758 = vector.broadcast %cst_396 : f32 to vector<8x1xf32>
    %759 = arith.divf %757, %758 : vector<8x1xf32>
    %760 = vector.broadcast %759 : vector<8x1xf32> to vector<8x32xf32>
    %761 = arith.subf %751, %760 : vector<8x32xf32>
    %762 = arith.mulf %761, %761 : vector<8x32xf32>
    %cst_397 = arith.constant dense<0.000000e+00> : vector<8xf32>
    %763 = vector.multi_reduction <add>, %762, %cst_397 [1] : vector<8x32xf32> to vector<8xf32>
    %764 = vector.shape_cast %763 : vector<8xf32> to vector<8x1xf32>
    %cst_398 = arith.constant 3.200000e+01 : f32
    %765 = vector.broadcast %cst_398 : f32 to vector<8x1xf32>
    %766 = arith.divf %764, %765 : vector<8x1xf32>
    %cst_399 = arith.constant 9.99999974E-6 : f32
    %767 = vector.broadcast %cst_399 : f32 to vector<8x1xf32>
    %768 = arith.addf %766, %767 : vector<8x1xf32>
    %769 = math.rsqrt %768 : vector<8x1xf32>
    %770 = vector.broadcast %769 : vector<8x1xf32> to vector<8x32xf32>
    %771 = arith.mulf %761, %770 : vector<8x32xf32>
    %772 = vector.broadcast %753 : vector<1x32xf32> to vector<8x32xf32>
    %773 = arith.mulf %771, %772 : vector<8x32xf32>
    %774 = vector.broadcast %755 : vector<1x32xf32> to vector<8x32xf32>
    %775 = arith.addf %773, %774 : vector<8x32xf32>
    %c0_400 = arith.constant 0 : index
    %c0_401 = arith.constant 0 : index
    %776 = vector.load %arg43[%c0_400, %c0_401] : memref<32x1xbf16, #tpu.memory_space<vmem>>, vector<32x1xbf16>
    %777 = arith.truncf %775 : vector<8x32xf32> to vector<8x32xbf16>
    %cst_402 = arith.constant dense<0.000000e+00> : vector<8x1xf32>
    %778 = tpu.matmul %777, %776, %cst_402 {dimension_numbers = #tpu.dot_dimension_numbers<[1], [0], [0], [1], [0, 0, 1, 1], [], []>} : vector<8x32xbf16>, vector<32x1xbf16>, vector<8x1xf32> -> vector<8x1xf32>
    %c0_403 = arith.constant 0 : index
    %c0_404 = arith.constant 0 : index
    %779 = vector.load %arg44[%c0_403, %c0_404] : memref<1x1xf32, #tpu.memory_space<vmem>>, vector<1x1xf32>
    %780 = vector.broadcast %779 : vector<1x1xf32> to vector<8x1xf32>
    %781 = arith.addf %778, %780 : vector<8x1xf32>
    %c0_405 = arith.constant 0 : index
    %c0_406 = arith.constant 0 : index
    %c0_407 = arith.constant 0 : index
    %782 = vector.load %arg45[%c0_405, %c0_406, %c0_407] : memref<1x8x1xf32, #tpu.memory_space<vmem>>, vector<1x8x1xf32>
    %783 = vector.shape_cast %782 : vector<1x8x1xf32> to vector<8x1xf32>
    %784 = vector.shape_cast %781 : vector<8x1xf32> to vector<1x8x1xf32>
    tpu.vector_store %arg45[%c0_405, %c0_406, %c0_407], %784 {strides = array<i32>} : memref<1x8x1xf32, #tpu.memory_space<vmem>>, vector<1x8x1xf32>,
    return
  }
  func.func @transform_0(%arg0: i32) -> (i32, i32, i32) {
    %c0_i32 = arith.constant 0 : i32
    %c0_i32_0 = arith.constant 0 : i32
    %c0_i32_1 = arith.constant 0 : i32
    return %arg0, %c0_i32, %c0_i32_0 : i32, i32, i32
  }
  func.func @transform_1(%arg0: i32) -> (i32, i32, i32) {
    %c0_i32 = arith.constant 0 : i32
    %c0_i32_0 = arith.constant 0 : i32
    %c0_i32_1 = arith.constant 0 : i32
    return %arg0, %c0_i32, %c0_i32_0 : i32, i32, i32
  }
  func.func @transform_2(%arg0: i32) -> (i32, i32, i32) {
    %c0_i32 = arith.constant 0 : i32
    %c0_i32_0 = arith.constant 0 : i32
    %c0_i32_1 = arith.constant 0 : i32
    return %arg0, %c0_i32, %c0_i32_0 : i32, i32, i32
  }
  func.func @transform_3(%arg0: i32) -> (i32, i32, i32) {
    %c0_i32 = arith.constant 0 : i32
    %c0_i32_0 = arith.constant 0 : i32
    %c0_i32_1 = arith.constant 0 : i32
    return %arg0, %c0_i32, %c0_i32_0 : i32, i32, i32
  }
  func.func @transform_4(%arg0: i32) -> (i32, i32) {
    %c0_i32 = arith.constant 0 : i32
    %c0_i32_0 = arith.constant 0 : i32
    %c0_i32_1 = arith.constant 0 : i32
    return %c0_i32, %c0_i32_0 : i32, i32
  }
  func.func @transform_5(%arg0: i32) -> (i32, i32) {
    %c0_i32 = arith.constant 0 : i32
    %c0_i32_0 = arith.constant 0 : i32
    %c0_i32_1 = arith.constant 0 : i32
    return %c0_i32, %c0_i32_0 : i32, i32
  }
  func.func @transform_6(%arg0: i32) -> (i32, i32) {
    %c0_i32 = arith.constant 0 : i32
    %c0_i32_0 = arith.constant 0 : i32
    %c0_i32_1 = arith.constant 0 : i32
    return %c0_i32, %c0_i32_0 : i32, i32
  }
  func.func @transform_7(%arg0: i32) -> (i32, i32) {
    %c0_i32 = arith.constant 0 : i32
    %c0_i32_0 = arith.constant 0 : i32
    %c0_i32_1 = arith.constant 0 : i32
    return %c0_i32, %c0_i32_0 : i32, i32
  }
  func.func @transform_8(%arg0: i32) -> (i32, i32) {
    %c0_i32 = arith.constant 0 : i32
    %c0_i32_0 = arith.constant 0 : i32
    %c0_i32_1 = arith.constant 0 : i32
    return %c0_i32, %c0_i32_0 : i32, i32
  }
  func.func @transform_9(%arg0: i32) -> (i32, i32) {
    %c0_i32 = arith.constant 0 : i32
    %c0_i32_0 = arith.constant 0 : i32
    %c0_i32_1 = arith.constant 0 : i32
    return %c0_i32, %c0_i32_0 : i32, i32
  }
  func.func @transform_10(%arg0: i32) -> (i32, i32) {
    %c0_i32 = arith.constant 0 : i32
    %c0_i32_0 = arith.constant 0 : i32
    %c0_i32_1 = arith.constant 0 : i32
    return %c0_i32, %c0_i32_0 : i32, i32
  }
  func.func @transform_11(%arg0: i32) -> (i32, i32) {
    %c0_i32 = arith.constant 0 : i32
    %c0_i32_0 = arith.constant 0 : i32
    %c0_i32_1 = arith.constant 0 : i32
    return %c0_i32, %c0_i32_0 : i32, i32
  }
  func.func @transform_12(%arg0: i32) -> (i32, i32) {
    %c0_i32 = arith.constant 0 : i32
    %c0_i32_0 = arith.constant 0 : i32
    %c0_i32_1 = arith.constant 0 : i32
    return %c0_i32, %c0_i32_0 : i32, i32
  }
  func.func @transform_13(%arg0: i32) -> (i32, i32) {
    %c0_i32 = arith.constant 0 : i32
    %c0_i32_0 = arith.constant 0 : i32
    %c0_i32_1 = arith.constant 0 : i32
    return %c0_i32, %c0_i32_0 : i32, i32
  }
  func.func @transform_14(%arg0: i32) -> (i32, i32) {
    %c0_i32 = arith.constant 0 : i32
    %c0_i32_0 = arith.constant 0 : i32
    %c0_i32_1 = arith.constant 0 : i32
    return %c0_i32, %c0_i32_0 : i32, i32
  }
  func.func @transform_15(%arg0: i32) -> (i32, i32) {
    %c0_i32 = arith.constant 0 : i32
    %c0_i32_0 = arith.constant 0 : i32
    %c0_i32_1 = arith.constant 0 : i32
    return %c0_i32, %c0_i32_0 : i32, i32
  }
  func.func @transform_16(%arg0: i32) -> (i32, i32) {
    %c0_i32 = arith.constant 0 : i32
    %c0_i32_0 = arith.constant 0 : i32
    %c0_i32_1 = arith.constant 0 : i32
    return %c0_i32, %c0_i32_0 : i32, i32
  }
  func.func @transform_17(%arg0: i32) -> (i32, i32) {
    %c0_i32 = arith.constant 0 : i32
    %c0_i32_0 = arith.constant 0 : i32
    %c0_i32_1 = arith.constant 0 : i32
    return %c0_i32, %c0_i32_0 : i32, i32
  }
  func.func @transform_18(%arg0: i32) -> (i32, i32) {
    %c0_i32 = arith.constant 0 : i32
    %c0_i32_0 = arith.constant 0 : i32
    %c0_i32_1 = arith.constant 0 : i32
    return %c0_i32, %c0_i32_0 : i32, i32
  }
  func.func @transform_19(%arg0: i32) -> (i32, i32) {
    %c0_i32 = arith.constant 0 : i32
    %c0_i32_0 = arith.constant 0 : i32
    %c0_i32_1 = arith.constant 0 : i32
    return %c0_i32, %c0_i32_0 : i32, i32
  }
  func.func @transform_20(%arg0: i32) -> (i32, i32) {
    %c0_i32 = arith.constant 0 : i32
    %c0_i32_0 = arith.constant 0 : i32
    %c0_i32_1 = arith.constant 0 : i32
    return %c0_i32, %c0_i32_0 : i32, i32
  }
  func.func @transform_21(%arg0: i32) -> (i32, i32) {
    %c0_i32 = arith.constant 0 : i32
    %c0_i32_0 = arith.constant 0 : i32
    %c0_i32_1 = arith.constant 0 : i32
    return %c0_i32, %c0_i32_0 : i32, i32
  }
  func.func @transform_22(%arg0: i32) -> (i32, i32, i32) {
    %c0_i32 = arith.constant 0 : i32
    %c0_i32_0 = arith.constant 0 : i32
    %c0_i32_1 = arith.constant 0 : i32
    %c0_i32_2 = arith.constant 0 : i32
    return %c0_i32, %c0_i32_0, %c0_i32_1 : i32, i32, i32
  }
  func.func @transform_23(%arg0: i32) -> (i32, i32) {
    %c0_i32 = arith.constant 0 : i32
    %c0_i32_0 = arith.constant 0 : i32
    %c0_i32_1 = arith.constant 0 : i32
    return %c0_i32, %c0_i32_0 : i32, i32
  }
  func.func @transform_24(%arg0: i32) -> (i32, i32, i32) {
    %c0_i32 = arith.constant 0 : i32
    %c0_i32_0 = arith.constant 0 : i32
    %c0_i32_1 = arith.constant 0 : i32
    %c0_i32_2 = arith.constant 0 : i32
    return %c0_i32, %c0_i32_0, %c0_i32_1 : i32, i32, i32
  }
  func.func @transform_25(%arg0: i32) -> (i32, i32) {
    %c0_i32 = arith.constant 0 : i32
    %c0_i32_0 = arith.constant 0 : i32
    %c0_i32_1 = arith.constant 0 : i32
    return %c0_i32, %c0_i32_0 : i32, i32
  }
  func.func @transform_26(%arg0: i32) -> (i32, i32) {
    %c0_i32 = arith.constant 0 : i32
    %c0_i32_0 = arith.constant 0 : i32
    %c0_i32_1 = arith.constant 0 : i32
    return %c0_i32, %c0_i32_0 : i32, i32
  }
  func.func @transform_27(%arg0: i32) -> (i32, i32) {
    %c0_i32 = arith.constant 0 : i32
    %c0_i32_0 = arith.constant 0 : i32
    %c0_i32_1 = arith.constant 0 : i32
    return %c0_i32, %c0_i32_0 : i32, i32
  }
  func.func @transform_28(%arg0: i32) -> (i32, i32) {
    %c0_i32 = arith.constant 0 : i32
    %c0_i32_0 = arith.constant 0 : i32
    %c0_i32_1 = arith.constant 0 : i32
    return %c0_i32, %c0_i32_0 : i32, i32
  }
  func.func @transform_29(%arg0: i32) -> (i32, i32) {
    %c0_i32 = arith.constant 0 : i32
    %c0_i32_0 = arith.constant 0 : i32
    %c0_i32_1 = arith.constant 0 : i32
    return %c0_i32, %c0_i32_0 : i32, i32
  }
  func.func @transform_30(%arg0: i32) -> (i32, i32, i32) {
    %c0_i32 = arith.constant 0 : i32
    %c0_i32_0 = arith.constant 0 : i32
    %c0_i32_1 = arith.constant 0 : i32
    %c0_i32_2 = arith.constant 0 : i32
    return %c0_i32, %c0_i32_0, %c0_i32_1 : i32, i32, i32
  }
  func.func @transform_31(%arg0: i32) -> (i32, i32, i32) {
    %c0_i32 = arith.constant 0 : i32
    %c0_i32_0 = arith.constant 0 : i32
    %c0_i32_1 = arith.constant 0 : i32
    %c0_i32_2 = arith.constant 0 : i32
    return %c0_i32, %c0_i32_0, %c0_i32_1 : i32, i32, i32
  }
  func.func @transform_32(%arg0: i32) -> (i32, i32, i32, i32) {
    %c0_i32 = arith.constant 0 : i32
    %c0_i32_0 = arith.constant 0 : i32
    %c0_i32_1 = arith.constant 0 : i32
    %c0_i32_2 = arith.constant 0 : i32
    %c0_i32_3 = arith.constant 0 : i32
    return %c0_i32, %c0_i32_0, %c0_i32_1, %c0_i32_2 : i32, i32, i32, i32
  }
  func.func @transform_33(%arg0: i32) -> (i32, i32, i32) {
    %c0_i32 = arith.constant 0 : i32
    %c0_i32_0 = arith.constant 0 : i32
    %c0_i32_1 = arith.constant 0 : i32
    %c0_i32_2 = arith.constant 0 : i32
    return %c0_i32, %c0_i32_0, %c0_i32_1 : i32, i32, i32
  }
  func.func @transform_34(%arg0: i32) -> (i32, i32, i32) {
    %c0_i32 = arith.constant 0 : i32
    %c0_i32_0 = arith.constant 0 : i32
    %c0_i32_1 = arith.constant 0 : i32
    %c0_i32_2 = arith.constant 0 : i32
    return %c0_i32, %c0_i32_0, %c0_i32_1 : i32, i32, i32
  }
  func.func @transform_35(%arg0: i32) -> (i32, i32, i32) {
    %c0_i32 = arith.constant 0 : i32
    %c0_i32_0 = arith.constant 0 : i32
    %c0_i32_1 = arith.constant 0 : i32
    %c0_i32_2 = arith.constant 0 : i32
    return %c0_i32, %c0_i32_0, %c0_i32_1 : i32, i32, i32
  }
  func.func @transform_36(%arg0: i32) -> (i32, i32, i32) {
    %c0_i32 = arith.constant 0 : i32
    %c0_i32_0 = arith.constant 0 : i32
    %c0_i32_1 = arith.constant 0 : i32
    %c0_i32_2 = arith.constant 0 : i32
    return %c0_i32, %c0_i32_0, %c0_i32_1 : i32, i32, i32
  }
  func.func @transform_37(%arg0: i32) -> (i32, i32, i32) {
    %c0_i32 = arith.constant 0 : i32
    %c0_i32_0 = arith.constant 0 : i32
    %c0_i32_1 = arith.constant 0 : i32
    %c0_i32_2 = arith.constant 0 : i32
    return %c0_i32, %c0_i32_0, %c0_i32_1 : i32, i32, i32
  }
  func.func @transform_38(%arg0: i32) -> (i32, i32, i32) {
    %c0_i32 = arith.constant 0 : i32
    %c0_i32_0 = arith.constant 0 : i32
    %c0_i32_1 = arith.constant 0 : i32
    %c0_i32_2 = arith.constant 0 : i32
    return %c0_i32, %c0_i32_0, %c0_i32_1 : i32, i32, i32
  }
  func.func @transform_39(%arg0: i32) -> (i32, i32, i32) {
    %c0_i32 = arith.constant 0 : i32
    %c0_i32_0 = arith.constant 0 : i32
    %c0_i32_1 = arith.constant 0 : i32
    %c0_i32_2 = arith.constant 0 : i32
    return %c0_i32, %c0_i32_0, %c0_i32_1 : i32, i32, i32
  }
  func.func @transform_40(%arg0: i32) -> (i32, i32, i32) {
    %c0_i32 = arith.constant 0 : i32
    %c0_i32_0 = arith.constant 0 : i32
    %c0_i32_1 = arith.constant 0 : i32
    %c0_i32_2 = arith.constant 0 : i32
    return %c0_i32, %c0_i32_0, %c0_i32_1 : i32, i32, i32
  }
  func.func @transform_41(%arg0: i32) -> (i32, i32, i32) {
    %c0_i32 = arith.constant 0 : i32
    %c0_i32_0 = arith.constant 0 : i32
    %c0_i32_1 = arith.constant 0 : i32
    %c0_i32_2 = arith.constant 0 : i32
    return %c0_i32, %c0_i32_0, %c0_i32_1 : i32, i32, i32
  }
  func.func @transform_42(%arg0: i32) -> (i32, i32) {
    %c0_i32 = arith.constant 0 : i32
    %c0_i32_0 = arith.constant 0 : i32
    %c0_i32_1 = arith.constant 0 : i32
    return %c0_i32, %c0_i32_0 : i32, i32
  }
  func.func @transform_43(%arg0: i32) -> (i32, i32) {
    %c0_i32 = arith.constant 0 : i32
    %c0_i32_0 = arith.constant 0 : i32
    %c0_i32_1 = arith.constant 0 : i32
    return %c0_i32, %c0_i32_0 : i32, i32
  }
  func.func @transform_44(%arg0: i32) -> (i32, i32, i32) {
    %c0_i32 = arith.constant 0 : i32
    %c0_i32_0 = arith.constant 0 : i32
    %c0_i32_1 = arith.constant 0 : i32
    return %arg0, %c0_i32, %c0_i32_0 : i32, i32, i32
  }
}

</mosaic_0001>

<bundles_post_ra>
// kernel: cnn_yield_predictor.1
= control target key start
LH: loop header
LB: loop body
LE: loop exit
PB: predicated region body
PF: predicated region fallthrough
CT: control target
= control target key end

     0   :  { %s10629_s6 = smov 1   ;;  %s10630_s10 = smov 2   ;;  %s12045_s0 = inlined_call_operand.smem [shape: u32[45], index: -1, kind: input, shape index: {}] }
   0x1   :  { %s10732_s5 = sld [smem:[%s12045_s0]]   ;;  %s10631_s14 = smov 3  }
   0x2   :  { %s10737_s9 = sld [smem:[%s12045_s0 + %s10629_s6]]   ;;  %s10632_s18 = smov 4  }
   0x3   :  { %s10742_s13 = sld [smem:[%s12045_s0 + %s10630_s10]]   ;;  %s10633_s22 = smov 5  }
   0x4   :  { %s10747_s17 = sld [smem:[%s12045_s0 + %s10631_s14]]   ;;  %s10634_s26 = smov 6  }
   0x5   :  { %s10752_s21 = sld [smem:[%s12045_s0 + %s10632_s18]]   ;;  %s10635_s30 = smov 7  }
   0x6   :  { %s10757_s25 = sld [smem:[%s12045_s0 + %s10633_s22]]   ;;  %s10636_s4 = smov 8  }
   0x7   :  { %12069 = sst [smem:[#allocation65_spill]] %s10732_s5  ;;  %s10637_s10 = smov 9  }
   0x8   :  { %12070 = sst [smem:[#allocation66_spill]] %s10737_s9  ;;  %s10638_s15 = smov 10  }
   0x9   :  { %12071 = sst [smem:[#allocation67_spill]] %s10742_s13  ;;  %s10639_s20 = smov 11  }
   0xa   :  { %12072 = sst [smem:[#allocation68_spill]] %s10747_s17  ;;  %s10641_s1 = smov 13  }
   0xb   :  { %12073 = sst [smem:[#allocation69_spill]] %s10752_s21  ;;  %s10642_s7 = smov 14  }
   0xc   :  { %s10762_s29 = sld [smem:[%s12045_s0 + %s10634_s26]]   ;;  %s10640_s26 = smov 12  }
   0xd   :  { %s10767_s3 = sld [smem:[%s12045_s0 + %s10635_s30]]   ;;  %s10644_s22 = smov 16  }
   0xe   :  { %s10772_s8 = sld [smem:[%s12045_s0 + %s10636_s4]]   ;;  %s10645_s28 = smov 17  }
   0xf   :  { %s10777_s14 = sld [smem:[%s12045_s0 + %s10637_s10]]   ;;  %s10672_s23 = smov 44  }
  0x10   :  { %s10782_s19 = sld [smem:[%s12045_s0 + %s10638_s15]]   ;;  %s10643_s15 = smov 15  }
  0x11   :  { %s10787_s24 = sld [smem:[%s12045_s0 + %s10639_s20]]  }
  0x12   :  { %12074 = sst [smem:[#allocation70_spill]] %s10762_s29 }
  0x13   :  { %12075 = sst [smem:[#allocation71_spill]] %s10767_s3 }
  0x14   :  { %12076 = sst [smem:[#allocation72_spill]] %s10772_s8 }
  0x15   :  { %12077 = sst [smem:[#allocation73_spill]] %s10777_s14 }
  0x16   :  { %s10792_s30 = sld [smem:[%s12045_s0 + %s10640_s26]]  }
  0x17   :  { %12078 = sst [smem:[#allocation74_spill]] %s10787_s24 }
  0x18   :  { %s10797_s6 = sld [smem:[%s12045_s0 + %s10641_s1]]  }
  0x19   :  { %s10802_s12 = sld [smem:[%s12045_s0 + %s10642_s7]]   ;;  %s10646_s7 = smov 18  }
  0x1a   :  { %s10807_s20 = sld [smem:[%s12045_s0 + %s10643_s15]]   ;;  %s10647_s15 = smov 19  }
  0x1b   :  { %s10812_s27 = sld [smem:[%s12045_s0 + %s10644_s22]]   ;;  %s10648_s22 = smov 20  }
  0x1c   :  { %s10817_s4 = sld [smem:[%s12045_s0 + %s10645_s28]]   ;;  %s10649_s28 = smov 21  }
  0x1d   :  { %s10822_s17 = sld [smem:[%s12045_s0 + %s10646_s7]]   ;;  %s10650_s7 = smov 22  }
  0x1e   :  { %12079 = sst [smem:[#allocation75_spill]] %s10797_s6 }
  0x1f   :  { %12080 = sst [smem:[#allocation76_spill]] %s10802_s12 }
  0x20   :  { %s10827_s13 = sld [smem:[%s12045_s0 + %s10647_s15]]   ;;  %s10651_s15 = smov 23  }
  0x21   :  { %12081 = sst [smem:[#allocation77_spill]] %s10812_s27 }
  0x22   :  { %12082 = sst [smem:[#allocation78_spill]] %s10817_s4 }
  0x23   :  { %12083 = sst [smem:[#allocation79_spill]] %s10822_s17 }
  0x24   :  { %s10832_s6 = sld [smem:[%s12045_s0 + %s10648_s22]]   ;;  %s10652_s22 = smov 24  }
  0x25   :  { %s10837_s9 = sld [smem:[%s12045_s0 + %s10649_s28]]   ;;  %s10653_s28 = smov 25  }
  0x26   :  { %s10842_s29 = sld [smem:[%s12045_s0 + %s10650_s7]]   ;;  %s10654_s7 = smov 26  }
  0x27   :  { %s10847_s5 = sld [smem:[%s12045_s0 + %s10651_s15]]   ;;  %s10655_s15 = smov 27  }
  0x28   :  { %s10857_s17 = sld [smem:[%s12045_s0 + %s10653_s28]]   ;;  %s10657_s28 = smov 29  }
  0x29   :  { %s10867_s27 = sld [smem:[%s12045_s0 + %s10655_s15]]   ;;  %s10659_s15 = smov 31  }
  0x2a   :  { %12084 = sst [smem:[#allocation80_spill]] %s10832_s6 }
  0x2b   :  { %s10852_s6 = sld [smem:[%s12045_s0 + %s10652_s22]]   ;;  %s10656_s22 = smov 28  }
  0x2c   :  { %12085 = sst [smem:[#allocation81_spill]] %s10842_s29 }
  0x2d   :  { %12086 = sst [smem:[#allocation82_spill]] %s10847_s5 }
  0x2e   :  { %s10862_s29 = sld [smem:[%s12045_s0 + %s10654_s7]]   ;;  %s10658_s7 = smov 30  }
  0x2f   :  { %s10877_s12 = sld [smem:[%s12045_s0 + %s10657_s28]]   ;;  %s10661_s28 = smov 33  }
  0x30   :  { %s10887_s24 = sld [smem:[%s12045_s0 + %s10659_s15]]   ;;  %s10663_s15 = smov 35  }
  0x31   :  { %12087 = sst [smem:[#allocation83_spill]] %s10852_s6 }
  0x32   :  { %s10872_s6 = sld [smem:[%s12045_s0 + %s10656_s22]]   ;;  %s10660_s22 = smov 32  }
  0x33   :  { %s10897_s14 = sld [smem:[%s12045_s0 + %s10661_s28]]   ;;  %s10665_s28 = smov 37  }
  0x34   :  { %12088 = sst [smem:[#allocation84_spill]] %s10862_s29 }
  0x35   :  { %s10882_s29 = sld [smem:[%s12045_s0 + %s10658_s7]]   ;;  %s10662_s7 = smov 34  }
  0x36   :  { %s10907_s3 = sld [smem:[%s12045_s0 + %s10663_s15]]   ;;  %s10667_s15 = smov 39  }
  0x37   :  { %s10917_s21 = sld [smem:[%s12045_s0 + %s10665_s28]]   ;;  %s10669_s28 = smov 41  }
  0x38   :  { %12089 = sst [smem:[#allocation85_spill]] %s10872_s6 }
  0x39   :  { %s10892_s6 = sld [smem:[%s12045_s0 + %s10660_s22]]   ;;  %s10664_s22 = smov 36  }
  0x3b   :  { %12090 = sst [smem:[#allocation86_spill]] %s10882_s29 }
  0x3c   :  { %s10902_s29 = sld [smem:[%s12045_s0 + %s10662_s7]]   ;;  %s10666_s7 = smov 38  }
  0x3d   :  { %12093 = sst [smem:[#allocation89_spill]] %s10907_s3 }
  0x3e   :  { %12095 = sst [smem:[#allocation91_spill]] %s10917_s21 }
  0x3f   :  { %12091 = sst [smem:[#allocation87_spill]] %s10892_s6 }
  0x40   :  { %s10912_s6 = sld [smem:[%s12045_s0 + %s10664_s22]]   ;;  %s10668_s22 = smov 40  }
  0x41   :  { %s10927_s3 = sld [smem:[%s12045_s0 + %s10667_s15]]   ;;  %s10671_s15 = smov 43  }
  0x42   :  { %12092 = sst [smem:[#allocation88_spill]] %s10902_s29 }
  0x43   :  { %s10922_s29 = sld [smem:[%s12045_s0 + %s10666_s7]]   ;;  %s10670_s7 = smov 42  }
  0x44   :  { %s10937_s21 = sld [smem:[%s12045_s0 + %s10669_s28]]  }
  0x46   :  { %12094 = sst [smem:[#allocation90_spill]] %s10912_s6 }
  0x47   :  { %12097 = sst [smem:[#allocation93_spill]] %s10927_s3 }
  0x48   :  { %s10932_s6 = sld [smem:[%s12045_s0 + %s10668_s22]]  }
  0x49   :  { %12096 = sst [smem:[#allocation92_spill]] %s10922_s29 }
  0x4a   :  { %s10942_s29 = sld [smem:[%s12045_s0 + %s10670_s7]]  }
  0x4b   :  { %s7991_s3 = sld [smem:[%s12045_s0 + %s10671_s15]]  }
  0x4e   :  { %12098 = sst [smem:[#allocation94_spill]] %s10932_s6 }
  0x4f   :  { %s10950_s6 = sld [smem:[%s12045_s0 + %s10672_s23]]  }
  0x51   :  { %v94_v0 = vstv %s7991_s3 }
  0x52   :  { %95 = vst [vmem:[#allocation2] sm:$0x1] %v94_v0 }
  0x53   :  { %96 = vsyncpa [#allocation4], 0 }
  0x54   :  { %97 = vsyncpa [#allocation6], 0 }
  0x55   :  { %98 = vsyncpa [#allocation9], 0 }
  0x56   :  { %99 = vsyncpa [#allocation12], 0 }
  0x57   :  { %100 = vsyncpa [#allocation15], 0 }
  0x58   :  { %101 = vsyncpa [#allocation18], 0 }
  0x59   :  { %102 = vsyncpa [#allocation21], 0 }
  0x5a   :  { %103 = vsyncpa [#allocation24], 0 }
  0x5b   :  { %104 = vsyncpa [#allocation27], 0 }
  0x5c   :  { %105 = vsyncpa [#allocation30], 0 }
  0x5d   :  { %106 = vsyncpa [#allocation33], 0 }
  0x5e   :  { %107 = vsyncpa [#allocation36], 0 }
  0x5f   :  { %108 = vsyncpa [#allocation39], 0 }
  0x60   :  { %109 = vsyncpa [#allocation42], 0 }
  0x61   :  { %110 = vsyncpa [#allocation45], 0 }
  0x62   :  { %111 = vsyncpa [#allocation48], 0  ;;  %s10952_s0 = smov 0  }
  0x63 LB: > { %s10673_s3 = smov [#allocation5]   ;;  %s10958_s1 = sadd.s32 4294967295, %s10627_s0   ;;  %s10627_s0 = sphi %s10952_s0, %s117_s0  }
  0x64   : > { %s1118_s28 = sshll.u32 %s10673_s3, 4  ;;  %p7995_p0 = scmp.ge.s32.totalorder %s10627_s0, 1  ;;  %s1119_s28 = int_to_ptr.vmem [resolvable:$true] %s1118_s28 }
  0x65   : > { %p1092_p1 = scmp.lt.s32.totalorder %s10627_s0, 3  ;;  %p12053_p2 = scmp.eq.s32.totalorder %s10958_s1, 0 }
  0x66   : > { %s10674_s7 = smov [#allocation8]   ;;  %s10675_s15 = smov [#allocation11]  }
  0x67   : > { %p10963_p3 = pnand %p7995_p0, %p1092_p1  ;;  %s1142_s10 = sshll.u32 %s10674_s7, 4  ;;  %s10969_s10 = int_to_ptr.vmem [resolvable:$true] %s1142_s10 }
  0x68   : > { %s1166_s16 = sshll.u32 %s10675_s15, 4  ;;  %s10676_s18 = smov [#allocation14]   ;;  %s10977_s16 = int_to_ptr.vmem [resolvable:$true] %s1166_s16 }
  0x69   : > { %s12099_s2 = scalar_select %p10963_p3, 1, 0 }
  0x6a   : > { %p9292_p4 = pneg %p10963_p3  ;;  %s10979_s23 = sshll.u32 %s10676_s18, 4  ;;  %s1191_s23 = int_to_ptr.vmem [resolvable:$true] %s10979_s23 }
  0x6b   : > { %s9788_s26 = scalar_lea.vmem %s1119_s28, 48  ;;  %s9795_s3 = scalar_lea.vmem %s1119_s28, 64 }
  0x6c   : > { %p10973_p5 = pnand %p12053_p2, %p9292_p4  ;;  %p9789_p7 = scmp.ne.s32.totalorder %s1119_s28, %s9788_s26 }
  0x6d   : > { %p9796_p10 = scmp.lt.s32.totalorder %s1119_s28, %s1119_s28  ;;  %p9797_p11 = scmp.lt.s32.totalorder %s9795_s3, %s9788_s26 }
  0x6e   : > { %p10983_p6 = pneg %p10973_p5 }
  0x6f   : > { %p9798_p12 = por %p9797_p11, %p9796_p10 }
  0x70   : > { %p9791_p8 = pnand %p9789_p7, %p10983_p6 }
  0x72   : > { %p9792_p9 = pneg %p9791_p8 }
  0x74   : > { %p9799_p13 = pnand %p9798_p12, %p9792_p9 }
  0x76   : > { %9802 = shalt.err (!%p9799_p13)
}
  0x77   : > { %9298 = dma.hbm_to_vmem [thread:$0]  (!%p10973_p5), %s10757_s25, 48, %s1119_s28, [#allocation6]  }
  0x78   : > { %s9814_s7 = scalar_lea.vmem %s10969_s10, 1920  ;;  %p9822_p7 = scmp.lt.s32.totalorder %s10969_s10, %s10969_s10 }
  0x79   : > { %p9815_p0 = scmp.ne.s32.totalorder %s10969_s10, %s9814_s7  ;;  %p9823_p8 = scmp.lt.s32.totalorder %s9814_s7, %s9814_s7 }
  0x7b   : > { %p9817_p1 = pnand %p9815_p0, %p10983_p6  ;;  %p9824_p2 = por %p9823_p8, %p9822_p7 }
  0x7d   : > { %p9818_p4 = pneg %p9817_p1 }
  0x7f   : > { %p9825_p10 = pnand %p9824_p2, %p9818_p4 }
  0x81   : > { %9828 = shalt.err (!%p9825_p10)
}
  0x82   : > { %s12055_s15 = smov 64   ;;  %s12102_s8 = sld [smem:[#allocation72_spill]] }
  0x83   : > { %s12057_s28 = smov 4   ;;  %s9840_s18 = scalar_lea.vmem %s10977_s16, 1024 }
  0x84   : > { %p9841_p9 = scmp.ne.s32.totalorder %s10977_s16, %s9840_s18  ;;  %p9848_p12 = scmp.lt.s32.totalorder %s10977_s16, %s10977_s16 }
  0x85   : > { %p9849_p13 = scmp.lt.s32.totalorder %s9840_s18, %s9840_s18 }
  0x86   : > { %p9843_p11 = pnand %p9841_p9, %p10983_p6 }
  0x87   : > { %p9850_p0 = por %p9849_p13, %p9848_p12 }
  0x88   : > { %9304 = dma.hbm_to_vmem [thread:$0]  (!%p10973_p5), %s12102_s8, 1920, %s10969_s10, [#allocation9], %s12055_s15, %s12055_s15, %s12057_s28  }
  0x89   : > { %p9844_p2 = pneg %p9843_p11 }
  0x8b   : > { %p9851_p1 = pnand %p9850_p0, %p9844_p2 }
  0x8d   : > { %9854 = shalt.err (!%p9851_p1)
}
  0x8e   : > { %9310 = dma.hbm_to_vmem [thread:$0]  (!%p10973_p5), %s10782_s19, 1024, %s10977_s16, [#allocation12], %s12055_s15, %s12055_s15, %s12057_s28  }
  0x8f   : > { %s9866_s10 = scalar_lea.vmem %s1191_s23, 320  ;;  %p9874_p10 = scmp.lt.s32.totalorder %s1191_s23, %s1191_s23 }
  0x90   : > { %p9867_p4 = scmp.ne.s32.totalorder %s1191_s23, %s9866_s10  ;;  %p9875_p9 = scmp.lt.s32.totalorder %s9866_s10, %s9866_s10 }
  0x92   : > { %p9869_p7 = pnand %p9867_p4, %p10983_p6  ;;  %p9876_p11 = por %p9875_p9, %p9874_p10 }
  0x94   : > { %p9870_p8 = pneg %p9869_p7 }
  0x96   : > { %p9877_p2 = pnand %p9876_p11, %p9870_p8 }
  0x98   : > { %9880 = shalt.err (!%p9877_p2)
}
  0x99   : > { %9316 = dma.hbm_to_vmem [thread:$0]  (!%p10973_p5), %s10792_s30, 320, %s1191_s23, [#allocation15], %s12055_s15, %s12055_s15, %s12057_s28  }
  0x9a   : > { %s10679_s16 = smov [#allocation17]   ;;  %s10680_s3 = smov [#allocation20]  }
  0x9b   : > { %s1218_s26 = sshll.u32 %s10679_s16, 4  ;;  %s1242_s7 = sshll.u32 %s10680_s3, 4  ;;  %s1219_s26 = int_to_ptr.vmem [resolvable:$true] %s1218_s26  ;;  %s1243_s7 = int_to_ptr.vmem [resolvable:$true] %s1242_s7 }
  0x9c   : > { %s9892_s18 = scalar_lea.vmem %s1219_s26, 16  ;;  %s9899_s10 = scalar_lea.vmem %s1219_s26, 32 }
  0x9d   : > { %p9893_p12 = scmp.ne.s32.totalorder %s1219_s26, %s9892_s18  ;;  %p9900_p1 = scmp.lt.s32.totalorder %s1219_s26, %s1219_s26 }
  0x9e   : > { %p9901_p4 = scmp.lt.s32.totalorder %s9899_s10, %s9892_s18 }
  0x9f   : > { %p9895_p13 = pnand %p9893_p12, %p10983_p6 }
  0xa0   : > { %p9902_p7 = por %p9901_p4, %p9900_p1 }
  0xa1   : > { %p9896_p0 = pneg %p9895_p13 }
  0xa3   : > { %p9903_p8 = pnand %p9902_p7, %p9896_p0 }
  0xa5   : > { %9906 = shalt.err (!%p9903_p8)
}
  0xa6   : > { %9322 = dma.hbm_to_vmem [thread:$0]  (!%p10973_p5), %s10807_s20, 16, %s1219_s26, [#allocation18]  }
  0xa7   : > { %s9918_s23 = scalar_lea.vmem %s1243_s7, 16  ;;  %s9925_s16 = scalar_lea.vmem %s1243_s7, 32 }
  0xa8   : > { %p9919_p10 = scmp.ne.s32.totalorder %s1243_s7, %s9918_s23  ;;  %p9926_p2 = scmp.lt.s32.totalorder %s1243_s7, %s1243_s7 }
  0xa9   : > { %p9927_p12 = scmp.lt.s32.totalorder %s9925_s16, %s9918_s23 }
  0xaa   : > { %p9921_p9 = pnand %p9919_p10, %p10983_p6 }
  0xab   : > { %p9928_p13 = por %p9927_p12, %p9926_p2 }
  0xac   : > { %p9922_p11 = pneg %p9921_p9 }
  0xae   : > { %p9929_p3 = pnand %p9928_p13, %p9922_p11 }
  0xb0   : > { %9932 = shalt.err (!%p9929_p3)
}
  0xb1   : > { %s12103_s4 = sld [smem:[#allocation78_spill]]  ;;  %s10681_s3 = smov [#allocation23]  }
  0xb2   : > { %s1266_s18 = sshll.u32 %s10681_s3, 4  ;;  %s10682_s26 = smov [#allocation26]   ;;  %s1267_s18 = int_to_ptr.vmem [resolvable:$true] %s1266_s18 }
  0xb3   : > { %s1290_s10 = sshll.u32 %s10682_s26, 4  ;;  %s9944_s15 = scalar_lea.vmem %s1267_s18, 16  ;;  %s1291_s10 = int_to_ptr.vmem [resolvable:$true] %s1290_s10 }
  0xb4   : > { %p9945_p0 = scmp.ne.s32.totalorder %s1267_s18, %s9944_s15  ;;  %s9951_s28 = scalar_lea.vmem %s1267_s18, 32 }
  0xb5   : > { %p9952_p7 = scmp.lt.s32.totalorder %s1267_s18, %s1267_s18  ;;  %p9953_p8 = scmp.lt.s32.totalorder %s9951_s28, %s9944_s15 }
  0xb6   : > { %p9947_p1 = pnand %p9945_p0, %p10983_p6 }
  0xb7   : > { %9328 = dma.hbm_to_vmem [thread:$0]  (!%p10973_p5), %s12103_s4, 16, %s1243_s7, [#allocation21]  }
  0xb8   : > { %p9948_p4 = pneg %p9947_p1  ;;  %p9954_p10 = por %p9953_p8, %p9952_p7 }
  0xba   : > { %p9955_p3 = pnand %p9954_p10, %p9948_p4 }
  0xbc   : > { %9958 = shalt.err (!%p9955_p3)
}
  0xbd   : > { %9334 = dma.hbm_to_vmem [thread:$0]  (!%p10973_p5), %s10827_s13, 16, %s1267_s18, [#allocation24]  }
  0xbe   : > { %s9970_s7 = scalar_lea.vmem %s1291_s10, 16  ;;  %s9977_s23 = scalar_lea.vmem %s1291_s10, 32 }
  0xbf   : > { %p9971_p9 = scmp.ne.s32.totalorder %s1291_s10, %s9970_s7  ;;  %p9978_p12 = scmp.lt.s32.totalorder %s1291_s10, %s1291_s10 }
  0xc0   : > { %p9979_p13 = scmp.lt.s32.totalorder %s9977_s23, %s9970_s7 }
  0xc1   : > { %p9973_p11 = pnand %p9971_p9, %p10983_p6 }
  0xc2   : > { %p9980_p0 = por %p9979_p13, %p9978_p12 }
  0xc3   : > { %p9974_p2 = pneg %p9973_p11 }
  0xc5   : > { %p9981_p1 = pnand %p9980_p0, %p9974_p2 }
  0xc7   : > { %9984 = shalt.err (!%p9981_p1)
}
  0xc8   : > { %9340 = dma.hbm_to_vmem [thread:$0]  (!%p10973_p5), %s10837_s9, 16, %s1291_s10, [#allocation27]  }
  0xc9   : > { %s10683_s15 = smov [#allocation29]   ;;  %s10684_s16 = smov [#allocation32]  }
  0xca   : > { %s1314_s28 = sshll.u32 %s10683_s15, 4  ;;  %s1338_s3 = sshll.u32 %s10684_s16, 4  ;;  %s1315_s28 = int_to_ptr.vmem [resolvable:$true] %s1314_s28  ;;  %s1339_s3 = int_to_ptr.vmem [resolvable:$true] %s1338_s3 }
  0xcb   : > { %s9996_s18 = scalar_lea.vmem %s1315_s28, 16  ;;  %s10003_s26 = scalar_lea.vmem %s1315_s28, 32 }
  0xcc   : > { %p9997_p4 = scmp.ne.s32.totalorder %s1315_s28, %s9996_s18  ;;  %p10004_p10 = scmp.lt.s32.totalorder %s1315_s28, %s1315_s28 }
  0xcd   : > { %p10005_p3 = scmp.lt.s32.totalorder %s10003_s26, %s9996_s18 }
  0xce   : > { %p9999_p7 = pnand %p9997_p4, %p10983_p6 }
  0xcf   : > { %p10006_p9 = por %p10005_p3, %p10004_p10 }
  0xd0   : > { %p10000_p8 = pneg %p9999_p7 }
  0xd2   : > { %p10007_p11 = pnand %p10006_p9, %p10000_p8 }
  0xd4   : > { %10010 = shalt.err (!%p10007_p11)
}
  0xd5   : > { %s12104_s5 = sld [smem:[#allocation82_spill]]  ;;  %s10022_s10 = scalar_lea.vmem %s1339_s3, 16 }
  0xd6   : > { %p10023_p2 = scmp.ne.s32.totalorder %s1339_s3, %s10022_s10  ;;  %s10029_s7 = scalar_lea.vmem %s1339_s3, 32 }
  0xd7   : > { %p10030_p0 = scmp.lt.s32.totalorder %s1339_s3, %s1339_s3  ;;  %p10031_p1 = scmp.lt.s32.totalorder %s10029_s7, %s10022_s10 }
  0xd8   : > { %p10025_p12 = pnand %p10023_p2, %p10983_p6 }
  0xd9   : > { %p10032_p4 = por %p10031_p1, %p10030_p0 }
  0xda   : > { %p10026_p13 = pneg %p10025_p12 }
  0xdb   : > { %9346 = dma.hbm_to_vmem [thread:$0]  (!%p10973_p5), %s12104_s5, 16, %s1315_s28, [#allocation30]  }
  0xdc   : > { %p10033_p7 = pnand %p10032_p4, %p10026_p13 }
  0xde   : > { %10036 = shalt.err (!%p10033_p7)
}
  0xdf   : > { %9352 = dma.hbm_to_vmem [thread:$0]  (!%p10973_p5), %s10857_s17, 16, %s1339_s3, [#allocation33]  }
  0xe0   : > { %s10685_s23 = smov [#allocation35]   ;;  %s10686_s28 = smov [#allocation38]  }
  0xe1   : > { %s1361_s15 = sshll.u32 %s10685_s23, 4  ;;  %s1388_s16 = sshll.u32 %s10686_s28, 4  ;;  %s1362_s15 = int_to_ptr.vmem [resolvable:$true] %s1361_s15  ;;  %s1389_s16 = int_to_ptr.vmem [resolvable:$true] %s1388_s16 }
  0xe2   : > { %s10048_s18 = scalar_lea.vmem %s1362_s15, 320  ;;  %p10056_p9 = scmp.lt.s32.totalorder %s1362_s15, %s1362_s15 }
  0xe3   : > { %p10049_p8 = scmp.ne.s32.totalorder %s1362_s15, %s10048_s18  ;;  %p10057_p11 = scmp.lt.s32.totalorder %s10048_s18, %s10048_s18 }
  0xe5   : > { %p10051_p10 = pnand %p10049_p8, %p10983_p6  ;;  %p10058_p2 = por %p10057_p11, %p10056_p9 }
  0xe7   : > { %p10052_p3 = pneg %p10051_p10 }
  0xe9   : > { %p10059_p12 = pnand %p10058_p2, %p10052_p3 }
  0xeb   : > { %10062 = shalt.err (!%p10059_p12)
}
  0xec   : > { %s12105_s26 = smov 4   ;;  %s12106_s10 = smov 64  }
  0xed   : > { %9358 = dma.hbm_to_vmem [thread:$0]  (!%p10973_p5), %s10867_s27, 320, %s1362_s15, [#allocation36], %s12106_s10, %s12106_s10, %s12105_s26  }
  0xee   : > { %s10074_s3 = scalar_lea.vmem %s1389_s16, 16  ;;  %s10081_s7 = scalar_lea.vmem %s1389_s16, 32 }
  0xef   : > { %p10075_p13 = scmp.ne.s32.totalorder %s1389_s16, %s10074_s3  ;;  %p10082_p4 = scmp.lt.s32.totalorder %s1389_s16, %s1389_s16 }
  0xf0   : > { %p10083_p7 = scmp.lt.s32.totalorder %s10081_s7, %s10074_s3 }
  0xf1   : > { %p10077_p0 = pnand %p10075_p13, %p10983_p6 }
  0xf2   : > { %p10084_p8 = por %p10083_p7, %p10082_p4 }
  0xf3   : > { %p10078_p1 = pneg %p10077_p0 }
  0xf5   : > { %p10085_p10 = pnand %p10084_p8, %p10078_p1 }
  0xf7   : > { %10088 = shalt.err (!%p10085_p10)
}
  0xf8   : > { %9364 = dma.hbm_to_vmem [thread:$0]  (!%p10973_p5), %s10877_s12, 16, %s1389_s16, [#allocation39]  }
  0xf9   : > { %s10687_s23 = smov [#allocation41]  }
  0xfa   : > { %s1411_s28 = sshll.u32 %s10687_s23, 4  ;;  %s1412_s28 = int_to_ptr.vmem [resolvable:$true] %s1411_s28 }
  0xfb   : > { %s10100_s15 = scalar_lea.vmem %s1412_s28, 48  ;;  %s10107_s18 = scalar_lea.vmem %s1412_s28, 64 }
  0xfc   : > { %p10101_p3 = scmp.ne.s32.totalorder %s1412_s28, %s10100_s15  ;;  %p10108_p2 = scmp.lt.s32.totalorder %s1412_s28, %s1412_s28 }
  0xfd   : > { %p10109_p12 = scmp.lt.s32.totalorder %s10107_s18, %s10100_s15 }
  0xfe   : > { %p10103_p9 = pnand %p10101_p3, %p10983_p6 }
  0xff   : > { %p10110_p13 = por %p10109_p12, %p10108_p2 }
 0x100   : > { %p10104_p11 = pneg %p10103_p9 }
 0x102   : > { %p10111_p0 = pnand %p10110_p13, %p10104_p11 }
 0x104   : > { %10114 = shalt.err (!%p10111_p0)
}
 0x105   : > { %s10688_s3 = smov 16   ;;  %s10689_s7 = smov 1  }
 0x106   : > { %9370 = dma.hbm_to_vmem [thread:$0]  (!%p10973_p5), %s10887_s24, 48, %s1412_s28, [#allocation42], %s10688_s3, %s10688_s3, %s10689_s7  }
 0x107   : > { %s10690_s16 = smov [#allocation44]   ;;  %s10691_s4 = smov [#allocation3]  }
 0x108   : > { %s1437_s23 = sshll.u32 %s10690_s16, 4  ;;  %s1104_s5 = sshll.u32 %s10691_s4, 4  ;;  %s1438_s23 = int_to_ptr.vmem [resolvable:$true] %s1437_s23  ;;  %s1105_s5 = int_to_ptr.vmem [resolvable:$true] %s1104_s5 }
 0x109   : > { %s10126_s8 = scalar_lea.vmem %s1438_s23, 48  ;;  %s10133_s15 = scalar_lea.vmem %s1438_s23, 64 }
 0x10a   : > { %p10127_p1 = scmp.ne.s32.totalorder %s1438_s23, %s10126_s8  ;;  %p10134_p8 = scmp.lt.s32.totalorder %s1438_s23, %s1438_s23 }
 0x10b   : > { %p10135_p10 = scmp.lt.s32.totalorder %s10133_s15, %s10126_s8 }
 0x10c   : > { %p10129_p4 = pnand %p10127_p1, %p10983_p6 }
 0x10d   : > { %p10136_p3 = por %p10135_p10, %p10134_p8 }
 0x10e   : > { %p10130_p7 = pneg %p10129_p4 }
 0x110   : > { %p10137_p9 = pnand %p10136_p3, %p10130_p7 }
 0x112   : > { %10140 = shalt.err (!%p10137_p9)
}
 0x113   : > { %9376 = dma.hbm_to_vmem [thread:$0]  (!%p10973_p5), %s10897_s14, 48, %s1438_s23, [#allocation45], %s10688_s3, %s10688_s3, %s10689_s7  }
 0x114   : > { %s10152_s28 = scalar_lea.vmem %s1105_s5, 1344  ;;  %p10160_p13 = scmp.lt.s32.totalorder %s1105_s5, %s1105_s5 }
 0x115   : > { %p10153_p11 = scmp.ne.s32.totalorder %s1105_s5, %s10152_s28  ;;  %p10161_p0 = scmp.lt.s32.totalorder %s10152_s28, %s10152_s28 }
 0x117   : > { %p10155_p2 = pnand %p10153_p11, %p10983_p6  ;;  %p10162_p1 = por %p10161_p0, %p10160_p13 }
 0x119   : > { %p10156_p12 = pneg %p10155_p2 }
 0x11b   : > { %p10163_p4 = pnand %p10162_p1, %p10156_p12 }
 0x11d   : > { %10166 = shalt.err (!%p10163_p4)
}
 0x11e   : > { %s10692_s4 = smov 192   ;;  %s12107_s8 = sld [smem:[#allocation69_spill]] }
 0x11f   : > { %s10693_s18 = smov 12   ;;  %s10694_s16 = smov [#allocation7]  }
 0x120   : > { %s1132_s15 = sshll.u32 %s10694_s16, 4  ;;  %s10695_s3 = smov [#allocation10]   ;;  %s1133_s15 = int_to_ptr.vmem [resolvable:$true] %s1132_s15 }
 0x121   : > { %s1156_s7 = sshll.u32 %s10695_s3, 4  ;;  %s10178_s23 = scalar_lea.vmem %s1133_s15, 32  ;;  %s1157_s7 = int_to_ptr.vmem [resolvable:$true] %s1156_s7 }
 0x122   : > { %p10179_p7 = scmp.ne.s32.totalorder %s1133_s15, %s10178_s23  ;;  %p10186_p3 = scmp.lt.s32.totalorder %s1133_s15, %s1133_s15 }
 0x123   : > { %p10187_p9 = scmp.lt.s32.totalorder %s10178_s23, %s10178_s23 }
 0x124   : > { %9295 = dma.hbm_to_vmem [thread:$0]  (!%p10973_p5), %s12107_s8, 1344, %s1105_s5, [#allocation4], %s10692_s4, %s10692_s4, %s10693_s18  }
 0x125   : > { %p10181_p8 = pnand %p10179_p7, %p10983_p6  ;;  %p10188_p11 = por %p10187_p9, %p10186_p3 }
 0x127   : > { %p10182_p10 = pneg %p10181_p8 }
 0x129   : > { %p10189_p2 = pnand %p10188_p11, %p10182_p10 }
 0x12b   : > { %10192 = shalt.err (!%p10189_p2)
}
 0x12c   : > { %s12108_s28 = sld [smem:[#allocation71_spill]]  ;;  %s10204_s5 = scalar_lea.vmem %s1157_s7, 16 }
 0x12d   : > { %p10205_p12 = scmp.ne.s32.totalorder %s1157_s7, %s10204_s5  ;;  %s10211_s4 = scalar_lea.vmem %s1157_s7, 32 }
 0x12e   : > { %p10212_p1 = scmp.lt.s32.totalorder %s1157_s7, %s1157_s7  ;;  %p10213_p4 = scmp.lt.s32.totalorder %s10211_s4, %s10204_s5 }
 0x12f   : > { %p10207_p13 = pnand %p10205_p12, %p10983_p6 }
 0x130   : > { %p10214_p7 = por %p10213_p4, %p10212_p1 }
 0x131   : > { %p10208_p0 = pneg %p10207_p13 }
 0x132   : > { %9301 = dma.hbm_to_vmem [thread:$0]  (!%p10973_p5), %s12108_s28, 32, %s1133_s15, [#allocation6]  }
 0x133   : > { %p10215_p8 = pnand %p10214_p7, %p10208_p0 }
 0x135   : > { %10218 = shalt.err (!%p10215_p8)
}
 0x136   : > { %s12109_s8 = sld [smem:[#allocation73_spill]]  ;;  %s10696_s18 = smov [#allocation13]  }
 0x137   : > { %s1180_s16 = sshll.u32 %s10696_s18, 4  ;;  %s10697_s3 = smov [#allocation16]   ;;  %s1181_s16 = int_to_ptr.vmem [resolvable:$true] %s1180_s16 }
 0x138   : > { %s1207_s15 = sshll.u32 %s10697_s3, 4  ;;  %s10230_s23 = scalar_lea.vmem %s1181_s16, 16  ;;  %s1208_s15 = int_to_ptr.vmem [resolvable:$true] %s1207_s15 }
 0x139   : > { %p10231_p10 = scmp.ne.s32.totalorder %s1181_s16, %s10230_s23  ;;  %s10237_s28 = scalar_lea.vmem %s1181_s16, 32 }
 0x13a   : > { %p10238_p11 = scmp.lt.s32.totalorder %s1181_s16, %s1181_s16  ;;  %p10239_p2 = scmp.lt.s32.totalorder %s10237_s28, %s10230_s23 }
 0x13b   : > { %p10233_p3 = pnand %p10231_p10, %p10983_p6 }
 0x13c   : > { %9307 = dma.hbm_to_vmem [thread:$0]  (!%p10973_p5), %s12109_s8, 16, %s1157_s7, [#allocation9]  }
 0x13d   : > { %p10234_p9 = pneg %p10233_p3  ;;  %p10240_p12 = por %p10239_p2, %p10238_p11 }
 0x13f   : > { %p10241_p13 = pnand %p10240_p12, %p10234_p9 }
 0x141   : > { %10244 = shalt.err (!%p10241_p13)
}
 0x142   : > { %s12110_s7 = sld [smem:[#allocation74_spill]]  ;;  %s10256_s5 = scalar_lea.vmem %s1208_s15, 64 }
 0x143   : > { %p10257_p0 = scmp.ne.s32.totalorder %s1208_s15, %s10256_s5  ;;  %p10264_p7 = scmp.lt.s32.totalorder %s1208_s15, %s1208_s15 }
 0x144   : > { %p10265_p8 = scmp.lt.s32.totalorder %s10256_s5, %s10256_s5 }
 0x145   : > { %p10259_p1 = pnand %p10257_p0, %p10983_p6 }
 0x146   : > { %p10266_p10 = por %p10265_p8, %p10264_p7 }
 0x147   : > { %p10260_p4 = pneg %p10259_p1 }
 0x148   : > { %9313 = dma.hbm_to_vmem [thread:$0]  (!%p10973_p5), %s12110_s7, 16, %s1181_s16, [#allocation12]  }
 0x149   : > { %p10267_p3 = pnand %p10266_p10, %p10260_p4 }
 0x14b   : > { %10270 = shalt.err (!%p10267_p3)
}
 0x14c   : > { %s12111_s4 = sld [smem:[#allocation76_spill]]  ;;  %s10698_s8 = smov [#allocation19]  }
 0x14d   : > { %s1228_s18 = sshll.u32 %s10698_s8, 4  ;;  %s10699_s3 = smov [#allocation22]   ;;  %s1229_s18 = int_to_ptr.vmem [resolvable:$true] %s1228_s18 }
 0x14e   : > { %s1252_s23 = sshll.u32 %s10699_s3, 4  ;;  %s10282_s16 = scalar_lea.vmem %s1229_s18, 192  ;;  %s1253_s23 = int_to_ptr.vmem [resolvable:$true] %s1252_s23 }
 0x14f   : > { %p10283_p9 = scmp.ne.s32.totalorder %s1229_s18, %s10282_s16  ;;  %p10290_p12 = scmp.lt.s32.totalorder %s1229_s18, %s1229_s18 }
 0x150   : > { %p10291_p13 = scmp.lt.s32.totalorder %s10282_s16, %s10282_s16 }
 0x151   : > { %p10285_p11 = pnand %p10283_p9, %p10983_p6 }
 0x152   : > { %9319 = dma.hbm_to_vmem [thread:$0]  (!%p10973_p5), %s12111_s4, 64, %s1208_s15, [#allocation15]  }
 0x153   : > { %p10286_p2 = pneg %p10285_p11  ;;  %p10292_p0 = por %p10291_p13, %p10290_p12 }
 0x155   : > { %p10293_p1 = pnand %p10292_p0, %p10286_p2 }
 0x157   : > { %10296 = shalt.err (!%p10293_p1)
}
 0x158   : > { %s12112_s15 = sld [smem:[#allocation77_spill]]  ;;  %s10308_s28 = scalar_lea.vmem %s1253_s23, 192 }
 0x159   : > { %p10309_p4 = scmp.ne.s32.totalorder %s1253_s23, %s10308_s28  ;;  %p10316_p10 = scmp.lt.s32.totalorder %s1253_s23, %s1253_s23 }
 0x15a   : > { %p10317_p3 = scmp.lt.s32.totalorder %s10308_s28, %s10308_s28 }
 0x15b   : > { %p10311_p7 = pnand %p10309_p4, %p10983_p6 }
 0x15c   : > { %p10318_p9 = por %p10317_p3, %p10316_p10 }
 0x15d   : > { %p10312_p8 = pneg %p10311_p7 }
 0x15e   : > { %9325 = dma.hbm_to_vmem [thread:$0]  (!%p10973_p5), %s12112_s15, 192, %s1229_s18, [#allocation18], %s12106_s10, %s12106_s10, %s12105_s26  }
 0x15f   : > { %p10319_p11 = pnand %p10318_p9, %p10312_p8 }
 0x161   : > { %10322 = shalt.err (!%p10319_p11)
}
 0x162   : > { %s12113_s7 = sld [smem:[#allocation79_spill]]  ;;  %s10700_s5 = smov [#allocation25]  }
 0x163   : > { %s1276_s4 = sshll.u32 %s10700_s5, 4  ;;  %s10701_s8 = smov [#allocation28]   ;;  %s1277_s4 = int_to_ptr.vmem [resolvable:$true] %s1276_s4 }
 0x164   : > { %s1300_s18 = sshll.u32 %s10701_s8, 4  ;;  %s10334_s3 = scalar_lea.vmem %s1277_s4, 192  ;;  %s1301_s18 = int_to_ptr.vmem [resolvable:$true] %s1300_s18 }
 0x165   : > { %p10335_p2 = scmp.ne.s32.totalorder %s1277_s4, %s10334_s3  ;;  %p10342_p0 = scmp.lt.s32.totalorder %s1277_s4, %s1277_s4 }
 0x166   : > { %p10343_p1 = scmp.lt.s32.totalorder %s10334_s3, %s10334_s3 }
 0x167   : > { %p10337_p12 = pnand %p10335_p2, %p10983_p6 }
 0x168   : > { %9331 = dma.hbm_to_vmem [thread:$0]  (!%p10973_p5), %s12113_s7, 192, %s1253_s23, [#allocation21], %s12106_s10, %s12106_s10, %s12105_s26  }
 0x169   : > { %p10338_p13 = pneg %p10337_p12  ;;  %p10344_p4 = por %p10343_p1, %p10342_p0 }
 0x16b   : > { %p10345_p7 = pnand %p10344_p4, %p10338_p13 }
 0x16d   : > { %10348 = shalt.err (!%p10345_p7)
}
 0x16e   : > { %s12114_s23 = sld [smem:[#allocation80_spill]]  ;;  %s10360_s16 = scalar_lea.vmem %s1301_s18, 1152 }
 0x16f   : > { %p10361_p8 = scmp.ne.s32.totalorder %s1301_s18, %s10360_s16  ;;  %p10368_p9 = scmp.lt.s32.totalorder %s1301_s18, %s1301_s18 }
 0x170   : > { %p10369_p11 = scmp.lt.s32.totalorder %s10360_s16, %s10360_s16 }
 0x171   : > { %p10363_p10 = pnand %p10361_p8, %p10983_p6 }
 0x172   : > { %p10370_p2 = por %p10369_p11, %p10368_p9 }
 0x173   : > { %p10364_p3 = pneg %p10363_p10 }
 0x174   : > { %9337 = dma.hbm_to_vmem [thread:$0]  (!%p10973_p5), %s12114_s23, 192, %s1277_s4, [#allocation24], %s12106_s10, %s12106_s10, %s12105_s26  }
 0x175   : > { %p10371_p12 = pnand %p10370_p2, %p10364_p3 }
 0x177   : > { %10374 = shalt.err (!%p10371_p12)
}
 0x178   : > { %s12115_s15 = sld [smem:[#allocation81_spill]]  ;;  %s10702_s28 = smov [#allocation31]  }
 0x179   : > { %s1324_s7 = sshll.u32 %s10702_s28, 4  ;;  %s10703_s5 = smov [#allocation34]   ;;  %s1325_s7 = int_to_ptr.vmem [resolvable:$true] %s1324_s7 }
 0x17a   : > { %s1348_s4 = sshll.u32 %s10703_s5, 4  ;;  %s10386_s8 = scalar_lea.vmem %s1325_s7, 1408  ;;  %s1349_s4 = int_to_ptr.vmem [resolvable:$true] %s1348_s4 }
 0x17b   : > { %p10387_p13 = scmp.ne.s32.totalorder %s1325_s7, %s10386_s8  ;;  %p10394_p4 = scmp.lt.s32.totalorder %s1325_s7, %s1325_s7 }
 0x17c   : > { %p10395_p7 = scmp.lt.s32.totalorder %s10386_s8, %s10386_s8 }
 0x17d   : > { %p10389_p0 = pnand %p10387_p13, %p10983_p6 }
 0x17e   : > { %9343 = dma.hbm_to_vmem [thread:$0]  (!%p10973_p5), %s12115_s15, 1152, %s1301_s18, [#allocation27], %s12106_s10, %s12106_s10, %s12105_s26  }
 0x17f   : > { %p10390_p1 = pneg %p10389_p0  ;;  %p10396_p8 = por %p10395_p7, %p10394_p4 }
 0x181   : > { %p10397_p10 = pnand %p10396_p8, %p10390_p1 }
 0x183   : > { %10400 = shalt.err (!%p10397_p10)
}
 0x184   : > { %s12116_s18 = sld [smem:[#allocation83_spill]]  ;;  %s10412_s3 = scalar_lea.vmem %s1349_s4, 512 }
 0x185   : > { %p10413_p3 = scmp.ne.s32.totalorder %s1349_s4, %s10412_s3  ;;  %p10420_p2 = scmp.lt.s32.totalorder %s1349_s4, %s1349_s4 }
 0x186   : > { %p10421_p12 = scmp.lt.s32.totalorder %s10412_s3, %s10412_s3 }
 0x187   : > { %p10415_p9 = pnand %p10413_p3, %p10983_p6 }
 0x188   : > { %p10422_p13 = por %p10421_p12, %p10420_p2 }
 0x189   : > { %p10416_p11 = pneg %p10415_p9 }
 0x18a   : > { %9349 = dma.hbm_to_vmem [thread:$0]  (!%p10973_p5), %s12116_s18, 1408, %s1325_s7, [#allocation30], %s12106_s10, %s12106_s10, %s12105_s26  }
 0x18b   : > { %p10423_p0 = pnand %p10422_p13, %p10416_p11 }
 0x18d   : > { %10426 = shalt.err (!%p10423_p0)
}
 0x18e   : > { %s12117_s23 = sld [smem:[#allocation84_spill]]  ;;  %s10704_s16 = smov [#allocation37]  }
 0x18f   : > { %s1374_s15 = sshll.u32 %s10704_s16, 4  ;;  %s10705_s28 = smov [#allocation40]   ;;  %s1375_s15 = int_to_ptr.vmem [resolvable:$true] %s1374_s15 }
 0x190   : > { %s1398_s7 = sshll.u32 %s10705_s28, 4  ;;  %s10438_s5 = scalar_lea.vmem %s1375_s15, 192  ;;  %s1399_s7 = int_to_ptr.vmem [resolvable:$true] %s1398_s7 }
 0x191   : > { %p10439_p1 = scmp.ne.s32.totalorder %s1375_s15, %s10438_s5  ;;  %p10446_p8 = scmp.lt.s32.totalorder %s1375_s15, %s1375_s15 }
 0x192   : > { %p10447_p10 = scmp.lt.s32.totalorder %s10438_s5, %s10438_s5 }
 0x193   : > { %p10441_p4 = pnand %p10439_p1, %p10983_p6 }
 0x194   : > { %9355 = dma.hbm_to_vmem [thread:$0]  (!%p10973_p5), %s12117_s23, 512, %s1349_s4, [#allocation33], %s12106_s10, %s12106_s10, %s12105_s26  }
 0x195   : > { %p10442_p7 = pneg %p10441_p4  ;;  %p10448_p3 = por %p10447_p10, %p10446_p8 }
 0x197   : > { %p10449_p9 = pnand %p10448_p3, %p10442_p7 }
 0x199   : > { %10452 = shalt.err (!%p10449_p9)
}
 0x19a   : > { %s12118_s4 = sld [smem:[#allocation85_spill]]  ;;  %s10464_s8 = scalar_lea.vmem %s1399_s7, 768 }
 0x19b   : > { %p10465_p11 = scmp.ne.s32.totalorder %s1399_s7, %s10464_s8  ;;  %p10472_p13 = scmp.lt.s32.totalorder %s1399_s7, %s1399_s7 }
 0x19c   : > { %p10473_p0 = scmp.lt.s32.totalorder %s10464_s8, %s10464_s8 }
 0x19d   : > { %p10467_p2 = pnand %p10465_p11, %p10983_p6 }
 0x19e   : > { %p10474_p1 = por %p10473_p0, %p10472_p13 }
 0x19f   : > { %p10468_p12 = pneg %p10467_p2 }
 0x1a0   : > { %9361 = dma.hbm_to_vmem [thread:$0]  (!%p10973_p5), %s12118_s4, 192, %s1375_s15, [#allocation36], %s12106_s10, %s12106_s10, %s12105_s26  }
 0x1a1   : > { %p10475_p4 = pnand %p10474_p1, %p10468_p12 }
 0x1a3   : > { %10478 = shalt.err (!%p10475_p4)
}
 0x1a4   : > { %s12119_s18 = sld [smem:[#allocation86_spill]]  ;;  %s10706_s3 = smov [#allocation43]  }
 0x1a5   : > { %s1424_s23 = sshll.u32 %s10706_s3, 4  ;;  %s10707_s16 = smov [#allocation46]   ;;  %s1425_s23 = int_to_ptr.vmem [resolvable:$true] %s1424_s23 }
 0x1a6   : > { %s1462_s15 = sshll.u32 %s10707_s16, 4  ;;  %s10490_s28 = scalar_lea.vmem %s1425_s23, 768  ;;  %s1463_s15 = int_to_ptr.vmem [resolvable:$true] %s1462_s15 }
 0x1a7   : > { %p10491_p7 = scmp.ne.s32.totalorder %s1425_s23, %s10490_s28  ;;  %p10498_p3 = scmp.lt.s32.totalorder %s1425_s23, %s1425_s23 }
 0x1a8   : > { %p10499_p9 = scmp.lt.s32.totalorder %s10490_s28, %s10490_s28 }
 0x1a9   : > { %p10493_p8 = pnand %p10491_p7, %p10983_p6 }
 0x1aa   : > { %9367 = dma.hbm_to_vmem [thread:$0]  (!%p10973_p5), %s12119_s18, 768, %s1399_s7, [#allocation39], %s12106_s10, %s12106_s10, %s12105_s26  }
 0x1ab   : > { %p10494_p10 = pneg %p10493_p8  ;;  %p10500_p11 = por %p10499_p9, %p10498_p3 }
 0x1ad   : > { %p10501_p2 = pnand %p10500_p11, %p10494_p10 }
 0x1af   : > { %10504 = shalt.err (!%p10501_p2)
}
 0x1b0   : > { %s12120_s7 = sld [smem:[#allocation87_spill]]  ;;  %s10516_s5 = scalar_lea.vmem %s1463_s15, 1536 }
 0x1b1   : > { %p10517_p12 = scmp.ne.s32.totalorder %s1463_s15, %s10516_s5  ;;  %p10524_p1 = scmp.lt.s32.totalorder %s1463_s15, %s1463_s15 }
 0x1b2   : > { %p10525_p4 = scmp.lt.s32.totalorder %s10516_s5, %s10516_s5 }
 0x1b3   : > { %p10519_p13 = pnand %p10517_p12, %p10983_p6 }
 0x1b4   : > { %p10526_p7 = por %p10525_p4, %p10524_p1 }
 0x1b5   : > { %p10520_p0 = pneg %p10519_p13 }
 0x1b6   : > { %9373 = dma.hbm_to_vmem [thread:$0]  (!%p10973_p5), %s12120_s7, 768, %s1425_s23, [#allocation42], %s12106_s10, %s12106_s10, %s12105_s26  }
 0x1b7   : > { %p10527_p8 = pnand %p10526_p7, %p10520_p0 }
 0x1b9   : > { %10530 = shalt.err (!%p10527_p8)
}
 0x1ba   : > { %s12121_s4 = sld [smem:[#allocation92_spill]]  ;;  %s10708_s8 = smov [#allocation47]  }
 0x1bb   : > { %s1484_s18 = sshll.u32 %s10708_s8, 4  ;;  %s1485_s18 = int_to_ptr.vmem [resolvable:$true] %s1484_s18 }
 0x1bc   : > { %s10542_s3 = scalar_lea.vmem %s1485_s18, 256  ;;  %p10550_p11 = scmp.lt.s32.totalorder %s1485_s18, %s1485_s18 }
 0x1bd   : > { %p10543_p10 = scmp.ne.s32.totalorder %s1485_s18, %s10542_s3  ;;  %p10551_p2 = scmp.lt.s32.totalorder %s10542_s3, %s10542_s3 }
 0x1bf   : > { %p10545_p3 = pnand %p10543_p10, %p10983_p6  ;;  %p10552_p12 = por %p10551_p2, %p10550_p11 }
 0x1c0   : > { %9379 = dma.hbm_to_vmem [thread:$0]  (!%p10973_p5), %s12121_s4, 1536, %s1463_s15, [#allocation45], %s12106_s10, %s12106_s10, %s12105_s26  }
 0x1c1   : > { %p10546_p9 = pneg %p10545_p3 }
 0x1c3   : > { %p10553_p13 = pnand %p10552_p12, %p10546_p9 }
 0x1c5   : > { %10556 = shalt.err (!%p10553_p13)
}
 0x1c6   : > { %9382 = dma.hbm_to_vmem [thread:$0]  (!%p10973_p5), %s10942_s29, 256, %s1485_s18, [#allocation48], %s12106_s10, %s12106_s10, %s12105_s26  }
 0x1c7   : > { %p12122_p0 = scmp.ne.s32.totalorder %s12099_s2, 0 }
 0x1c8   : > { %p12123_p1 = scmp.eq.s32.totalorder (!%p12122_p0), %s10958_s1, 0 }
 0x1c9   : > { %1532 = sbr.rel (%p12122_p0) target bundleno = 14018 (0x36c2), region = 196 }
 0x1ce   : > { %10562 = dma.done.wait (%p12123_p1), [#allocation4], 1344   ;;  %p12124_p6 = pmov %p12123_p1 }
 0x1cf   : > { %p12125_p4 = pmov %p12123_p1 }
 0x1d0   : > { %10564 = vsyncadd (%p12124_p6), [#allocation4], 4294965952 }
 0x1d1   : > { %10566 = dma.done.wait (%p12125_p4), [#allocation6], 80   ;;  %p12126_p7 = pmov %p12123_p1 }
 0x1d2   : > { %p12127_p8 = pmov %p12123_p1 }
 0x1d3   : > { %10568 = vsyncadd (%p12126_p7), [#allocation6], 4294967216 }
 0x1d4   : > { %10570 = dma.done.wait (%p12127_p8), [#allocation9], 1936   ;;  %p12128_p5 = pmov %p12123_p1 }
 0x1d5   : > { %p12129_p10 = pmov %p12123_p1 }
 0x1d6   : > { %10572 = vsyncadd (%p12128_p5), [#allocation9], 4294965360 }
 0x1d7   : > { %10574 = dma.done.wait (%p12129_p10), [#allocation12], 1040   ;;  %p12130_p3 = pmov %p12123_p1 }
 0x1d8   : > { %p12131_p9 = pmov %p12123_p1 }
 0x1d9   : > { %10576 = vsyncadd (%p12130_p3), [#allocation12], 4294966256 }
 0x1da   : > { %10578 = dma.done.wait (%p12131_p9), [#allocation15], 384   ;;  %p12132_p11 = pmov %p12123_p1 }
 0x1db   : > { %p12133_p2 = pmov %p12123_p1 }
 0x1dc   : > { %10580 = vsyncadd (%p12132_p11), [#allocation15], 4294966912 }
 0x1dd   : > { %10582 = dma.done.wait (%p12133_p2), [#allocation18], 208   ;;  %p12134_p12 = pmov %p12123_p1 }
 0x1de   : > { %p12135_p13 = pmov %p12123_p1 }
 0x1df   : > { %10584 = vsyncadd (%p12134_p12), [#allocation18], 4294967088 }
 0x1e0   : > { %10586 = dma.done.wait (%p12135_p13), [#allocation21], 208   ;;  %p12136_p0 = pmov %p12123_p1 }
 0x1e2   : > { %10588 = vsyncadd (%p12136_p0), [#allocation21], 4294967088  ;;  %p12137_p1 = pmov %p12136_p0 }
 0x1e3   : > { %p12138_p6 = pmov %p12136_p0 }
 0x1e4   : > { %10590 = dma.done.wait (%p12137_p1), [#allocation24], 208  }
 0x1e5   : > { %10592 = vsyncadd (%p12138_p6), [#allocation24], 4294967088  ;;  %p12139_p4 = pmov %p12136_p0 }
 0x1e6   : > { %p12140_p7 = pmov %p12136_p0 }
 0x1e7   : > { %10594 = dma.done.wait (%p12139_p4), [#allocation27], 1168  }
 0x1e8   : > { %10596 = vsyncadd (%p12140_p7), [#allocation27], 4294966128  ;;  %p12141_p8 = pmov %p12136_p0 }
 0x1e9   : > { %p12142_p5 = pmov %p12136_p0 }
 0x1ea   : > { %10598 = dma.done.wait (%p12141_p8), [#allocation30], 1424  }
 0x1eb   : > { %10600 = vsyncadd (%p12142_p5), [#allocation30], 4294965872  ;;  %p12143_p10 = pmov %p12136_p0 }
 0x1ec   : > { %p12144_p3 = pmov %p12136_p0 }
 0x1ed   : > { %10602 = dma.done.wait (%p12143_p10), [#allocation33], 528  }
 0x1ee   : > { %10604 = vsyncadd (%p12144_p3), [#allocation33], 4294966768  ;;  %p12145_p9 = pmov %p12136_p0 }
 0x1ef   : > { %p12146_p11 = pmov %p12136_p0 }
 0x1f0   : > { %10606 = dma.done.wait (%p12145_p9), [#allocation36], 512  }
 0x1f1   : > { %10608 = vsyncadd (%p12146_p11), [#allocation36], 4294966784  ;;  %p12147_p2 = pmov %p12136_p0 }
 0x1f2   : > { %p12148_p12 = pmov %p12136_p0 }
 0x1f3   : > { %10610 = dma.done.wait (%p12147_p2), [#allocation39], 784  }
 0x1f4   : > { %10612 = vsyncadd (%p12148_p12), [#allocation39], 4294966512  ;;  %p12149_p13 = pmov %p12136_p0 }
 0x1f6   : > { %10614 = dma.done.wait (%p12149_p13), [#allocation42], 816  }
 0x1f7   : > { %10616 = vsyncadd (%p12136_p0), [#allocation42], 4294966480  ;;  %p12150_p1 = pmov %p12136_p0 }
 0x1f8   : > { %p12151_p6 = pmov %p12136_p0 }
 0x1f9   : > { %10618 = dma.done.wait (%p12150_p1), [#allocation45], 1584  }
 0x1fa   : > { %10620 = vsyncadd (%p12151_p6), [#allocation45], 4294965712  ;;  %p12152_p4 = pmov %p12136_p0 }
 0x1fb   : > { %p12153_p7 = pmov %p12136_p0 }
 0x1fc   : > { %10622 = dma.done.wait (%p12152_p4), [#allocation48], 256  }
 0x1fd   : > { %10624 = vsyncadd (%p12153_p7), [#allocation48], 4294967040  ;;  %v10709_v1 = vmov 0.0   ;;  %v10710_v2 = vmov 0   ;;  %vm10711_vm0 = vmmov 0   ;;  %p1765_p8 = scmp.lt.s32.totalorder %s10958_s1, 1 }
 0x1fe   : > { %8586 = vmatprep.subr.bf16.mxu1 %v10709_v1  ;;  %1935 = vmatprep.mubr.bf16.mxu0 %v10710_v2  ;;  %vm1893_vm1 = vcmask 1041408   ;;  %v1805_v3 = vld [vmem:[#allocation3 + $0x48] sm:$0x33]  ;;  %v9548_v6 = vld [vmem:[#allocation3 + $0x50] ss:$0 sps:$4 sm:$0x33]  }
 0x1ff   : > { %8594 = vmatprep.mubr.msk.bf16.mxu1 %vm10711_vm0, %v10709_v1  ;;  %s12174_s1 = smov (!%p1765_p8, %s10958_s1), 1  ;;  %v8072_v4 = vcombine.high %v1805_v3, %v1805_v3  ;;  %v8071_v5 = vcombine.low %v1805_v3, %v1805_v3  ;;  %v9549_v7 = vld [vmem:[#allocation3 + $0x34] ss:$12 sps:$4 sm:$0xff]   ;;  %v1901_v9 = vsel %vm1893_vm1, %v9548_v6, 0  ;;  %s12154_s2 = sld [smem:[#allocation65_spill]]  ;;  %vm1883_vm2 = vcmask 424960  }
 0x200   : > { %8587 = vmatpush3.bf16.msra.mxu1 %v1901_v9  ;;  %v9551_v10 = vld [vmem:[#allocation3 + $0x30] ss:$12 sps:$4 sm:$0xff]   ;;  %v9552_v11 = vld [vmem:[#allocation3 + $0x38] ss:$12 sps:$4 sm:$0xff]   ;;  %s9170_s11 = smul.u32 48, %s12174_s1  ;;  %s12155_s22 = sld [smem:[#allocation70_spill]]  ;;  %v1812_v9 = vlaneseq }
 0x201   : > { %8074 = vmatprep.subr.msk.bf16.mxu0 %vm1893_vm1, %v8072_v4  ;;  %v1895_v8 = vsel %vm1893_vm1, %v8071_v5, 0  ;;  %8588 = vmatprep.subr.bf16.mxu1 %v10709_v1  ;;  %v9553_v12 = vld [vmem:[#allocation3 + $0x1c] ss:$12 sps:$4 sm:$0xff]   ;;  %v9555_v13 = vld [vmem:[#allocation3 + $0x18] ss:$12 sps:$4 sm:$0xff]   ;;  %vm2326_vm3 = vcmask 785408  }
 0x202   : > { %1912 = vmatpush1.bf16.msra.mxu0 %v1895_v8  ;;  %v9556_v14 = vld [vmem:[#allocation3 + $0x20] ss:$12 sps:$4 sm:$0xff]   ;;  %v9557_v15 = vld [vmem:[#allocation3 + $0x4] ss:$12 sps:$4 sm:$0xff]   ;;  %v9560_v17 = vld [vmem:[#allocation3 + $0x8] ss:$12 sps:$4 sm:$0xff]  }
 0x203   : > { %1913 = vmatprep.subr.bf16.mxu0 %v9549_v7  ;;  %v9559_v16 = vld [vmem:[#allocation3] ss:$12 sps:$4 sm:$0xff]   ;;  %vm2607_vm4 = vcmask 916480   ;;  %vm2962_vm5 = vcmask 1042432   ;;  %vm2857_vm6 = vcmask 1043456   ;;  %s12156_s10 = sld [smem:[#allocation66_spill]] }
 0x204   : > { %8589 = vmatpush3.bf16.msra.mxu1 %v9552_v11  ;;  %s9171_s23 = smul.u32 88, %s12174_s1  ;;  %vm2943_vm7 = vcmask 48128   ;;  %vm2847_vm8 = vcmask 326656   ;;  %vm3082_vm9 = vcmask 195584   ;;  %s12157_s15 = sld [smem:[#allocation75_spill]]  ;;  %vm3472_vm10 = vcmask 162816  }
 0x205   : > { %8590 = vmatprep.subr.bf16.mxu1 %v10709_v1  ;;  %s11274_s26 = scalar_lea.vmem %s12154_s2, %s9170_s11  ;;  %vm3845_vm11 = vcmask 1045504   ;;  %vm3841_vm12 = vcmask 97280   ;;  %vm4556_vm13 = vcmask 490496   ;;  %s12158_s28 = sld [smem:[#allocation67_spill]]  ;;  %vm4620_vm14 = vcmask 1040384  }
 0x206   : > { %1914 = vmatpush1.bf16.msra.mxu0 %v9551_v10  ;;  %v1787_v18 = vld [vmem:[%s11274_s26] sm:$0xff]  ;;  %v1788_v19 = vld [vmem:[%s11274_s26 + $0x8] sm:$0xff]  ;;  %v9563_v20 = vld [vmem:[%s12155_s22 + $0x74] ss:$8 sps:$4 sm:$0xff]   ;;  %v11342_v10 = vshrl.u32 %v1812_v9, 7  ;;  %s12059_s7 = sshll.u32 %s12174_s1, 3 }
 0x207   : > { %1915 = vmatprep.subr.bf16.mxu0 %v9553_v12  ;;  %v1807_v21 = vpack.c.bf16 %v1788_v19, %v1787_v18  ;;  %v9561_v22 = vld [vmem:[%s12155_s22 + $0x70] ss:$8 sps:$4 sm:$0xff]   ;;  %v9566_v23 = vld [vmem:[%s12155_s22 + $0x64] ss:$8 sps:$4 sm:$0xff]   ;;  %v9564_v26 = vld [vmem:[%s12155_s22 + $0x60] ss:$8 sps:$4 sm:$0xff]  }
 0x208   : > { %8591 = vmatpush3.bf16.msra.mxu1 %v9556_v14  ;;  %v1789_v24 = vld [vmem:[%s11274_s26 + $0x10] sm:$0xff]  ;;  %v1790_v25 = vld [vmem:[%s11274_s26 + $0x18] sm:$0xff]  ;;  %v1791_v32 = vld [vmem:[%s11274_s26 + $0x20] sm:$0xff]  ;;  %v1822_v11 = vsub.s32 2, %v11342_v10  ;;  %v1818_v14 = vsub.s32 1, %v11342_v10  ;;  %vm4616_vm15 = vcmask 146432  }
 0x209   : > { %8592 = vmatprep.subr.bf16.mxu1 %v10709_v1  ;;  %v9569_v27 = vld [vmem:[%s12155_s22 + $0x54] ss:$8 sps:$4 sm:$0xff]   ;;  %v1808_v28 = vpack.c.bf16 %v1790_v25, %v1789_v24  ;;  %v9567_v30 = vld [vmem:[%s12155_s22 + $0x50] ss:$8 sps:$4 sm:$0xff]   ;;  %v9572_v33 = vld [vmem:[%s12155_s22 + $0x44] ss:$8 sps:$4 sm:$0xff]   ;;  %s11420_s16 = scalar_lea.vmem %s12156_s10, %s9171_s23 }
 0x20a   : > { %1916 = vmatpush1.bf16.msra.mxu0 %v9555_v13  ;;  %v9593_v29 = vld [vmem:[%s12155_s22 + $0x154] ss:$8 sps:$4 sm:$0xff]   ;;  %v9591_v31 = vld [vmem:[%s12155_s22 + $0x150] ss:$8 sps:$4 sm:$0xff]   ;;  %v9599_v34 = vld [vmem:[%s12155_s22 + $0x144] ss:$8 sps:$4 sm:$0xff]  }
 0x20b   : > { %1917 = vmatprep.subr.bf16.mxu0 %v9557_v15  ;;  %v1792_v35 = vld [vmem:[%s11274_s26 + $0x28] sm:$0xff]  ;;  %v9575_v37 = vld [vmem:[%s12155_s22 + $0x34] ss:$8 sps:$4 sm:$0xff]   ;;  %v9573_v41 = vld [vmem:[%s12155_s22 + $0x30] ss:$8 sps:$4 sm:$0xff]   ;;  %v11349_v15 = vsub.s32 0, %v11342_v10  ;;  %s1778_s5 = scalar_lea.vmem %s12158_s28, %s12059_s7 }
 0x20c   : > { %8593 = vmatpush3.bf16.msra.mxu1 %v9560_v17  ;;  %v9570_v36 = vld [vmem:[%s12155_s22 + $0x40] ss:$8 sps:$4 sm:$0xff]   ;;  %v9605_v39 = vld [vmem:[%s12155_s22 + $0x134] ss:$8 sps:$4 sm:$0xff]   ;;  %v1809_v40 = vpack.c.bf16 %v1792_v35, %v1791_v32  ;;  %v9578_v42 = vld [vmem:[%s12155_s22 + $0x24] ss:$8 sps:$4 sm:$0xff]  }
 0x20d   : > { %2403 = vmatprep.subr.bf16.mxu1 %v9593_v29  ;;  %v9597_v38 = vld [vmem:[%s12155_s22 + $0x140] ss:$8 sps:$4 sm:$0xff]   ;;  %v9603_v43 = vld [vmem:[%s12155_s22 + $0x130] ss:$8 sps:$4 sm:$0xff]   ;;  %v9611_v44 = vld [vmem:[%s12155_s22 + $0x124] ss:$8 sps:$4 sm:$0xff]  }
 0x20e   : > { %1918 = vmatpush1.bf16.msra.mxu0 %v9559_v16  ;;  %v9576_v45 = vld [vmem:[%s12155_s22 + $0x20] ss:$8 sps:$4 sm:$0xff]   ;;  %v9581_v47 = vld [vmem:[%s12155_s22 + $0x14] ss:$8 sps:$4 sm:$0xff]   ;;  %v9579_v48 = vld [vmem:[%s12155_s22 + $0x10] ss:$8 sps:$4 sm:$0xff]  }
 0x20f   : > { %2336 = vmatprep.subr.bf16.mxu0 %v9563_v20  ;;  %8595 = vmatmul.mubr.msk.bf16.vlgmr.msra.gmra.mxu1 %vm1883_vm2, %v1807_v21  ;;  %v9609_v46 = vld [vmem:[%s12155_s22 + $0x120] ss:$8 sps:$4 sm:$0xff]   ;;  %v9584_v49 = vld [vmem:[%s12155_s22 + $0x4] ss:$8 sps:$4 sm:$0xff]   ;;  %v9587_v51 = vld [vmem:[%s12155_s22 + $0xf4] ss:$8 sps:$4 sm:$0xff]  }
 0x210   : > { %8598 = vmatprep.mubr.msk.bf16.mxu1 %vm10711_vm0, %v10709_v1  ;;  %2404 = vmatpush1.bf16.msra.mxu1 %v9591_v31  ;;  %v9582_v50 = vld [vmem:[%s12155_s22] ss:$8 sps:$4 sm:$0xff]   ;;  %v9585_v52 = vld [vmem:[%s12155_s22 + $0xf0] ss:$8 sps:$4 sm:$0xff]   ;;  %v9590_v53 = vld [vmem:[%s12155_s22 + $0xe4] ss:$8 sps:$4 sm:$0xff]  }
 0x211   : > { %8075 = vmatmul.mubr.msk.bf16.vlgmr.msra.gmra.mxu0 %vm1883_vm2, %v1807_v21  ;;  %2405 = vmatprep.subr.bf16.mxu1 %v9599_v34  ;;  %v9588_v54 = vld [vmem:[%s12155_s22 + $0xe0] ss:$8 sps:$4 sm:$0xff]   ;;  %v9596_v55 = vld [vmem:[%s12155_s22 + $0xd4] ss:$8 sps:$4 sm:$0xff]   ;;  %v9594_v56 = vld [vmem:[%s12155_s22 + $0xd0] ss:$8 sps:$4 sm:$0xff]  }
 0x212   : > { %1945 = vmatprep.mubr.bf16.mxu0 %v10710_v2  ;;  %2337 = vmatpush1.bf16.msra.mxu0 %v9561_v22  ;;  %v9602_v57 = vld [vmem:[%s12155_s22 + $0xc4] ss:$8 sps:$4 sm:$0xff]   ;;  %v9600_v58 = vld [vmem:[%s12155_s22 + $0xc0] ss:$8 sps:$4 sm:$0xff]   ;;  %v9608_v59 = vld [vmem:[%s12155_s22 + $0xb4] ss:$8 sps:$4 sm:$0xff]  }
 0x213   : > { %2338 = vmatprep.subr.bf16.mxu0 %v9566_v23  ;;  %v9606_v60 = vld [vmem:[%s12155_s22 + $0xb0] ss:$8 sps:$4 sm:$0xff]   ;;  %v9614_v61 = vld [vmem:[%s12155_s22 + $0xa4] ss:$8 sps:$4 sm:$0xff]   ;;  %v9617_v62 = vld [vmem:[%s12155_s22 + $0x114] ss:$8 sps:$4 sm:$0xff]  }
 0x214   : > { %2406 = vmatpush1.bf16.msra.mxu1 %v9597_v38  ;;  %v9612_v63 = vld [vmem:[%s12155_s22 + $0xa0] ss:$8 sps:$4 sm:$0xff]   ;;  %v9615_v0 = vld [vmem:[%s12155_s22 + $0x110] ss:$8 sps:$4 sm:$0xff]   ;;  %v9620_v3 = vld [vmem:[%s12155_s22 + $0x94] ss:$8 sps:$4 sm:$0xff]  }
 0x215   : > { %2407 = vmatprep.subr.bf16.mxu1 %v9605_v39  ;;  %v9623_v4 = vld [vmem:[%s12155_s22 + $0x104] ss:$8 sps:$4 sm:$0xff]   ;;  %v9618_v5 = vld [vmem:[%s12155_s22 + $0x90] ss:$8 sps:$4 sm:$0xff]   ;;  %v9621_v6 = vld [vmem:[%s12155_s22 + $0x100] ss:$8 sps:$4 sm:$0xff]  }
 0x216   : > { %2339 = vmatpush1.bf16.msra.mxu0 %v9564_v26  ;;  %v9626_v7 = vld [vmem:[%s12155_s22 + $0x84] ss:$8 sps:$4 sm:$0xff]   ;;  %v9624_v8 = vld [vmem:[%s12155_s22 + $0x80] ss:$8 sps:$4 sm:$0xff]   ;;  %v1810_v12 = vld [vmem:[#allocation5] sm:$0x7] }
 0x217   : > { %2340 = vmatprep.subr.bf16.mxu0 %v9569_v27  ;;  %8599 = vmatmul.mubr.msk.bf16.gmra.mxu1 %vm1883_vm2, %v1808_v28  ;;  %v11345_v13 = vrot.slane %v1810_v12, %v1822_v11  ;;  %v11354_v19 = vrot.slane %v1810_v12, %v1818_v14  ;;  %v11357_v20 = vrot.slane %v1810_v12, %v11349_v15  ;;  %s10712_s4 = smov 64   ;;  %s12159_s8 = sld [smem:[#allocation68_spill]] }
 0x218   : > { %8602 = vmatprep.mubr.msk.bf16.mxu1 %vm10711_vm0, %v10709_v1  ;;  %2408 = vmatpush1.bf16.msra.mxu1 %v9603_v43  ;;  %s10713_s18 = smov 96   ;;  %s10715_s2 = smov 56  }
 0x219   : > { %8076 = vmatmul.mubr.msk.bf16.gmra.mxu0 %vm1883_vm2, %v1808_v28  ;;  %2409 = vmatprep.subr.bf16.mxu1 %v9611_v44  ;;  %s10716_s11 = smov 88   ;;  %s10717_s26 = smov 120  }
 0x21a   : > { %1955 = vmatprep.mubr.bf16.mxu0 %v10710_v2  ;;  %2341 = vmatpush1.bf16.msra.mxu0 %v9567_v30  ;;  %s12067_s10 = smov 80   ;;  %s12066_s23 = smov 112  }
 0x21b   : > { %2342 = vmatprep.subr.bf16.mxu0 %v9572_v33  ;;  %s12062_s28 = smov 104   ;;  %s12162_s7 = sld [smem:[#allocation89_spill]] }
 0x21c   : > { %2410 = vmatpush1.bf16.msra.mxu1 %v9609_v46 }
 0x21d   : > { %2411 = vmatprep.subr.bf16.mxu1 %v9617_v62  ;;  %v9629_v62 = vld [vmem:[#allocation8 + $0x28] sm:$0xff]   ;;  %s1781_s3 = scalar_lea.vmem %s12159_s8, %s12174_s1  ;;  %s12160_s8 = sld [smem:[#allocation90_spill]] }
 0x21e   : > { %2343 = vmatpush1.bf16.msra.mxu0 %v9570_v36 }
 0x21f   : > { %2344 = vmatprep.subr.bf16.mxu0 %v9575_v37  ;;  %8603 = vmatmul.mubr.msk.bf16.gmra.mxu1 %vm1883_vm2, %v1809_v40  ;;  %v9627_v37 = vld [vmem:[#allocation8 + $0x38] sm:$0xff]  }
 0x220   : > { %2431 = vmatprep.mubr.bf16.mxu1 %v10710_v2  ;;  %2412 = vmatpush1.bf16.msra.mxu1 %v9615_v0 }
 0x221   : > { %8077 = vmatmul.mubr.msk.bf16.gmra.mxu0 %vm1883_vm2, %v1809_v40  ;;  %2413 = vmatprep.subr.bf16.mxu1 %v9623_v4  ;;  %vm4749_vm2 = vcmask 64512  }
 0x222   : > { %2345 = vmatpush1.bf16.msra.mxu0 %v9573_v41 }
 0x223   : > { %2346 = vmatprep.subr.bf16.mxu0 %v9578_v42 }
 0x224   : > { %2414 = vmatpush1.bf16.msra.mxu1 %v9621_v6 }
 0x225   : > { %2617 = vmatprep.subr.bf16.mxu1 %v10710_v2 }
 0x226   : > { %2347 = vmatpush1.bf16.msra.mxu0 %v9576_v45 }
 0x227   : > { %2348 = vmatprep.subr.bf16.mxu0 %v9581_v47 }
 0x22a   : > { %2349 = vmatpush1.bf16.msra.mxu0 %v9579_v48 }
 0x22b   : > { %2350 = vmatprep.subr.bf16.mxu0 %v9584_v49  ;;  %v9628_v49 = vld [vmem:[#allocation8 + $0x30] sm:$0xff]  }
 0x22e   : > { %2351 = vmatpush1.bf16.msra.mxu0 %v9582_v50 }
 0x22f   : > { %2352 = vmatprep.subr.bf16.mxu0 %v9587_v51 }
 0x232   : > { %2353 = vmatpush2.bf16.msra.mxu0 %v9585_v52 }
 0x233   : > { %2354 = vmatprep.subr.bf16.mxu0 %v9590_v53 }
 0x236   : > { %2355 = vmatpush2.bf16.msra.mxu0 %v9588_v54 }
 0x237   : > { %2356 = vmatprep.subr.bf16.mxu0 %v9596_v55 }
 0x23a   : > { %2357 = vmatpush2.bf16.msra.mxu0 %v9594_v56 }
 0x23b   : > { %2358 = vmatprep.subr.bf16.mxu0 %v9602_v57 }
 0x23e   : > { %2359 = vmatpush2.bf16.msra.mxu0 %v9600_v58 }
 0x23f   : > { %2360 = vmatprep.subr.bf16.mxu0 %v9608_v59 }
 0x242   : > { %2361 = vmatpush2.bf16.msra.mxu0 %v9606_v60 }
 0x243   : > { %2362 = vmatprep.subr.bf16.mxu0 %v9614_v61 }
 0x246   : > { %2363 = vmatpush2.bf16.msra.mxu0 %v9612_v63 }
 0x247   : > { %2364 = vmatprep.subr.bf16.mxu0 %v9620_v3 }
 0x24a   : > { %2365 = vmatpush2.bf16.msra.mxu0 %v9618_v5 }
 0x24b   : > { %2366 = vmatprep.subr.bf16.mxu0 %v9626_v7 }
 0x24e   : > { %2367 = vmatpush2.bf16.msra.mxu0 %v9624_v8 }
 0x24f   : > { %8606 = vmatprep.subr.bf16.mxu0 %v10709_v1 }
 0x2cf   : > { %v2000_v17 = vpop.f32.mrf.mxu1 }
 0x2d0   : > { %v2001_v18 = vadd.f32 %v2000_v17, %v11345_v13 }
 0x2d1   : > { %v1937_v16 = vpop.f32.mrf.mxu0  ;;  %v8596_v22 = vpop.f32.mrf.mxu1 }
 0x2d2   : > { %v2025_v25 = vmax.f32 %v2001_v18, 0.0  ;;  %v1938_v29 = vadd.f32 %v1937_v16, %v11357_v20  ;;  %v9630_v16 = vld [vmem:[#allocation8 + $0x20] sm:$0xff]  }
 0x2d3   : > { %v1939_v21 = vpop.f32.mrf.mxu0  ;;  %v2003_v24 = vpop.f32.mrf.mxu1 }
 0x2d4   : > { %v1940_v26 = vadd.f32 %v1939_v21, %v11354_v19  ;;  %v2004_v28 = vadd.f32 %v2003_v24, %v11345_v13  ;;  %v2023_v41 = vmax.f32 %v1938_v29, 0.0  ;;  %v9631_v29 = vld [vmem:[#allocation8 + $0x18] sm:$0xff]  }
 0x2d5   : > { %v1941_v23 = vpop.f32.mrf.mxu0  ;;  %v8597_v31 = vpop.f32.mrf.mxu1 }
 0x2d6   : > { %v1942_v27 = vadd.f32 %v1941_v23, %v11357_v20  ;;  %v2028_v32 = vmax.f32 %v2004_v28, 0.0  ;;  %v2024_v38 = vmax.f32 %v1940_v26, 0.0 }
 0x2d7   : > { %v1943_v30 = vpop.f32.mrf.mxu0  ;;  %v2008_v36 = vpop.f32.mrf.mxu1 }
 0x2d8   : > { %v1944_v33 = vadd.f32 %v1943_v30, %v11354_v19  ;;  %v2026_v34 = vmax.f32 %v1942_v27, 0.0  ;;  %v2087_v39 = vpack.c.bf16 %v2028_v32, %v2025_v25  ;;  %v2009_v42 = vadd.f32 %v2008_v36, %v11345_v13  ;;  %v9635_v36 = vld [vmem:[#allocation8 + $0x70] sm:$0xff]  }
 0x2d9   : > { %v1947_v35 = vpop.f32.mrf.mxu0  ;;  %v8600_v44 = vpop.f32.mrf.mxu1 }
 0x2da   : > { %v2027_v40 = vmax.f32 %v1944_v33, 0.0  ;;  %8125 = vmatmul.mubr.msk.bf16.vlgmr.msra.gmra.mxu1 %vm2326_vm3, %v2087_v39  ;;  %v2085_v46 = vpack.c.bf16 %v2026_v34, %v2023_v41  ;;  %v2031_v50 = vmax.f32 %v2009_v42, 0.0  ;;  %v1948_v54 = vadd.f32 %v1947_v35, %v11357_v20  ;;  %v9634_v35 = vld [vmem:[#allocation8] sm:$0xff]   ;;  %v9638_v39 = vld [vmem:[#allocation8 + $0x58] sm:$0xff]   ;;  %v9640_v41 = vld [vmem:[#allocation8 + $0x48] sm:$0xff]  }
 0x2db   : > { %v1949_v43 = vpop.f32.mrf.mxu0  ;;  %v2011_v48 = vpop.f32.mrf.mxu1  ;;  %2441 = vmatprep.mubr.bf16.mxu1 %v10710_v2  ;;  %2618 = vmatpush1.bf16.msra.mxu1 %v9627_v37  ;;  %v9636_v37 = vld [vmem:[#allocation8 + $0x68] sm:$0xff]   ;;  %v9641_v42 = vld [vmem:[#allocation8 + $0x40] sm:$0xff]  }
 0x2dc   : > { %v2086_v45 = vpack.c.bf16 %v2027_v40, %v2024_v38  ;;  %v1950_v51 = vadd.f32 %v1949_v43, %v11354_v19  ;;  %v2012_v53 = vadd.f32 %v2011_v48, %v11345_v13  ;;  %2619 = vmatprep.subr.bf16.mxu1 %v10710_v2  ;;  %v2029_v4 = vmax.f32 %v1948_v54, 0.0  ;;  %v9637_v38 = vld [vmem:[#allocation8 + $0x60] sm:$0xff]   ;;  %v9639_v40 = vld [vmem:[#allocation8 + $0x50] sm:$0xff]   ;;  %v2094_v48 = vld [vmem:[#allocation7] sm:$0x3] }
 0x2dd   : > { %v1951_v47 = vpop.f32.mrf.mxu0  ;;  %v8601_v56 = vpop.f32.mrf.mxu1  ;;  %v9642_v43 = vld [vmem:[#allocation11 + $0x38] sm:$0xff]   ;;  %v9643_v44 = vld [vmem:[#allocation11 + $0x30] sm:$0xff]  }
 0x2de   : > { %v1952_v52 = vadd.f32 %v1951_v47, %v11357_v20  ;;  %2368 = vmatprep.mubr.bf16.mxu0 %v2086_v45  ;;  %v2034_v57 = vmax.f32 %v2012_v53, 0.0  ;;  %v2030_v63 = vmax.f32 %v1950_v51, 0.0  ;;  %v9644_v45 = vld [vmem:[#allocation11 + $0x28] sm:$0xff]   ;;  %v9646_v47 = vld [vmem:[#allocation11 + $0x18] sm:$0xff]   ;;  %v2099_v51 = vrot.slane %v2094_v48, %v11349_v15 }
 0x2df   : > { %v1953_v55 = vpop.f32.mrf.mxu0  ;;  %2369 = vmatmul.mubr.bf16.vlgmr.msra.gmra.mxu0 %v2085_v46  ;;  %v2016_v61 = vpop.f32.mrf.mxu1  ;;  %2620 = vmatpush1.bf16.msra.mxu1 %v9628_v49  ;;  %v9645_v46 = vld [vmem:[#allocation11 + $0x20] sm:$0xff]  }
 0x2e0   : > { %v1954_v58 = vadd.f32 %v1953_v55, %v11354_v19  ;;  %v2032_v59 = vmax.f32 %v1952_v52, 0.0  ;;  %v2090_v0 = vpack.c.bf16 %v2034_v57, %v2031_v50  ;;  %2621 = vmatprep.subr.bf16.mxu1 %v10710_v2  ;;  %v2017_v5 = vadd.f32 %v2016_v61, %v11345_v13  ;;  %8607 = vmatpush3.bf16.msra.mxu0 %v9642_v43 }
 0x2e1   : > { %v1957_v60 = vpop.f32.mrf.mxu0  ;;  %v8604_v7 = vpop.f32.mrf.mxu1  ;;  %8608 = vmatprep.subr.bf16.mxu0 %v10709_v1  ;;  %v2103_v50 = vrot.slane %v2094_v48, %v1818_v14 }
 0x2e2   : > { %v2033_v3 = vmax.f32 %v1954_v58, 0.0  ;;  %8126 = vmatmul.mubr.msk.bf16.gmra.mxu1 %vm2326_vm3, %v2090_v0  ;;  %v2088_v9 = vpack.c.bf16 %v2032_v59, %v2029_v4  ;;  %v2037_v17 = vmax.f32 %v2017_v5, 0.0  ;;  %v1958_v23 = vadd.f32 %v1957_v60, %v11357_v20 }
 0x2e3   : > { %v1959_v6 = vpop.f32.mrf.mxu0  ;;  %v2019_v12 = vpop.f32.mrf.mxu1  ;;  %2451 = vmatprep.mubr.bf16.mxu1 %v10710_v2  ;;  %2622 = vmatpush1.bf16.msra.mxu1 %v9629_v62 }
 0x2e4   : > { %v2089_v8 = vpack.c.bf16 %v2033_v3, %v2030_v63  ;;  %v1960_v18 = vadd.f32 %v1959_v6, %v11354_v19  ;;  %v2020_v22 = vadd.f32 %v2019_v12, %v11345_v13  ;;  %2623 = vmatprep.subr.bf16.mxu1 %v10710_v2  ;;  %v2035_v13 = vmax.f32 %v1958_v23, 0.0  ;;  %8609 = vmatpush3.bf16.msra.mxu0 %v9643_v44 }
 0x2e5   : > { %v1961_v11 = vpop.f32.mrf.mxu0  ;;  %v8605_v25 = vpop.f32.mrf.mxu1  ;;  %8610 = vmatprep.subr.bf16.mxu0 %v10709_v1 }
 0x2e6   : > { %v1962_v21 = vadd.f32 %v1961_v11, %v11357_v20  ;;  %2378 = vmatprep.mubr.bf16.mxu0 %v2089_v8  ;;  %v2040_v26 = vmax.f32 %v2020_v22, 0.0  ;;  %v2036_v30 = vmax.f32 %v1960_v18, 0.0  ;;  %v9632_v20 = vld [vmem:[#allocation8 + $0x10] sm:$0xff]  }
 0x2e7   : > { %v1963_v24 = vpop.f32.mrf.mxu0  ;;  %2379 = vmatmul.mubr.bf16.gmra.mxu0 %v2088_v9  ;;  %2624 = vmatpush1.bf16.msra.mxu1 %v9630_v16 }
 0x2e8   : > { %v1964_v27 = vadd.f32 %v1963_v24, %v11354_v19  ;;  %v2038_v28 = vmax.f32 %v1962_v21, 0.0  ;;  %v2093_v31 = vpack.c.bf16 %v2040_v26, %v2037_v17  ;;  %2625 = vmatprep.subr.bf16.mxu1 %v10710_v2  ;;  %v9633_v19 = vld [vmem:[#allocation8 + $0x8] sm:$0xff]   ;;  %8611 = vmatpush3.bf16.msra.mxu0 %v9644_v45 }
 0x2e9   : > { %8612 = vmatprep.subr.bf16.mxu0 %v10709_v1 }
 0x2ea   : > { %v2039_v32 = vmax.f32 %v1964_v27, 0.0  ;;  %8127 = vmatmul.mubr.msk.bf16.gmra.mxu1 %vm2326_vm3, %v2093_v31  ;;  %v2091_v34 = vpack.c.bf16 %v2038_v28, %v2035_v13 }
 0x2eb   : > { %2626 = vmatpush1.bf16.msra.mxu1 %v9631_v29 }
 0x2ec   : > { %v2092_v33 = vpack.c.bf16 %v2039_v32, %v2036_v30  ;;  %2627 = vmatprep.subr.bf16.mxu1 %v10710_v2  ;;  %8613 = vmatpush3.bf16.msra.mxu0 %v9645_v46 }
 0x2ed   : > { %8614 = vmatprep.subr.bf16.mxu0 %v10709_v1 }
 0x2ee   : > { %2388 = vmatprep.mubr.bf16.mxu0 %v2092_v33 }
 0x2ef   : > { %2389 = vmatmul.mubr.bf16.gmra.mxu0 %v2091_v34  ;;  %2628 = vmatpush1.bf16.msra.mxu1 %v9632_v20 }
 0x2f0   : > { %8622 = vmatprep.mubr.msk.bf16.mxu0 %vm10711_vm0, %v10709_v1  ;;  %2629 = vmatprep.subr.bf16.mxu1 %v10710_v2 }
 0x2f1   : > { %8615 = vmatpush3.bf16.msra.mxu0 %v9646_v47 }
 0x2f2   : > { %8616 = vmatprep.subr.bf16.mxu0 %v10709_v1 }
 0x2f3   : > { %2630 = vmatpush1.bf16.msra.mxu1 %v9633_v19 }
 0x2f4   : > { %2631 = vmatprep.subr.bf16.mxu1 %v10710_v2 }
 0x2f7   : > { %2632 = vmatpush1.bf16.msra.mxu1 %v9634_v35 }
 0x2f8   : > { %2635 = vmatprep.subr.bf16.mxu1 %v10710_v2 }
 0x2fb   : > { %2636 = vmatpush2.bf16.msra.mxu1 %v9635_v36 }
 0x2fc   : > { %2637 = vmatprep.subr.bf16.mxu1 %v10710_v2 }
 0x2ff   : > { %2638 = vmatpush2.bf16.msra.mxu1 %v9636_v37 }
 0x300   : > { %2639 = vmatprep.subr.bf16.mxu1 %v10710_v2 }
 0x303   : > { %2640 = vmatpush2.bf16.msra.mxu1 %v9637_v38 }
 0x304   : > { %2641 = vmatprep.subr.bf16.mxu1 %v10710_v2 }
 0x307   : > { %2642 = vmatpush2.bf16.msra.mxu1 %v9638_v39 }
 0x308   : > { %2643 = vmatprep.subr.bf16.mxu1 %v10710_v2 }
 0x30b   : > { %2644 = vmatpush2.bf16.msra.mxu1 %v9639_v40 }
 0x30c   : > { %2645 = vmatprep.subr.bf16.mxu1 %v10710_v2 }
 0x30f   : > { %2646 = vmatpush2.bf16.msra.mxu1 %v9640_v41 }
 0x310   : > { %2647 = vmatprep.subr.bf16.mxu1 %v10710_v2 }
 0x313   : > { %2648 = vmatpush2.bf16.msra.mxu1 %v9641_v42 }
 0x314   : > { %8634 = vmatprep.subr.bf16.mxu1 %v10709_v1 }
 0x39a   : > { %v2433_v2 = vpop.f32.mrf.mxu1 }
 0x39c   : > { %v2435_v49 = vpop.f32.mrf.mxu1 }
 0x39e   : > { %v2437_v53 = vpop.f32.mrf.mxu1 }
 0x39f   : > { %v2370_v52 = vpop.f32.mrf.mxu0 }
 0x3a0   : > { %v2439_v56 = vpop.f32.mrf.mxu1  ;;  %v2371_v57 = vadd.f32 %v2370_v52, %v2099_v51 }
 0x3a1   : > { %v2372_v54 = vpop.f32.mrf.mxu0 }
 0x3a2   : > { %v2373_v55 = vadd.f32 %v2372_v54, %v2103_v50  ;;  %v2443_v60 = vpop.f32.mrf.mxu1  ;;  %v2434_v4 = vadd.f32 %v2433_v2, %v2371_v57  ;;  %v2929_v57 = vld [vmem:[#allocation16] sm:$0x7] }
 0x3a3   : > { %v2374_v58 = vpop.f32.mrf.mxu0 }
 0x3a4   : > { %v2375_v59 = vadd.f32 %v2374_v58, %v2099_v51  ;;  %v2436_v62 = vadd.f32 %v2435_v49, %v2373_v55  ;;  %v2445_v3 = vpop.f32.mrf.mxu1  ;;  %v2462_v16 = vmax.f32 %v2434_v4, 0.0  ;;  %v2964_v58 = vsel %vm2962_vm5, %v2929_v57, 0 }
 0x3a5   : > { %v2376_v61 = vpop.f32.mrf.mxu0 }
 0x3a6   : > { %v2438_v63 = vadd.f32 %v2437_v53, %v2375_v59  ;;  %v2377_v0 = vadd.f32 %v2376_v61, %v2103_v50  ;;  %v2447_v14 = vpop.f32.mrf.mxu1  ;;  %v2463_v8 = vmax.f32 %v2436_v62, 0.0  ;;  %v9650_v59 = vld [vmem:[#allocation14 + $0x10] ss:$0 sps:$4 sm:$0xff]   ;;  %v9651_v61 = vld [vmem:[#allocation14 + $0x8] sm:$0xff]   ;;  %v8128_v62 = vld [vmem:[#allocation10] ss:$0 sm:$0xff] }
 0x3a7   : > { %v2380_v5 = vpop.f32.mrf.mxu0 }
 0x3a8   : > { %v2440_v10 = vadd.f32 %v2439_v56, %v2377_v0  ;;  %v2464_v6 = vmax.f32 %v2438_v63, 0.0  ;;  %v2449_v12 = vpop.f32.mrf.mxu1  ;;  %v2381_v17 = vadd.f32 %v2380_v5, %v2099_v51  ;;  %v9649_v56 = vld [vmem:[#allocation11] sm:$0xff]  }
 0x3a9   : > { %v2382_v7 = vpop.f32.mrf.mxu0 }
 0x3aa   : > { %v2465_v9 = vmax.f32 %v2440_v10, 0.0  ;;  %v2383_v11 = vadd.f32 %v2382_v7, %v2103_v50  ;;  %v2453_v23 = vpop.f32.mrf.mxu1  ;;  %v2504_v24 = vpack.c.bf16 %v2464_v6, %v2462_v16  ;;  %v2444_v29 = vadd.f32 %v2443_v60, %v2381_v17 }
 0x3ab   : > { %v2384_v18 = vpop.f32.mrf.mxu0  ;;  %v2859_v60 = vsel %vm2857_vm6, %v9650_v59, 0  ;;  %v9654_v59 = vld [vmem:[#allocation19] sm:$0xff]  }
 0x3ac   : > { %v2505_v21 = vpack.c.bf16 %v2465_v9, %v2463_v8  ;;  %v2385_v22 = vadd.f32 %v2384_v18, %v2099_v51  ;;  %v2446_v26 = vadd.f32 %v2445_v3, %v2383_v11  ;;  %v2455_v30 = vpop.f32.mrf.mxu1  ;;  %v2466_v35 = vmax.f32 %v2444_v29, 0.0  ;;  %v2919_v29 = vld [vmem:[%s11420_s16 + $0x8] sm:$0xff] }
 0x3ad   : > { %v2386_v25 = vpop.f32.mrf.mxu0 }
 0x3ae   : > { %v2448_v27 = vadd.f32 %v2447_v14, %v2385_v22  ;;  %v2387_v28 = vadd.f32 %v2386_v25, %v2103_v50  ;;  %8144 = vmatprep.mubr.msk.bf16.mxu1 %vm2607_vm4, %v2505_v21  ;;  %v2467_v34 = vmax.f32 %v2446_v26, 0.0  ;;  %v2457_v37 = vpop.f32.mrf.mxu1 }
 0x3af   : > { %v2390_v31 = vpop.f32.mrf.mxu0  ;;  %2650 = vmatmul.mubr.bf16.vlgmr.msra.gmra.mxu1 %v2504_v24 }
 0x3b0   : > { %v2450_v32 = vadd.f32 %v2449_v12, %v2387_v28  ;;  %v2468_v13 = vmax.f32 %v2448_v27, 0.0  ;;  %v2391_v36 = vadd.f32 %v2390_v31, %v2099_v51  ;;  %v2459_v47 = vpop.f32.mrf.mxu1  ;;  %8635 = vmatpush3.bf16.msra.mxu1 %v2859_v60  ;;  %v2918_v28 = vld [vmem:[%s11420_s16] sm:$0xff] }
 0x3b1   : > { %v2392_v33 = vpop.f32.mrf.mxu0  ;;  %8636 = vmatprep.subr.bf16.mxu1 %v10709_v1 }
 0x3b2   : > { %v2469_v20 = vmax.f32 %v2450_v32, 0.0  ;;  %v2393_v19 = vadd.f32 %v2392_v33, %v2103_v50  ;;  %v2506_v42 = vpack.c.bf16 %v2468_v13, %v2466_v35  ;;  %v2454_v46 = vadd.f32 %v2453_v23, %v2391_v36  ;;  %v2923_v35 = vld [vmem:[%s11420_s16 + $0x28] sm:$0xff] }
 0x3b3   : > { %v2394_v38 = vpop.f32.mrf.mxu0  ;;  %v2930_v13 = vpack.c.bf16 %v2919_v29, %v2918_v28 }
 0x3b4   : > { %v2507_v39 = vpack.c.bf16 %v2469_v20, %v2467_v34  ;;  %v2395_v40 = vadd.f32 %v2394_v38, %v2099_v51  ;;  %v2456_v43 = vadd.f32 %v2455_v30, %v2393_v19  ;;  %v2470_v53 = vmax.f32 %v2454_v46, 0.0  ;;  %v9647_v51 = vld [vmem:[#allocation11 + $0x10] sm:$0xff]   ;;  %8637 = vmatpush3.bf16.msra.mxu1 %v9651_v61  ;;  %v2920_v34 = vld [vmem:[%s11420_s16 + $0x10] sm:$0xff]  ;;  %v2921_v20 = vld [vmem:[%s11420_s16 + $0x18] sm:$0xff] }
 0x3b5   : > { %v2396_v41 = vpop.f32.mrf.mxu0  ;;  %8617 = vmatpush3.bf16.msra.mxu0 %v9647_v51  ;;  %8638 = vmatprep.subr.bf16.mxu1 %v10709_v1  ;;  %v2922_v19 = vld [vmem:[%s11420_s16 + $0x20] sm:$0xff]  ;;  %v2931_v36 = vpack.c.bf16 %v2921_v20, %v2920_v34  ;;  %v2924_v38 = vld [vmem:[%s11420_s16 + $0x30] sm:$0xff] }
 0x3b6   : > { %v2458_v44 = vadd.f32 %v2457_v37, %v2395_v40  ;;  %v2397_v45 = vadd.f32 %v2396_v41, %v2103_v50  ;;  %8145 = vmatprep.mubr.msk.bf16.mxu1 %vm2607_vm4, %v2507_v39  ;;  %v2471_v49 = vmax.f32 %v2456_v43, 0.0  ;;  %8618 = vmatprep.subr.bf16.mxu0 %v10709_v1  ;;  %v9648_v50 = vld [vmem:[#allocation11 + $0x8] sm:$0xff]   ;;  %v2932_v37 = vpack.c.bf16 %v2923_v35, %v2922_v19  ;;  %v2927_v41 = vld [vmem:[%s11420_s16 + $0x48] sm:$0xff] }
 0x3b7   : > { %2658 = vmatmul.mubr.bf16.gmra.mxu1 %v2506_v42  ;;  %v2925_v39 = vld [vmem:[%s11420_s16 + $0x38] sm:$0xff]  ;;  %v2926_v40 = vld [vmem:[%s11420_s16 + $0x40] sm:$0xff] }
 0x3b8   : > { %v2460_v2 = vadd.f32 %v2459_v47, %v2397_v45  ;;  %v2472_v48 = vmax.f32 %v2458_v44, 0.0  ;;  %v2933_v42 = vpack.c.bf16 %v2925_v39, %v2924_v38  ;;  %v2934_v43 = vpack.c.bf16 %v2927_v41, %v2926_v40  ;;  %v2928_v44 = vld [vmem:[%s11420_s16 + $0x50] sm:$0xff]  ;;  %v9653_v47 = vld [vmem:[#allocation19 + $0x8] ss:$0 sps:$4 sm:$0xff]   ;;  %s12068_s16 = smov 48  }
 0x3b9   : > { %8619 = vmatpush3.bf16.msra.mxu0 %v9648_v50  ;;  %v2935_v45 = vpack.c.bf16 %v2928_v44, %v2928_v44  ;;  %v9652_v46 = vld [vmem:[#allocation14] sm:$0xff]  }
 0x3ba   : > { %v2473_v52 = vmax.f32 %v2460_v2, 0.0  ;;  %v2508_v55 = vpack.c.bf16 %v2472_v48, %v2470_v53  ;;  %8620 = vmatprep.subr.bf16.mxu0 %v10709_v1  ;;  %8639 = vmatpush3.bf16.msra.mxu1 %v9652_v46  ;;  %v8147_v2 = vld [vmem:[#allocation13] ss:$0 sm:$0xff] }
 0x3bb   : > { %9167 = vmatprep.subr.msk.bf16.mxu1 %vm2857_vm6, %v9653_v47 }
 0x3bc   : > { %v2509_v54 = vpack.c.bf16 %v2473_v52, %v2471_v49 }
 0x3bd   : > { %8621 = vmatpush3.bf16.msra.mxu0 %v9649_v56 }
 0x3be   : > { %8146 = vmatprep.mubr.msk.bf16.mxu1 %vm2607_vm4, %v2509_v54  ;;  %9166 = vmatprep.subr.msk.bf16.mxu0 %vm2962_vm5, %v2929_v57  ;;  %vm5544_vm4 = vcmask 523264  }
 0x3bf   : > { %2666 = vmatmul.mubr.bf16.gmra.mxu1 %v2508_v55 }
 0x3c0   : > { %8640 = vmatprep.mubr.msk.bf16.mxu1 %vm10711_vm0, %v10709_v1 }
 0x46f   : > { %v2651_v63 = vpop.f32.mrf.mxu1 }
 0x470   : > { %v2652_v3 = vadd.f32 %v8128_v62, %v2651_v63 }
 0x471   : > { %v2653_v0 = vpop.f32.mrf.mxu1 }
 0x472   : > { %v2674_v14 = vmax.f32 %v2652_v3, 0.0 }
 0x473   : > { %v2654_v4 = vpop.f32.mrf.mxu1 }
 0x474   : > { %v2655_v5 = vadd.f32 %v8128_v62, %v2654_v4 }
 0x475   : > { %v2656_v10 = vpop.f32.mrf.mxu1 }
 0x476   : > { %v2675_v6 = vmax.f32 %v2655_v5, 0.0 }
 0x477   : > { %v2659_v7 = vpop.f32.mrf.mxu1 }
 0x478   : > { %v2696_v8 = vpack.c.bf16 %v2675_v6, %v2674_v14  ;;  %v2660_v11 = vadd.f32 %v8128_v62, %v2659_v7 }
 0x479   : > { %v2661_v9 = vpop.f32.mrf.mxu1 }
 0x47a   : > { %8623 = vmatmul.mubr.bf16.vlgmr.msra.gmra.mxu0 %v2696_v8  ;;  %v2676_v18 = vmax.f32 %v2660_v11, 0.0 }
 0x47b   : > { %v2662_v12 = vpop.f32.mrf.mxu1  ;;  %8653 = vmatpush3.bf16.msra.mxu0 %v2964_v58  ;;  %8626 = vmatprep.mubr.msk.bf16.mxu0 %vm10711_vm0, %v10709_v1  ;;  %v3102_v58 = vsel %vm2857_vm6, %v9653_v47, 0 }
 0x47c   : > { %v2663_v16 = vadd.f32 %v8128_v62, %v2662_v12 }
 0x47d   : > { %v2664_v17 = vpop.f32.mrf.mxu1 }
 0x47e   : > { %v2677_v21 = vmax.f32 %v2663_v16, 0.0 }
 0x47f   : > { %v2667_v22 = vpop.f32.mrf.mxu1 }
 0x480   : > { %v2697_v23 = vpack.c.bf16 %v2677_v21, %v2676_v18  ;;  %v2668_v25 = vadd.f32 %v8128_v62, %v2667_v22  ;;  %v8163_v21 = vld [vmem:[#allocation17] ss:$0 sm:$0xff] }
 0x481   : > { %v2669_v24 = vpop.f32.mrf.mxu1 }
 0x482   : > { %8627 = vmatmul.mubr.bf16.gmra.mxu0 %v2697_v23  ;;  %v2678_v31 = vmax.f32 %v2668_v25, 0.0 }
 0x483   : > { %v2670_v26 = vpop.f32.mrf.mxu1  ;;  %8630 = vmatprep.mubr.msk.bf16.mxu0 %vm10711_vm0, %v10709_v1 }
 0x484   : > { %v2671_v27 = vadd.f32 %v8128_v62, %v2670_v26 }
 0x485   : > { %v2672_v30 = vpop.f32.mrf.mxu1 }
 0x486   : > { %v2679_v32 = vmax.f32 %v2671_v27, 0.0 }
 0x488   : > { %v2698_v33 = vpack.c.bf16 %v2679_v32, %v2678_v31 }
 0x48a   : > { %8631 = vmatmul.mubr.bf16.gmra.mxu0 %v2698_v33 }
 0x48b   : > { %8654 = vmatprep.mubr.msk.bf16.mxu0 %vm2943_vm7, %v2930_v13 }
 0x492   : > { %8655 = vmatmul.mubr.msk.bf16.vlgmr.msra.gmra.mxu0 %vm2943_vm7, %v2931_v36 }
 0x493   : > { %8658 = vmatprep.mubr.msk.bf16.mxu0 %vm2943_vm7, %v2932_v37 }
 0x49a   : > { %8659 = vmatmul.mubr.msk.bf16.gmra.mxu0 %vm2943_vm7, %v2933_v42 }
 0x49b   : > { %8662 = vmatprep.mubr.msk.bf16.mxu0 %vm2943_vm7, %v2934_v43 }
 0x4a2   : > { %8663 = vmatmul.mubr.msk.bf16.gmra.mxu0 %vm2943_vm7, %v2935_v45 }
 0x53a   : > { %v2788_v48 = vpop.f32.mrf.mxu0 }
 0x53b   : > { %v2789_v52 = vadd.f32 %v8147_v2, %v2788_v48 }
 0x53c   : > { %v8624_v49 = vpop.f32.mrf.mxu0 }
 0x53d   : > { %v2811_v51 = vmax.f32 %v2789_v52, 0.0 }
 0x53e   : > { %v2791_v53 = vpop.f32.mrf.mxu0 }
 0x53f   : > { %v2792_v54 = vadd.f32 %v8147_v2, %v2791_v53 }
 0x540   : > { %v8625_v55 = vpop.f32.mrf.mxu0 }
 0x541   : > { %v2812_v50 = vmax.f32 %v2792_v54, 0.0 }
 0x542   : > { %v2796_v56 = vpop.f32.mrf.mxu0 }
 0x543   : > { %v2822_v57 = vpack.c.bf16 %v2812_v50, %v2811_v51  ;;  %v2797_v61 = vadd.f32 %v8147_v2, %v2796_v56  ;;  %v9655_v56 = vld [vmem:[#allocation22 + $0x8] ss:$0 sps:$4 sm:$0xff]  }
 0x544   : > { %v8628_v60 = vpop.f32.mrf.mxu0  ;;  %9168 = vmatprep.subr.msk.bf16.mxu0 %vm2857_vm6, %v9655_v56 }
 0x545   : > { %8641 = vmatmul.mubr.msk.bf16.vlgmr.msra.gmra.mxu1 %vm2847_vm8, %v2822_v57  ;;  %v2813_v3 = vmax.f32 %v2797_v61, 0.0  ;;  %v3239_v57 = vsel %vm2857_vm6, %v9655_v56, 0 }
 0x546   : > { %v2799_v62 = vpop.f32.mrf.mxu0  ;;  %8667 = vmatpush3.bf16.msra.mxu1 %v3102_v58  ;;  %8644 = vmatprep.mubr.msk.bf16.mxu1 %vm10711_vm0, %v10709_v1  ;;  %v9656_v58 = vld [vmem:[#allocation22] sm:$0xff]  }
 0x547   : > { %v2800_v63 = vadd.f32 %v8147_v2, %v2799_v62  ;;  %8668 = vmatprep.subr.bf16.mxu1 %v9654_v59  ;;  %8683 = vmatpush3.bf16.msra.mxu0 %v3239_v57 }
 0x548   : > { %v8629_v0 = vpop.f32.mrf.mxu0  ;;  %8684 = vmatprep.subr.bf16.mxu0 %v9656_v58 }
 0x549   : > { %v2814_v4 = vmax.f32 %v2800_v63, 0.0 }
 0x54a   : > { %v2804_v5 = vpop.f32.mrf.mxu0  ;;  %8669 = vmatpush3.bf16.msra.mxu1 %v9654_v59  ;;  %v9665_v59 = vld [vmem:[#allocation25 + $0x8] ss:$0 sps:$4 sm:$0xff]  }
 0x54b   : > { %v2823_v10 = vpack.c.bf16 %v2814_v4, %v2813_v3  ;;  %v2805_v6 = vadd.f32 %v8147_v2, %v2804_v5  ;;  %8685 = vmatpush3.bf16.msra.mxu0 %v9656_v58  ;;  %9169 = vmatprep.subr.msk.bf16.mxu1 %vm2857_vm6, %v9665_v59  ;;  %v3365_v60 = vsel %vm2857_vm6, %v9665_v59, 0  ;;  %v11466_v3 = vld [vmem:[%s12157_s15] ss:$0 sm:$0xff]  ;;  %v9659_v59 = vld [vmem:[#allocation28 + $0x14] ss:$0 sps:$4 sm:$0x33]  }
 0x54c   : > { %v8632_v14 = vpop.f32.mrf.mxu0  ;;  %8714 = vmatprep.subr.bf16.mxu0 %v10709_v1  ;;  %s12064_s15 = smov 72  }
 0x54d   : > { %8645 = vmatmul.mubr.msk.bf16.gmra.mxu1 %vm2847_vm8, %v2823_v10  ;;  %v2815_v11 = vmax.f32 %v2805_v6, 0.0 }
 0x54e   : > { %v2807_v7 = vpop.f32.mrf.mxu0  ;;  %8648 = vmatprep.mubr.msk.bf16.mxu1 %vm10711_vm0, %v10709_v1 }
 0x54f   : > { %v2808_v8 = vadd.f32 %v8147_v2, %v2807_v7 }
 0x550   : > { %v8633_v9 = vpop.f32.mrf.mxu0 }
 0x551   : > { %v2816_v12 = vmax.f32 %v2808_v8, 0.0 }
 0x552   : > { %v8656_v16 = vpop.f32.mrf.mxu0 }
 0x553   : > { %v2824_v17 = vpack.c.bf16 %v2816_v12, %v2815_v11  ;;  %v3009_v25 = vadd.f32 %v8656_v16, %v8163_v21 }
 0x554   : > { %v3000_v18 = vpop.f32.mrf.mxu0 }
 0x555   : > { %8649 = vmatmul.mubr.msk.bf16.gmra.mxu1 %vm2847_vm8, %v2824_v17  ;;  %v3001_v23 = vadd.f32 %v8163_v21, %v3000_v18  ;;  %v3048_v32 = vmax.f32 %v3009_v25, 0.0  ;;  %v8170_v18 = vld [vmem:[#allocation20] ss:$0 sm:$0xff] }
 0x556   : > { %v8657_v22 = vpop.f32.mrf.mxu0 }
 0x557   : > { %v3012_v24 = vadd.f32 %v8657_v22, %v8163_v21  ;;  %v3046_v30 = vmax.f32 %v3001_v23, 0.0 }
 0x558   : > { %v3003_v26 = vpop.f32.mrf.mxu0 }
 0x559   : > { %v3004_v27 = vadd.f32 %v8163_v21, %v3003_v26  ;;  %v3049_v28 = vmax.f32 %v3012_v24, 0.0 }
 0x55a   : > { %v8660_v29 = vpop.f32.mrf.mxu0 }
 0x55b   : > { %v3047_v31 = vmax.f32 %v3004_v27, 0.0  ;;  %v3025_v13 = vadd.f32 %v8660_v29, %v8163_v21  ;;  %v3061_v19 = vpack.c.bf16 %v3049_v28, %v3048_v32  ;;  %v9657_v29 = vld [vmem:[#allocation28 + $0x8] ss:$0 sps:$4 sm:$0x33]  }
 0x55c   : > { %v3016_v33 = vpop.f32.mrf.mxu0 }
 0x55d   : > { %v3060_v34 = vpack.c.bf16 %v3047_v31, %v3046_v30  ;;  %v3017_v20 = vadd.f32 %v8163_v21, %v3016_v33  ;;  %v3052_v37 = vmax.f32 %v3025_v13, 0.0 }
 0x55e   : > { %v8661_v35 = vpop.f32.mrf.mxu0 }
 0x55f   : > { %v3028_v36 = vadd.f32 %v8661_v35, %v8163_v21  ;;  %8670 = vmatprep.mubr.msk.bf16.mxu1 %vm3082_vm9, %v3060_v34  ;;  %v3050_v39 = vmax.f32 %v3017_v20, 0.0 }
 0x560   : > { %v3019_v38 = vpop.f32.mrf.mxu0  ;;  %8671 = vmatmul.mubr.msk.bf16.vlgmr.msra.gmra.mxu1 %vm3082_vm9, %v3061_v19  ;;  %v3477_v19 = vsel %vm1893_vm1, %v9657_v29, 0 }
 0x561   : > { %v3053_v40 = vmax.f32 %v3028_v36, 0.0  ;;  %v3020_v41 = vadd.f32 %v8163_v21, %v3019_v38  ;;  %8699 = vmatpush3.bf16.msra.mxu1 %v3365_v60 }
 0x562   : > { %v8664_v42 = vpop.f32.mrf.mxu0 }
 0x563   : > { %v3051_v43 = vmax.f32 %v3020_v41, 0.0  ;;  %v3063_v44 = vpack.c.bf16 %v3053_v40, %v3052_v37  ;;  %v3041_v45 = vadd.f32 %v8664_v42, %v8163_v21  ;;  %v9658_v40 = vld [vmem:[#allocation28] sm:$0xff]  }
 0x564   : > { %v3032_v46 = vpop.f32.mrf.mxu0 }
 0x565   : > { %v3062_v47 = vpack.c.bf16 %v3051_v43, %v3050_v39  ;;  %v3033_v2 = vadd.f32 %v8163_v21, %v3032_v46  ;;  %v3056_v49 = vmax.f32 %v3041_v45, 0.0 }
 0x566   : > { %v8665_v48 = vpop.f32.mrf.mxu0 }
 0x567   : > { %8674 = vmatprep.mubr.msk.bf16.mxu1 %vm3082_vm9, %v3062_v47  ;;  %v3054_v53 = vmax.f32 %v3033_v2, 0.0  ;;  %v3065_v51 = vpack.c.bf16 %v3056_v49, %v3056_v49 }
 0x568   : > { %v3035_v52 = vpop.f32.mrf.mxu0  ;;  %8675 = vmatmul.mubr.msk.bf16.gmra.mxu1 %vm3082_vm9, %v3063_v44 }
 0x569   : > { %v3036_v54 = vadd.f32 %v8163_v21, %v3035_v52 }
 0x56b   : > { %v3055_v55 = vmax.f32 %v3036_v54, 0.0 }
 0x56d   : > { %v3064_v50 = vpack.c.bf16 %v3055_v55, %v3054_v53 }
 0x56f   : > { %8678 = vmatprep.mubr.msk.bf16.mxu1 %vm3082_vm9, %v3064_v50 }
 0x570   : > { %8679 = vmatmul.mubr.msk.bf16.gmra.mxu1 %vm3082_vm9, %v3065_v51 }
 0x605   : > { %v11461_v61 = vpop.f32.mrf.mxu1 }
 0x606   : > { %v2896_v58 = vadd.f32 %v11466_v3, %v11461_v61 }
 0x607   : > { %v8642_v62 = vpop.f32.mrf.mxu1 }
 0x608   : > { %v3462_v60 = vpack.c.bf16 %v2896_v58, %v2896_v58  ;;  %v3544_v62 = vsel %vm1893_vm1, %v9659_v59, 0 }
 0x609   : > { %v11463_v63 = vpop.f32.mrf.mxu1 }
 0x60b   : > { %v8643_v0 = vpop.f32.mrf.mxu1 }
 0x60c   : > { %v9660_v0 = vld [vmem:[#allocation28 + $0xc] sm:$0xff]  }
 0x60d   : > { %v2903_v4 = vpop.f32.mrf.mxu1 }
 0x60e   : > { %v11469_v5 = vadd.f32 %v11466_v3, %v2903_v4  ;;  %v2899_v4 = vadd.f32 %v11466_v3, %v11463_v63  ;;  %v9663_v63 = vld [vmem:[#allocation28 + $0x44] ss:$0 sps:$4 sm:$0x33]  }
 0x60f   : > { %v8646_v10 = vpop.f32.mrf.mxu1 }
 0x610   : > { %v9661_v10 = vld [vmem:[#allocation28 + $0x2c] ss:$0 sps:$4 sm:$0x33]   ;;  %v3530_v61 = vpack.c.bf16 %v2899_v4, %v2899_v4  ;;  %v3591_v58 = vpack.c.bf16 %v11469_v5, %v11469_v5 }
 0x611   : > { %v11471_v14 = vpop.f32.mrf.mxu1 }
 0x613   : > { %v8647_v6 = vpop.f32.mrf.mxu1 }
 0x614   : > { %v3666_v6 = vsel %vm1893_vm1, %v9661_v10, 0 }
 0x615   : > { %v2911_v7 = vpop.f32.mrf.mxu1 }
 0x616   : > { %v11474_v8 = vadd.f32 %v11466_v3, %v2911_v7  ;;  %v9662_v7 = vld [vmem:[#allocation28 + $0x24] sm:$0xff]  }
 0x617   : > { %v8650_v9 = vpop.f32.mrf.mxu1 }
 0x618   : > { %v2907_v9 = vadd.f32 %v11466_v3, %v11471_v14  ;;  %v3713_v5 = vpack.c.bf16 %v11474_v8, %v11474_v8  ;;  %v9672_v8 = vld [vmem:[#allocation31 + $0x8] sm:$0x3f]  }
 0x619   : > { %v11476_v11 = vpop.f32.mrf.mxu1 }
 0x61b   : > { %v8651_v12 = vpop.f32.mrf.mxu1 }
 0x61c   : > { %v3652_v12 = vpack.c.bf16 %v2907_v9, %v2907_v9 }
 0x620   : > { %v8672_v16 = vpop.f32.mrf.mxu1 }
 0x621   : > { %v3147_v24 = vadd.f32 %v8672_v16, %v8170_v18  ;;  %v3788_v16 = vsel %vm1893_vm1, %v9663_v63, 0 }
 0x622   : > { %v3138_v17 = vpop.f32.mrf.mxu1 }
 0x623   : > { %v3139_v22 = vadd.f32 %v8170_v18, %v3138_v17  ;;  %v3186_v32 = vmax.f32 %v3147_v24, 0.0  ;;  %v9664_v17 = vld [vmem:[#allocation28 + $0x3c] sm:$0xff]  }
 0x624   : > { %v8673_v21 = vpop.f32.mrf.mxu1 }
 0x625   : > { %v3150_v23 = vadd.f32 %v8673_v21, %v8170_v18  ;;  %v3184_v30 = vmax.f32 %v3139_v22, 0.0  ;;  %v9666_v21 = vld [vmem:[#allocation25] sm:$0xff]  }
 0x626   : > { %v3141_v25 = vpop.f32.mrf.mxu1  ;;  %8700 = vmatprep.subr.bf16.mxu1 %v9666_v21 }
 0x627   : > { %v3142_v26 = vadd.f32 %v8170_v18, %v3141_v25  ;;  %v3187_v27 = vmax.f32 %v3150_v23, 0.0  ;;  %8701 = vmatpush3.bf16.msra.mxu1 %v9666_v21 }
 0x628   : > { %v8676_v28 = vpop.f32.mrf.mxu1  ;;  %8730 = vmatprep.subr.bf16.mxu1 %v10709_v1 }
 0x629   : > { %v3185_v31 = vmax.f32 %v3142_v26, 0.0  ;;  %v3199_v34 = vpack.c.bf16 %v3187_v27, %v3186_v32  ;;  %v3163_v37 = vadd.f32 %v8676_v28, %v8170_v18  ;;  %v9667_v26 = vld [vmem:[#allocation28 + $0x20] ss:$0 sps:$4 sm:$0x33]  }
 0x62a   : > { %v3154_v13 = vpop.f32.mrf.mxu1 }
 0x62b   : > { %v3198_v33 = vpack.c.bf16 %v3185_v31, %v3184_v30  ;;  %v3155_v35 = vadd.f32 %v8170_v18, %v3154_v13  ;;  %v3190_v45 = vmax.f32 %v3163_v37, 0.0 }
 0x62c   : > { %v8677_v20 = vpop.f32.mrf.mxu1 }
 0x62d   : > { %v3166_v36 = vadd.f32 %v8677_v20, %v8170_v18  ;;  %8686 = vmatprep.mubr.msk.bf16.mxu0 %vm3082_vm9, %v3198_v33  ;;  %v3188_v43 = vmax.f32 %v3155_v35, 0.0  ;;  %v3605_v33 = vsel %vm1893_vm1, %v9667_v26, 0  ;;  %v9668_v20 = vld [vmem:[#allocation28 + $0x18] sm:$0xff]  }
 0x62e   : > { %v3157_v38 = vpop.f32.mrf.mxu1  ;;  %8687 = vmatmul.mubr.msk.bf16.vlgmr.msra.gmra.mxu0 %vm3082_vm9, %v3199_v34 }
 0x62f   : > { %v3158_v39 = vadd.f32 %v8170_v18, %v3157_v38  ;;  %8715 = vmatpush3.bf16.msra.mxu0 %v3477_v19  ;;  %v3191_v41 = vmax.f32 %v3166_v36, 0.0 }
 0x630   : > { %v8680_v42 = vpop.f32.mrf.mxu1  ;;  %8716 = vmatprep.subr.bf16.mxu0 %v10709_v1 }
 0x631   : > { %v3189_v44 = vmax.f32 %v3158_v39, 0.0  ;;  %v3179_v46 = vadd.f32 %v8680_v42, %v8170_v18  ;;  %v3201_v49 = vpack.c.bf16 %v3191_v41, %v3190_v45 }
 0x632   : > { %v3170_v47 = vpop.f32.mrf.mxu1 }
 0x633   : > { %v3200_v2 = vpack.c.bf16 %v3189_v44, %v3188_v43  ;;  %v3171_v48 = vadd.f32 %v8170_v18, %v3170_v47  ;;  %8717 = vmatpush3.bf16.msra.mxu0 %v9658_v40  ;;  %v3194_v53 = vmax.f32 %v3179_v46, 0.0 }
 0x634   : > { %v8681_v52 = vpop.f32.mrf.mxu1  ;;  %8722 = vmatprep.subr.bf16.mxu0 %v10709_v1 }
 0x635   : > { %8690 = vmatprep.mubr.msk.bf16.mxu0 %vm3082_vm9, %v3200_v2  ;;  %v3192_v55 = vmax.f32 %v3171_v48, 0.0  ;;  %v3203_v56 = vpack.c.bf16 %v3194_v53, %v3194_v53  ;;  %v8200_v53 = vld [vmem:[#allocation29] ss:$0 sm:$0xff] }
 0x636   : > { %v3173_v54 = vpop.f32.mrf.mxu1  ;;  %8691 = vmatmul.mubr.msk.bf16.gmra.mxu0 %vm3082_vm9, %v3201_v49 }
 0x637   : > { %v3174_v51 = vadd.f32 %v8170_v18, %v3173_v54  ;;  %v2915_v18 = vadd.f32 %v11466_v3, %v11476_v11  ;;  %v8179_v3 = vld [vmem:[#allocation23] ss:$0 sm:$0xff] }
 0x639   : > { %v3193_v50 = vmax.f32 %v3174_v51, 0.0  ;;  %v3774_v14 = vpack.c.bf16 %v2915_v18, %v2915_v18  ;;  %v9669_v51 = vld [vmem:[#allocation28 + $0x38] ss:$0 sps:$4 sm:$0x33]  }
 0x63b   : > { %v3202_v57 = vpack.c.bf16 %v3193_v50, %v3192_v55 }
 0x63d   : > { %8694 = vmatprep.mubr.msk.bf16.mxu0 %vm3082_vm9, %v3202_v57 }
 0x63e   : > { %8695 = vmatmul.mubr.msk.bf16.gmra.mxu0 %vm3082_vm9, %v3203_v56 }
 0x63f   : > { %8718 = vmatprep.mubr.msk.bf16.mxu0 %vm10711_vm0, %v10709_v1 }
 0x646   : > { %8719 = vmatmul.mubr.msk.bf16.vlgmr.msra.gmra.mxu0 %vm3472_vm10, %v3462_v60  ;;  %v3727_v60 = vsel %vm1893_vm1, %v9669_v51, 0  ;;  %vm4700_vm1 = vcmask 261120  }
 0x647   : > { %8723 = vmatpush3.bf16.msra.mxu0 %v3544_v62  ;;  %8726 = vmatprep.mubr.msk.bf16.mxu0 %vm10711_vm0, %v10709_v1 }
 0x648   : > { %8724 = vmatprep.subr.bf16.mxu0 %v10709_v1 }
 0x64b   : > { %8725 = vmatpush3.bf16.msra.mxu0 %v9660_v0  ;;  %v9670_v0 = vld [vmem:[#allocation28 + $0x30] sm:$0xff]  }
 0x64c   : > { %8738 = vmatprep.subr.bf16.mxu0 %v10709_v1 }
 0x64e   : > { %8727 = vmatmul.mubr.msk.bf16.vlgmr.msra.gmra.mxu0 %vm3472_vm10, %v3530_v61 }
 0x64f   : > { %8739 = vmatpush3.bf16.msra.mxu0 %v3666_v6  ;;  %8742 = vmatprep.mubr.msk.bf16.mxu0 %vm10711_vm0, %v10709_v1 }
 0x650   : > { %8740 = vmatprep.subr.bf16.mxu0 %v10709_v1 }
 0x653   : > { %8741 = vmatpush3.bf16.msra.mxu0 %v9662_v7 }
 0x654   : > { %8754 = vmatprep.subr.bf16.mxu0 %v10709_v1 }
 0x656   : > { %8743 = vmatmul.mubr.msk.bf16.vlgmr.msra.gmra.mxu0 %vm3472_vm10, %v3652_v12 }
 0x657   : > { %8755 = vmatpush3.bf16.msra.mxu0 %v3788_v16  ;;  %8758 = vmatprep.mubr.msk.bf16.mxu0 %vm10711_vm0, %v10709_v1 }
 0x658   : > { %8756 = vmatprep.subr.bf16.mxu0 %v10709_v1 }
 0x65b   : > { %8757 = vmatpush3.bf16.msra.mxu0 %v9664_v17  ;;  %v9671_v17 = vld [vmem:[#allocation31] sm:$0x3f]  }
 0x65c   : > { %8768 = vmatprep.subr.bf16.mxu0 %v10709_v1  ;;  %v3847_v18 = vsel %vm3845_vm11, %v9671_v17, 0  ;;  %v9680_v17 = vld [vmem:[#allocation31 + $0x48] sm:$0x3f]  }
 0x65e   : > { %8759 = vmatmul.mubr.msk.bf16.vlgmr.msra.gmra.mxu0 %vm3472_vm10, %v3774_v14  ;;  %v3909_v14 = vsel %vm3845_vm11, %v9672_v8, 0 }
 0x65f   : > { %8770 = vmatprep.mubr.msk.bf16.mxu0 %vm10711_vm0, %v10709_v1  ;;  %8769 = vmatpush3.bf16.msra.mxu0 %v3909_v14 }
 0x660   : > { %8780 = vmatprep.subr.bf16.mxu0 %v10709_v1 }
 0x6ee   : > { %v8688_v22 = vpop.f32.mrf.mxu0 }
 0x6ef   : > { %v3284_v29 = vadd.f32 %v8688_v22, %v8179_v3  ;;  %v11553_v22 = vld [vmem:[#allocation26] ss:$0 sm:$0xff] }
 0x6f0   : > { %v3275_v23 = vpop.f32.mrf.mxu0 }
 0x6f1   : > { %v3276_v27 = vadd.f32 %v8179_v3, %v3275_v23 }
 0x6f2   : > { %v8689_v24 = vpop.f32.mrf.mxu0 }
 0x6f3   : > { %v3287_v11 = vadd.f32 %v8689_v24, %v8179_v3 }
 0x6f4   : > { %v3278_v25 = vpop.f32.mrf.mxu0 }
 0x6f5   : > { %v3279_v28 = vadd.f32 %v8179_v3, %v3278_v25  ;;  %v3325_v32 = vpack.c.bf16 %v3287_v11, %v3284_v29 }
 0x6f6   : > { %v8692_v30 = vpop.f32.mrf.mxu0 }
 0x6f7   : > { %v3324_v31 = vpack.c.bf16 %v3279_v28, %v3276_v27  ;;  %v3300_v38 = vadd.f32 %v8692_v30, %v8179_v3 }
 0x6f8   : > { %v3291_v13 = vpop.f32.mrf.mxu0 }
 0x6f9   : > { %8702 = vmatprep.mubr.msk.bf16.mxu1 %vm3082_vm9, %v3324_v31  ;;  %v3292_v36 = vadd.f32 %v8179_v3, %v3291_v13  ;;  %v9674_v31 = vld [vmem:[#allocation31 + $0x18] sm:$0x3f]  }
 0x6fa   : > { %v8693_v34 = vpop.f32.mrf.mxu0  ;;  %8703 = vmatmul.mubr.msk.bf16.vlgmr.msra.gmra.mxu1 %vm3082_vm9, %v3325_v32 }
 0x6fb   : > { %8731 = vmatpush3.bf16.msra.mxu1 %v3605_v33  ;;  %v3303_v19 = vadd.f32 %v8693_v34, %v8179_v3 }
 0x6fc   : > { %v3294_v35 = vpop.f32.mrf.mxu0  ;;  %8732 = vmatprep.subr.bf16.mxu1 %v10709_v1 }
 0x6fd   : > { %v3295_v37 = vadd.f32 %v8179_v3, %v3294_v35  ;;  %v3327_v41 = vpack.c.bf16 %v3303_v19, %v3300_v38  ;;  %v4021_v35 = vsel %vm3845_vm11, %v9674_v31, 0 }
 0x6fe   : > { %v8696_v39 = vpop.f32.mrf.mxu0 }
 0x6ff   : > { %v3326_v40 = vpack.c.bf16 %v3295_v37, %v3292_v36  ;;  %8733 = vmatpush3.bf16.msra.mxu1 %v9668_v20  ;;  %v3316_v44 = vadd.f32 %v8696_v39, %v8179_v3  ;;  %v9675_v36 = vld [vmem:[#allocation31 + $0x20] sm:$0x3f]  }
 0x700   : > { %v3307_v42 = vpop.f32.mrf.mxu0  ;;  %8746 = vmatprep.subr.bf16.mxu1 %v10709_v1 }
 0x701   : > { %8706 = vmatprep.mubr.msk.bf16.mxu1 %vm3082_vm9, %v3326_v40  ;;  %v3308_v46 = vadd.f32 %v8179_v3, %v3307_v42  ;;  %v3329_v49 = vpack.c.bf16 %v3316_v44, %v3316_v44  ;;  %v4077_v42 = vsel %vm3845_vm11, %v9675_v36, 0  ;;  %v9685_v36 = vld [vmem:[#allocation34] sm:$0xff]  }
 0x702   : > { %v8697_v43 = vpop.f32.mrf.mxu0  ;;  %8707 = vmatmul.mubr.msk.bf16.gmra.mxu1 %vm3082_vm9, %v3327_v41 }
 0x703   : > { %v9676_v43 = vld [vmem:[#allocation31 + $0x28] sm:$0x3f]  }
 0x704   : > { %v3310_v45 = vpop.f32.mrf.mxu0 }
 0x705   : > { %v3311_v47 = vadd.f32 %v8179_v3, %v3310_v45  ;;  %v9673_v3 = vld [vmem:[#allocation31 + $0x10] sm:$0x3f]  }
 0x706   : > { %v3513_v2 = vpop.f32.mrf.mxu0  ;;  %v3965_v30 = vsel %vm3845_vm11, %v9673_v3, 0  ;;  %v9681_v3 = vld [vmem:[#allocation31 + $0x50] sm:$0x3f]  }
 0x707   : > { %v3328_v48 = vpack.c.bf16 %v3311_v47, %v3308_v46  ;;  %v3525_v50 = vadd.f32 %v8200_v53, %v3513_v2 }
 0x708   : > { %v8720_v52 = vpop.f32.mrf.mxu0 }
 0x709   : > { %8710 = vmatprep.mubr.msk.bf16.mxu1 %vm3082_vm9, %v3328_v48  ;;  %v4133_v48 = vsel %vm3845_vm11, %v9676_v43, 0 }
 0x70a   : > { %8711 = vmatmul.mubr.msk.bf16.gmra.mxu1 %vm3082_vm9, %v3329_v49  ;;  %v3516_v54 = vpop.f32.mrf.mxu0  ;;  %v9677_v49 = vld [vmem:[#allocation31 + $0x30] sm:$0x3f]  }
 0x70b   : > { %8734 = vmatprep.mubr.msk.bf16.mxu1 %vm10711_vm0, %v10709_v1 }
 0x70c   : > { %v8721_v55 = vpop.f32.mrf.mxu0 }
 0x70e   : > { %v3580_v56 = vpop.f32.mrf.mxu0 }
 0x70f   : > { %v11530_v57 = vadd.f32 %v3580_v56, %v3525_v50  ;;  %v4189_v50 = vsel %vm3845_vm11, %v9677_v49, 0  ;;  %v9678_v56 = vld [vmem:[#allocation31 + $0x38] sm:$0x3f]  }
 0x710   : > { %v8728_v59 = vpop.f32.mrf.mxu0 }
 0x712   : > { %v3583_v62 = vpop.f32.mrf.mxu0  ;;  %8735 = vmatmul.mubr.msk.bf16.vlgmr.msra.gmra.mxu1 %vm3472_vm10, %v3591_v58 }
 0x713   : > { %8747 = vmatpush3.bf16.msra.mxu1 %v3727_v60  ;;  %8750 = vmatprep.mubr.msk.bf16.mxu1 %vm10711_vm0, %v10709_v1 }
 0x714   : > { %v8729_v4 = vpop.f32.mrf.mxu0  ;;  %8748 = vmatprep.subr.bf16.mxu1 %v10709_v1 }
 0x715   : > { %v4245_v4 = vsel %vm3845_vm11, %v9678_v56, 0  ;;  %v8218_v56 = vld [vmem:[#allocation32] ss:$0 sm:$0xff] }
 0x716   : > { %v11539_v10 = vpop.f32.mrf.mxu0 }
 0x717   : > { %8749 = vmatpush3.bf16.msra.mxu1 %v9670_v0 }
 0x718   : > { %v8744_v61 = vpop.f32.mrf.mxu0  ;;  %8762 = vmatprep.subr.bf16.mxu1 %v10709_v1 }
 0x71a   : > { %v3705_v6 = vpop.f32.mrf.mxu0  ;;  %8751 = vmatmul.mubr.msk.bf16.vlgmr.msra.gmra.mxu1 %vm3472_vm10, %v3713_v5  ;;  %v9679_v5 = vld [vmem:[#allocation31 + $0x40] sm:$0x3f]  }
 0x71b   : > { %8764 = vmatprep.mubr.msk.bf16.mxu1 %vm10711_vm0, %v10709_v1  ;;  %8763 = vmatpush3.bf16.msra.mxu1 %v3847_v18 }
 0x71c   : > { %v8745_v7 = vpop.f32.mrf.mxu0  ;;  %8774 = vmatprep.subr.bf16.mxu1 %v10709_v1 }
 0x71e   : > { %v11547_v9 = vpop.f32.mrf.mxu0 }
 0x720   : > { %v8760_v63 = vpop.f32.mrf.mxu0 }
 0x722   : > { %v3827_v12 = vpop.f32.mrf.mxu0 }
 0x724   : > { %v8761_v16 = vpop.f32.mrf.mxu0 }
 0x725   : > { %v4301_v16 = vsel %vm3845_vm11, %v9679_v5, 0 }
 0x7ba   : > { %v8704_v21 = vpop.f32.mrf.mxu1 }
 0x7bb   : > { %v3410_v27 = vadd.f32 %v8704_v21, %v11553_v22 }
 0x7bc   : > { %v3401_v23 = vpop.f32.mrf.mxu1 }
 0x7bd   : > { %v3402_v24 = vadd.f32 %v11553_v22, %v3401_v23  ;;  %v3449_v34 = vmax.f32 %v3410_v27, 0.0 }
 0x7be   : > { %v8705_v11 = vpop.f32.mrf.mxu1 }
 0x7bf   : > { %v3447_v25 = vmax.f32 %v3402_v24, 0.0  ;;  %v3413_v20 = vadd.f32 %v8705_v11, %v11553_v22  ;;  %v3955_v39 = vpack.c.bf16 %v3449_v34, %v3449_v34  ;;  %v4357_v24 = vsel %vm3845_vm11, %v9680_v17, 0 }
 0x7c0   : > { %v3404_v26 = vpop.f32.mrf.mxu1 }
 0x7c1   : > { %v3835_v28 = vpack.c.bf16 %v3447_v25, %v3447_v25  ;;  %v3405_v29 = vadd.f32 %v11553_v22, %v3404_v26  ;;  %v3450_v40 = vmax.f32 %v3413_v20, 0.0  ;;  %v9683_v20 = vld [vmem:[#allocation34 + $0x10] sm:$0xff]  }
 0x7c2   : > { %v8708_v32 = vpop.f32.mrf.mxu1 }
 0x7c3   : > { %v3448_v13 = vmax.f32 %v3405_v29, 0.0  ;;  %8765 = vmatmul.mubr.msk.bf16.vlgmr.msra.gmra.mxu1 %vm3841_vm12, %v3835_v28  ;;  %v4011_v46 = vpack.c.bf16 %v3450_v40, %v3450_v40  ;;  %v3426_v54 = vadd.f32 %v8708_v32, %v11553_v22  ;;  %v4413_v29 = vsel %vm3845_vm11, %v9681_v3, 0  ;;  %v9682_v32 = vld [vmem:[#allocation34 + $0x18] sm:$0x3f]   ;;  %v9688_v40 = vld [vmem:[#allocation35] sm:$0xff]  }
 0x7c4   : > { %v3417_v33 = vpop.f32.mrf.mxu1  ;;  %8775 = vmatpush3.bf16.msra.mxu1 %v3965_v30  ;;  %8776 = vmatprep.mubr.msk.bf16.mxu1 %vm10711_vm0, %v10709_v1 }
 0x7c5   : > { %v3899_v19 = vpack.c.bf16 %v3448_v13, %v3448_v13  ;;  %8786 = vmatprep.subr.bf16.mxu1 %v10709_v1  ;;  %v3418_v41 = vadd.f32 %v11553_v22, %v3417_v33  ;;  %v3453_v60 = vmax.f32 %v3426_v54, 0.0  ;;  %v4561_v33 = vsel %vm3845_vm11, %v9682_v32, 0 }
 0x7c6   : > { %v8709_v37 = vpop.f32.mrf.mxu1 }
 0x7c7   : > { %8771 = vmatmul.mubr.msk.bf16.vlgmr.msra.gmra.mxu0 %vm3841_vm12, %v3899_v19  ;;  %v3451_v47 = vmax.f32 %v3418_v41, 0.0  ;;  %v3429_v62 = vadd.f32 %v8709_v37, %v11553_v22  ;;  %v4179_v7 = vpack.c.bf16 %v3453_v60, %v3453_v60 }
 0x7c8   : > { %v3420_v38 = vpop.f32.mrf.mxu1  ;;  %8781 = vmatpush3.bf16.msra.mxu0 %v4021_v35  ;;  %8782 = vmatprep.mubr.msk.bf16.mxu0 %vm10711_vm0, %v10709_v1 }
 0x7c9   : > { %8792 = vmatprep.subr.bf16.mxu0 %v10709_v1  ;;  %v3421_v2 = vadd.f32 %v11553_v22, %v3420_v38  ;;  %v4067_v55 = vpack.c.bf16 %v3451_v47, %v3451_v47  ;;  %v3454_v63 = vmax.f32 %v3429_v62, 0.0  ;;  %v9686_v38 = vld [vmem:[#allocation35 + $0x10] ss:$0 sps:$4 sm:$0xff]  }
 0x7ca   : > { %v8712_v44 = vpop.f32.mrf.mxu1 }
 0x7cb   : > { %8777 = vmatmul.mubr.msk.bf16.vlgmr.msra.gmra.mxu1 %vm3841_vm12, %v3955_v39  ;;  %v3452_v51 = vmax.f32 %v3421_v2, 0.0  ;;  %v4235_v14 = vpack.c.bf16 %v3454_v63, %v3454_v63  ;;  %v3442_v26 = vadd.f32 %v8712_v44, %v11553_v22  ;;  %v4491_v39 = vsel %vm2857_vm6, %v9686_v38, 0 }
 0x7cc   : > { %v3433_v45 = vpop.f32.mrf.mxu1  ;;  %8787 = vmatpush3.bf16.msra.mxu1 %v4077_v42  ;;  %8788 = vmatprep.mubr.msk.bf16.mxu1 %vm10711_vm0, %v10709_v1 }
 0x7cd   : > { %8798 = vmatprep.subr.bf16.mxu1 %v10709_v1  ;;  %v4123_v0 = vpack.c.bf16 %v3452_v51, %v3452_v51  ;;  %v3434_v12 = vadd.f32 %v11553_v22, %v3433_v45  ;;  %v3457_v30 = vmax.f32 %v3442_v26, 0.0 }
 0x7ce   : > { %v8713_v52 = vpop.f32.mrf.mxu1 }
 0x7cf   : > { %8783 = vmatmul.mubr.msk.bf16.vlgmr.msra.gmra.mxu0 %vm3841_vm12, %v4011_v46  ;;  %v3455_v21 = vmax.f32 %v3434_v12, 0.0 }
 0x7d0   : > { %v3436_v53 = vpop.f32.mrf.mxu1  ;;  %8793 = vmatpush3.bf16.msra.mxu0 %v4133_v48  ;;  %8794 = vmatprep.mubr.msk.bf16.mxu0 %vm10711_vm0, %v10709_v1 }
 0x7d1   : > { %8804 = vmatprep.subr.bf16.mxu0 %v10709_v1  ;;  %v3437_v23 = vadd.f32 %v11553_v22, %v3436_v53  ;;  %v4291_v27 = vpack.c.bf16 %v3455_v21, %v3455_v21  ;;  %v4403_v22 = vpack.c.bf16 %v3457_v30, %v3457_v30 }
 0x7d2   : > { %v3641_v58 = vpop.f32.mrf.mxu1 }
 0x7d3   : > { %8789 = vmatmul.mubr.msk.bf16.vlgmr.msra.gmra.mxu1 %vm3841_vm12, %v4067_v55  ;;  %v3456_v28 = vmax.f32 %v3437_v23, 0.0  ;;  %v3647_v13 = vadd.f32 %v3641_v58, %v11530_v57  ;;  %v9684_v57 = vld [vmem:[#allocation34 + $0x8] sm:$0xff]  }
 0x7d4   : > { %v8736_v59 = vpop.f32.mrf.mxu1  ;;  %8799 = vmatpush3.bf16.msra.mxu1 %v4189_v50  ;;  %8800 = vmatprep.mubr.msk.bf16.mxu1 %vm10711_vm0, %v10709_v1 }
 0x7d5   : > { %8810 = vmatprep.subr.bf16.mxu1 %v10709_v1  ;;  %v4347_v31 = vpack.c.bf16 %v3456_v28, %v3456_v28  ;;  %v3708_v34 = vadd.f32 %v11539_v10, %v3647_v13 }
 0x7d6   : > { %v3644_v61 = vpop.f32.mrf.mxu1 }
 0x7d7   : > { %8795 = vmatmul.mubr.msk.bf16.vlgmr.msra.gmra.mxu0 %vm3841_vm12, %v4123_v0 }
 0x7d8   : > { %v8737_v6 = vpop.f32.mrf.mxu1  ;;  %8805 = vmatpush3.bf16.msra.mxu0 %v4245_v4  ;;  %8806 = vmatprep.mubr.msk.bf16.mxu0 %vm10711_vm0, %v10709_v1 }
 0x7d9   : > { %8816 = vmatprep.subr.bf16.mxu0 %v10709_v1 }
 0x7da   : > { %v3763_v18 = vpop.f32.mrf.mxu1 }
 0x7db   : > { %8801 = vmatmul.mubr.msk.bf16.vlgmr.msra.gmra.mxu1 %vm3841_vm12, %v4179_v7  ;;  %v3769_v19 = vadd.f32 %v3763_v18, %v3708_v34 }
 0x7dc   : > { %v8752_v8 = vpop.f32.mrf.mxu1  ;;  %8811 = vmatpush3.bf16.msra.mxu1 %v4301_v16  ;;  %8812 = vmatprep.mubr.msk.bf16.mxu1 %vm10711_vm0, %v10709_v1 }
 0x7dd   : > { %8822 = vmatprep.subr.bf16.mxu1 %v10709_v1  ;;  %v3830_v35 = vadd.f32 %v11547_v9, %v3769_v19  ;;  %v9687_v9 = vld [vmem:[#allocation35 + $0x8] sm:$0xff]  }
 0x7de   : > { %v3766_v11 = vpop.f32.mrf.mxu1 }
 0x7df   : > { %8807 = vmatmul.mubr.msk.bf16.vlgmr.msra.gmra.mxu0 %vm3841_vm12, %v4235_v14  ;;  %v3831_v37 = vmax.f32 %v3830_v35, 0.0 }
 0x7e0   : > { %v8753_v25 = vpop.f32.mrf.mxu1  ;;  %8817 = vmatpush3.bf16.msra.mxu0 %v4357_v24  ;;  %8818 = vmatprep.mubr.msk.bf16.mxu0 %vm10711_vm0, %v10709_v1 }
 0x7e1   : > { %8828 = vmatprep.subr.bf16.mxu0 %v10709_v1  ;;  %v4465_v10 = vpack.c.bf16 %v3831_v37, %v3831_v37 }
 0x7e3   : > { %8813 = vmatmul.mubr.msk.bf16.vlgmr.msra.gmra.mxu1 %vm3841_vm12, %v4291_v27 }
 0x7e4   : > { %8823 = vmatpush3.bf16.msra.mxu1 %v4413_v29  ;;  %8824 = vmatprep.mubr.msk.bf16.mxu1 %vm10711_vm0, %v10709_v1 }
 0x7e5   : > { %8838 = vmatprep.subr.bf16.mxu1 %v10709_v1 }
 0x7e7   : > { %8819 = vmatmul.mubr.msk.bf16.vlgmr.msra.gmra.mxu0 %vm3841_vm12, %v4347_v31 }
 0x7e8   : > { %8834 = vmatprep.mubr.msk.bf16.mxu0 %vm10711_vm0, %v10709_v1  ;;  %8829 = vmatpush3.bf16.msra.mxu0 %v4491_v39  ;;  %v9690_v39 = vld [vmem:[#allocation37] sm:$0xff]  }
 0x7e9   : > { %8830 = vmatprep.subr.bf16.mxu0 %v10709_v1 }
 0x7eb   : > { %8825 = vmatmul.mubr.msk.bf16.vlgmr.msra.gmra.mxu1 %vm3841_vm12, %v4403_v22 }
 0x7ec   : > { %8839 = vmatpush3.bf16.msra.mxu1 %v4561_v33  ;;  %8846 = vmatprep.mubr.msk.bf16.mxu1 %vm10711_vm0, %v10709_v1  ;;  %v9689_v33 = vld [vmem:[#allocation37 + $0x8] ss:$0 sps:$4 sm:$0x11]  }
 0x7ed   : > { %8840 = vmatprep.subr.bf16.mxu1 %v10709_v1  ;;  %8831 = vmatpush3.bf16.msra.mxu0 %v9687_v9  ;;  %v4622_v37 = vsel %vm4620_vm14, %v9689_v33, 0  ;;  %v4456_v9 = vld [vmem:[%s1778_s5] sm:$0xff]  ;;  %s12060_s5 = smov 40  }
 0x7ee   : > { %8832 = vmatprep.subr.bf16.mxu0 %v10709_v1 }
 0x7f0   : > { %8841 = vmatpush3.bf16.msra.mxu1 %v9683_v20 }
 0x7f1   : > { %8842 = vmatprep.subr.bf16.mxu1 %v10709_v1  ;;  %8833 = vmatpush3.bf16.msra.mxu0 %v9688_v40  ;;  %v4606_v40 = vpack.c.bf16 %v4456_v9, %v4456_v9 }
 0x7f2   : > { %8850 = vmatprep.subr.bf16.mxu0 %v10709_v1 }
 0x7f4   : > { %8843 = vmatpush3.bf16.msra.mxu1 %v9684_v57 }
 0x7f5   : > { %8844 = vmatprep.subr.bf16.mxu1 %v10709_v1 }
 0x7f8   : > { %8845 = vmatpush3.bf16.msra.mxu1 %v9685_v36 }
 0x7f9   : > { %8866 = vmatprep.subr.bf16.mxu1 %v10709_v1 }
 0x7fb   : > { %8847 = vmatmul.mubr.msk.bf16.vlgmr.msra.gmra.mxu1 %vm4556_vm13, %v4465_v10 }
 0x7fc   : > { %8868 = vmatprep.mubr.msk.bf16.mxu1 %vm10711_vm0, %v10709_v1 }
 0x883   : > { %v3883_v41 = vpop.f32.mrf.mxu1 }
 0x884   : > { %v3895_v0 = vadd.f32 %v8218_v56, %v3883_v41 }
 0x885   : > { %v8766_v42 = vpop.f32.mrf.mxu1 }
 0x887   : > { %v3886_v43 = vpop.f32.mrf.mxu1  ;;  %v3945_v44 = vpop.f32.mrf.mxu0 }
 0x888   : > { %v3951_v61 = vadd.f32 %v3945_v44, %v3895_v0 }
 0x889   : > { %v8767_v45 = vpop.f32.mrf.mxu1  ;;  %v8772_v46 = vpop.f32.mrf.mxu0 }
 0x88a   : > { %v9691_v45 = vld [vmem:[#allocation40 + $0x8] sm:$0xff]   ;;  %v9692_v46 = vld [vmem:[#allocation40] sm:$0xff]  }
 0x88b   : > { %v3948_v47 = vpop.f32.mrf.mxu0  ;;  %v4001_v2 = vpop.f32.mrf.mxu1 }
 0x88c   : > { %v4007_v63 = vadd.f32 %v4001_v2, %v3951_v61 }
 0x88d   : > { %v8773_v48 = vpop.f32.mrf.mxu0  ;;  %v8778_v49 = vpop.f32.mrf.mxu1 }
 0x88f   : > { %v4004_v52 = vpop.f32.mrf.mxu1  ;;  %v4057_v53 = vpop.f32.mrf.mxu0 }
 0x890   : > { %v4063_v17 = vadd.f32 %v4057_v53, %v4007_v63 }
 0x891   : > { %v8779_v54 = vpop.f32.mrf.mxu1  ;;  %v8784_v55 = vpop.f32.mrf.mxu0 }
 0x892   : > { %v8251_v54 = vld [vmem:[#allocation38] ss:$0 sm:$0xff] }
 0x893   : > { %v4060_v51 = vpop.f32.mrf.mxu0  ;;  %v4113_v50 = vpop.f32.mrf.mxu1 }
 0x894   : > { %v4119_v14 = vadd.f32 %v4113_v50, %v4063_v17  ;;  %v4673_v17 = vld [vmem:[%s1781_s3] sm:$0x1]  ;;  %s12161_s3 = sld [smem:[#allocation88_spill]] }
 0x895   : > { %v8785_v58 = vpop.f32.mrf.mxu0  ;;  %v8790_v59 = vpop.f32.mrf.mxu1  ;;  %vm4674_vm3 = vcmp.gt.f32.partialorder %v4673_v17, 0.5 }
 0x897   : > { %v4116_v60 = vpop.f32.mrf.mxu1  ;;  %v4169_v62 = vpop.f32.mrf.mxu0 }
 0x898   : > { %v4175_v24 = vadd.f32 %v4169_v62, %v4119_v14  ;;  %v8252_v60 = vld [vmem:[#allocation41] ss:$0 sm:$0xff] }
 0x899   : > { %v8791_v4 = vpop.f32.mrf.mxu1  ;;  %v8796_v5 = vpop.f32.mrf.mxu0 }
 0x89b   : > { %v4172_v6 = vpop.f32.mrf.mxu0  ;;  %v4225_v7 = vpop.f32.mrf.mxu1 }
 0x89c   : > { %v4231_v25 = vadd.f32 %v4225_v7, %v4175_v24 }
 0x89d   : > { %v8797_v12 = vpop.f32.mrf.mxu0  ;;  %v8802_v16 = vpop.f32.mrf.mxu1 }
 0x89f   : > { %v4228_v18 = vpop.f32.mrf.mxu1  ;;  %v4281_v8 = vpop.f32.mrf.mxu0 }
 0x8a0   : > { %v4287_v28 = vadd.f32 %v4281_v8, %v4231_v25  ;;  %v10714_v18 = vmov -1e+09  }
 0x8a1   : > { %v8803_v21 = vpop.f32.mrf.mxu1  ;;  %v8808_v23 = vpop.f32.mrf.mxu0  ;;  %v4675_v8 = vsel %vm4674_vm3, 0.0, %v10714_v18 }
 0x8a2   : > { %v11668_v14 = vrot.slane %v4675_v8, %v11349_v15 }
 0x8a3   : > { %v4284_v3 = vpop.f32.mrf.mxu0  ;;  %v4337_v11 = vpop.f32.mrf.mxu1 }
 0x8a4   : > { %v4343_v31 = vadd.f32 %v4337_v11, %v4287_v28 }
 0x8a5   : > { %v8809_v26 = vpop.f32.mrf.mxu0  ;;  %v8814_v27 = vpop.f32.mrf.mxu1 }
 0x8a7   : > { %v4340_v29 = vpop.f32.mrf.mxu1  ;;  %v4393_v30 = vpop.f32.mrf.mxu0 }
 0x8a8   : > { %v4399_v22 = vadd.f32 %v4393_v30, %v4343_v31  ;;  %v4865_v31 = vld [vmem:[#allocation43] sm:$0xf] }
 0x8a9   : > { %v8815_v32 = vpop.f32.mrf.mxu1  ;;  %v8820_v13 = vpop.f32.mrf.mxu0 }
 0x8aa   : > { %v4870_v32 = vsel %vm2857_vm6, %v4865_v31, 0  ;;  %v8259_v31 = vld [vmem:[#allocation44] ss:$0 sm:$0xff] }
 0x8ab   : > { %v4396_v34 = vpop.f32.mrf.mxu0  ;;  %v4449_v20 = vpop.f32.mrf.mxu1 }
 0x8ac   : > { %v4455_v19 = vadd.f32 %v4449_v20, %v4399_v22 }
 0x8ad   : > { %v8821_v57 = vpop.f32.mrf.mxu0  ;;  %v8826_v35 = vpop.f32.mrf.mxu1 }
 0x8ae   : > { %v4471_v36 = vpack.c.bf16 %v4455_v19, %v4455_v19 }
 0x8af   : > { %v4452_v10 = vpop.f32.mrf.mxu1 }
 0x8b0   : > { %8835 = vmatmul.mubr.msk.bf16.vlgmr.msra.gmra.mxu0 %vm2847_vm8, %v4471_v36 }
 0x8b1   : > { %v8827_v38 = vpop.f32.mrf.mxu1  ;;  %8851 = vmatpush3.bf16.msra.mxu0 %v4622_v37  ;;  %8854 = vmatprep.mubr.msk.bf16.mxu0 %vm10711_vm0, %v10709_v1 }
 0x8b2   : > { %8852 = vmatprep.subr.bf16.mxu0 %v10709_v1 }
 0x8b5   : > { %8853 = vmatpush3.bf16.msra.mxu0 %v9690_v39 }
 0x8b6   : > { %8858 = vmatprep.subr.bf16.mxu0 %v10709_v1 }
 0x8b8   : > { %8855 = vmatmul.mubr.msk.bf16.vlgmr.msra.gmra.mxu0 %vm4616_vm15, %v4606_v40 }
 0x8b9   : > { %8862 = vmatprep.mubr.msk.bf16.mxu0 %vm10711_vm0, %v10709_v1  ;;  %8859 = vmatpush3.bf16.msra.mxu0 %v9691_v45 }
 0x8ba   : > { %8860 = vmatprep.subr.bf16.mxu0 %v10709_v1 }
 0x8bb   : > { %v4597_v41 = vpop.f32.mrf.mxu1 }
 0x8bd   : > { %v8848_v42 = vpop.f32.mrf.mxu1  ;;  %8861 = vmatpush3.bf16.msra.mxu0 %v9692_v46 }
 0x8be   : > { %8872 = vmatprep.subr.bf16.mxu0 %v10709_v1 }
 0x8bf   : > { %v4600_v43 = vpop.f32.mrf.mxu1 }
 0x8c1   : > { %v8849_v44 = vpop.f32.mrf.mxu1 }
 0x970   : > { %v4527_v47 = vpop.f32.mrf.mxu0 }
 0x971   : > { %v4598_v52 = vadd.f32 %v4597_v41, %v4527_v47 }
 0x972   : > { %v8836_v2 = vpop.f32.mrf.mxu0 }
 0x974   : > { %v4530_v48 = vpop.f32.mrf.mxu0 }
 0x976   : > { %v8837_v49 = vpop.f32.mrf.mxu0 }
 0x978   : > { %v4658_v53 = vpop.f32.mrf.mxu0 }
 0x979   : > { %v4664_v55 = vadd.f32 %v4658_v53, %v4598_v52 }
 0x97a   : > { %v8856_v51 = vpop.f32.mrf.mxu0 }
 0x97b   : > { %v11644_v50 = vadd.f32 %v8251_v54, %v4664_v55 }
 0x97c   : > { %v4661_v56 = vpop.f32.mrf.mxu0 }
 0x97d   : > { %v4680_v58 = vpack.c.bf16 %v11644_v50, %v11644_v50 }
 0x97e   : > { %v8857_v59 = vpop.f32.mrf.mxu0 }
 0x97f   : > { %8863 = vmatmul.mubr.msk.bf16.vlgmr.msra.gmra.mxu0 %vm4700_vm1, %v4680_v58 }
 0x980   : > { %8874 = vmatprep.mubr.msk.bf16.mxu0 %vm10711_vm0, %v10709_v1 }
 0xa3f   : > { %v4738_v62 = vpop.f32.mrf.mxu0 }
 0xa40   : > { %v4739_v0 = vadd.f32 %v8252_v60, %v4738_v62 }
 0xa41   : > { %v8864_v4 = vpop.f32.mrf.mxu0 }
 0xa42   : > { %v11651_v5 = vpack.c.bf16 %v4739_v0, %v4739_v0 }
 0xa43   : > { %v4741_v61 = vpop.f32.mrf.mxu0 }
 0xa44   : > { %4816 = vrot.lane.b32.xlu1 %v11651_v5, %s10712_s4  ;;  %4747 = vrot.lane.b32.xlu0 %v11651_v5, %s10713_s18  ;;  %v5033_v61 = vld [vmem:[#allocation43 + $0x4] sm:$0xf] }
 0xa45   : > { %v8865_v6 = vpop.f32.mrf.mxu0 }
 0xa46   : > { %v5038_v6 = vsel %vm2857_vm6, %v5033_v61, 0 }
 0xab6   : > { %v4817_v7 = vpop.permute.xlu1 %4816  ;;  %v4748_v63 = vpop.permute.xlu0 %4747 }
 0xab7   : > { %v4822_v12 = vsel %vm2857_vm6, %v4817_v7, 0  ;;  %v4754_v16 = vsel %vm4749_vm2, %v4748_v63, 0 }
 0xab8   : > { %8867 = vmatpush3.bf16.xpose.msra.mxu1 %v4754_v16  ;;  %8873 = vmatpush3.bf16.msra.mxu0 %v4822_v12 }
 0xab9   : > { %8884 = vmatprep.subr.bf16.mxu0 %v10709_v1  ;;  %8878 = vmatprep.subr.bf16.mxu1 %v10709_v1 }
 0xabf   : > { %8869 = vmatmul.mubr.msk.bf16.vlgmr.msra.gmra.mxu1 %vm4749_vm2, %v11651_v5 }
 0xac0   : > { %8880 = vmatprep.mubr.msk.bf16.mxu1 %vm10711_vm0, %v10709_v1  ;;  %8879 = vmatpush3.bf16.msra.mxu1 %v4870_v32 }
 0xac1   : > { %8890 = vmatprep.subr.bf16.mxu1 %v10709_v1 }
 0xb7f   : > { %v4790_v21 = vpop.f32.mrf.mxu1 }
 0xb80   : > { %v4796_v23 = vmul.f32 0.35355338, %v4790_v21 }
 0xb81   : > { %v8870_v24 = vpop.f32.mrf.mxu1 }
 0xb82   : > { %v4803_v3 = vadd.f32 %v11668_v14, %v4796_v23 }
 0xb83   : > { %v4793_v11 = vpop.f32.mrf.mxu1 }
 0xb84   : > { %v4804_v25 = vsel %vm4749_vm2, %v4803_v3, -inf }
 0xb85   : > { %4805 = vmax.xlane.f32.xlu0 %v4804_v25  ;;  %v8871_v26 = vpop.f32.mrf.mxu1 }
 0xb9b   : > { %4983 = vrot.lane.b32.xlu0 %v11651_v5, %s10715_s2 }
 0xc0e   : > { %v4806_v27 = vpop.xlane.xlu0 %4805 }
 0xc0f   : > { %v4807_v28 = vsub.f32 %v4803_v3, %v4806_v27 }
 0xc11   : > { %v4808_v29 = vmul.f32 1.442695, %v4807_v28 }
 0xc12   : > { %v4984_v35 = vpop.permute.xlu0 %4983 }
 0xc13   : > { %9717 = vpow2.f32 %v4808_v29  ;;  %v4989_v38 = vsel %vm2857_vm6, %v4984_v35, 0 }
 0xc20   : > { %v9718_v15 = vpop.eup %9717 }
 0xc21   : > { %v4810_v30 = vsel %vm4749_vm2, %v9718_v15, 0.0 }
 0xc22   : > { %4811 = vadd.xlane.f32.xlu1 %v4810_v30 }
 0xc33   : > { %4921 = vrot.lane.b32.xlu1 %v11651_v5, %s10716_s11 }
 0xc37   : > { %4919 = vrot.lane.b32.xlu1 %v11651_v5, %s10717_s26 }
 0xcab   : > { %v4812_v13 = vpop.xlane.xlu1 %4811 }
 0xcac   : > { %9719 = vrcp.f32 %v4812_v13 }
 0xcaf   : > { %v4922_v34 = vpop.permute.xlu1 %4921 }
 0xcb0   : > { %v4927_v19 = vsel %vm4749_vm2, %v4922_v34, 0 }
 0xcb3   : > { %v4920_v57 = vpop.permute.xlu1 %4919 }
 0xcb9   : > { %v9720_v22 = vpop.eup %9719 }
 0xcba   : > { %v4814_v33 = vmul.f32 %v9720_v22, %v9718_v15 }
 0xcbc   : > { %v4815_v20 = vpack.c.bf16 %v4814_v33, %v4814_v33 }
 0xcbe   : > { %8875 = vmatmul.mubr.msk.bf16.vlgmr.msra.gmra.mxu0 %vm4749_vm2, %v4815_v20 }
 0xcbf   : > { %8885 = vmatpush3.bf16.xpose.msra.mxu0 %v4927_v19  ;;  %8886 = vmatprep.mubr.msk.bf16.mxu0 %vm10711_vm0, %v10709_v1 }
 0xcc0   : > { %8896 = vmatprep.subr.bf16.mxu0 %v10709_v1 }
 0xcc6   : > { %8887 = vmatmul.mubr.msk.bf16.vlgmr.msra.gmra.mxu0 %vm4749_vm2, %v4920_v57 }
 0xcc7   : > { %8898 = vmatprep.mubr.msk.bf16.mxu0 %vm10711_vm0, %v10709_v1  ;;  %8897 = vmatpush3.bf16.msra.mxu0 %v5038_v6 }
 0xcc8   : > { %8908 = vmatprep.subr.bf16.mxu0 %v10709_v1 }
 0xd7e   : > { %v4858_v36 = vpop.f32.mrf.mxu0 }
 0xd7f   : > { %v4864_v37 = vpack.c.bf16 %v4858_v36, %v4858_v36 }
 0xd80   : > { %v8876_v10 = vpop.f32.mrf.mxu0 }
 0xd81   : > { %8881 = vmatmul.mubr.msk.bf16.vlgmr.msra.gmra.mxu1 %vm4749_vm2, %v4864_v37 }
 0xd82   : > { %8891 = vmatpush3.bf16.msra.mxu1 %v4989_v38  ;;  %v4861_v39 = vpop.f32.mrf.mxu0  ;;  %8892 = vmatprep.mubr.msk.bf16.mxu1 %vm10711_vm0, %v10709_v1 }
 0xd83   : > { %8902 = vmatprep.subr.bf16.mxu1 %v10709_v1  ;;  %v5195_v39 = vld [vmem:[#allocation43 + $0x8] sm:$0xf] }
 0xd84   : > { %v8877_v9 = vpop.f32.mrf.mxu0 }
 0xd85   : > { %v5200_v9 = vsel %vm2857_vm6, %v5195_v39, 0 }
 0xd86   : > { %v4963_v40 = vpop.f32.mrf.mxu0 }
 0xd87   : > { %v4969_v41 = vmul.f32 0.35355338, %v4963_v40 }
 0xd88   : > { %v8888_v42 = vpop.f32.mrf.mxu0 }
 0xd89   : > { %v4970_v43 = vadd.f32 %v4969_v41, %v11668_v14 }
 0xd8a   : > { %v4966_v44 = vpop.f32.mrf.mxu0 }
 0xd8b   : > { %v4971_v45 = vsel %vm4749_vm2, %v4970_v43, -inf }
 0xd8c   : > { %4972 = vmax.xlane.f32.xlu1 %v4971_v45  ;;  %v8889_v46 = vpop.f32.mrf.mxu0 }
 0xe15   : > { %v4973_v47 = vpop.xlane.xlu1 %4972 }
 0xe16   : > { %v4974_v2 = vsub.f32 %v4970_v43, %v4973_v47 }
 0xe18   : > { %v4975_v48 = vmul.f32 1.442695, %v4974_v2 }
 0xe1a   : > { %9721 = vpow2.f32 %v4975_v48 }
 0xe27   : > { %v9722_v49 = vpop.eup %9721 }
 0xe28   : > { %v4977_v52 = vsel %vm4749_vm2, %v9722_v49, 0.0 }
 0xe29   : > { %4978 = vadd.xlane.f32.xlu0 %v4977_v52 }
 0xe3f   : > { %5083 = vrot.lane.b32.xlu0 %v11651_v5, %s12067_s10 }
 0xe41   : > { %v4906_v53 = vpop.f32.mrf.mxu1 }
 0xe42   : > { %v4918_v32 = vadd.f32 %v8259_v31, %v4906_v53 }
 0xe43   : > { %5081 = vrot.lane.b32.xlu0 %v11651_v5, %s12066_s23  ;;  %v8882_v54 = vpop.f32.mrf.mxu1 }
 0xe45   : > { %v4909_v55 = vpop.f32.mrf.mxu1 }
 0xe47   : > { %v8883_v51 = vpop.f32.mrf.mxu1 }
 0xeb2   : > { %v4979_v56 = vpop.xlane.xlu0 %4978 }
 0xeb3   : > { %9723 = vrcp.f32 %v4979_v56 }
 0xeb6   : > { %v5084_v60 = vpop.permute.xlu0 %5083 }
 0xeb7   : > { %v5089_v0 = vsel %vm4749_vm2, %v5084_v60, 0 }
 0xeba   : > { %v5082_v4 = vpop.permute.xlu0 %5081 }
 0xec0   : > { %v9724_v58 = vpop.eup %9723 }
 0xec1   : > { %v4981_v59 = vmul.f32 %v9724_v58, %v9722_v49 }
 0xec3   : > { %v4982_v62 = vpack.c.bf16 %v4981_v59, %v4981_v59 }
 0xec5   : > { %8893 = vmatmul.mubr.msk.bf16.vlgmr.msra.gmra.mxu1 %vm4749_vm2, %v4982_v62 }
 0xec6   : > { %8903 = vmatpush3.bf16.xpose.msra.mxu1 %v5089_v0  ;;  %8904 = vmatprep.mubr.msk.bf16.mxu1 %vm10711_vm0, %v10709_v1  ;;  %v5357_v0 = vld [vmem:[#allocation43 + $0xc] sm:$0xf] }
 0xec7   : > { %8914 = vmatprep.subr.bf16.mxu1 %v10709_v1 }
 0xecd   : > { %8905 = vmatmul.mubr.msk.bf16.vlgmr.msra.gmra.mxu1 %vm4749_vm2, %v5082_v4  ;;  %v5362_v4 = vsel %vm2857_vm6, %v5357_v0, 0 }
 0xece   : > { %8916 = vmatprep.mubr.msk.bf16.mxu1 %vm10711_vm0, %v10709_v1  ;;  %8915 = vmatpush3.bf16.msra.mxu1 %v5200_v9  ;;  %v9697_v9 = vld [vmem:[#allocation46 + $0x8] sm:$0xff]  }
 0xecf   : > { %8926 = vmatprep.subr.bf16.mxu1 %v10709_v1 }
 0xf85   : > { %v5025_v7 = vpop.f32.mrf.mxu1 }
 0xf86   : > { %v5031_v63 = vpack.c.bf16 %v5025_v7, %v5025_v7 }
 0xf87   : > { %v8894_v12 = vpop.f32.mrf.mxu1 }
 0xf88   : > { %8899 = vmatmul.mubr.msk.bf16.vlgmr.msra.gmra.mxu0 %vm4749_vm2, %v5031_v63 }
 0xf89   : > { %v5028_v16 = vpop.f32.mrf.mxu1  ;;  %8910 = vmatprep.mubr.msk.bf16.mxu0 %vm10711_vm0, %v10709_v1 }
 0xf8b   : > { %v8895_v17 = vpop.f32.mrf.mxu1 }
 0xf8d   : > { %v5125_v18 = vpop.f32.mrf.mxu1 }
 0xf8e   : > { %v5131_v8 = vmul.f32 0.35355338, %v5125_v18 }
 0xf8f   : > { %v8906_v21 = vpop.f32.mrf.mxu1 }
 0xf90   : > { %v5132_v23 = vadd.f32 %v5131_v8, %v11668_v14 }
 0xf91   : > { %v5128_v24 = vpop.f32.mrf.mxu1 }
 0xf92   : > { %v5133_v3 = vsel %vm4749_vm2, %v5132_v23, -inf }
 0xf93   : > { %5134 = vmax.xlane.f32.xlu1 %v5133_v3  ;;  %v8907_v11 = vpop.f32.mrf.mxu1 }
 0xfa4   : > { %5145 = vrot.lane.b32.xlu1 %v11651_v5, %s12068_s16 }
 0xfa8   : > { %5245 = vrot.lane.b32.xlu1 %v11651_v5, %s12064_s15  ;;  %s12165_s15 = sld [smem:[#allocation94_spill]] }
 0xfac   : > { %5243 = vrot.lane.b32.xlu1 %v11651_v5, %s12062_s28  ;;  %s12164_s28 = sld [smem:[#allocation93_spill]] }
0x101c   : > { %v5135_v25 = vpop.xlane.xlu1 %5134 }
0x101d   : > { %v5136_v26 = vsub.f32 %v5132_v23, %v5135_v25 }
0x101f   : > { %v5137_v27 = vmul.f32 1.442695, %v5136_v26 }
0x1020   : > { %v5146_v28 = vpop.permute.xlu1 %5145 }
0x1021   : > { %9725 = vpow2.f32 %v5137_v27  ;;  %v5151_v29 = vsel %vm2857_vm6, %v5146_v28, 0 }
0x1022   : > { %8909 = vmatpush3.bf16.msra.mxu0 %v5151_v29 }
0x1023   : > { %8920 = vmatprep.subr.bf16.mxu0 %v10709_v1 }
0x1024   : > { %v5246_v36 = vpop.permute.xlu1 %5245 }
0x1025   : > { %v5251_v10 = vsel %vm4749_vm2, %v5246_v36, 0 }
0x1028   : > { %v5244_v38 = vpop.permute.xlu1 %5243 }
0x102e   : > { %v9726_v15 = vpop.eup %9725 }
0x102f   : > { %v5139_v30 = vsel %vm4749_vm2, %v9726_v15, 0.0 }
0x1030   : > { %5140 = vadd.xlane.f32.xlu0 %v5139_v30 }
0x1048   : > { %v5074_v13 = vpop.f32.mrf.mxu0 }
0x1049   : > { %v5080_v22 = vadd.f32 %v5074_v13, %v4918_v32  ;;  %v9693_v13 = vld [vmem:[%s12160_s8 + $0x8] sm:$0xff]  }
0x104a   : > { %v8900_v33 = vpop.f32.mrf.mxu0 }
0x104b   : > { %v9696_v33 = vld [vmem:[#allocation46 + $0x10] sm:$0xff]  }
0x104c   : > { %v5077_v34 = vpop.f32.mrf.mxu0 }
0x104e   : > { %v8901_v20 = vpop.f32.mrf.mxu0 }
0x10b9   : > { %v5141_v19 = vpop.xlane.xlu0 %5140 }
0x10ba   : > { %9727 = vrcp.f32 %v5141_v19 }
0x10c7   : > { %v9728_v57 = vpop.eup %9727 }
0x10c8   : > { %v5143_v35 = vmul.f32 %v9728_v57, %v9726_v15 }
0x10ca   : > { %v5144_v37 = vpack.c.bf16 %v5143_v35, %v5143_v35  ;;  %v8269_v35 = vld [vmem:[%s12161_s3] ss:$0 sm:$0xff] }
0x10cc   : > { %8911 = vmatmul.mubr.msk.bf16.vlgmr.msra.gmra.mxu0 %vm4749_vm2, %v5144_v37  ;;  %v8270_v37 = vld [vmem:[%s12162_s7] ss:$0 sm:$0xff] }
0x10cd   : > { %8921 = vmatpush3.bf16.xpose.msra.mxu0 %v5251_v10  ;;  %8922 = vmatprep.mubr.msk.bf16.mxu0 %vm10711_vm0, %v10709_v1 }
0x10ce   : > { %8932 = vmatprep.subr.bf16.mxu0 %v10709_v1 }
0x10d4   : > { %8923 = vmatmul.mubr.msk.bf16.vlgmr.msra.gmra.mxu0 %vm4749_vm2, %v5244_v38 }
0x10d5   : > { %8934 = vmatprep.mubr.msk.bf16.mxu0 %vm10711_vm0, %v10709_v1  ;;  %8933 = vmatpush3.bf16.msra.mxu0 %v5362_v4  ;;  %v9699_v4 = vld [vmem:[#allocation40 + $0x18] sm:$0xff]  }
0x10d6   : > { %8946 = vmatprep.subr.bf16.mxu0 %v10709_v1 }
0x118c   : > { %v5187_v40 = vpop.f32.mrf.mxu0 }
0x118d   : > { %v5193_v41 = vpack.c.bf16 %v5187_v40, %v5187_v40  ;;  %v9698_v40 = vld [vmem:[#allocation46] sm:$0xff]  }
0x118e   : > { %v8912_v42 = vpop.f32.mrf.mxu0 }
0x118f   : > { %8917 = vmatmul.mubr.msk.bf16.vlgmr.msra.gmra.mxu1 %vm4749_vm2, %v5193_v41 }
0x1190   : > { %v5190_v43 = vpop.f32.mrf.mxu0  ;;  %8928 = vmatprep.mubr.msk.bf16.mxu1 %vm10711_vm0, %v10709_v1 }
0x1192   : > { %v8913_v44 = vpop.f32.mrf.mxu0 }
0x1194   : > { %v5287_v45 = vpop.f32.mrf.mxu0 }
0x1195   : > { %v5293_v46 = vmul.f32 0.35355338, %v5287_v45 }
0x1196   : > { %v8924_v47 = vpop.f32.mrf.mxu0 }
0x1197   : > { %v5294_v2 = vadd.f32 %v5293_v46, %v11668_v14 }
0x1198   : > { %v5290_v48 = vpop.f32.mrf.mxu0 }
0x1199   : > { %v5295_v49 = vsel %vm4749_vm2, %v5294_v2, -inf  ;;  %v8275_v48 = vld [vmem:[%s12164_s28] ss:$0 sm:$0xff] }
0x119a   : > { %5296 = vmax.xlane.f32.xlu1 %v5295_v49  ;;  %v8925_v52 = vpop.f32.mrf.mxu0 }
0x1223   : > { %v5297_v53 = vpop.xlane.xlu1 %5296 }
0x1224   : > { %v5298_v54 = vsub.f32 %v5294_v2, %v5297_v53 }
0x1226   : > { %v5299_v55 = vmul.f32 1.442695, %v5298_v54 }
0x1228   : > { %9729 = vpow2.f32 %v5299_v55 }
0x1235   : > { %v9730_v51 = vpop.eup %9729 }
0x1236   : > { %v5301_v56 = vsel %vm4749_vm2, %v9730_v51, 0.0 }
0x1237   : > { %5302 = vadd.xlane.f32.xlu0 %v5301_v56 }
0x124d   : > { %5307 = vrot.lane.b32.xlu0 %v11651_v5, %s12060_s5  ;;  %s12163_s5 = sld [smem:[#allocation91_spill]] }
0x124f   : > { %v5236_v58 = vpop.f32.mrf.mxu1 }
0x1250   : > { %v5242_v59 = vadd.f32 %v5236_v58, %v5080_v22  ;;  %v9694_v22 = vld [vmem:[%s12160_s8] sm:$0xff]  }
0x1251   : > { %v8918_v60 = vpop.f32.mrf.mxu1 }
0x1253   : > { %v5239_v62 = vpop.f32.mrf.mxu1  ;;  %v8271_v41 = vld [vmem:[%s12163_s5] ss:$0 sm:$0xff] }
0x1255   : > { %v8919_v61 = vpop.f32.mrf.mxu1 }
0x1256   : > { %v9700_v61 = vld [vmem:[#allocation40 + $0x10] sm:$0xff]  }
0x12c0   : > { %v5303_v6 = vpop.xlane.xlu0 %5302 }
0x12c1   : > { %9731 = vrcp.f32 %v5303_v6 }
0x12c4   : > { %v5308_v7 = vpop.permute.xlu0 %5307 }
0x12c5   : > { %v5313_v63 = vsel %vm2857_vm6, %v5308_v7, 0 }
0x12c6   : > { %8927 = vmatpush3.bf16.msra.mxu1 %v5313_v63 }
0x12c7   : > { %8938 = vmatprep.subr.bf16.mxu1 %v10709_v1 }
0x12ce   : > { %v9732_v5 = vpop.eup %9731 }
0x12cf   : > { %v5305_v12 = vmul.f32 %v9732_v5, %v9730_v51 }
0x12d1   : > { %v5306_v16 = vpack.c.bf16 %v5305_v12, %v5305_v12  ;;  %v8281_v12 = vld [vmem:[%s12165_s15] ss:$0 sm:$0xff] }
0x12d3   : > { %8929 = vmatmul.mubr.msk.bf16.vlgmr.msra.gmra.mxu1 %vm4749_vm2, %v5306_v16 }
0x12d4   : > { %8942 = vmatprep.mubr.msk.bf16.mxu1 %vm10711_vm0, %v10709_v1  ;;  %8939 = vmatpush3.bf16.msra.mxu1 %v9693_v13 }
0x12d5   : > { %8940 = vmatprep.subr.bf16.mxu1 %v10709_v1 }
0x12d8   : > { %8941 = vmatpush3.bf16.msra.mxu1 %v9694_v22 }
0x12d9   : > { %8958 = vmatprep.subr.bf16.mxu1 %v10709_v1 }
0x1393   : > { %v5349_v17 = vpop.f32.mrf.mxu1 }
0x1394   : > { %v5355_v18 = vpack.c.bf16 %v5349_v17, %v5349_v17  ;;  %v8282_v17 = vld [vmem:[%s10937_s21] ss:$0 sm:$0xff] }
0x1395   : > { %v8930_v8 = vpop.f32.mrf.mxu1 }
0x1396   : > { %8935 = vmatmul.mubr.msk.bf16.vlgmr.msra.gmra.mxu0 %vm4749_vm2, %v5355_v18 }
0x1397   : > { %v5352_v21 = vpop.f32.mrf.mxu1  ;;  %8954 = vmatprep.mubr.msk.bf16.mxu0 %vm10711_vm0, %v10709_v1 }
0x1399   : > { %v8931_v23 = vpop.f32.mrf.mxu1 }
0x139a   : > { %v8283_v23 = vld [vmem:[#allocation41 + $0x1] ss:$0 sm:$0xff] }
0x1456   : > { %v5398_v24 = vpop.f32.mrf.mxu0 }
0x1457   : > { %v5404_v3 = vadd.f32 %v5398_v24, %v5242_v59 }
0x1458   : > { %v8936_v11 = vpop.f32.mrf.mxu0 }
0x1459   : > { %v5405_v25 = vadd.f32 %v5404_v3, %v11644_v50  ;;  %v9695_v50 = vld [vmem:[#allocation46 + $0x18] sm:$0xff]  }
0x145a   : > { %v5401_v26 = vpop.f32.mrf.mxu0  ;;  %8947 = vmatpush3.bf16.msra.mxu0 %v9695_v50 }
0x145b   : > { %v5408_v27 = vsel %vm4700_vm1, %v5405_v25, 0.0  ;;  %8948 = vmatprep.subr.bf16.mxu0 %v10709_v1 }
0x145c   : > { %5409 = vadd.xlane.f32.xlu0 %v5408_v27  ;;  %v8937_v28 = vpop.f32.mrf.mxu0 }
0x145e   : > { %8949 = vmatpush3.bf16.msra.mxu0 %v9696_v33 }
0x145f   : > { %8950 = vmatprep.subr.bf16.mxu0 %v10709_v1 }
0x1462   : > { %8951 = vmatpush3.bf16.msra.mxu0 %v9697_v9 }
0x1463   : > { %8952 = vmatprep.subr.bf16.mxu0 %v10709_v1 }
0x1466   : > { %8953 = vmatpush3.bf16.msra.mxu0 %v9698_v40 }
0x1467   : > { %8972 = vmatprep.subr.bf16.mxu0 %v10709_v1 }
0x14e5   : > { %v5410_v29 = vpop.xlane.xlu0 %5409 }
0x14e6   : > { %v5412_v15 = vmul.f32 0.03125, %v5410_v29 }
0x14e8   : > { %v5413_v30 = vsub.f32 %v5405_v25, %v5412_v15 }
0x14ea   : > { %v5414_v31 = vmul.f32 %v5413_v30, %v5413_v30 }
0x14ec   : > { %v5415_v32 = vsel %vm4700_vm1, %v5414_v31, 0.0 }
0x14ed   : > { %5416 = vadd.xlane.f32.xlu1 %v5415_v32 }
0x1576   : > { %v5417_v34 = vpop.xlane.xlu1 %5416 }
0x1577   : > { %v5418_v20 = vmul.f32 0.03125, %v5417_v34 }
0x1579   : > { %v5419_v19 = vadd.f32 1e-05, %v5418_v20 }
0x157b   : > { %9733 = vrsqrt.f32 %v5419_v19 }
0x1588   : > { %v9734_v57 = vpop.eup %9733 }
0x1589   : > { %v5421_v36 = vmul.f32 %v9734_v57, %v5413_v30 }
0x158b   : > { %v5428_v10 = vmul.f32 %v8269_v35, %v5421_v36 }
0x158d   : > { %v5435_v38 = vadd.f32 %v8270_v37, %v5428_v10  ;;  %v5803_v37 = vld [vmem:[#allocation43 + $0x10] sm:$0xf] }
0x158e   : > { %v5808_v10 = vsel %vm2857_vm6, %v5803_v37, 0  ;;  %v8290_v37 = vld [vmem:[#allocation44 + $0x1] ss:$0 sm:$0xff] }
0x158f   : > { %v5440_v39 = vpack.c.bf16 %v5435_v38, %v5435_v38 }
0x1591   : > { %8943 = vmatmul.mubr.msk.bf16.vlgmr.msra.gmra.mxu1 %vm4700_vm1, %v5440_v39 }
0x1592   : > { %8962 = vmatprep.mubr.msk.bf16.mxu1 %vm10711_vm0, %v10709_v1  ;;  %8959 = vmatpush3.bf16.msra.mxu1 %v9699_v4 }
0x1593   : > { %8960 = vmatprep.subr.bf16.mxu1 %v10709_v1 }
0x1596   : > { %8961 = vmatpush3.bf16.msra.mxu1 %v9700_v61 }
0x1597   : > { %8966 = vmatprep.subr.bf16.mxu1 %v10709_v1 }
0x1651   : > { %v5497_v42 = vpop.f32.mrf.mxu1 }
0x1652   : > { %v5498_v43 = vadd.f32 %v8271_v41, %v5497_v42 }
0x1653   : > { %v8944_v44 = vpop.f32.mrf.mxu1 }
0x1654   : > { %v5503_v45 = vmax.f32 %v5498_v43, 0.0 }
0x1655   : > { %v5500_v46 = vpop.f32.mrf.mxu1 }
0x1656   : > { %v5512_v47 = vpack.c.bf16 %v5503_v45, %v5503_v45 }
0x1657   : > { %v8945_v2 = vpop.f32.mrf.mxu1 }
0x1658   : > { %8955 = vmatmul.mubr.msk.bf16.vlgmr.msra.gmra.mxu0 %vm5544_vm4, %v5512_v47 }
0x1659   : > { %8974 = vmatprep.mubr.msk.bf16.mxu0 %vm10711_vm0, %v10709_v1 }
0x1718   : > { %v5582_v49 = vpop.f32.mrf.mxu0 }
0x1719   : > { %v5583_v52 = vadd.f32 %v8275_v48, %v5582_v49 }
0x171a   : > { %v8956_v53 = vpop.f32.mrf.mxu0 }
0x171b   : > { %v5588_v54 = vadd.f32 %v5583_v52, %v5435_v38 }
0x171c   : > { %v5585_v55 = vpop.f32.mrf.mxu0 }
0x171d   : > { %v5591_v51 = vsel %vm4700_vm1, %v5588_v54, 0.0 }
0x171e   : > { %5592 = vadd.xlane.f32.xlu1 %v5591_v51  ;;  %v8957_v56 = vpop.f32.mrf.mxu0 }
0x17a7   : > { %v5593_v58 = vpop.xlane.xlu1 %5592 }
0x17a8   : > { %v5594_v59 = vmul.f32 0.03125, %v5593_v58 }
0x17aa   : > { %v5595_v60 = vsub.f32 %v5588_v54, %v5594_v59 }
0x17ac   : > { %v5596_v62 = vmul.f32 %v5595_v60, %v5595_v60 }
0x17ae   : > { %v5597_v0 = vsel %vm4700_vm1, %v5596_v62, 0.0 }
0x17af   : > { %5598 = vadd.xlane.f32.xlu1 %v5597_v0 }
0x1838   : > { %v5599_v6 = vpop.xlane.xlu1 %5598 }
0x1839   : > { %v5600_v7 = vmul.f32 0.03125, %v5599_v6 }
0x183b   : > { %v5601_v63 = vadd.f32 1e-05, %v5600_v7 }
0x183d   : > { %9735 = vrsqrt.f32 %v5601_v63 }
0x184a   : > { %v9736_v5 = vpop.eup %9735 }
0x184b   : > { %v5603_v16 = vmul.f32 %v9736_v5, %v5595_v60 }
0x184d   : > { %v5610_v18 = vmul.f32 %v8281_v12, %v5603_v16 }
0x184f   : > { %v11780_v8 = vadd.f32 %v8282_v17, %v5610_v18 }
0x1851   : > { %v5623_v21 = vpack.c.bf16 %v11780_v8, %v11780_v8 }
0x1853   : > { %8963 = vmatmul.mubr.msk.bf16.vlgmr.msra.gmra.mxu1 %vm4700_vm1, %v5623_v21 }
0x1854   : > { %8968 = vmatprep.mubr.msk.bf16.mxu1 %vm10711_vm0, %v10709_v1 }
0x1913   : > { %v5681_v24 = vpop.f32.mrf.mxu1 }
0x1914   : > { %v5682_v3 = vadd.f32 %v8283_v23, %v5681_v24  ;;  %v5971_v24 = vld [vmem:[#allocation43 + $0x14] sm:$0xf] }
0x1915   : > { %v8964_v11 = vpop.f32.mrf.mxu1 }
0x1916   : > { %v11787_v25 = vpack.c.bf16 %v5682_v3, %v5682_v3  ;;  %v5976_v3 = vsel %vm2857_vm6, %v5971_v24, 0 }
0x1917   : > { %v5684_v26 = vpop.f32.mrf.mxu1 }
0x1918   : > { %5691 = vrot.lane.b32.xlu1 %v11787_v25, %s10713_s18 }
0x1919   : > { %v8965_v27 = vpop.f32.mrf.mxu1 }
0x198a   : > { %v5692_v28 = vpop.permute.xlu1 %5691 }
0x198b   : > { %v5697_v29 = vsel %vm4749_vm2, %v5692_v28, 0 }
0x198c   : > { %8967 = vmatpush3.bf16.xpose.msra.mxu1 %v5697_v29 }
0x198d   : > { %8978 = vmatprep.subr.bf16.mxu1 %v10709_v1 }
0x1993   : > { %8969 = vmatmul.mubr.msk.bf16.vlgmr.msra.gmra.mxu1 %vm4749_vm2, %v11787_v25 }
0x1994   : > { %8980 = vmatprep.mubr.msk.bf16.mxu1 %vm10711_vm0, %v10709_v1  ;;  %8979 = vmatpush3.bf16.msra.mxu1 %v5808_v10 }
0x1995   : > { %8990 = vmatprep.subr.bf16.mxu1 %v10709_v1 }
0x1a53   : > { %v5733_v15 = vpop.f32.mrf.mxu1 }
0x1a54   : > { %v5739_v30 = vmul.f32 0.35355338, %v5733_v15 }
0x1a55   : > { %v8970_v31 = vpop.f32.mrf.mxu1 }
0x1a56   : > { %v5740_v32 = vadd.f32 %v5739_v30, %v11668_v14 }
0x1a57   : > { %v5736_v13 = vpop.f32.mrf.mxu1 }
0x1a58   : > { %v5741_v22 = vsel %vm4749_vm2, %v5740_v32, -inf }
0x1a59   : > { %5742 = vmax.xlane.f32.xlu0 %v5741_v22  ;;  %v8971_v50 = vpop.f32.mrf.mxu1 }
0x1a6f   : > { %5753 = vrot.lane.b32.xlu0 %v11787_v25, %s10712_s4 }
0x1a73   : > { %5859 = vrot.lane.b32.xlu0 %v11787_v25, %s10716_s11 }
0x1a77   : > { %5857 = vrot.lane.b32.xlu0 %v11787_v25, %s10717_s26 }
0x1ae2   : > { %v5743_v33 = vpop.xlane.xlu0 %5742 }
0x1ae3   : > { %v5744_v34 = vsub.f32 %v5740_v32, %v5743_v33 }
0x1ae5   : > { %v5745_v20 = vmul.f32 1.442695, %v5744_v34 }
0x1ae6   : > { %v5754_v19 = vpop.permute.xlu0 %5753 }
0x1ae7   : > { %9737 = vpow2.f32 %v5745_v20  ;;  %v5759_v57 = vsel %vm2857_vm6, %v5754_v19, 0 }
0x1ae8   : > { %8973 = vmatpush3.bf16.msra.mxu0 %v5759_v57 }
0x1ae9   : > { %8984 = vmatprep.subr.bf16.mxu0 %v10709_v1 }
0x1aea   : > { %v5860_v40 = vpop.permute.xlu0 %5859 }
0x1aeb   : > { %v5865_v42 = vsel %vm4749_vm2, %v5860_v40, 0 }
0x1aee   : > { %v5858_v43 = vpop.permute.xlu0 %5857 }
0x1af4   : > { %v9738_v35 = vpop.eup %9737 }
0x1af5   : > { %v5747_v36 = vsel %vm4749_vm2, %v9738_v35, 0.0 }
0x1af6   : > { %5748 = vadd.xlane.f32.xlu1 %v5747_v36 }
0x1b07   : > { %5921 = vrot.lane.b32.xlu1 %v11787_v25, %s10715_s2 }
0x1b7f   : > { %v5749_v38 = vpop.xlane.xlu1 %5748 }
0x1b80   : > { %9739 = vrcp.f32 %v5749_v38 }
0x1b83   : > { %v5922_v44 = vpop.permute.xlu1 %5921 }
0x1b84   : > { %v5927_v2 = vsel %vm2857_vm6, %v5922_v44, 0 }
0x1b8d   : > { %v9740_v39 = vpop.eup %9739 }
0x1b8e   : > { %v5751_v9 = vmul.f32 %v9740_v39, %v9738_v35 }
0x1b90   : > { %v5752_v41 = vpack.c.bf16 %v5751_v9, %v5751_v9 }
0x1b92   : > { %8975 = vmatmul.mubr.msk.bf16.vlgmr.msra.gmra.mxu0 %vm4749_vm2, %v5752_v41 }
0x1b93   : > { %8985 = vmatpush3.bf16.xpose.msra.mxu0 %v5865_v42  ;;  %8986 = vmatprep.mubr.msk.bf16.mxu0 %vm10711_vm0, %v10709_v1 }
0x1b94   : > { %8996 = vmatprep.subr.bf16.mxu0 %v10709_v1 }
0x1b9a   : > { %8987 = vmatmul.mubr.msk.bf16.vlgmr.msra.gmra.mxu0 %vm4749_vm2, %v5858_v43 }
0x1b9b   : > { %8998 = vmatprep.mubr.msk.bf16.mxu0 %vm10711_vm0, %v10709_v1  ;;  %8997 = vmatpush3.bf16.msra.mxu0 %v5976_v3 }
0x1b9c   : > { %9008 = vmatprep.subr.bf16.mxu0 %v10709_v1 }
0x1c52   : > { %v5795_v45 = vpop.f32.mrf.mxu0 }
0x1c53   : > { %v5801_v46 = vpack.c.bf16 %v5795_v45, %v5795_v45 }
0x1c54   : > { %v8976_v47 = vpop.f32.mrf.mxu0 }
0x1c55   : > { %8981 = vmatmul.mubr.msk.bf16.vlgmr.msra.gmra.mxu1 %vm4749_vm2, %v5801_v46 }
0x1c56   : > { %8991 = vmatpush3.bf16.msra.mxu1 %v5927_v2  ;;  %v5798_v48 = vpop.f32.mrf.mxu0  ;;  %8992 = vmatprep.mubr.msk.bf16.mxu1 %vm10711_vm0, %v10709_v1 }
0x1c57   : > { %9002 = vmatprep.subr.bf16.mxu1 %v10709_v1  ;;  %v6133_v48 = vld [vmem:[#allocation43 + $0x18] sm:$0xf] }
0x1c58   : > { %v8977_v49 = vpop.f32.mrf.mxu0 }
0x1c59   : > { %v6138_v49 = vsel %vm2857_vm6, %v6133_v48, 0 }
0x1c5a   : > { %v5901_v52 = vpop.f32.mrf.mxu0 }
0x1c5b   : > { %v5907_v53 = vmul.f32 0.35355338, %v5901_v52 }
0x1c5c   : > { %v8988_v54 = vpop.f32.mrf.mxu0 }
0x1c5d   : > { %v5908_v55 = vadd.f32 %v5907_v53, %v11668_v14 }
0x1c5e   : > { %v5904_v51 = vpop.f32.mrf.mxu0 }
0x1c5f   : > { %v5909_v56 = vsel %vm4749_vm2, %v5908_v55, -inf }
0x1c60   : > { %5910 = vmax.xlane.f32.xlu0 %v5909_v56  ;;  %v8989_v58 = vpop.f32.mrf.mxu0 }
0x1ce9   : > { %v5911_v59 = vpop.xlane.xlu0 %5910 }
0x1cea   : > { %v5912_v60 = vsub.f32 %v5908_v55, %v5911_v59 }
0x1cec   : > { %v5913_v62 = vmul.f32 1.442695, %v5912_v60 }
0x1cee   : > { %9741 = vpow2.f32 %v5913_v62 }
0x1cfb   : > { %v9742_v0 = vpop.eup %9741 }
0x1cfc   : > { %v5915_v4 = vsel %vm4749_vm2, %v9742_v0, 0.0 }
0x1cfd   : > { %5916 = vadd.xlane.f32.xlu1 %v5915_v4 }
0x1d0e   : > { %6021 = vrot.lane.b32.xlu1 %v11787_v25, %s12067_s10  ;;  %s12167_s10 = smov 104  }
0x1d12   : > { %6019 = vrot.lane.b32.xlu1 %v11787_v25, %s12066_s23  ;;  %s12166_s23 = smov 72  }
0x1d15   : > { %v5844_v61 = vpop.f32.mrf.mxu1 }
0x1d16   : > { %v5856_v10 = vadd.f32 %v8290_v37, %v5844_v61 }
0x1d17   : > { %v8982_v6 = vpop.f32.mrf.mxu1 }
0x1d19   : > { %v5847_v7 = vpop.f32.mrf.mxu1 }
0x1d1b   : > { %v8983_v63 = vpop.f32.mrf.mxu1 }
0x1d86   : > { %v5917_v5 = vpop.xlane.xlu1 %5916 }
0x1d87   : > { %9743 = vrcp.f32 %v5917_v5 }
0x1d8a   : > { %v6022_v17 = vpop.permute.xlu1 %6021 }
0x1d8b   : > { %v6027_v21 = vsel %vm4749_vm2, %v6022_v17, 0 }
0x1d8e   : > { %v6020_v23 = vpop.permute.xlu1 %6019 }
0x1d94   : > { %v9744_v12 = vpop.eup %9743 }
0x1d95   : > { %v5919_v16 = vmul.f32 %v9744_v12, %v9742_v0 }
0x1d97   : > { %v5920_v18 = vpack.c.bf16 %v5919_v16, %v5919_v16 }
0x1d99   : > { %8993 = vmatmul.mubr.msk.bf16.vlgmr.msra.gmra.mxu1 %vm4749_vm2, %v5920_v18 }
0x1d9a   : > { %9003 = vmatpush3.bf16.xpose.msra.mxu1 %v6027_v21  ;;  %9004 = vmatprep.mubr.msk.bf16.mxu1 %vm10711_vm0, %v10709_v1  ;;  %v6295_v21 = vld [vmem:[#allocation43 + $0x1c] sm:$0xf] }
0x1d9b   : > { %9014 = vmatprep.subr.bf16.mxu1 %v10709_v1 }
0x1da1   : > { %9005 = vmatmul.mubr.msk.bf16.vlgmr.msra.gmra.mxu1 %vm4749_vm2, %v6020_v23  ;;  %v6300_v23 = vsel %vm2857_vm6, %v6295_v21, 0 }
0x1da2   : > { %9016 = vmatprep.mubr.msk.bf16.mxu1 %vm10711_vm0, %v10709_v1  ;;  %9015 = vmatpush3.bf16.msra.mxu1 %v6138_v49  ;;  %v9705_v49 = vld [vmem:[#allocation46 + $0x28] sm:$0xff]  }
0x1da3   : > { %9026 = vmatprep.subr.bf16.mxu1 %v10709_v1 }
0x1e59   : > { %v5963_v11 = vpop.f32.mrf.mxu1 }
0x1e5a   : > { %v5969_v26 = vpack.c.bf16 %v5963_v11, %v5963_v11 }
0x1e5b   : > { %v8994_v27 = vpop.f32.mrf.mxu1 }
0x1e5c   : > { %8999 = vmatmul.mubr.msk.bf16.vlgmr.msra.gmra.mxu0 %vm4749_vm2, %v5969_v26 }
0x1e5d   : > { %v5966_v28 = vpop.f32.mrf.mxu1  ;;  %9010 = vmatprep.mubr.msk.bf16.mxu0 %vm10711_vm0, %v10709_v1 }
0x1e5f   : > { %v8995_v29 = vpop.f32.mrf.mxu1 }
0x1e61   : > { %v6063_v15 = vpop.f32.mrf.mxu1 }
0x1e62   : > { %v6069_v30 = vmul.f32 0.35355338, %v6063_v15 }
0x1e63   : > { %v9006_v31 = vpop.f32.mrf.mxu1 }
0x1e64   : > { %v6070_v32 = vadd.f32 %v6069_v30, %v11668_v14 }
0x1e65   : > { %v6066_v13 = vpop.f32.mrf.mxu1 }
0x1e66   : > { %v6071_v22 = vsel %vm4749_vm2, %v6070_v32, -inf }
0x1e67   : > { %6072 = vmax.xlane.f32.xlu0 %v6071_v22  ;;  %v9007_v50 = vpop.f32.mrf.mxu1 }
0x1e7d   : > { %6083 = vrot.lane.b32.xlu0 %v11787_v25, %s12068_s16  ;;  %s12168_s16 = smov 40  }
0x1e81   : > { %6183 = vrot.lane.b32.xlu0 %v11787_v25, %s12166_s23 }
0x1e85   : > { %6181 = vrot.lane.b32.xlu0 %v11787_v25, %s12167_s10 }
0x1ef0   : > { %v6073_v33 = vpop.xlane.xlu0 %6072 }
0x1ef1   : > { %v6074_v34 = vsub.f32 %v6070_v32, %v6073_v33 }
0x1ef3   : > { %v6075_v20 = vmul.f32 1.442695, %v6074_v34 }
0x1ef4   : > { %v6084_v19 = vpop.permute.xlu0 %6083 }
0x1ef5   : > { %9745 = vpow2.f32 %v6075_v20  ;;  %v6089_v57 = vsel %vm2857_vm6, %v6084_v19, 0 }
0x1ef6   : > { %9009 = vmatpush3.bf16.msra.mxu0 %v6089_v57 }
0x1ef7   : > { %9020 = vmatprep.subr.bf16.mxu0 %v10709_v1 }
0x1ef8   : > { %v6184_v45 = vpop.permute.xlu0 %6183 }
0x1ef9   : > { %v6189_v47 = vsel %vm4749_vm2, %v6184_v45, 0 }
0x1efc   : > { %v6182_v2 = vpop.permute.xlu0 %6181 }
0x1f02   : > { %v9746_v35 = vpop.eup %9745 }
0x1f03   : > { %v6077_v36 = vsel %vm4749_vm2, %v9746_v35, 0.0 }
0x1f04   : > { %6078 = vadd.xlane.f32.xlu1 %v6077_v36 }
0x1f1c   : > { %v6012_v38 = vpop.f32.mrf.mxu0 }
0x1f1d   : > { %v6018_v39 = vadd.f32 %v6012_v38, %v5856_v10  ;;  %v9701_v38 = vld [vmem:[%s12160_s8 + $0x18] sm:$0xff]  }
0x1f1e   : > { %v9000_v9 = vpop.f32.mrf.mxu0 }
0x1f1f   : > { %v9704_v9 = vld [vmem:[#allocation46 + $0x30] sm:$0xff]  }
0x1f20   : > { %v6015_v40 = vpop.f32.mrf.mxu0 }
0x1f22   : > { %v9001_v41 = vpop.f32.mrf.mxu0 }
0x1f8d   : > { %v6079_v42 = vpop.xlane.xlu1 %6078 }
0x1f8e   : > { %9747 = vrcp.f32 %v6079_v42 }
0x1f9b   : > { %v9748_v43 = vpop.eup %9747 }
0x1f9c   : > { %v6081_v44 = vmul.f32 %v9748_v43, %v9746_v35 }
0x1f9e   : > { %v6082_v46 = vpack.c.bf16 %v6081_v44, %v6081_v44  ;;  %v8302_v44 = vld [vmem:[%s12161_s3 + $0x1] ss:$0 sm:$0xff] }
0x1fa0   : > { %9011 = vmatmul.mubr.msk.bf16.vlgmr.msra.gmra.mxu0 %vm4749_vm2, %v6082_v46  ;;  %v8303_v46 = vld [vmem:[%s12162_s7 + $0x1] ss:$0 sm:$0xff] }
0x1fa1   : > { %9021 = vmatpush3.bf16.xpose.msra.mxu0 %v6189_v47  ;;  %9022 = vmatprep.mubr.msk.bf16.mxu0 %vm10711_vm0, %v10709_v1 }
0x1fa2   : > { %9032 = vmatprep.subr.bf16.mxu0 %v10709_v1 }
0x1fa8   : > { %9023 = vmatmul.mubr.msk.bf16.vlgmr.msra.gmra.mxu0 %vm4749_vm2, %v6182_v2 }
0x1fa9   : > { %9034 = vmatprep.mubr.msk.bf16.mxu0 %vm10711_vm0, %v10709_v1  ;;  %9033 = vmatpush3.bf16.msra.mxu0 %v6300_v23  ;;  %v9707_v23 = vld [vmem:[#allocation40 + $0x28] sm:$0xff]  }
0x1faa   : > { %9046 = vmatprep.subr.bf16.mxu0 %v10709_v1 }
0x2060   : > { %v6125_v52 = vpop.f32.mrf.mxu0 }
0x2061   : > { %v6131_v53 = vpack.c.bf16 %v6125_v52, %v6125_v52  ;;  %v9706_v52 = vld [vmem:[#allocation46 + $0x20] sm:$0xff]  }
0x2062   : > { %v9012_v54 = vpop.f32.mrf.mxu0 }
0x2063   : > { %9017 = vmatmul.mubr.msk.bf16.vlgmr.msra.gmra.mxu1 %vm4749_vm2, %v6131_v53  ;;  %v8309_v53 = vld [vmem:[%s12163_s5 + $0x1] ss:$0 sm:$0xff] }
0x2064   : > { %v6128_v55 = vpop.f32.mrf.mxu0  ;;  %9028 = vmatprep.mubr.msk.bf16.mxu1 %vm10711_vm0, %v10709_v1 }
0x2066   : > { %v9013_v51 = vpop.f32.mrf.mxu0 }
0x2068   : > { %v6225_v56 = vpop.f32.mrf.mxu0 }
0x2069   : > { %v6231_v58 = vmul.f32 0.35355338, %v6225_v56 }
0x206a   : > { %v9024_v59 = vpop.f32.mrf.mxu0 }
0x206b   : > { %v6232_v60 = vadd.f32 %v6231_v58, %v11668_v14 }
0x206c   : > { %v6228_v62 = vpop.f32.mrf.mxu0 }
0x206d   : > { %v6233_v0 = vsel %vm4749_vm2, %v6232_v60, -inf  ;;  %v8314_v62 = vld [vmem:[%s12164_s28 + $0x1] ss:$0 sm:$0xff] }
0x206e   : > { %6234 = vmax.xlane.f32.xlu0 %v6233_v0  ;;  %v9025_v4 = vpop.f32.mrf.mxu0 }
0x20f7   : > { %v6235_v61 = vpop.xlane.xlu0 %6234 }
0x20f8   : > { %v6236_v6 = vsub.f32 %v6232_v60, %v6235_v61 }
0x20fa   : > { %v6237_v7 = vmul.f32 1.442695, %v6236_v6 }
0x20fc   : > { %9749 = vpow2.f32 %v6237_v7 }
0x2109   : > { %v9750_v63 = vpop.eup %9749 }
0x210a   : > { %v6239_v5 = vsel %vm4749_vm2, %v9750_v63, 0.0 }
0x210b   : > { %6240 = vadd.xlane.f32.xlu1 %v6239_v5 }
0x211c   : > { %6245 = vrot.lane.b32.xlu1 %v11787_v25, %s12168_s16 }
0x2123   : > { %v6174_v12 = vpop.f32.mrf.mxu1 }
0x2124   : > { %v6180_v16 = vadd.f32 %v6174_v12, %v6018_v39  ;;  %v9702_v39 = vld [vmem:[%s12160_s8 + $0x10] sm:$0xff]  }
0x2125   : > { %v9018_v17 = vpop.f32.mrf.mxu1 }
0x2127   : > { %v6177_v18 = vpop.f32.mrf.mxu1 }
0x2129   : > { %v9019_v24 = vpop.f32.mrf.mxu1 }
0x212a   : > { %v9708_v24 = vld [vmem:[#allocation40 + $0x20] sm:$0xff]  }
0x2194   : > { %v6241_v3 = vpop.xlane.xlu1 %6240 }
0x2195   : > { %9751 = vrcp.f32 %v6241_v3 }
0x2198   : > { %v6246_v11 = vpop.permute.xlu1 %6245 }
0x2199   : > { %v6251_v26 = vsel %vm2857_vm6, %v6246_v11, 0 }
0x219a   : > { %9027 = vmatpush3.bf16.msra.mxu1 %v6251_v26 }
0x219b   : > { %9038 = vmatprep.subr.bf16.mxu1 %v10709_v1 }
0x21a2   : > { %v9752_v25 = vpop.eup %9751 }
0x21a3   : > { %v6243_v27 = vmul.f32 %v9752_v25, %v9750_v63 }
0x21a5   : > { %v6244_v28 = vpack.c.bf16 %v6243_v27, %v6243_v27  ;;  %v8322_v27 = vld [vmem:[%s12165_s15 + $0x1] ss:$0 sm:$0xff] }
0x21a7   : > { %9029 = vmatmul.mubr.msk.bf16.vlgmr.msra.gmra.mxu1 %vm4749_vm2, %v6244_v28 }
0x21a8   : > { %9042 = vmatprep.mubr.msk.bf16.mxu1 %vm10711_vm0, %v10709_v1  ;;  %9039 = vmatpush3.bf16.msra.mxu1 %v9701_v38 }
0x21a9   : > { %9040 = vmatprep.subr.bf16.mxu1 %v10709_v1 }
0x21ac   : > { %9041 = vmatpush3.bf16.msra.mxu1 %v9702_v39 }
0x21ad   : > { %9058 = vmatprep.subr.bf16.mxu1 %v10709_v1 }
0x2267   : > { %v6287_v29 = vpop.f32.mrf.mxu1 }
0x2268   : > { %v6293_v15 = vpack.c.bf16 %v6287_v29, %v6287_v29  ;;  %v8323_v29 = vld [vmem:[%s10937_s21 + $0x1] ss:$0 sm:$0xff] }
0x2269   : > { %v9030_v30 = vpop.f32.mrf.mxu1 }
0x226a   : > { %9035 = vmatmul.mubr.msk.bf16.vlgmr.msra.gmra.mxu0 %vm4749_vm2, %v6293_v15 }
0x226b   : > { %v6290_v31 = vpop.f32.mrf.mxu1  ;;  %9054 = vmatprep.mubr.msk.bf16.mxu0 %vm10711_vm0, %v10709_v1 }
0x226d   : > { %v9031_v32 = vpop.f32.mrf.mxu1 }
0x226e   : > { %v8324_v32 = vld [vmem:[#allocation41 + $0x2] ss:$0 sm:$0xff] }
0x232a   : > { %v6336_v13 = vpop.f32.mrf.mxu0 }
0x232b   : > { %v6342_v22 = vadd.f32 %v6336_v13, %v6180_v16 }
0x232c   : > { %v9036_v50 = vpop.f32.mrf.mxu0 }
0x232d   : > { %v6343_v33 = vadd.f32 %v6342_v22, %v11780_v8  ;;  %v9703_v8 = vld [vmem:[#allocation46 + $0x38] sm:$0xff]  }
0x232e   : > { %v6339_v34 = vpop.f32.mrf.mxu0  ;;  %9047 = vmatpush3.bf16.msra.mxu0 %v9703_v8 }
0x232f   : > { %v6348_v20 = vsel %vm4700_vm1, %v6343_v33, 0.0  ;;  %9048 = vmatprep.subr.bf16.mxu0 %v10709_v1 }
0x2330   : > { %6349 = vadd.xlane.f32.xlu1 %v6348_v20  ;;  %v9037_v19 = vpop.f32.mrf.mxu0 }
0x2332   : > { %9049 = vmatpush3.bf16.msra.mxu0 %v9704_v9 }
0x2333   : > { %9050 = vmatprep.subr.bf16.mxu0 %v10709_v1 }
0x2336   : > { %9051 = vmatpush3.bf16.msra.mxu0 %v9705_v49 }
0x2337   : > { %9052 = vmatprep.subr.bf16.mxu0 %v10709_v1 }
0x233a   : > { %9053 = vmatpush3.bf16.msra.mxu0 %v9706_v52 }
0x233b   : > { %9072 = vmatprep.subr.bf16.mxu0 %v10709_v1 }
0x23b9   : > { %v6350_v57 = vpop.xlane.xlu1 %6349 }
0x23ba   : > { %v6351_v35 = vmul.f32 0.03125, %v6350_v57 }
0x23bc   : > { %v6352_v36 = vsub.f32 %v6343_v33, %v6351_v35 }
0x23be   : > { %v6353_v37 = vmul.f32 %v6352_v36, %v6352_v36 }
0x23c0   : > { %v6354_v10 = vsel %vm4700_vm1, %v6353_v37, 0.0 }
0x23c1   : > { %6355 = vadd.xlane.f32.xlu0 %v6354_v10 }
0x244a   : > { %v6356_v40 = vpop.xlane.xlu0 %6355 }
0x244b   : > { %v6357_v41 = vmul.f32 0.03125, %v6356_v40 }
0x244d   : > { %v6358_v42 = vadd.f32 1e-05, %v6357_v41 }
0x244f   : > { %9753 = vrsqrt.f32 %v6358_v42 }
0x245c   : > { %v9754_v43 = vpop.eup %9753 }
0x245d   : > { %v6360_v45 = vmul.f32 %v9754_v43, %v6352_v36 }
0x245f   : > { %v6367_v47 = vmul.f32 %v8302_v44, %v6360_v45 }
0x2461   : > { %v6374_v2 = vadd.f32 %v8303_v46, %v6367_v47  ;;  %v6747_v46 = vld [vmem:[#allocation43 + $0x20] sm:$0xf] }
0x2462   : > { %v6752_v47 = vsel %vm2857_vm6, %v6747_v46, 0  ;;  %v8331_v46 = vld [vmem:[#allocation44 + $0x2] ss:$0 sm:$0xff] }
0x2463   : > { %v6380_v48 = vpack.c.bf16 %v6374_v2, %v6374_v2 }
0x2465   : > { %9043 = vmatmul.mubr.msk.bf16.vlgmr.msra.gmra.mxu1 %vm4700_vm1, %v6380_v48 }
0x2466   : > { %9062 = vmatprep.mubr.msk.bf16.mxu1 %vm10711_vm0, %v10709_v1  ;;  %9059 = vmatpush3.bf16.msra.mxu1 %v9707_v23 }
0x2467   : > { %9060 = vmatprep.subr.bf16.mxu1 %v10709_v1 }
0x246a   : > { %9061 = vmatpush3.bf16.msra.mxu1 %v9708_v24 }
0x246b   : > { %9066 = vmatprep.subr.bf16.mxu1 %v10709_v1 }
0x2525   : > { %v6438_v54 = vpop.f32.mrf.mxu1 }
0x2526   : > { %v6439_v55 = vadd.f32 %v8309_v53, %v6438_v54 }
0x2527   : > { %v9044_v51 = vpop.f32.mrf.mxu1 }
0x2528   : > { %v6444_v56 = vmax.f32 %v6439_v55, 0.0 }
0x2529   : > { %v6441_v58 = vpop.f32.mrf.mxu1 }
0x252a   : > { %v6454_v59 = vpack.c.bf16 %v6444_v56, %v6444_v56 }
0x252b   : > { %v9045_v60 = vpop.f32.mrf.mxu1 }
0x252c   : > { %9055 = vmatmul.mubr.msk.bf16.vlgmr.msra.gmra.mxu0 %vm5544_vm4, %v6454_v59 }
0x252d   : > { %9074 = vmatprep.mubr.msk.bf16.mxu0 %vm10711_vm0, %v10709_v1 }
0x25ec   : > { %v6524_v0 = vpop.f32.mrf.mxu0 }
0x25ed   : > { %v6525_v4 = vadd.f32 %v8314_v62, %v6524_v0 }
0x25ee   : > { %v9056_v61 = vpop.f32.mrf.mxu0 }
0x25ef   : > { %v6530_v6 = vadd.f32 %v6525_v4, %v6374_v2 }
0x25f0   : > { %v6527_v7 = vpop.f32.mrf.mxu0 }
0x25f1   : > { %v6535_v63 = vsel %vm4700_vm1, %v6530_v6, 0.0 }
0x25f2   : > { %6536 = vadd.xlane.f32.xlu0 %v6535_v63  ;;  %v9057_v5 = vpop.f32.mrf.mxu0 }
0x267b   : > { %v6537_v12 = vpop.xlane.xlu0 %6536 }
0x267c   : > { %v6538_v16 = vmul.f32 0.03125, %v6537_v12 }
0x267e   : > { %v6539_v17 = vsub.f32 %v6530_v6, %v6538_v16 }
0x2680   : > { %v6540_v18 = vmul.f32 %v6539_v17, %v6539_v17 }
0x2682   : > { %v6541_v21 = vsel %vm4700_vm1, %v6540_v18, 0.0 }
0x2683   : > { %6542 = vadd.xlane.f32.xlu0 %v6541_v21 }
0x270c   : > { %v6543_v3 = vpop.xlane.xlu0 %6542 }
0x270d   : > { %v6544_v11 = vmul.f32 0.03125, %v6543_v3 }
0x270f   : > { %v6545_v26 = vadd.f32 1e-05, %v6544_v11 }
0x2711   : > { %9755 = vrsqrt.f32 %v6545_v26 }
0x271e   : > { %v9756_v25 = vpop.eup %9755 }
0x271f   : > { %v6547_v28 = vmul.f32 %v9756_v25, %v6539_v17 }
0x2721   : > { %v6554_v15 = vmul.f32 %v8322_v27, %v6547_v28 }
0x2723   : > { %v11911_v30 = vadd.f32 %v8323_v29, %v6554_v15 }
0x2725   : > { %v6567_v31 = vpack.c.bf16 %v11911_v30, %v11911_v30 }
0x2727   : > { %9063 = vmatmul.mubr.msk.bf16.vlgmr.msra.gmra.mxu1 %vm4700_vm1, %v6567_v31 }
0x2728   : > { %9068 = vmatprep.mubr.msk.bf16.mxu1 %vm10711_vm0, %v10709_v1 }
0x27e7   : > { %v6625_v13 = vpop.f32.mrf.mxu1 }
0x27e8   : > { %v6626_v22 = vadd.f32 %v8324_v32, %v6625_v13  ;;  %v6915_v13 = vld [vmem:[#allocation43 + $0x24] sm:$0xf] }
0x27e9   : > { %v9064_v50 = vpop.f32.mrf.mxu1 }
0x27ea   : > { %v11918_v33 = vpack.c.bf16 %v6626_v22, %v6626_v22  ;;  %v6920_v22 = vsel %vm2857_vm6, %v6915_v13, 0 }
0x27eb   : > { %v6628_v34 = vpop.f32.mrf.mxu1 }
0x27ec   : > { %6635 = vrot.lane.b32.xlu0 %v11918_v33, %s10713_s18  ;;  %s12170_s18 = smov 112  }
0x27ed   : > { %v9065_v20 = vpop.f32.mrf.mxu1 }
0x285e   : > { %v6636_v19 = vpop.permute.xlu0 %6635 }
0x285f   : > { %v6641_v57 = vsel %vm4749_vm2, %v6636_v19, 0 }
0x2860   : > { %9067 = vmatpush3.bf16.xpose.msra.mxu1 %v6641_v57 }
0x2861   : > { %9078 = vmatprep.subr.bf16.mxu1 %v10709_v1 }
0x2867   : > { %9069 = vmatmul.mubr.msk.bf16.vlgmr.msra.gmra.mxu1 %vm4749_vm2, %v11918_v33 }
0x2868   : > { %9080 = vmatprep.mubr.msk.bf16.mxu1 %vm10711_vm0, %v10709_v1  ;;  %9079 = vmatpush3.bf16.msra.mxu1 %v6752_v47 }
0x2869   : > { %9090 = vmatprep.subr.bf16.mxu1 %v10709_v1 }
0x2927   : > { %v6677_v35 = vpop.f32.mrf.mxu1 }
0x2928   : > { %v6683_v36 = vmul.f32 0.35355338, %v6677_v35 }
0x2929   : > { %v9070_v37 = vpop.f32.mrf.mxu1 }
0x292a   : > { %v6684_v10 = vadd.f32 %v6683_v36, %v11668_v14 }
0x292b   : > { %v6680_v38 = vpop.f32.mrf.mxu1 }
0x292c   : > { %v6685_v39 = vsel %vm4749_vm2, %v6684_v10, -inf }
0x292d   : > { %6686 = vmax.xlane.f32.xlu1 %v6685_v39  ;;  %v9071_v8 = vpop.f32.mrf.mxu1 }
0x293e   : > { %6697 = vrot.lane.b32.xlu1 %v11918_v33, %s10712_s4  ;;  %s12169_s4 = smov 80  }
0x2942   : > { %6803 = vrot.lane.b32.xlu1 %v11918_v33, %s10716_s11  ;;  %s12172_s11 = sshll.u32 %s12174_s1, 3 }
0x2946   : > { %6801 = vrot.lane.b32.xlu1 %v11918_v33, %s10717_s26  ;;  %s1785_s26 = scalar_lea.vmem %s10950_s6, %s12172_s11 }
0x29b6   : > { %v6687_v9 = vpop.xlane.xlu1 %6686 }
0x29b7   : > { %v6688_v40 = vsub.f32 %v6684_v10, %v6687_v9 }
0x29b9   : > { %v6689_v41 = vmul.f32 1.442695, %v6688_v40 }
0x29ba   : > { %v6698_v42 = vpop.permute.xlu1 %6697 }
0x29bb   : > { %9757 = vpow2.f32 %v6689_v41  ;;  %v6703_v43 = vsel %vm2857_vm6, %v6698_v42, 0 }
0x29bc   : > { %9073 = vmatpush3.bf16.msra.mxu0 %v6703_v43 }
0x29bd   : > { %9084 = vmatprep.subr.bf16.mxu0 %v10709_v1 }
0x29be   : > { %v6804_v52 = vpop.permute.xlu1 %6803 }
0x29bf   : > { %v6809_v54 = vsel %vm4749_vm2, %v6804_v52, 0 }
0x29c2   : > { %v6802_v55 = vpop.permute.xlu1 %6801 }
0x29c8   : > { %v9758_v44 = vpop.eup %9757 }
0x29c9   : > { %v6691_v45 = vsel %vm4749_vm2, %v9758_v44, 0.0 }
0x29ca   : > { %6692 = vadd.xlane.f32.xlu0 %v6691_v45 }
0x29e0   : > { %6865 = vrot.lane.b32.xlu0 %v11918_v33, %s10715_s2  ;;  %s12171_s2 = smov 48  }
0x2a53   : > { %v6693_v2 = vpop.xlane.xlu0 %6692 }
0x2a54   : > { %9759 = vrcp.f32 %v6693_v2 }
0x2a57   : > { %v6866_v51 = vpop.permute.xlu0 %6865 }
0x2a58   : > { %v6871_v60 = vsel %vm2857_vm6, %v6866_v51, 0 }
0x2a61   : > { %v9760_v48 = vpop.eup %9759 }
0x2a62   : > { %v6695_v49 = vmul.f32 %v9760_v48, %v9758_v44 }
0x2a64   : > { %v6696_v53 = vpack.c.bf16 %v6695_v49, %v6695_v49 }
0x2a66   : > { %9075 = vmatmul.mubr.msk.bf16.vlgmr.msra.gmra.mxu0 %vm4749_vm2, %v6696_v53 }
0x2a67   : > { %9085 = vmatpush3.bf16.xpose.msra.mxu0 %v6809_v54  ;;  %9086 = vmatprep.mubr.msk.bf16.mxu0 %vm10711_vm0, %v10709_v1 }
0x2a68   : > { %9096 = vmatprep.subr.bf16.mxu0 %v10709_v1 }
0x2a6e   : > { %9087 = vmatmul.mubr.msk.bf16.vlgmr.msra.gmra.mxu0 %vm4749_vm2, %v6802_v55 }
0x2a6f   : > { %9098 = vmatprep.mubr.msk.bf16.mxu0 %vm10711_vm0, %v10709_v1  ;;  %9097 = vmatpush3.bf16.msra.mxu0 %v6920_v22 }
0x2a70   : > { %9108 = vmatprep.subr.bf16.mxu0 %v10709_v1 }
0x2b26   : > { %v6739_v56 = vpop.f32.mrf.mxu0 }
0x2b27   : > { %v6745_v58 = vpack.c.bf16 %v6739_v56, %v6739_v56 }
0x2b28   : > { %v9076_v59 = vpop.f32.mrf.mxu0 }
0x2b29   : > { %9081 = vmatmul.mubr.msk.bf16.vlgmr.msra.gmra.mxu1 %vm4749_vm2, %v6745_v58 }
0x2b2a   : > { %9091 = vmatpush3.bf16.msra.mxu1 %v6871_v60  ;;  %v6742_v62 = vpop.f32.mrf.mxu0  ;;  %9092 = vmatprep.mubr.msk.bf16.mxu1 %vm10711_vm0, %v10709_v1 }
0x2b2b   : > { %9102 = vmatprep.subr.bf16.mxu1 %v10709_v1  ;;  %v7077_v62 = vld [vmem:[#allocation43 + $0x28] sm:$0xf] }
0x2b2c   : > { %v9077_v0 = vpop.f32.mrf.mxu0 }
0x2b2d   : > { %v7082_v0 = vsel %vm2857_vm6, %v7077_v62, 0  ;;  %v9713_v62 = vld [vmem:[#allocation46 + $0x48] sm:$0xff]  }
0x2b2e   : > { %v6845_v4 = vpop.f32.mrf.mxu0 }
0x2b2f   : > { %v6851_v61 = vmul.f32 0.35355338, %v6845_v4 }
0x2b30   : > { %v9088_v6 = vpop.f32.mrf.mxu0 }
0x2b31   : > { %v6852_v7 = vadd.f32 %v6851_v61, %v11668_v14 }
0x2b32   : > { %v6848_v63 = vpop.f32.mrf.mxu0 }
0x2b33   : > { %v6853_v5 = vsel %vm4749_vm2, %v6852_v7, -inf }
0x2b34   : > { %6854 = vmax.xlane.f32.xlu1 %v6853_v5  ;;  %v9089_v12 = vpop.f32.mrf.mxu0 }
0x2bbd   : > { %v6855_v16 = vpop.xlane.xlu1 %6854 }
0x2bbe   : > { %v6856_v17 = vsub.f32 %v6852_v7, %v6855_v16 }
0x2bc0   : > { %v6857_v18 = vmul.f32 1.442695, %v6856_v17 }
0x2bc2   : > { %9761 = vpow2.f32 %v6857_v18 }
0x2bcf   : > { %v9762_v21 = vpop.eup %9761 }
0x2bd0   : > { %v6859_v23 = vsel %vm4749_vm2, %v9762_v21, 0.0 }
0x2bd1   : > { %6860 = vadd.xlane.f32.xlu0 %v6859_v23 }
0x2be7   : > { %6965 = vrot.lane.b32.xlu0 %v11918_v33, %s12169_s4 }
0x2be9   : > { %v6788_v24 = vpop.f32.mrf.mxu1 }
0x2bea   : > { %v6800_v47 = vadd.f32 %v8331_v46, %v6788_v24 }
0x2beb   : > { %6963 = vrot.lane.b32.xlu0 %v11918_v33, %s12170_s18  ;;  %v9082_v3 = vpop.f32.mrf.mxu1 }
0x2bed   : > { %v6791_v11 = vpop.f32.mrf.mxu1 }
0x2bef   : > { %v9083_v26 = vpop.f32.mrf.mxu1 }
0x2c5a   : > { %v6861_v25 = vpop.xlane.xlu0 %6860 }
0x2c5b   : > { %9763 = vrcp.f32 %v6861_v25 }
0x2c5e   : > { %v6966_v29 = vpop.permute.xlu0 %6965 }
0x2c5f   : > { %v6971_v31 = vsel %vm4749_vm2, %v6966_v29, 0 }
0x2c62   : > { %v6964_v32 = vpop.permute.xlu0 %6963 }
0x2c68   : > { %v9764_v27 = vpop.eup %9763 }
0x2c69   : > { %v6863_v28 = vmul.f32 %v9764_v27, %v9762_v21 }
0x2c6b   : > { %v6864_v15 = vpack.c.bf16 %v6863_v28, %v6863_v28 }
0x2c6d   : > { %9093 = vmatmul.mubr.msk.bf16.vlgmr.msra.gmra.mxu1 %vm4749_vm2, %v6864_v15  ;;  %v7239_v15 = vld [vmem:[#allocation43 + $0x2c] sm:$0xf] }
0x2c6e   : > { %9103 = vmatpush3.bf16.xpose.msra.mxu1 %v6971_v31  ;;  %9104 = vmatprep.mubr.msk.bf16.mxu1 %vm10711_vm0, %v10709_v1  ;;  %v7244_v31 = vsel %vm2857_vm6, %v7239_v15, 0  ;;  %v9715_v15 = vld [vmem:[#allocation47 + $0x8] sm:$0xff]  }
0x2c6f   : > { %9114 = vmatprep.subr.bf16.mxu1 %v10709_v1 }
0x2c75   : > { %9105 = vmatmul.mubr.msk.bf16.vlgmr.msra.gmra.mxu1 %vm4749_vm2, %v6964_v32 }
0x2c76   : > { %9116 = vmatprep.mubr.msk.bf16.mxu1 %vm10711_vm0, %v10709_v1  ;;  %9115 = vmatpush3.bf16.msra.mxu1 %v7082_v0  ;;  %v9714_v0 = vld [vmem:[#allocation46 + $0x40] sm:$0xff]  }
0x2c77   : > { %9126 = vmatprep.subr.bf16.mxu1 %v10709_v1 }
0x2d2d   : > { %v6907_v50 = vpop.f32.mrf.mxu1 }
0x2d2e   : > { %v6913_v34 = vpack.c.bf16 %v6907_v50, %v6907_v50 }
0x2d2f   : > { %v9094_v20 = vpop.f32.mrf.mxu1 }
0x2d30   : > { %9099 = vmatmul.mubr.msk.bf16.vlgmr.msra.gmra.mxu0 %vm4749_vm2, %v6913_v34 }
0x2d31   : > { %v6910_v19 = vpop.f32.mrf.mxu1  ;;  %9110 = vmatprep.mubr.msk.bf16.mxu0 %vm10711_vm0, %v10709_v1 }
0x2d33   : > { %v9095_v57 = vpop.f32.mrf.mxu1 }
0x2d35   : > { %v7007_v35 = vpop.f32.mrf.mxu1 }
0x2d36   : > { %v7013_v36 = vmul.f32 0.35355338, %v7007_v35 }
0x2d37   : > { %v9106_v37 = vpop.f32.mrf.mxu1 }
0x2d38   : > { %v7014_v10 = vadd.f32 %v7013_v36, %v11668_v14 }
0x2d39   : > { %v7010_v38 = vpop.f32.mrf.mxu1 }
0x2d3a   : > { %v7015_v39 = vsel %vm4749_vm2, %v7014_v10, -inf }
0x2d3b   : > { %7016 = vmax.xlane.f32.xlu1 %v7015_v39  ;;  %v9107_v8 = vpop.f32.mrf.mxu1 }
0x2d4c   : > { %7027 = vrot.lane.b32.xlu1 %v11918_v33, %s12171_s2 }
0x2d50   : > { %7127 = vrot.lane.b32.xlu1 %v11918_v33, %s12166_s23 }
0x2d54   : > { %7125 = vrot.lane.b32.xlu1 %v11918_v33, %s12167_s10 }
0x2dc4   : > { %v7017_v9 = vpop.xlane.xlu1 %7016 }
0x2dc5   : > { %v7018_v40 = vsub.f32 %v7014_v10, %v7017_v9 }
0x2dc7   : > { %v7019_v41 = vmul.f32 1.442695, %v7018_v40 }
0x2dc8   : > { %v7028_v42 = vpop.permute.xlu1 %7027 }
0x2dc9   : > { %9765 = vpow2.f32 %v7019_v41  ;;  %v7033_v43 = vsel %vm2857_vm6, %v7028_v42, 0 }
0x2dca   : > { %9109 = vmatpush3.bf16.msra.mxu0 %v7033_v43 }
0x2dcb   : > { %9120 = vmatprep.subr.bf16.mxu0 %v10709_v1 }
0x2dcc   : > { %v7128_v56 = vpop.permute.xlu1 %7127 }
0x2dcd   : > { %v7133_v59 = vsel %vm4749_vm2, %v7128_v56, 0  ;;  %v8344_v56 = vld [vmem:[%s12162_s7 + $0x2] ss:$0 sm:$0xff] }
0x2dd0   : > { %v7126_v60 = vpop.permute.xlu1 %7125 }
0x2dd6   : > { %v9766_v44 = vpop.eup %9765 }
0x2dd7   : > { %v7021_v45 = vsel %vm4749_vm2, %v9766_v44, 0.0 }
0x2dd8   : > { %7022 = vadd.xlane.f32.xlu0 %v7021_v45 }
0x2df0   : > { %v6956_v2 = vpop.f32.mrf.mxu0 }
0x2df1   : > { %v6962_v48 = vadd.f32 %v6956_v2, %v6800_v47  ;;  %v9709_v47 = vld [vmem:[%s12160_s8 + $0x28] sm:$0xff]   ;;  %v9710_v2 = vld [vmem:[%s12160_s8 + $0x20] sm:$0xff]  }
0x2df2   : > { %v9100_v49 = vpop.f32.mrf.mxu0 }
0x2df4   : > { %v6959_v52 = vpop.f32.mrf.mxu0 }
0x2df6   : > { %v9101_v53 = vpop.f32.mrf.mxu0 }
0x2e61   : > { %v7023_v54 = vpop.xlane.xlu0 %7022 }
0x2e62   : > { %9767 = vrcp.f32 %v7023_v54 }
0x2e6f   : > { %v9768_v55 = vpop.eup %9767 }
0x2e70   : > { %v7025_v51 = vmul.f32 %v9768_v55, %v9766_v44  ;;  %v8343_v55 = vld [vmem:[%s12161_s3 + $0x2] ss:$0 sm:$0xff] }
0x2e72   : > { %v7026_v58 = vpack.c.bf16 %v7025_v51, %v7025_v51 }
0x2e74   : > { %9111 = vmatmul.mubr.msk.bf16.vlgmr.msra.gmra.mxu0 %vm4749_vm2, %v7026_v58 }
0x2e75   : > { %9121 = vmatpush3.bf16.xpose.msra.mxu0 %v7133_v59  ;;  %9122 = vmatprep.mubr.msk.bf16.mxu0 %vm10711_vm0, %v10709_v1 }
0x2e76   : > { %9132 = vmatprep.subr.bf16.mxu0 %v10709_v1 }
0x2e7c   : > { %9123 = vmatmul.mubr.msk.bf16.vlgmr.msra.gmra.mxu0 %vm4749_vm2, %v7126_v60 }
0x2e7d   : > { %9134 = vmatprep.mubr.msk.bf16.mxu0 %vm10711_vm0, %v10709_v1  ;;  %9133 = vmatpush3.bf16.msra.mxu0 %v7244_v31  ;;  %v9716_v31 = vld [vmem:[#allocation47] sm:$0xff]  }
0x2e7e   : > { %9146 = vmatprep.subr.bf16.mxu0 %v10709_v1 }
0x2f34   : > { %v7069_v4 = vpop.f32.mrf.mxu0 }
0x2f35   : > { %v7075_v61 = vpack.c.bf16 %v7069_v4, %v7069_v4  ;;  %v8350_v4 = vld [vmem:[%s12163_s5 + $0x2] ss:$0 sm:$0xff] }
0x2f36   : > { %v9112_v6 = vpop.f32.mrf.mxu0 }
0x2f37   : > { %9117 = vmatmul.mubr.msk.bf16.vlgmr.msra.gmra.mxu1 %vm4749_vm2, %v7075_v61 }
0x2f38   : > { %v7072_v7 = vpop.f32.mrf.mxu0  ;;  %9128 = vmatprep.mubr.msk.bf16.mxu1 %vm10711_vm0, %v10709_v1 }
0x2f3a   : > { %v9113_v63 = vpop.f32.mrf.mxu0 }
0x2f3c   : > { %v7169_v5 = vpop.f32.mrf.mxu0 }
0x2f3d   : > { %v7175_v12 = vmul.f32 0.35355338, %v7169_v5 }
0x2f3e   : > { %v9124_v16 = vpop.f32.mrf.mxu0 }
0x2f3f   : > { %v7176_v17 = vadd.f32 %v7175_v12, %v11668_v14 }
0x2f40   : > { %v7172_v18 = vpop.f32.mrf.mxu0 }
0x2f41   : > { %v7177_v21 = vsel %vm4749_vm2, %v7176_v17, -inf }
0x2f42   : > { %7178 = vmax.xlane.f32.xlu1 %v7177_v21  ;;  %v9125_v23 = vpop.f32.mrf.mxu0 }
0x2fcb   : > { %v7179_v24 = vpop.xlane.xlu1 %7178 }
0x2fcc   : > { %v7180_v3 = vsub.f32 %v7176_v17, %v7179_v24  ;;  %v8355_v17 = vld [vmem:[%s12164_s28 + $0x2] ss:$0 sm:$0xff] }
0x2fce   : > { %v7181_v11 = vmul.f32 1.442695, %v7180_v3 }
0x2fd0   : > { %9769 = vpow2.f32 %v7181_v11 }
0x2fdd   : > { %v9770_v26 = vpop.eup %9769 }
0x2fde   : > { %v7183_v25 = vsel %vm4749_vm2, %v9770_v26, 0.0 }
0x2fdf   : > { %7184 = vadd.xlane.f32.xlu0 %v7183_v25 }
0x2ff5   : > { %7189 = vrot.lane.b32.xlu0 %v11918_v33, %s12168_s16 }
0x2ff7   : > { %v7118_v27 = vpop.f32.mrf.mxu1 }
0x2ff8   : > { %v7124_v28 = vadd.f32 %v7118_v27, %v6962_v48  ;;  %v9712_v48 = vld [vmem:[#allocation46 + $0x50] sm:$0xff]  }
0x2ff9   : > { %v9118_v29 = vpop.f32.mrf.mxu1 }
0x2ffb   : > { %v7121_v14 = vpop.f32.mrf.mxu1 }
0x2ffd   : > { %v9119_v32 = vpop.f32.mrf.mxu1 }
0x3068   : > { %v7185_v13 = vpop.xlane.xlu0 %7184 }
0x3069   : > { %9771 = vrcp.f32 %v7185_v13 }
0x306c   : > { %v7190_v22 = vpop.permute.xlu0 %7189 }
0x306d   : > { %v7195_v50 = vsel %vm2857_vm6, %v7190_v22, 0 }
0x306e   : > { %9127 = vmatpush3.bf16.msra.mxu1 %v7195_v50 }
0x306f   : > { %9138 = vmatprep.subr.bf16.mxu1 %v10709_v1 }
0x3076   : > { %v9772_v33 = vpop.eup %9771 }
0x3077   : > { %v7187_v34 = vmul.f32 %v9772_v33, %v9770_v26  ;;  %v8363_v33 = vld [vmem:[%s12165_s15 + $0x2] ss:$0 sm:$0xff] }
0x3079   : > { %v7188_v20 = vpack.c.bf16 %v7187_v34, %v7187_v34 }
0x307b   : > { %9129 = vmatmul.mubr.msk.bf16.vlgmr.msra.gmra.mxu1 %vm4749_vm2, %v7188_v20  ;;  %v8364_v20 = vld [vmem:[%s10937_s21 + $0x2] ss:$0 sm:$0xff] }
0x307c   : > { %9142 = vmatprep.mubr.msk.bf16.mxu1 %vm10711_vm0, %v10709_v1  ;;  %9139 = vmatpush3.bf16.msra.mxu1 %v9709_v47 }
0x307d   : > { %9140 = vmatprep.subr.bf16.mxu1 %v10709_v1 }
0x3080   : > { %9141 = vmatpush3.bf16.msra.mxu1 %v9710_v2 }
0x3081   : > { %9158 = vmatprep.subr.bf16.mxu1 %v10709_v1 }
0x313b   : > { %v7231_v19 = vpop.f32.mrf.mxu1 }
0x313c   : > { %v7237_v57 = vpack.c.bf16 %v7231_v19, %v7231_v19 }
0x313d   : > { %v9130_v35 = vpop.f32.mrf.mxu1 }
0x313e   : > { %9135 = vmatmul.mubr.msk.bf16.vlgmr.msra.gmra.mxu0 %vm4749_vm2, %v7237_v57 }
0x313f   : > { %v7234_v36 = vpop.f32.mrf.mxu1  ;;  %9154 = vmatprep.mubr.msk.bf16.mxu0 %vm10711_vm0, %v10709_v1 }
0x3140   : > { %v8365_v36 = vld [vmem:[#allocation2] ss:$0 sm:$0xff] }
0x3141   : > { %v9131_v37 = vpop.f32.mrf.mxu1 }
0x31fe   : > { %v7280_v10 = vpop.f32.mrf.mxu0 }
0x31ff   : > { %v7286_v38 = vadd.f32 %v7280_v10, %v7124_v28 }
0x3200   : > { %v9136_v39 = vpop.f32.mrf.mxu0 }
0x3201   : > { %v7287_v8 = vadd.f32 %v7286_v38, %v11911_v30  ;;  %v9711_v30 = vld [vmem:[#allocation46 + $0x58] sm:$0xff]  }
0x3202   : > { %v7283_v9 = vpop.f32.mrf.mxu0  ;;  %9147 = vmatpush3.bf16.msra.mxu0 %v9711_v30 }
0x3203   : > { %v7292_v40 = vsel %vm4700_vm1, %v7287_v8, 0.0  ;;  %9148 = vmatprep.subr.bf16.mxu0 %v10709_v1 }
0x3204   : > { %7293 = vadd.xlane.f32.xlu0 %v7292_v40  ;;  %v9137_v41 = vpop.f32.mrf.mxu0 }
0x3206   : > { %9149 = vmatpush3.bf16.msra.mxu0 %v9712_v48 }
0x3207   : > { %9150 = vmatprep.subr.bf16.mxu0 %v10709_v1 }
0x320a   : > { %9151 = vmatpush3.bf16.msra.mxu0 %v9713_v62 }
0x320b   : > { %9152 = vmatprep.subr.bf16.mxu0 %v10709_v1 }
0x320e   : > { %9153 = vmatpush3.bf16.msra.mxu0 %v9714_v0 }
0x328d   : > { %v7294_v42 = vpop.xlane.xlu0 %7293 }
0x328e   : > { %v7295_v43 = vmul.f32 0.03125, %v7294_v42 }
0x3290   : > { %v7296_v44 = vsub.f32 %v7287_v8, %v7295_v43 }
0x3292   : > { %v7297_v45 = vmul.f32 %v7296_v44, %v7296_v44 }
0x3294   : > { %v7298_v46 = vsel %vm4700_vm1, %v7297_v45, 0.0 }
0x3295   : > { %7299 = vadd.xlane.f32.xlu1 %v7298_v46 }
0x331e   : > { %v7300_v49 = vpop.xlane.xlu1 %7299 }
0x331f   : > { %v7301_v52 = vmul.f32 0.03125, %v7300_v49 }
0x3321   : > { %v7302_v53 = vadd.f32 1e-05, %v7301_v52 }
0x3323   : > { %9773 = vrsqrt.f32 %v7302_v53 }
0x3330   : > { %v9774_v54 = vpop.eup %9773 }
0x3331   : > { %v7304_v51 = vmul.f32 %v9774_v54, %v7296_v44 }
0x3333   : > { %v7311_v58 = vmul.f32 %v8343_v55, %v7304_v51 }
0x3335   : > { %v7318_v59 = vadd.f32 %v8344_v56, %v7311_v58 }
0x3337   : > { %v7324_v60 = vpack.c.bf16 %v7318_v59, %v7318_v59 }
0x3339   : > { %9143 = vmatmul.mubr.msk.bf16.vlgmr.msra.gmra.mxu1 %vm4700_vm1, %v7324_v60 }
0x333a   : > { %9162 = vmatprep.mubr.msk.bf16.mxu1 %vm10711_vm0, %v10709_v1  ;;  %9159 = vmatpush3.bf16.msra.mxu1 %v9715_v15  ;;  %vm7573_vm0 = vcmask 7168  }
0x333b   : > { %9160 = vmatprep.subr.bf16.mxu1 %v10709_v1 }
0x333e   : > { %9161 = vmatpush3.bf16.msra.mxu1 %v9716_v31 }
0x33f9   : > { %v7382_v61 = vpop.f32.mrf.mxu1 }
0x33fa   : > { %v7383_v6 = vadd.f32 %v8350_v4, %v7382_v61 }
0x33fb   : > { %v9144_v7 = vpop.f32.mrf.mxu1 }
0x33fc   : > { %v7388_v63 = vmax.f32 %v7383_v6, 0.0 }
0x33fd   : > { %v7385_v5 = vpop.f32.mrf.mxu1 }
0x33fe   : > { %v7398_v12 = vpack.c.bf16 %v7388_v63, %v7388_v63 }
0x33ff   : > { %v9145_v16 = vpop.f32.mrf.mxu1 }
0x3400   : > { %9155 = vmatmul.mubr.msk.bf16.vlgmr.msra.gmra.mxu0 %vm5544_vm4, %v7398_v12 }
0x34c0   : > { %v7468_v18 = vpop.f32.mrf.mxu0 }
0x34c1   : > { %v7469_v21 = vadd.f32 %v8355_v17, %v7468_v18 }
0x34c2   : > { %v9156_v23 = vpop.f32.mrf.mxu0 }
0x34c3   : > { %v7474_v24 = vadd.f32 %v7469_v21, %v7318_v59 }
0x34c4   : > { %v7471_v3 = vpop.f32.mrf.mxu0 }
0x34c5   : > { %v7479_v11 = vsel %vm4700_vm1, %v7474_v24, 0.0 }
0x34c6   : > { %7480 = vadd.xlane.f32.xlu1 %v7479_v11  ;;  %v9157_v26 = vpop.f32.mrf.mxu0 }
0x354f   : > { %v7481_v25 = vpop.xlane.xlu1 %7480 }
0x3550   : > { %v7482_v27 = vmul.f32 0.03125, %v7481_v25 }
0x3552   : > { %v7483_v28 = vsub.f32 %v7474_v24, %v7482_v27 }
0x3554   : > { %v7484_v29 = vmul.f32 %v7483_v28, %v7483_v28 }
0x3556   : > { %v7485_v14 = vsel %vm4700_vm1, %v7484_v29, 0.0 }
0x3557   : > { %7486 = vadd.xlane.f32.xlu1 %v7485_v14 }
0x35e0   : > { %v7487_v32 = vpop.xlane.xlu1 %7486 }
0x35e1   : > { %v7488_v13 = vmul.f32 0.03125, %v7487_v32 }
0x35e3   : > { %v7489_v22 = vadd.f32 1e-05, %v7488_v13 }
0x35e5   : > { %9775 = vrsqrt.f32 %v7489_v22 }
0x35f2   : > { %v9776_v50 = vpop.eup %9775 }
0x35f3   : > { %v7491_v34 = vmul.f32 %v9776_v50, %v7483_v28 }
0x35f5   : > { %v7498_v19 = vmul.f32 %v8363_v33, %v7491_v34 }
0x35f7   : > { %v7505_v57 = vadd.f32 %v8364_v20, %v7498_v19 }
0x35f9   : > { %v7510_v35 = vpack.c.bf16 %v7505_v57, %v7505_v57 }
0x35fb   : > { %9163 = vmatmul.mubr.msk.bf16.vlgmr.msra.gmra.mxu1 %vm4700_vm1, %v7510_v35 }
0x36bb   : > { %v7567_v37 = vpop.f32.mrf.mxu1 }
0x36bc   : > { %v7568_v1 = vadd.f32 %v8365_v36, %v7567_v37 }
0x36bd   : > { %v9164_v10 = vpop.f32.mrf.mxu1 }
0x36be   : > { %7574 = vst.msk [vmem:[%s1785_s26] sm:$0xff] %vm7573_vm0, %v7568_v1 }
0x36bf   : > { %v7570_v38 = vpop.f32.mrf.mxu1 }
0x36c1   : > { %v9165_v39 = vpop.f32.mrf.mxu1 }
0x36c2 PF: > { %s117_s0 = sadd.s32 1, %s10627_s0  }
0x36c3   : > { %p114_p5 = scmp.ge.s32.totalorder %s117_s0, 4  }
0x36c5   :  { %116 = sbr.rel (!%p114_p5) target bundleno = 99 (0x63), region = 448 }
0x36ca   :  { %7594 = vsyncpa [#allocation4], 1 }
0x36cb   :  { %7596 = vsyncpa [#allocation4 + $0x1], 1 }
0x36cc   :  { %7597 = vsyncpa [#allocation6], 1 }
0x36cd   :  { %7598 = vsyncpa [#allocation9], 1 }
0x36ce   :  { %7599 = vsyncpa [#allocation12], 1 }
0x36cf   :  { %7600 = vsyncpa [#allocation15], 1 }
0x36d0   :  { %7601 = vsyncpa [#allocation18], 1 }
0x36d1   :  { %7602 = vsyncpa [#allocation21], 1 }
0x36d2   :  { %7603 = vsyncpa [#allocation24], 1 }
0x36d3   :  { %7604 = vsyncpa [#allocation27], 1 }
0x36d4   :  { %7605 = vsyncpa [#allocation30], 1 }
0x36d5   :  { %7606 = vsyncpa [#allocation33], 1 }
0x36d6   :  { %7607 = vsyncpa [#allocation36], 1 }
0x36d7   :  { %7608 = vsyncpa [#allocation39], 1 }
0x36d8   :  { %7609 = vsyncpa [#allocation42], 1 }
0x36d9   :  { %7610 = vsyncpa [#allocation45], 1 }
0x36da   :  { %7611 = vsyncpa [#allocation48], 1 }

</bundles_post_ra>
